<compile_context>
chip_gen: v5e
topology: v5e:2x2
jax: 0.10.0
libtpu: 0.0.40
codegen_flags: <defaults>
</compile_context>

<pallas_src>
import functools

import jax
import jax.numpy as jnp
from jax import lax
from jax.experimental import pallas as pl
from jax.experimental.pallas import tpu as pltpu

_EPS = 1e-5
_LANE = 128
_H1_COL_OFF = 8          # sublane-aligned start column of the staged h1 interior


def _round_up(x, m):
    return (x + m - 1) // m * m


def _residual_block_kernel(x_ref, w1_ref, w2_ref, ws_ref,
                           b1_ref, b2_ref, bs_ref,
                           o_ref, h1_ref,
                           *, stride, has_proj, fold1, fold2,
                           Ho, Wo, T, Cin_p, Cout_p):
    s = stride
    off = _H1_COL_OFF
    t = pl.program_id(1)
    row0 = t * T                      # first packed-input row used by this tile
    nrows = T + 2                     # h1 rows incl. the 1-row top/bottom halo

    # ---- conv1: 3x3, stride s, pad 1.  BN1 scale folded into w1 (f32 fold, bf16 cast).
    # Taps are unit-stride reads of the parity-packed input for both strides. ----
    acc1 = jnp.zeros((nrows * Wo, Cout_p), jnp.float32)
    for kh in range(3):
        qh, ph = divmod(kh, s)
        if fold1:
            taps = []
            for kw in range(3):
                qw, pw = divmod(kw, s)
                p = ph * s + pw
                taps.append(x_ref[0, pl.ds(row0 + qh, nrows),
                                  qw:qw + Wo, p * Cin_p:(p + 1) * Cin_p])
            patch = jnp.concatenate(taps, axis=-1).reshape(nrows * Wo, 3 * Cin_p)
            acc1 = acc1 + jnp.dot(patch, w1_ref[kh],
                                  preferred_element_type=jnp.float32)
        else:
            for kw in range(3):
                qw, pw = divmod(kw, s)
                p = ph * s + pw
                tap = x_ref[0, pl.ds(row0 + qh, nrows),
                            qw:qw + Wo, p * Cin_p:(p + 1) * Cin_p]
                acc1 = acc1 + jnp.dot(tap.reshape(nrows * Wo, Cin_p),
                                      w1_ref[kh, kw],
                                      preferred_element_type=jnp.float32)

    h1 = jnp.maximum(acc1 + b1_ref[...], 0.0).reshape(nrows, Wo, Cout_p)
    # Rows outside [0, Ho) are conv2's zero padding (and last-tile overrun): mask them.
    g = row0 - 1 + lax.broadcasted_iota(jnp.int32, (nrows, 1, 1), 0)
    h1 = jnp.where((g >= 0) & (g < Ho), h1, 0.0)

    # ---- stage h1 (bf16) for conv2; interior starts at sublane-aligned column `off`.
    # Only two 1-wide column strips need zeroing; rewritten every step so the kernel is
    # correct even when the parallel grid axes are split across TensorCores. ----
    h1_ref[:, off:off + Wo, :] = h1.astype(h1_ref.dtype)
    zcol = jnp.zeros((nrows, 1, Cout_p), h1_ref.dtype)
    h1_ref[:, off - 1:off, :] = zcol
    h1_ref[:, off + Wo:off + Wo + 1, :] = zcol

    # ---- conv2: 3x3, stride 1, pad 1 on staged h1.  BN2 scale folded into w2. ----
    acc2 = jnp.zeros((T * Wo, Cout_p), jnp.float32)
    for kh in range(3):
        if fold2:
            taps = [h1_ref[kh:kh + T, off - 1 + kw:off - 1 + kw + Wo, :]
                    for kw in range(3)]
            patch = jnp.concatenate(taps, axis=-1).reshape(T * Wo, 3 * Cout_p)
            acc2 = acc2 + jnp.dot(patch, w2_ref[kh],
                                  preferred_element_type=jnp.float32)
        else:
            for kw in range(3):
                tap = h1_ref[kh:kh + T, off - 1 + kw:off - 1 + kw + Wo, :]
                acc2 = acc2 + jnp.dot(tap.reshape(T * Wo, Cout_p),
                                      w2_ref[kh, kw],
                                      preferred_element_type=jnp.float32)

    # ---- shortcut (unit-stride read of the parity-packed input) ----
    q1, p1 = divmod(1, s)
    pblk = p1 * s + p1
    xs = x_ref[0, pl.ds(row0 + q1 + 1, T), q1:q1 + Wo,
               pblk * Cin_p:(pblk + 1) * Cin_p]
    if has_proj:
        sc = jnp.dot(xs.reshape(T * Wo, Cin_p), ws_ref[...],
                     preferred_element_type=jnp.float32) + bs_ref[...]
    else:
        sc = xs.reshape(T * Wo, Cout_p).astype(jnp.float32)

    out = jnp.maximum(acc2 + b2_ref[...] + sc, 0.0)
    o_ref[...] = out.reshape(1, T, Wo, Cout_p).astype(o_ref.dtype)


def residual_block(x_nchw, w1_hwio, w2_hwio, ws_io, bn1, bn2, bns, *,
                   stride=1, row_tile=None, fold_kw=None, nhwc_bf16_out=False):
    """ResidualBlock forward (eval-mode BN).  x_nchw: (N, Cin, H, W) f32."""
    N, Cin, H, W = x_nchw.shape
    Cout = w1_hwio.shape[-1]
    s = int(stride)
    Ho = (H - 1) // s + 1
    Wo = (W - 1) // s + 1
    has_proj = (s != 1) or (Cin != Cout)

    Cin_p = _round_up(Cin, _LANE)
    Cout_p = _round_up(Cout, _LANE)
    PP = s * s                      # number of (ph, pw) parity planes
    max_q = 2 // s                  # largest tap row/col offset in parity space
    Wq_ext = Wo + max_q
    W_scr = _round_up(_H1_COL_OFF + Wo + 1, 8)

    # ---- per-generation derivation: VMEM capacity -> row tile + scoped limit ----
    vmem_cap = 64 * 1024 * 1024     # conservative default (v7x physical VMEM)
    tpu_gen = ""
    try:
        info = pltpu.get_tpu_info()
        vmem_cap = int(info.vmem_capacity_bytes)
        tpu_gen = str(getattr(info, "chip_version", "")).lower()
    except Exception:
        pass

    if fold_kw is None:
        # kw-fold (im2col over kw) only pays when the per-tap K doesn't already cover
        # the MXU depth; never on v5e (4x128 MXU, single vst slot).
        is_v5 = "v5" in tpu_gen
        fold1 = (Cin_p < 256) and not is_v5
        fold2 = (Cout_p < 256) and not is_v5
    else:
        fold1 = fold2 = bool(fold_kw)

    def est_bytes(T):
        n_t = (Ho + T - 1) // T
        H_ext = n_t * T + max_q + 2
        x_res = 2 * H_ext * Wq_ext * PP * Cin_p * 2          # resident input, 2 buffers
        wts = (9 * Cin_p * Cout_p + 9 * Cout_p * Cout_p
               + Cin_p * Cout_p) * 2 + 3 * Cout_p * 4        # single-buffered consts
        outb = 2 * T * Wo * Cout_p * 2                       # bf16 out block, 2 buffers
        h1s = (T + 2) * W_scr * Cout_p * 2
        acc = ((T + 2) + T) * Wo * Cout_p * 4
        patch = ((T + 2) * (3 if fold1 else 1) * Cin_p
                 + T * (3 if fold2 else 1) * Cout_p) * Wo * 2
        shct = T * Wo * Cout_p * 4
        return int(1.4 * (x_res + wts + outb + h1s + acc + patch + shct))

    if row_tile is None:
        budget = int(0.55 * vmem_cap)
        row_tile = 8
        for cand in (256, 128, 64, 32, 16, 8):
            if est_bytes(cand) <= budget:
                row_tile = cand
                break
    T = max(1, min(int(row_tile), Ho))
    n_tiles = (Ho + T - 1) // T
    Ho_p = n_tiles * T
    H_ext_q = Ho_p + max_q + 2
    vmem_limit = max(32 * 1024 * 1024,
                     min(int(0.85 * vmem_cap), 2 * est_bytes(T)))

    # ---- pack input: NCHW -> NHWC, conv zero-pad, space-to-depth parity planes along
    # the 128-padded channel axis, bf16.  Every in-kernel tap read is unit-stride. ----
    x = jnp.transpose(x_nchw, (0, 2, 3, 1)).astype(jnp.float32)
    x_pad = jnp.pad(x, ((0, 0), (1, 1), (1, 1), (0, 0)))
    rows_total = s * H_ext_q
    cols_total = s * Wq_ext
    x_ext = jnp.pad(x_pad, ((0, 0), (s, rows_total - s - (H + 2)),
                            (0, cols_total - (W + 2)), (0, 0)))
    x_q = x_ext.reshape(N, H_ext_q, s, Wq_ext, s, Cin).transpose(0, 1, 3, 2, 4, 5)
    x_q = jnp.pad(x_q, ((0, 0),) * 5 + ((0, Cin_p - Cin),))
    x_q = x_q.reshape(N, H_ext_q, Wq_ext, PP * Cin_p).astype(jnp.bfloat16)

    # ---- fold eval-mode BN into weights (f32 fold, then bf16 cast) and biases ----
    def fold_bn(p):
        g, b, m, v = p
        scale = g / jnp.sqrt(v + _EPS)
        return scale, b - m * scale

    sc1, sh1 = fold_bn(bn1)
    sc2, sh2 = fold_bn(bn2)

    def prep_w3x3(w, scale, ci, ci_p, fold):
        wf = w * scale.reshape(1, 1, 1, Cout)
        wf = jnp.pad(wf, ((0, 0), (0, 0), (0, ci_p - ci), (0, Cout_p - Cout)))
        wf = wf.astype(jnp.bfloat16)
        if fold:
            return wf.reshape(3, 3 * ci_p, Cout_p)   # K index = kw*ci_p + c
        return wf                                     # (3, 3, ci_p, Cout_p)

    w1 = prep_w3x3(w1_hwio, sc1, Cin, Cin_p, fold1)
    w2 = prep_w3x3(w2_hwio, sc2, Cout, Cout_p, fold2)

    if has_proj:
        scs, shs = fold_bn(bns)
        ws = jnp.pad(ws_io * scs.reshape(1, Cout),
                     ((0, Cin_p - Cin), (0, Cout_p - Cout))).astype(jnp.bfloat16)
    else:
        shs = jnp.zeros((Cout,), jnp.float32)
        ws = jnp.zeros((Cin_p, Cout_p), jnp.bfloat16)

    def pad_vec(v):
        return jnp.pad(v, (0, Cout_p - Cout)).reshape(1, Cout_p).astype(jnp.float32)

    b1p, b2p, bsp = pad_vec(sh1), pad_vec(sh2), pad_vec(shs)

    kernel = functools.partial(
        _residual_block_kernel, stride=s, has_proj=has_proj,
        fold1=fold1, fold2=fold2, Ho=Ho, Wo=Wo, T=T,
        Cin_p=Cin_p, Cout_p=Cout_p)

    def build(single_buffer_consts):
        def const_spec(arr):
            nd = arr.ndim
            kw = {"pipeline_mode": pl.Buffered(1)} if single_buffer_consts else {}
            return pl.BlockSpec(arr.shape, lambda n, t: (0,) * nd, **kw)

        return pl.pallas_call(
            kernel,
            out_shape=jax.ShapeDtypeStruct((N, Ho_p, Wo, Cout_p), jnp.bfloat16),
            grid_spec=pltpu.PrefetchScalarGridSpec(
                num_scalar_prefetch=0,
                grid=(N, n_tiles),
                in_specs=[
                    # full packed image resident per batch element; index ignores t
                    pl.BlockSpec((1, H_ext_q, Wq_ext, PP * Cin_p),
                                 lambda n, t: (n, 0, 0, 0)),
                    const_spec(w1), const_spec(w2), const_spec(ws),
                    const_spec(b1p), const_spec(b2p), const_spec(bsp),
                ],
                out_specs=pl.BlockSpec((1, T, Wo, Cout_p),
                                       lambda n, t: (n, t, 0, 0)),
                scratch_shapes=[pltpu.VMEM((T + 2, W_scr, Cout_p), jnp.bfloat16)],
            ),
            compiler_params=pltpu.CompilerParams(
                dimension_semantics=("parallel", "parallel"),
                vmem_limit_bytes=vmem_limit),
        )

    args = (x_q, w1, w2, ws, b1p, b2p, bsp)
    try:
        out_q = build(True)(*args)
    except Exception:
        # pl.Buffered(1) single-buffering unavailable -> default double buffering.
        out_q = build(False)(*args)

    out = out_q[:, :Ho, :, :Cout]
    if nhwc_bf16_out:
        return out                                    # chainable NHWC bf16 layout
    return jnp.transpose(out, (0, 3, 1, 2)).astype(jnp.float32)


def ref_forward(x, w1_hwio, w2_hwio, ws_io, bn1, bn2, bns, *, stride=1):
    """Pure-JAX reference (eval-mode BN), NCHW in / NCHW out."""
    Cin, Cout = w1_hwio.shape[2], w1_hwio.shape[3]
    has_proj = (stride != 1) or (Cin != Cout)

    def conv(y, w, s, pad):
        return lax.conv_general_dilated(
            y, w, window_strides=(s, s), padding=[(pad, pad), (pad, pad)],
            dimension_numbers=('NCHW', 'HWIO', 'NCHW'))

    def bn(y, p):
        g, b, m, v = p
        sh = (1, -1, 1, 1)
        return (y - m.reshape(sh)) / jnp.sqrt(v.reshape(sh) + _EPS) * g.reshape(sh) + b.reshape(sh)

    out = jax.nn.relu(bn(conv(x, w1_hwio, stride, 1), bn1))
    out = bn(conv(out, w2_hwio, 1, 1), bn2)
    if has_proj:
        sc = bn(conv(x, ws_io.reshape(1, 1, Cin, Cout), stride, 0), bns)
    else:
        sc = x
    return jax.nn.relu(out + sc)


if __name__ == "__main__":
    def make_params(key, Cin, Cout):
        ks = jax.random.split(key, 15)
        w1 = jax.random.normal(ks[0], (3, 3, Cin, Cout), jnp.float32) * 0.2
        w2 = jax.random.normal(ks[1], (3, 3, Cout, Cout), jnp.float32) * 0.2
        ws = jax.random.normal(ks[2], (Cin, Cout), jnp.float32) * 0.2

        def bn(i):
            g = 1.0 + 0.1 * jax.random.normal(ks[3 + 4 * i], (Cout,), jnp.float32)
            b = 0.1 * jax.random.normal(ks[4 + 4 * i], (Cout,), jnp.float32)
            m = 0.1 * jax.random.normal(ks[5 + 4 * i], (Cout,), jnp.float32)
            v = jax.random.uniform(ks[6 + 4 * i], (Cout,), jnp.float32,
                                   minval=0.5, maxval=1.5)
            return (g, b, m, v)

        return w1, w2, ws, bn(0), bn(1), bn(2)

    key = jax.random.PRNGKey(0)
    configs = [
        # (N, Cin, Cout, H, W, stride, row_tile, fold_kw)
        (2, 8, 8, 16, 16, 1, 8, None),     # identity shortcut, kw-fold path, 2 row tiles
        (2, 4, 8, 18, 18, 2, 4, False),    # projection shortcut, stride-2 parity packing,
                                           # ragged last row tile, 9-matmul (no-fold) path
    ]
    for (N, Cin, Cout, H, W, stride, row_tile, fold_kw) in configs:
        key, kx, kp = jax.random.split(key, 3)
        x = jax.random.normal(kx, (N, Cin, H, W), jnp.float32)
        w1, w2, ws, bn1, bn2, bns = make_params(kp, Cin, Cout)

        out = residual_block(x, w1, w2, ws, bn1, bn2, bns,
                             stride=stride, row_tile=row_tile, fold_kw=fold_kw)
        out = jax.block_until_ready(out)
        ref = ref_forward(x, w1, w2, ws, bn1, bn2, bns, stride=stride)

        Ho = (H - 1) // stride + 1
        Wo = (W - 1) // stride + 1
        assert out.shape == ref.shape == (N, Cout, Ho, Wo), (out.shape, ref.shape)
        max_err = float(jnp.max(jnp.abs(out - ref)))
        # bf16 MXU operands / bf16 output with f32 accumulation -> relaxed tolerance.
        assert jnp.allclose(out, ref, atol=5e-2, rtol=5e-2), max_err

    print("KERNEL_OK")
</pallas_src>

<mosaic_0001>
module attributes {stable_mosaic.version = 11 : i64} {
  func.func @_residual_block_kernel(%arg0: i32, %arg1: i32, %arg2: memref<1x20x18x128xbf16, #tpu.memory_space<vmem>>, %arg3: memref<3x384x128xbf16, #tpu.memory_space<vmem>>, %arg4: memref<3x384x128xbf16, #tpu.memory_space<vmem>>, %arg5: memref<128x128xbf16, #tpu.memory_space<vmem>>, %arg6: memref<1x128xf32, #tpu.memory_space<vmem>>, %arg7: memref<1x128xf32, #tpu.memory_space<vmem>>, %arg8: memref<1x128xf32, #tpu.memory_space<vmem>>, %arg9: memref<1x8x16x128xbf16, #tpu.memory_space<vmem>>, %arg10: memref<10x32x128xbf16, #tpu.memory_space<vmem>>) attributes {dimension_semantics = [#tpu.dimension_semantics<parallel>, #tpu.dimension_semantics<parallel>], iteration_bounds = array<i64: 2, 2>, scalar_prefetch = 0 : i64, scratch_operands = 1 : i64, tpu.core_type = #tpu.core_type<tc>, window_params = [{transform_indices = @transform_0, window_bounds = array<i64: 1, 20, 18, 128>}, {pipeline_mode = #tpu.pipeline_mode<synchronous>, transform_indices = @transform_1, window_bounds = array<i64: 3, 384, 128>}, {pipeline_mode = #tpu.pipeline_mode<synchronous>, transform_indices = @transform_2, window_bounds = array<i64: 3, 384, 128>}, {pipeline_mode = #tpu.pipeline_mode<synchronous>, transform_indices = @transform_3, window_bounds = array<i64: 128, 128>}, {pipeline_mode = #tpu.pipeline_mode<synchronous>, transform_indices = @transform_4, window_bounds = array<i64: 1, 128>}, {pipeline_mode = #tpu.pipeline_mode<synchronous>, transform_indices = @transform_5, window_bounds = array<i64: 1, 128>}, {pipeline_mode = #tpu.pipeline_mode<synchronous>, transform_indices = @transform_6, window_bounds = array<i64: 1, 128>}, {transform_indices = @transform_7, window_bounds = array<i64: 1, 8, 16, 128>}]} {
    %c8_i32 = arith.constant 8 : i32
    %0 = arith.muli %arg1, %c8_i32 : i32
    %cst = arith.constant 0.000000e+00 : f32
    %1 = vector.broadcast %cst : f32 to vector<160x128xf32>
    %c0_i32 = arith.constant 0 : i32
    %2 = arith.addi %0, %c0_i32 : i32
    %c0 = arith.constant 0 : index
    %3 = arith.index_cast %2 : i32 to index
    %c0_0 = arith.constant 0 : index
    %c0_1 = arith.constant 0 : index
    %4 = vector.load %arg2[%c0, %3, %c0_0, %c0_1] : memref<1x20x18x128xbf16, #tpu.memory_space<vmem>>, vector<1x10x16x128xbf16>
    %5 = vector.shape_cast %4 : vector<1x10x16x128xbf16> to vector<10x16x128xbf16>
    %c0_i32_2 = arith.constant 0 : i32
    %6 = arith.addi %0, %c0_i32_2 : i32
    %c0_3 = arith.constant 0 : index
    %7 = arith.index_cast %6 : i32 to index
    %c1 = arith.constant 1 : index
    %c0_4 = arith.constant 0 : index
    %8 = vector.load %arg2[%c0_3, %7, %c1, %c0_4] : memref<1x20x18x128xbf16, #tpu.memory_space<vmem>>, vector<1x10x16x128xbf16>
    %9 = vector.shape_cast %8 : vector<1x10x16x128xbf16> to vector<10x16x128xbf16>
    %c0_i32_5 = arith.constant 0 : i32
    %10 = arith.addi %0, %c0_i32_5 : i32
    %c0_6 = arith.constant 0 : index
    %11 = arith.index_cast %10 : i32 to index
    %c2 = arith.constant 2 : index
    %c0_7 = arith.constant 0 : index
    %12 = vector.load %arg2[%c0_6, %11, %c2, %c0_7] : memref<1x20x18x128xbf16, #tpu.memory_space<vmem>>, vector<1x10x16x128xbf16>
    %13 = vector.shape_cast %12 : vector<1x10x16x128xbf16> to vector<10x16x128xbf16>
    %14 = tpu.concatenate %5, %9, %13 in 2 : vector<10x16x128xbf16>, vector<10x16x128xbf16>, vector<10x16x128xbf16> -> vector<10x16x384xbf16>
    %15 = vector.shape_cast %14 : vector<10x16x384xbf16> to vector<160x384xbf16>
    %c0_8 = arith.constant 0 : index
    %c0_9 = arith.constant 0 : index
    %c0_10 = arith.constant 0 : index
    %16 = vector.load %arg3[%c0_8, %c0_9, %c0_10] : memref<3x384x128xbf16, #tpu.memory_space<vmem>>, vector<1x384x128xbf16>
    %17 = vector.shape_cast %16 : vector<1x384x128xbf16> to vector<384x128xbf16>
    %cst_11 = arith.constant dense<0.000000e+00> : vector<160x128xf32>
    %18 = tpu.matmul %15, %17, %cst_11 {dimension_numbers = #tpu.dot_dimension_numbers<[1], [0], [0], [1], [0, 0, 1, 1], [], []>} : vector<160x384xbf16>, vector<384x128xbf16>, vector<160x128xf32> -> vector<160x128xf32>
    %19 = arith.addf %1, %18 : vector<160x128xf32>
    %c1_i32 = arith.constant 1 : i32
    %20 = arith.addi %0, %c1_i32 : i32
    %c0_12 = arith.constant 0 : index
    %21 = arith.index_cast %20 : i32 to index
    %c0_13 = arith.constant 0 : index
    %c0_14 = arith.constant 0 : index
    %22 = vector.load %arg2[%c0_12, %21, %c0_13, %c0_14] : memref<1x20x18x128xbf16, #tpu.memory_space<vmem>>, vector<1x10x16x128xbf16>
    %23 = vector.shape_cast %22 : vector<1x10x16x128xbf16> to vector<10x16x128xbf16>
    %c1_i32_15 = arith.constant 1 : i32
    %24 = arith.addi %0, %c1_i32_15 : i32
    %c0_16 = arith.constant 0 : index
    %25 = arith.index_cast %24 : i32 to index
    %c1_17 = arith.constant 1 : index
    %c0_18 = arith.constant 0 : index
    %26 = vector.load %arg2[%c0_16, %25, %c1_17, %c0_18] : memref<1x20x18x128xbf16, #tpu.memory_space<vmem>>, vector<1x10x16x128xbf16>
    %27 = vector.shape_cast %26 : vector<1x10x16x128xbf16> to vector<10x16x128xbf16>
    %c1_i32_19 = arith.constant 1 : i32
    %28 = arith.addi %0, %c1_i32_19 : i32
    %c0_20 = arith.constant 0 : index
    %29 = arith.index_cast %28 : i32 to index
    %c2_21 = arith.constant 2 : index
    %c0_22 = arith.constant 0 : index
    %30 = vector.load %arg2[%c0_20, %29, %c2_21, %c0_22] : memref<1x20x18x128xbf16, #tpu.memory_space<vmem>>, vector<1x10x16x128xbf16>
    %31 = vector.shape_cast %30 : vector<1x10x16x128xbf16> to vector<10x16x128xbf16>
    %32 = tpu.concatenate %23, %27, %31 in 2 : vector<10x16x128xbf16>, vector<10x16x128xbf16>, vector<10x16x128xbf16> -> vector<10x16x384xbf16>
    %33 = vector.shape_cast %32 : vector<10x16x384xbf16> to vector<160x384xbf16>
    %c1_23 = arith.constant 1 : index
    %c0_24 = arith.constant 0 : index
    %c0_25 = arith.constant 0 : index
    %34 = vector.load %arg3[%c1_23, %c0_24, %c0_25] : memref<3x384x128xbf16, #tpu.memory_space<vmem>>, vector<1x384x128xbf16>
    %35 = vector.shape_cast %34 : vector<1x384x128xbf16> to vector<384x128xbf16>
    %cst_26 = arith.constant dense<0.000000e+00> : vector<160x128xf32>
    %36 = tpu.matmul %33, %35, %cst_26 {dimension_numbers = #tpu.dot_dimension_numbers<[1], [0], [0], [1], [0, 0, 1, 1], [], []>} : vector<160x384xbf16>, vector<384x128xbf16>, vector<160x128xf32> -> vector<160x128xf32>
    %37 = arith.addf %19, %36 : vector<160x128xf32>
    %c2_i32 = arith.constant 2 : i32
    %38 = arith.addi %0, %c2_i32 : i32
    %c0_27 = arith.constant 0 : index
    %39 = arith.index_cast %38 : i32 to index
    %c0_28 = arith.constant 0 : index
    %c0_29 = arith.constant 0 : index
    %40 = vector.load %arg2[%c0_27, %39, %c0_28, %c0_29] : memref<1x20x18x128xbf16, #tpu.memory_space<vmem>>, vector<1x10x16x128xbf16>
    %41 = vector.shape_cast %40 : vector<1x10x16x128xbf16> to vector<10x16x128xbf16>
    %c2_i32_30 = arith.constant 2 : i32
    %42 = arith.addi %0, %c2_i32_30 : i32
    %c0_31 = arith.constant 0 : index
    %43 = arith.index_cast %42 : i32 to index
    %c1_32 = arith.constant 1 : index
    %c0_33 = arith.constant 0 : index
    %44 = vector.load %arg2[%c0_31, %43, %c1_32, %c0_33] : memref<1x20x18x128xbf16, #tpu.memory_space<vmem>>, vector<1x10x16x128xbf16>
    %45 = vector.shape_cast %44 : vector<1x10x16x128xbf16> to vector<10x16x128xbf16>
    %c2_i32_34 = arith.constant 2 : i32
    %46 = arith.addi %0, %c2_i32_34 : i32
    %c0_35 = arith.constant 0 : index
    %47 = arith.index_cast %46 : i32 to index
    %c2_36 = arith.constant 2 : index
    %c0_37 = arith.constant 0 : index
    %48 = vector.load %arg2[%c0_35, %47, %c2_36, %c0_37] : memref<1x20x18x128xbf16, #tpu.memory_space<vmem>>, vector<1x10x16x128xbf16>
    %49 = vector.shape_cast %48 : vector<1x10x16x128xbf16> to vector<10x16x128xbf16>
    %50 = tpu.concatenate %41, %45, %49 in 2 : vector<10x16x128xbf16>, vector<10x16x128xbf16>, vector<10x16x128xbf16> -> vector<10x16x384xbf16>
    %51 = vector.shape_cast %50 : vector<10x16x384xbf16> to vector<160x384xbf16>
    %c2_38 = arith.constant 2 : index
    %c0_39 = arith.constant 0 : index
    %c0_40 = arith.constant 0 : index
    %52 = vector.load %arg3[%c2_38, %c0_39, %c0_40] : memref<3x384x128xbf16, #tpu.memory_space<vmem>>, vector<1x384x128xbf16>
    %53 = vector.shape_cast %52 : vector<1x384x128xbf16> to vector<384x128xbf16>
    %cst_41 = arith.constant dense<0.000000e+00> : vector<160x128xf32>
    %54 = tpu.matmul %51, %53, %cst_41 {dimension_numbers = #tpu.dot_dimension_numbers<[1], [0], [0], [1], [0, 0, 1, 1], [], []>} : vector<160x384xbf16>, vector<384x128xbf16>, vector<160x128xf32> -> vector<160x128xf32>
    %55 = arith.addf %37, %54 : vector<160x128xf32>
    %c0_42 = arith.constant 0 : index
    %c0_43 = arith.constant 0 : index
    %56 = vector.load %arg6[%c0_42, %c0_43] : memref<1x128xf32, #tpu.memory_space<vmem>>, vector<1x128xf32>
    %57 = vector.broadcast %56 : vector<1x128xf32> to vector<160x128xf32>
    %58 = arith.addf %55, %57 : vector<160x128xf32>
    %cst_44 = arith.constant 0.000000e+00 : f32
    %59 = vector.broadcast %cst_44 : f32 to vector<160x128xf32>
    %60 = arith.maximumf %58, %59 : vector<160x128xf32>
    %61 = vector.shape_cast %60 : vector<160x128xf32> to vector<10x16x128xf32>
    %c1_i32_45 = arith.constant 1 : i32
    %62 = arith.subi %0, %c1_i32_45 : i32
    %63 = tpu.iota {dimensions = array<i32: 0>} : vector<10x1x1xi32>
    %64 = vector.broadcast %62 : i32 to vector<10x1x1xi32>
    %65 = arith.addi %64, %63 : vector<10x1x1xi32>
    %c0_i32_46 = arith.constant 0 : i32
    %66 = vector.broadcast %c0_i32_46 : i32 to vector<10x1x1xi32>
    %67 = arith.cmpi sge, %65, %66 : vector<10x1x1xi32>
    %c16_i32 = arith.constant 16 : i32
    %68 = vector.broadcast %c16_i32 : i32 to vector<10x1x1xi32>
    %69 = arith.cmpi slt, %65, %68 : vector<10x1x1xi32>
    %70 = arith.andi %67, %69 : vector<10x1x1xi1>
    %cst_47 = arith.constant 0.000000e+00 : f32
    %71 = vector.shape_cast %70 : vector<10x1x1xi1> to vector<10x1x1xi1>
    %72 = vector.broadcast %71 : vector<10x1x1xi1> to vector<10x16x128xi1>
    %73 = vector.broadcast %cst_47 : f32 to vector<10x16x128xf32>
    %74 = arith.select %72, %61, %73 : vector<10x16x128xi1>, vector<10x16x128xf32>
    %75 = arith.truncf %74 : vector<10x16x128xf32> to vector<10x16x128xbf16>
    %c0_48 = arith.constant 0 : index
    %c8 = arith.constant 8 : index
    %c0_49 = arith.constant 0 : index
    %76 = vector.load %arg10[%c0_48, %c8, %c0_49] : memref<10x32x128xbf16, #tpu.memory_space<vmem>>, vector<10x16x128xbf16>
    tpu.vector_store %arg10[%c0_48, %c8, %c0_49], %75 {strides = array<i32>} : memref<10x32x128xbf16, #tpu.memory_space<vmem>>, vector<10x16x128xbf16>,
    %cst_50 = arith.constant 0.000000e+00 : bf16
    %77 = vector.broadcast %cst_50 : bf16 to vector<10x1x128xbf16>
    %c0_51 = arith.constant 0 : index
    %c7 = arith.constant 7 : index
    %c0_52 = arith.constant 0 : index
    %78 = vector.load %arg10[%c0_51, %c7, %c0_52] : memref<10x32x128xbf16, #tpu.memory_space<vmem>>, vector<10x1x128xbf16>
    tpu.vector_store %arg10[%c0_51, %c7, %c0_52], %77 {strides = array<i32>} : memref<10x32x128xbf16, #tpu.memory_space<vmem>>, vector<10x1x128xbf16>,
    %c0_53 = arith.constant 0 : index
    %c24 = arith.constant 24 : index
    %c0_54 = arith.constant 0 : index
    %79 = vector.load %arg10[%c0_53, %c24, %c0_54] : memref<10x32x128xbf16, #tpu.memory_space<vmem>>, vector<10x1x128xbf16>
    tpu.vector_store %arg10[%c0_53, %c24, %c0_54], %77 {strides = array<i32>} : memref<10x32x128xbf16, #tpu.memory_space<vmem>>, vector<10x1x128xbf16>,
    %cst_55 = arith.constant 0.000000e+00 : f32
    %80 = vector.broadcast %cst_55 : f32 to vector<128x128xf32>
    %c0_56 = arith.constant 0 : index
    %c7_57 = arith.constant 7 : index
    %c0_58 = arith.constant 0 : index
    %81 = vector.load %arg10[%c0_56, %c7_57, %c0_58] : memref<10x32x128xbf16, #tpu.memory_space<vmem>>, vector<8x16x128xbf16>
    %c0_59 = arith.constant 0 : index
    %c8_60 = arith.constant 8 : index
    %c0_61 = arith.constant 0 : index
    %82 = vector.load %arg10[%c0_59, %c8_60, %c0_61] : memref<10x32x128xbf16, #tpu.memory_space<vmem>>, vector<8x16x128xbf16>
    %c0_62 = arith.constant 0 : index
    %c9 = arith.constant 9 : index
    %c0_63 = arith.constant 0 : index
    %83 = vector.load %arg10[%c0_62, %c9, %c0_63] : memref<10x32x128xbf16, #tpu.memory_space<vmem>>, vector<8x16x128xbf16>
    %84 = tpu.concatenate %81, %82, %83 in 2 : vector<8x16x128xbf16>, vector<8x16x128xbf16>, vector<8x16x128xbf16> -> vector<8x16x384xbf16>
    %85 = vector.shape_cast %84 : vector<8x16x384xbf16> to vector<128x384xbf16>
    %c0_64 = arith.constant 0 : index
    %c0_65 = arith.constant 0 : index
    %c0_66 = arith.constant 0 : index
    %86 = vector.load %arg4[%c0_64, %c0_65, %c0_66] : memref<3x384x128xbf16, #tpu.memory_space<vmem>>, vector<1x384x128xbf16>
    %87 = vector.shape_cast %86 : vector<1x384x128xbf16> to vector<384x128xbf16>
    %cst_67 = arith.constant dense<0.000000e+00> : vector<128x128xf32>
    %88 = tpu.matmul %85, %87, %cst_67 {dimension_numbers = #tpu.dot_dimension_numbers<[1], [0], [0], [1], [0, 0, 1, 1], [], []>} : vector<128x384xbf16>, vector<384x128xbf16>, vector<128x128xf32> -> vector<128x128xf32>
    %89 = arith.addf %80, %88 : vector<128x128xf32>
    %c1_68 = arith.constant 1 : index
    %c7_69 = arith.constant 7 : index
    %c0_70 = arith.constant 0 : index
    %90 = vector.load %arg10[%c1_68, %c7_69, %c0_70] : memref<10x32x128xbf16, #tpu.memory_space<vmem>>, vector<8x16x128xbf16>
    %c1_71 = arith.constant 1 : index
    %c8_72 = arith.constant 8 : index
    %c0_73 = arith.constant 0 : index
    %91 = vector.load %arg10[%c1_71, %c8_72, %c0_73] : memref<10x32x128xbf16, #tpu.memory_space<vmem>>, vector<8x16x128xbf16>
    %c1_74 = arith.constant 1 : index
    %c9_75 = arith.constant 9 : index
    %c0_76 = arith.constant 0 : index
    %92 = vector.load %arg10[%c1_74, %c9_75, %c0_76] : memref<10x32x128xbf16, #tpu.memory_space<vmem>>, vector<8x16x128xbf16>
    %93 = tpu.concatenate %90, %91, %92 in 2 : vector<8x16x128xbf16>, vector<8x16x128xbf16>, vector<8x16x128xbf16> -> vector<8x16x384xbf16>
    %94 = vector.shape_cast %93 : vector<8x16x384xbf16> to vector<128x384xbf16>
    %c1_77 = arith.constant 1 : index
    %c0_78 = arith.constant 0 : index
    %c0_79 = arith.constant 0 : index
    %95 = vector.load %arg4[%c1_77, %c0_78, %c0_79] : memref<3x384x128xbf16, #tpu.memory_space<vmem>>, vector<1x384x128xbf16>
    %96 = vector.shape_cast %95 : vector<1x384x128xbf16> to vector<384x128xbf16>
    %cst_80 = arith.constant dense<0.000000e+00> : vector<128x128xf32>
    %97 = tpu.matmul %94, %96, %cst_80 {dimension_numbers = #tpu.dot_dimension_numbers<[1], [0], [0], [1], [0, 0, 1, 1], [], []>} : vector<128x384xbf16>, vector<384x128xbf16>, vector<128x128xf32> -> vector<128x128xf32>
    %98 = arith.addf %89, %97 : vector<128x128xf32>
    %c2_81 = arith.constant 2 : index
    %c7_82 = arith.constant 7 : index
    %c0_83 = arith.constant 0 : index
    %99 = vector.load %arg10[%c2_81, %c7_82, %c0_83] : memref<10x32x128xbf16, #tpu.memory_space<vmem>>, vector<8x16x128xbf16>
    %c2_84 = arith.constant 2 : index
    %c8_85 = arith.constant 8 : index
    %c0_86 = arith.constant 0 : index
    %100 = vector.load %arg10[%c2_84, %c8_85, %c0_86] : memref<10x32x128xbf16, #tpu.memory_space<vmem>>, vector<8x16x128xbf16>
    %c2_87 = arith.constant 2 : index
    %c9_88 = arith.constant 9 : index
    %c0_89 = arith.constant 0 : index
    %101 = vector.load %arg10[%c2_87, %c9_88, %c0_89] : memref<10x32x128xbf16, #tpu.memory_space<vmem>>, vector<8x16x128xbf16>
    %102 = tpu.concatenate %99, %100, %101 in 2 : vector<8x16x128xbf16>, vector<8x16x128xbf16>, vector<8x16x128xbf16> -> vector<8x16x384xbf16>
    %103 = vector.shape_cast %102 : vector<8x16x384xbf16> to vector<128x384xbf16>
    %c2_90 = arith.constant 2 : index
    %c0_91 = arith.constant 0 : index
    %c0_92 = arith.constant 0 : index
    %104 = vector.load %arg4[%c2_90, %c0_91, %c0_92] : memref<3x384x128xbf16, #tpu.memory_space<vmem>>, vector<1x384x128xbf16>
    %105 = vector.shape_cast %104 : vector<1x384x128xbf16> to vector<384x128xbf16>
    %cst_93 = arith.constant dense<0.000000e+00> : vector<128x128xf32>
    %106 = tpu.matmul %103, %105, %cst_93 {dimension_numbers = #tpu.dot_dimension_numbers<[1], [0], [0], [1], [0, 0, 1, 1], [], []>} : vector<128x384xbf16>, vector<384x128xbf16>, vector<128x128xf32> -> vector<128x128xf32>
    %107 = arith.addf %98, %106 : vector<128x128xf32>
    %c1_i32_94 = arith.constant 1 : i32
    %108 = arith.addi %0, %c1_i32_94 : i32
    %c1_i32_95 = arith.constant 1 : i32
    %109 = arith.addi %108, %c1_i32_95 : i32
    %c0_96 = arith.constant 0 : index
    %110 = arith.index_cast %109 : i32 to index
    %c1_97 = arith.constant 1 : index
    %c0_98 = arith.constant 0 : index
    %111 = vector.load %arg2[%c0_96, %110, %c1_97, %c0_98] : memref<1x20x18x128xbf16, #tpu.memory_space<vmem>>, vector<1x8x16x128xbf16>
    %112 = vector.shape_cast %111 : vector<1x8x16x128xbf16> to vector<8x16x128xbf16>
    %113 = vector.shape_cast %112 : vector<8x16x128xbf16> to vector<128x128xbf16>
    %114 = arith.extf %113 : vector<128x128xbf16> to vector<128x128xf32>
    %c0_99 = arith.constant 0 : index
    %c0_100 = arith.constant 0 : index
    %115 = vector.load %arg7[%c0_99, %c0_100] : memref<1x128xf32, #tpu.memory_space<vmem>>, vector<1x128xf32>
    %116 = vector.broadcast %115 : vector<1x128xf32> to vector<128x128xf32>
    %117 = arith.addf %107, %116 : vector<128x128xf32>
    %118 = arith.addf %117, %114 : vector<128x128xf32>
    %cst_101 = arith.constant 0.000000e+00 : f32
    %119 = vector.broadcast %cst_101 : f32 to vector<128x128xf32>
    %120 = arith.maximumf %118, %119 : vector<128x128xf32>
    %121 = vector.shape_cast %120 : vector<128x128xf32> to vector<1x8x16x128xf32>
    %122 = arith.truncf %121 : vector<1x8x16x128xf32> to vector<1x8x16x128xbf16>
    %c0_102 = arith.constant 0 : index
    %c0_103 = arith.constant 0 : index
    %c0_104 = arith.constant 0 : index
    %c0_105 = arith.constant 0 : index
    %123 = vector.load %arg9[%c0_102, %c0_103, %c0_104, %c0_105] : memref<1x8x16x128xbf16, #tpu.memory_space<vmem>>, vector<1x8x16x128xbf16>
    tpu.vector_store %arg9[%c0_102, %c0_103, %c0_104, %c0_105], %122 {strides = array<i32>} : memref<1x8x16x128xbf16, #tpu.memory_space<vmem>>, vector<1x8x16x128xbf16>,
    return
  }
  func.func @transform_0(%arg0: i32, %arg1: i32) -> (i32, i32, i32, i32) {
    %c0_i32 = arith.constant 0 : i32
    %c0_i32_0 = arith.constant 0 : i32
    %c0_i32_1 = arith.constant 0 : i32
    %c0_i32_2 = arith.constant 0 : i32
    return %arg0, %c0_i32, %c0_i32_0, %c0_i32_1 : i32, i32, i32, i32
  }
  func.func @transform_1(%arg0: i32, %arg1: i32) -> (i32, i32, i32) {
    %c0_i32 = arith.constant 0 : i32
    %c0_i32_0 = arith.constant 0 : i32
    %c0_i32_1 = arith.constant 0 : i32
    %c0_i32_2 = arith.constant 0 : i32
    return %c0_i32, %c0_i32_0, %c0_i32_1 : i32, i32, i32
  }
  func.func @transform_2(%arg0: i32, %arg1: i32) -> (i32, i32, i32) {
    %c0_i32 = arith.constant 0 : i32
    %c0_i32_0 = arith.constant 0 : i32
    %c0_i32_1 = arith.constant 0 : i32
    %c0_i32_2 = arith.constant 0 : i32
    return %c0_i32, %c0_i32_0, %c0_i32_1 : i32, i32, i32
  }
  func.func @transform_3(%arg0: i32, %arg1: i32) -> (i32, i32) {
    %c0_i32 = arith.constant 0 : i32
    %c0_i32_0 = arith.constant 0 : i32
    %c0_i32_1 = arith.constant 0 : i32
    return %c0_i32, %c0_i32_0 : i32, i32
  }
  func.func @transform_4(%arg0: i32, %arg1: i32) -> (i32, i32) {
    %c0_i32 = arith.constant 0 : i32
    %c0_i32_0 = arith.constant 0 : i32
    %c0_i32_1 = arith.constant 0 : i32
    return %c0_i32, %c0_i32_0 : i32, i32
  }
  func.func @transform_5(%arg0: i32, %arg1: i32) -> (i32, i32) {
    %c0_i32 = arith.constant 0 : i32
    %c0_i32_0 = arith.constant 0 : i32
    %c0_i32_1 = arith.constant 0 : i32
    return %c0_i32, %c0_i32_0 : i32, i32
  }
  func.func @transform_6(%arg0: i32, %arg1: i32) -> (i32, i32) {
    %c0_i32 = arith.constant 0 : i32
    %c0_i32_0 = arith.constant 0 : i32
    %c0_i32_1 = arith.constant 0 : i32
    return %c0_i32, %c0_i32_0 : i32, i32
  }
  func.func @transform_7(%arg0: i32, %arg1: i32) -> (i32, i32, i32, i32) {
    %c0_i32 = arith.constant 0 : i32
    %c0_i32_0 = arith.constant 0 : i32
    %c0_i32_1 = arith.constant 0 : i32
    return %arg0, %arg1, %c0_i32, %c0_i32_0 : i32, i32, i32, i32
  }
}

module attributes {stable_mosaic.version = 11 : i64} {
  func.func @_residual_block_kernel(%arg0: i32, %arg1: i32, %arg2: memref<1x20x18x128xbf16, #tpu.memory_space<vmem>>, %arg3: memref<3x384x128xbf16, #tpu.memory_space<vmem>>, %arg4: memref<3x384x128xbf16, #tpu.memory_space<vmem>>, %arg5: memref<128x128xbf16, #tpu.memory_space<vmem>>, %arg6: memref<1x128xf32, #tpu.memory_space<vmem>>, %arg7: memref<1x128xf32, #tpu.memory_space<vmem>>, %arg8: memref<1x128xf32, #tpu.memory_space<vmem>>, %arg9: memref<1x8x16x128xbf16, #tpu.memory_space<vmem>>, %arg10: memref<10x32x128xbf16, #tpu.memory_space<vmem>>) attributes {dimension_semantics = [#tpu.dimension_semantics<parallel>, #tpu.dimension_semantics<parallel>], iteration_bounds = array<i64: 2, 2>, scalar_prefetch = 0 : i64, scratch_operands = 1 : i64, tpu.core_type = #tpu.core_type<tc>, window_params = [{transform_indices = @transform_0, window_bounds = array<i64: 1, 20, 18, 128>}, {pipeline_mode = #tpu.pipeline_mode<synchronous>, transform_indices = @transform_1, window_bounds = array<i64: 3, 384, 128>}, {pipeline_mode = #tpu.pipeline_mode<synchronous>, transform_indices = @transform_2, window_bounds = array<i64: 3, 384, 128>}, {pipeline_mode = #tpu.pipeline_mode<synchronous>, transform_indices = @transform_3, window_bounds = array<i64: 128, 128>}, {pipeline_mode = #tpu.pipeline_mode<synchronous>, transform_indices = @transform_4, window_bounds = array<i64: 1, 128>}, {pipeline_mode = #tpu.pipeline_mode<synchronous>, transform_indices = @transform_5, window_bounds = array<i64: 1, 128>}, {pipeline_mode = #tpu.pipeline_mode<synchronous>, transform_indices = @transform_6, window_bounds = array<i64: 1, 128>}, {transform_indices = @transform_7, window_bounds = array<i64: 1, 8, 16, 128>}]} {
    %c8_i32 = arith.constant 8 : i32
    %0 = arith.muli %arg1, %c8_i32 : i32
    %cst = arith.constant 0.000000e+00 : f32
    %1 = vector.broadcast %cst : f32 to vector<160x128xf32>
    %c0_i32 = arith.constant 0 : i32
    %2 = arith.addi %0, %c0_i32 : i32
    %c0 = arith.constant 0 : index
    %3 = arith.index_cast %2 : i32 to index
    %c0_0 = arith.constant 0 : index
    %c0_1 = arith.constant 0 : index
    %4 = vector.load %arg2[%c0, %3, %c0_0, %c0_1] : memref<1x20x18x128xbf16, #tpu.memory_space<vmem>>, vector<1x10x16x128xbf16>
    %5 = vector.shape_cast %4 : vector<1x10x16x128xbf16> to vector<10x16x128xbf16>
    %c0_i32_2 = arith.constant 0 : i32
    %6 = arith.addi %0, %c0_i32_2 : i32
    %c0_3 = arith.constant 0 : index
    %7 = arith.index_cast %6 : i32 to index
    %c1 = arith.constant 1 : index
    %c0_4 = arith.constant 0 : index
    %8 = vector.load %arg2[%c0_3, %7, %c1, %c0_4] : memref<1x20x18x128xbf16, #tpu.memory_space<vmem>>, vector<1x10x16x128xbf16>
    %9 = vector.shape_cast %8 : vector<1x10x16x128xbf16> to vector<10x16x128xbf16>
    %c0_i32_5 = arith.constant 0 : i32
    %10 = arith.addi %0, %c0_i32_5 : i32
    %c0_6 = arith.constant 0 : index
    %11 = arith.index_cast %10 : i32 to index
    %c2 = arith.constant 2 : index
    %c0_7 = arith.constant 0 : index
    %12 = vector.load %arg2[%c0_6, %11, %c2, %c0_7] : memref<1x20x18x128xbf16, #tpu.memory_space<vmem>>, vector<1x10x16x128xbf16>
    %13 = vector.shape_cast %12 : vector<1x10x16x128xbf16> to vector<10x16x128xbf16>
    %14 = tpu.concatenate %5, %9, %13 in 2 : vector<10x16x128xbf16>, vector<10x16x128xbf16>, vector<10x16x128xbf16> -> vector<10x16x384xbf16>
    %15 = vector.shape_cast %14 : vector<10x16x384xbf16> to vector<160x384xbf16>
    %c0_8 = arith.constant 0 : index
    %c0_9 = arith.constant 0 : index
    %c0_10 = arith.constant 0 : index
    %16 = vector.load %arg3[%c0_8, %c0_9, %c0_10] : memref<3x384x128xbf16, #tpu.memory_space<vmem>>, vector<1x384x128xbf16>
    %17 = vector.shape_cast %16 : vector<1x384x128xbf16> to vector<384x128xbf16>
    %cst_11 = arith.constant dense<0.000000e+00> : vector<160x128xf32>
    %18 = tpu.matmul %15, %17, %cst_11 {dimension_numbers = #tpu.dot_dimension_numbers<[1], [0], [0], [1], [0, 0, 1, 1], [], []>} : vector<160x384xbf16>, vector<384x128xbf16>, vector<160x128xf32> -> vector<160x128xf32>
    %19 = arith.addf %1, %18 : vector<160x128xf32>
    %c1_i32 = arith.constant 1 : i32
    %20 = arith.addi %0, %c1_i32 : i32
    %c0_12 = arith.constant 0 : index
    %21 = arith.index_cast %20 : i32 to index
    %c0_13 = arith.constant 0 : index
    %c0_14 = arith.constant 0 : index
    %22 = vector.load %arg2[%c0_12, %21, %c0_13, %c0_14] : memref<1x20x18x128xbf16, #tpu.memory_space<vmem>>, vector<1x10x16x128xbf16>
    %23 = vector.shape_cast %22 : vector<1x10x16x128xbf16> to vector<10x16x128xbf16>
    %c1_i32_15 = arith.constant 1 : i32
    %24 = arith.addi %0, %c1_i32_15 : i32
    %c0_16 = arith.constant 0 : index
    %25 = arith.index_cast %24 : i32 to index
    %c1_17 = arith.constant 1 : index
    %c0_18 = arith.constant 0 : index
    %26 = vector.load %arg2[%c0_16, %25, %c1_17, %c0_18] : memref<1x20x18x128xbf16, #tpu.memory_space<vmem>>, vector<1x10x16x128xbf16>
    %27 = vector.shape_cast %26 : vector<1x10x16x128xbf16> to vector<10x16x128xbf16>
    %c1_i32_19 = arith.constant 1 : i32
    %28 = arith.addi %0, %c1_i32_19 : i32
    %c0_20 = arith.constant 0 : index
    %29 = arith.index_cast %28 : i32 to index
    %c2_21 = arith.constant 2 : index
    %c0_22 = arith.constant 0 : index
    %30 = vector.load %arg2[%c0_20, %29, %c2_21, %c0_22] : memref<1x20x18x128xbf16, #tpu.memory_space<vmem>>, vector<1x10x16x128xbf16>
    %31 = vector.shape_cast %30 : vector<1x10x16x128xbf16> to vector<10x16x128xbf16>
    %32 = tpu.concatenate %23, %27, %31 in 2 : vector<10x16x128xbf16>, vector<10x16x128xbf16>, vector<10x16x128xbf16> -> vector<10x16x384xbf16>
    %33 = vector.shape_cast %32 : vector<10x16x384xbf16> to vector<160x384xbf16>
    %c1_23 = arith.constant 1 : index
    %c0_24 = arith.constant 0 : index
    %c0_25 = arith.constant 0 : index
    %34 = vector.load %arg3[%c1_23, %c0_24, %c0_25] : memref<3x384x128xbf16, #tpu.memory_space<vmem>>, vector<1x384x128xbf16>
    %35 = vector.shape_cast %34 : vector<1x384x128xbf16> to vector<384x128xbf16>
    %cst_26 = arith.constant dense<0.000000e+00> : vector<160x128xf32>
    %36 = tpu.matmul %33, %35, %cst_26 {dimension_numbers = #tpu.dot_dimension_numbers<[1], [0], [0], [1], [0, 0, 1, 1], [], []>} : vector<160x384xbf16>, vector<384x128xbf16>, vector<160x128xf32> -> vector<160x128xf32>
    %37 = arith.addf %19, %36 : vector<160x128xf32>
    %c2_i32 = arith.constant 2 : i32
    %38 = arith.addi %0, %c2_i32 : i32
    %c0_27 = arith.constant 0 : index
    %39 = arith.index_cast %38 : i32 to index
    %c0_28 = arith.constant 0 : index
    %c0_29 = arith.constant 0 : index
    %40 = vector.load %arg2[%c0_27, %39, %c0_28, %c0_29] : memref<1x20x18x128xbf16, #tpu.memory_space<vmem>>, vector<1x10x16x128xbf16>
    %41 = vector.shape_cast %40 : vector<1x10x16x128xbf16> to vector<10x16x128xbf16>
    %c2_i32_30 = arith.constant 2 : i32
    %42 = arith.addi %0, %c2_i32_30 : i32
    %c0_31 = arith.constant 0 : index
    %43 = arith.index_cast %42 : i32 to index
    %c1_32 = arith.constant 1 : index
    %c0_33 = arith.constant 0 : index
    %44 = vector.load %arg2[%c0_31, %43, %c1_32, %c0_33] : memref<1x20x18x128xbf16, #tpu.memory_space<vmem>>, vector<1x10x16x128xbf16>
    %45 = vector.shape_cast %44 : vector<1x10x16x128xbf16> to vector<10x16x128xbf16>
    %c2_i32_34 = arith.constant 2 : i32
    %46 = arith.addi %0, %c2_i32_34 : i32
    %c0_35 = arith.constant 0 : index
    %47 = arith.index_cast %46 : i32 to index
    %c2_36 = arith.constant 2 : index
    %c0_37 = arith.constant 0 : index
    %48 = vector.load %arg2[%c0_35, %47, %c2_36, %c0_37] : memref<1x20x18x128xbf16, #tpu.memory_space<vmem>>, vector<1x10x16x128xbf16>
    %49 = vector.shape_cast %48 : vector<1x10x16x128xbf16> to vector<10x16x128xbf16>
    %50 = tpu.concatenate %41, %45, %49 in 2 : vector<10x16x128xbf16>, vector<10x16x128xbf16>, vector<10x16x128xbf16> -> vector<10x16x384xbf16>
    %51 = vector.shape_cast %50 : vector<10x16x384xbf16> to vector<160x384xbf16>
    %c2_38 = arith.constant 2 : index
    %c0_39 = arith.constant 0 : index
    %c0_40 = arith.constant 0 : index
    %52 = vector.load %arg3[%c2_38, %c0_39, %c0_40] : memref<3x384x128xbf16, #tpu.memory_space<vmem>>, vector<1x384x128xbf16>
    %53 = vector.shape_cast %52 : vector<1x384x128xbf16> to vector<384x128xbf16>
    %cst_41 = arith.constant dense<0.000000e+00> : vector<160x128xf32>
    %54 = tpu.matmul %51, %53, %cst_41 {dimension_numbers = #tpu.dot_dimension_numbers<[1], [0], [0], [1], [0, 0, 1, 1], [], []>} : vector<160x384xbf16>, vector<384x128xbf16>, vector<160x128xf32> -> vector<160x128xf32>
    %55 = arith.addf %37, %54 : vector<160x128xf32>
    %c0_42 = arith.constant 0 : index
    %c0_43 = arith.constant 0 : index
    %56 = vector.load %arg6[%c0_42, %c0_43] : memref<1x128xf32, #tpu.memory_space<vmem>>, vector<1x128xf32>
    %57 = vector.broadcast %56 : vector<1x128xf32> to vector<160x128xf32>
    %58 = arith.addf %55, %57 : vector<160x128xf32>
    %cst_44 = arith.constant 0.000000e+00 : f32
    %59 = vector.broadcast %cst_44 : f32 to vector<160x128xf32>
    %60 = arith.maximumf %58, %59 : vector<160x128xf32>
    %61 = vector.shape_cast %60 : vector<160x128xf32> to vector<10x16x128xf32>
    %c1_i32_45 = arith.constant 1 : i32
    %62 = arith.subi %0, %c1_i32_45 : i32
    %63 = tpu.iota {dimensions = array<i32: 0>} : vector<10x1x1xi32>
    %64 = vector.broadcast %62 : i32 to vector<10x1x1xi32>
    %65 = arith.addi %64, %63 : vector<10x1x1xi32>
    %c0_i32_46 = arith.constant 0 : i32
    %66 = vector.broadcast %c0_i32_46 : i32 to vector<10x1x1xi32>
    %67 = arith.cmpi sge, %65, %66 : vector<10x1x1xi32>
    %c16_i32 = arith.constant 16 : i32
    %68 = vector.broadcast %c16_i32 : i32 to vector<10x1x1xi32>
    %69 = arith.cmpi slt, %65, %68 : vector<10x1x1xi32>
    %70 = arith.andi %67, %69 : vector<10x1x1xi1>
    %cst_47 = arith.constant 0.000000e+00 : f32
    %71 = vector.shape_cast %70 : vector<10x1x1xi1> to vector<10x1x1xi1>
    %72 = vector.broadcast %71 : vector<10x1x1xi1> to vector<10x16x128xi1>
    %73 = vector.broadcast %cst_47 : f32 to vector<10x16x128xf32>
    %74 = arith.select %72, %61, %73 : vector<10x16x128xi1>, vector<10x16x128xf32>
    %75 = arith.truncf %74 : vector<10x16x128xf32> to vector<10x16x128xbf16>
    %c0_48 = arith.constant 0 : index
    %c8 = arith.constant 8 : index
    %c0_49 = arith.constant 0 : index
    %76 = vector.load %arg10[%c0_48, %c8, %c0_49] : memref<10x32x128xbf16, #tpu.memory_space<vmem>>, vector<10x16x128xbf16>
    tpu.vector_store %arg10[%c0_48, %c8, %c0_49], %75 {strides = array<i32>} : memref<10x32x128xbf16, #tpu.memory_space<vmem>>, vector<10x16x128xbf16>,
    %cst_50 = arith.constant 0.000000e+00 : bf16
    %77 = vector.broadcast %cst_50 : bf16 to vector<10x1x128xbf16>
    %c0_51 = arith.constant 0 : index
    %c7 = arith.constant 7 : index
    %c0_52 = arith.constant 0 : index
    %78 = vector.load %arg10[%c0_51, %c7, %c0_52] : memref<10x32x128xbf16, #tpu.memory_space<vmem>>, vector<10x1x128xbf16>
    tpu.vector_store %arg10[%c0_51, %c7, %c0_52], %77 {strides = array<i32>} : memref<10x32x128xbf16, #tpu.memory_space<vmem>>, vector<10x1x128xbf16>,
    %c0_53 = arith.constant 0 : index
    %c24 = arith.constant 24 : index
    %c0_54 = arith.constant 0 : index
    %79 = vector.load %arg10[%c0_53, %c24, %c0_54] : memref<10x32x128xbf16, #tpu.memory_space<vmem>>, vector<10x1x128xbf16>
    tpu.vector_store %arg10[%c0_53, %c24, %c0_54], %77 {strides = array<i32>} : memref<10x32x128xbf16, #tpu.memory_space<vmem>>, vector<10x1x128xbf16>,
    %cst_55 = arith.constant 0.000000e+00 : f32
    %80 = vector.broadcast %cst_55 : f32 to vector<128x128xf32>
    %c0_56 = arith.constant 0 : index
    %c7_57 = arith.constant 7 : index
    %c0_58 = arith.constant 0 : index
    %81 = vector.load %arg10[%c0_56, %c7_57, %c0_58] : memref<10x32x128xbf16, #tpu.memory_space<vmem>>, vector<8x16x128xbf16>
    %c0_59 = arith.constant 0 : index
    %c8_60 = arith.constant 8 : index
    %c0_61 = arith.constant 0 : index
    %82 = vector.load %arg10[%c0_59, %c8_60, %c0_61] : memref<10x32x128xbf16, #tpu.memory_space<vmem>>, vector<8x16x128xbf16>
    %c0_62 = arith.constant 0 : index
    %c9 = arith.constant 9 : index
    %c0_63 = arith.constant 0 : index
    %83 = vector.load %arg10[%c0_62, %c9, %c0_63] : memref<10x32x128xbf16, #tpu.memory_space<vmem>>, vector<8x16x128xbf16>
    %84 = tpu.concatenate %81, %82, %83 in 2 : vector<8x16x128xbf16>, vector<8x16x128xbf16>, vector<8x16x128xbf16> -> vector<8x16x384xbf16>
    %85 = vector.shape_cast %84 : vector<8x16x384xbf16> to vector<128x384xbf16>
    %c0_64 = arith.constant 0 : index
    %c0_65 = arith.constant 0 : index
    %c0_66 = arith.constant 0 : index
    %86 = vector.load %arg4[%c0_64, %c0_65, %c0_66] : memref<3x384x128xbf16, #tpu.memory_space<vmem>>, vector<1x384x128xbf16>
    %87 = vector.shape_cast %86 : vector<1x384x128xbf16> to vector<384x128xbf16>
    %cst_67 = arith.constant dense<0.000000e+00> : vector<128x128xf32>
    %88 = tpu.matmul %85, %87, %cst_67 {dimension_numbers = #tpu.dot_dimension_numbers<[1], [0], [0], [1], [0, 0, 1, 1], [], []>} : vector<128x384xbf16>, vector<384x128xbf16>, vector<128x128xf32> -> vector<128x128xf32>
    %89 = arith.addf %80, %88 : vector<128x128xf32>
    %c1_68 = arith.constant 1 : index
    %c7_69 = arith.constant 7 : index
    %c0_70 = arith.constant 0 : index
    %90 = vector.load %arg10[%c1_68, %c7_69, %c0_70] : memref<10x32x128xbf16, #tpu.memory_space<vmem>>, vector<8x16x128xbf16>
    %c1_71 = arith.constant 1 : index
    %c8_72 = arith.constant 8 : index
    %c0_73 = arith.constant 0 : index
    %91 = vector.load %arg10[%c1_71, %c8_72, %c0_73] : memref<10x32x128xbf16, #tpu.memory_space<vmem>>, vector<8x16x128xbf16>
    %c1_74 = arith.constant 1 : index
    %c9_75 = arith.constant 9 : index
    %c0_76 = arith.constant 0 : index
    %92 = vector.load %arg10[%c1_74, %c9_75, %c0_76] : memref<10x32x128xbf16, #tpu.memory_space<vmem>>, vector<8x16x128xbf16>
    %93 = tpu.concatenate %90, %91, %92 in 2 : vector<8x16x128xbf16>, vector<8x16x128xbf16>, vector<8x16x128xbf16> -> vector<8x16x384xbf16>
    %94 = vector.shape_cast %93 : vector<8x16x384xbf16> to vector<128x384xbf16>
    %c1_77 = arith.constant 1 : index
    %c0_78 = arith.constant 0 : index
    %c0_79 = arith.constant 0 : index
    %95 = vector.load %arg4[%c1_77, %c0_78, %c0_79] : memref<3x384x128xbf16, #tpu.memory_space<vmem>>, vector<1x384x128xbf16>
    %96 = vector.shape_cast %95 : vector<1x384x128xbf16> to vector<384x128xbf16>
    %cst_80 = arith.constant dense<0.000000e+00> : vector<128x128xf32>
    %97 = tpu.matmul %94, %96, %cst_80 {dimension_numbers = #tpu.dot_dimension_numbers<[1], [0], [0], [1], [0, 0, 1, 1], [], []>} : vector<128x384xbf16>, vector<384x128xbf16>, vector<128x128xf32> -> vector<128x128xf32>
    %98 = arith.addf %89, %97 : vector<128x128xf32>
    %c2_81 = arith.constant 2 : index
    %c7_82 = arith.constant 7 : index
    %c0_83 = arith.constant 0 : index
    %99 = vector.load %arg10[%c2_81, %c7_82, %c0_83] : memref<10x32x128xbf16, #tpu.memory_space<vmem>>, vector<8x16x128xbf16>
    %c2_84 = arith.constant 2 : index
    %c8_85 = arith.constant 8 : index
    %c0_86 = arith.constant 0 : index
    %100 = vector.load %arg10[%c2_84, %c8_85, %c0_86] : memref<10x32x128xbf16, #tpu.memory_space<vmem>>, vector<8x16x128xbf16>
    %c2_87 = arith.constant 2 : index
    %c9_88 = arith.constant 9 : index
    %c0_89 = arith.constant 0 : index
    %101 = vector.load %arg10[%c2_87, %c9_88, %c0_89] : memref<10x32x128xbf16, #tpu.memory_space<vmem>>, vector<8x16x128xbf16>
    %102 = tpu.concatenate %99, %100, %101 in 2 : vector<8x16x128xbf16>, vector<8x16x128xbf16>, vector<8x16x128xbf16> -> vector<8x16x384xbf16>
    %103 = vector.shape_cast %102 : vector<8x16x384xbf16> to vector<128x384xbf16>
    %c2_90 = arith.constant 2 : index
    %c0_91 = arith.constant 0 : index
    %c0_92 = arith.constant 0 : index
    %104 = vector.load %arg4[%c2_90, %c0_91, %c0_92] : memref<3x384x128xbf16, #tpu.memory_space<vmem>>, vector<1x384x128xbf16>
    %105 = vector.shape_cast %104 : vector<1x384x128xbf16> to vector<384x128xbf16>
    %cst_93 = arith.constant dense<0.000000e+00> : vector<128x128xf32>
    %106 = tpu.matmul %103, %105, %cst_93 {dimension_numbers = #tpu.dot_dimension_numbers<[1], [0], [0], [1], [0, 0, 1, 1], [], []>} : vector<128x384xbf16>, vector<384x128xbf16>, vector<128x128xf32> -> vector<128x128xf32>
    %107 = arith.addf %98, %106 : vector<128x128xf32>
    %c1_i32_94 = arith.constant 1 : i32
    %108 = arith.addi %0, %c1_i32_94 : i32
    %c1_i32_95 = arith.constant 1 : i32
    %109 = arith.addi %108, %c1_i32_95 : i32
    %c0_96 = arith.constant 0 : index
    %110 = arith.index_cast %109 : i32 to index
    %c1_97 = arith.constant 1 : index
    %c0_98 = arith.constant 0 : index
    %111 = vector.load %arg2[%c0_96, %110, %c1_97, %c0_98] : memref<1x20x18x128xbf16, #tpu.memory_space<vmem>>, vector<1x8x16x128xbf16>
    %112 = vector.shape_cast %111 : vector<1x8x16x128xbf16> to vector<8x16x128xbf16>
    %113 = vector.shape_cast %112 : vector<8x16x128xbf16> to vector<128x128xbf16>
    %114 = arith.extf %113 : vector<128x128xbf16> to vector<128x128xf32>
    %c0_99 = arith.constant 0 : index
    %c0_100 = arith.constant 0 : index
    %115 = vector.load %arg7[%c0_99, %c0_100] : memref<1x128xf32, #tpu.memory_space<vmem>>, vector<1x128xf32>
    %116 = vector.broadcast %115 : vector<1x128xf32> to vector<128x128xf32>
    %117 = arith.addf %107, %116 : vector<128x128xf32>
    %118 = arith.addf %117, %114 : vector<128x128xf32>
    %cst_101 = arith.constant 0.000000e+00 : f32
    %119 = vector.broadcast %cst_101 : f32 to vector<128x128xf32>
    %120 = arith.maximumf %118, %119 : vector<128x128xf32>
    %121 = vector.shape_cast %120 : vector<128x128xf32> to vector<1x8x16x128xf32>
    %122 = arith.truncf %121 : vector<1x8x16x128xf32> to vector<1x8x16x128xbf16>
    %c0_102 = arith.constant 0 : index
    %c0_103 = arith.constant 0 : index
    %c0_104 = arith.constant 0 : index
    %c0_105 = arith.constant 0 : index
    %123 = vector.load %arg9[%c0_102, %c0_103, %c0_104, %c0_105] : memref<1x8x16x128xbf16, #tpu.memory_space<vmem>>, vector<1x8x16x128xbf16>
    tpu.vector_store %arg9[%c0_102, %c0_103, %c0_104, %c0_105], %122 {strides = array<i32>} : memref<1x8x16x128xbf16, #tpu.memory_space<vmem>>, vector<1x8x16x128xbf16>,
    return
  }
  func.func @transform_0(%arg0: i32, %arg1: i32) -> (i32, i32, i32, i32) {
    %c0_i32 = arith.constant 0 : i32
    %c0_i32_0 = arith.constant 0 : i32
    %c0_i32_1 = arith.constant 0 : i32
    %c0_i32_2 = arith.constant 0 : i32
    return %arg0, %c0_i32, %c0_i32_0, %c0_i32_1 : i32, i32, i32, i32
  }
  func.func @transform_1(%arg0: i32, %arg1: i32) -> (i32, i32, i32) {
    %c0_i32 = arith.constant 0 : i32
    %c0_i32_0 = arith.constant 0 : i32
    %c0_i32_1 = arith.constant 0 : i32
    %c0_i32_2 = arith.constant 0 : i32
    return %c0_i32, %c0_i32_0, %c0_i32_1 : i32, i32, i32
  }
  func.func @transform_2(%arg0: i32, %arg1: i32) -> (i32, i32, i32) {
    %c0_i32 = arith.constant 0 : i32
    %c0_i32_0 = arith.constant 0 : i32
    %c0_i32_1 = arith.constant 0 : i32
    %c0_i32_2 = arith.constant 0 : i32
    return %c0_i32, %c0_i32_0, %c0_i32_1 : i32, i32, i32
  }
  func.func @transform_3(%arg0: i32, %arg1: i32) -> (i32, i32) {
    %c0_i32 = arith.constant 0 : i32
    %c0_i32_0 = arith.constant 0 : i32
    %c0_i32_1 = arith.constant 0 : i32
    return %c0_i32, %c0_i32_0 : i32, i32
  }
  func.func @transform_4(%arg0: i32, %arg1: i32) -> (i32, i32) {
    %c0_i32 = arith.constant 0 : i32
    %c0_i32_0 = arith.constant 0 : i32
    %c0_i32_1 = arith.constant 0 : i32
    return %c0_i32, %c0_i32_0 : i32, i32
  }
  func.func @transform_5(%arg0: i32, %arg1: i32) -> (i32, i32) {
    %c0_i32 = arith.constant 0 : i32
    %c0_i32_0 = arith.constant 0 : i32
    %c0_i32_1 = arith.constant 0 : i32
    return %c0_i32, %c0_i32_0 : i32, i32
  }
  func.func @transform_6(%arg0: i32, %arg1: i32) -> (i32, i32) {
    %c0_i32 = arith.constant 0 : i32
    %c0_i32_0 = arith.constant 0 : i32
    %c0_i32_1 = arith.constant 0 : i32
    return %c0_i32, %c0_i32_0 : i32, i32
  }
  func.func @transform_7(%arg0: i32, %arg1: i32) -> (i32, i32, i32, i32) {
    %c0_i32 = arith.constant 0 : i32
    %c0_i32_0 = arith.constant 0 : i32
    %c0_i32_1 = arith.constant 0 : i32
    return %arg0, %arg1, %c0_i32, %c0_i32_0 : i32, i32, i32, i32
  }
}

</mosaic_0001>

<bundles_post_ra>
// kernel: tpu_custom_call.1
= control target key start
LH: loop header
LB: loop body
LE: loop exit
PB: predicated region body
PF: predicated region fallthrough
CT: control target
= control target key end

     0   :  { %s9424_s0 = inlined_call_operand.vmem [shape: bf16[2,20,18,128], index: 0, kind: input, shape index: {}]   ;;  %s9425_s1 = inlined_call_operand.vmem [shape: bf16[3,384,128], index: 1, kind: input, shape index: {}]   ;;  %s9426_s2 = inlined_call_operand.hbm [shape: bf16[3,384,128], index: 2, kind: input, shape index: {}]   ;;  %s9427_s3 = inlined_call_operand.vmem [shape: bf16[128,128], index: 3, kind: input, shape index: {}]   ;;  %s9428_s4 = inlined_call_operand.vmem [shape: f32[1,128], index: 4, kind: input, shape index: {}]   ;;  %s9429_s5 = inlined_call_operand.vmem [shape: f32[1,128], index: 5, kind: input, shape index: {}]   ;;  %s9430_s6 = inlined_call_operand.vmem [shape: f32[1,128], index: 6, kind: input, shape index: {}]   ;;  %s9431_s7 = inlined_call_operand.hbm [shape: bf16[2,16,16,128], index: 7, kind: output, shape index: {}]  }
   0x1   :  { %9432 = sst [smem:[#allocation21_spill]] %s9426_s2 }
   0x2   :  { %12 = vsyncpa [#allocation4], 0 }
   0x3   :  { %13 = vsyncpa [#allocation5], 0 }
   0x4   :  { %15 = vsyncpa [#allocation5 + $0x1], 0  ;;  %s7475_s24 = smov 0   ;;  %s7477_s25 = smov 0  }
   0x5   :  { %s7479_s3 = smov 0   ;;  %s7481_s26 = smov 0  }
   0x6   :  { %s7483_s27 = smov 0   ;;  %s7485_s28 = smov 0  }
   0x7   :  { %s7487_s29 = smov 0   ;;  %s7489_s6 = smov 0  }
   0x8 LB: > { %s5917_s30 = sadd.s32 4294967295, %s7428_s6   ;;  %s5918_s8 = sadd.s32 4294967294, %s7428_s6   ;;  %s7428_s6 = sphi %s7489_s6, %s21_s6   ;;  %s7424_s29 = sphi %s7487_s29, %s9494_s29   ;;  %s7420_s28 = sphi %s7485_s28, %s9493_s28   ;;  %s7416_s27 = sphi %s7483_s27, %s9492_s27   ;;  %s7412_s26 = sphi %s7481_s26, %s9491_s26   ;;  %s7408_s3 = sphi %s7479_s3, %s9490_s3   ;;  %s7404_s25 = sphi %s7477_s25, %s9489_s25   ;;  %s7400_s24 = sphi %s7475_s24, %s9488_s24  }
   0x9   : > { %s30_s9 = sadd.s32 1, %s7420_s28  ;;  %s33_s10 = sadd.s32 1, %s7424_s29 }
   0xa   : > { %p31_p0 = scmp.ge.s32.totalorder %s30_s9, 2  ;;  %s194_s11 = sadd.s32 1, %s7408_s3 }
   0xb   : > { %p204_p1 = scmp.ne.s32.totalorder %s7408_s3, %s7404_s25  ;;  %p205_p2 = scmp.eq.s32.totalorder %s5917_s30, 3 }
   0xc   : > { %s9496_s9 = smov (%p31_p0, %s30_s9), 0  ;;  %s9498_s10 = smov (!%p31_p0, %s33_s10), %s7424_s29 }
   0xd   : > { %s190_s12 = ssub.s32 %s7420_s28, %s9496_s9  ;;  %p7527_p3 = por %p205_p2, %p204_p1 }
   0xe   : > { %p35_p4 = scmp.ge.s32.totalorder %s9498_s10, 2  ;;  %p210_p5 = scmp.ne.s32.totalorder %s7404_s25, %s7400_s24 }
   0xf   : > { %p211_p6 = scmp.eq.s32.totalorder %s5918_s8, 3  ;;  %p5919_p7 = scmp.ge.s32.totalorder %s7428_s6, 1 }
  0x10   : > { %s9500_s10 = smov (%p35_p4, %s9498_s10), 0  ;;  %p218_p9 = scmp.lt.s32.totalorder %s7428_s6, 5 }
  0x11   : > { %p7536_p8 = por %p211_p6, %p210_p5  ;;  %s189_s15 = ssub.s32 %s7424_s29, %s9500_s10 }
  0x12   : > { %s191_s16 = sor.u32 %s190_s12, %s189_s15  ;;  %p7543_p10 = pnand %p5919_p7, %p218_p9 }
  0x13   : > { %p192_p11 = scmp.eq.s32.totalorder %s191_s16, 0  ;;  %p7547_p12 = scmp.eq.s32.totalorder %s5917_s30, 0 }
  0x14   : > { %p7052_p13 = pneg %p7543_p10  ;;  %s9437_s2 = sld [smem:[#allocation21_spill]] }
  0x15   : > { %s7557_s22 = scalar_select %p192_p11, %s7408_s3, %s194_s11  }
  0x16   : > { %s7430_s23 = smov [#allocation3]   ;;  %p7053_p0 = pnand %p7547_p12, %p7052_p13 }
  0x17   : > { %s234_s8 = sshll.u32 %s7430_s23, 4  ;;  %s7431_s12 = smov 64   ;;  %s235_s8 = int_to_ptr.vmem [resolvable:$true] %s234_s8 }
  0x18   : > { %s7432_s30 = smov 4   ;;  %270 = sbr.rel (%p7543_p10) target bundleno = 1158 (0x486), region = 48 }
  0x1a   : > { %s232_s21 = sshll.u32 %s9437_s2, 4  ;;  %s233_s21 = int_to_ptr.hbm [resolvable:$true] %s232_s21 }
  0x1b   : > { %7055 = dma.hbm_to_vmem [thread:$0]  (!%p7053_p0), %s233_s21, 9216, %s235_s8, [#allocation4], %s7431_s12, %s7431_s12, %s7432_s30  }
  0x1d   : > { %7337 = dma.done.wait (%p7547_p12), [#allocation4], 9216  }
  0x1e   : > { %7339 = vsyncadd (%p7547_p12), [#allocation4], 4294958080  ;;  %p303_p1 = scmp.lt.s32.totalorder %s7416_s27, 1  ;;  %v6749_v0 = vld [vmem:[%s9425_s1 + $0xf8] sm:$0xff]  ;;  %s6717_s17 = smul.u32 96, %s7412_s26  ;;  %v6748_v2 = vld [vmem:[%s9425_s1 + $0xf0] sm:$0xff] }
  0x1f   : > { %v6757_v1 = vld [vmem:[%s9425_s1 + $0x138] sm:$0xff]  ;;  %1221 = vmatpush.bf16.msra.mxu0 %v6749_v0  ;;  %v6756_v3 = vld [vmem:[%s9425_s1 + $0x130] sm:$0xff]  ;;  %v6747_v4 = vld [vmem:[%s9425_s1 + $0xe8] sm:$0xff]  ;;  %vm444_vm0 = vsmask.f32 7424  ;;  %vm605_vm1 = vcmask 1046528  }
  0x20   : > { %s304_s11 = scalar_select %p303_p1, %s7416_s27, 1  ;;  %1280 = vmatpush.bf16.msra.mxu1 %v6757_v1  ;;  %7029 = vmatpush.bf16.msra.mxu3 %v6757_v1  ;;  %v6755_v5 = vld [vmem:[%s9425_s1 + $0x128] sm:$0xff]  ;;  %v7596_v6 = vld [vmem:[%s9425_s1 + $0x178] sm:$0xff]  ;;  %v6746_v9 = vld [vmem:[%s9425_s1 + $0xe0] sm:$0xff]  ;;  %vm2608_vm2 = vcmask 1043459   ;;  %vm2641_vm4 = vcmask 1040384  }
  0x21   : > { %7037 = vmatpush.bf16.msra.mxu2 %v7596_v6  ;;  %v6754_v10 = vld [vmem:[%s9425_s1 + $0x120] sm:$0xff]  ;;  %v6745_v13 = vld [vmem:[%s9425_s1 + $0xd8] sm:$0xff]  ;;  %v6764_v18 = vld [vmem:[%s9425_s1 + $0x170] sm:$0xff]  ;;  %s5926_s23 = sshll.u32 %s7412_s26, 3  ;;  %vm2609_vm3 = vsmask.f32 7950 }
  0x22   : > { %s7045_s15 = smul.u32 240, %s304_s11  ;;  %v6753_v14 = vld [vmem:[%s9425_s1 + $0x118] sm:$0xff]  ;;  %v6744_v19 = vld [vmem:[%s9425_s1 + $0xd0] sm:$0xff]  ;;  %v7640_v25 = vld [vmem:[%s9425_s1 + $0x168] sm:$0xff]  ;;  %s6397_s2 = sadd.s32 4294967295, %s5926_s23 }
  0x23   : > { %1222 = vmatpush.bf16.msra.mxu0 %v6748_v2  ;;  %v6752_v20 = vld [vmem:[%s9425_s1 + $0x110] sm:$0xff]  ;;  %v6743_v26 = vld [vmem:[%s9425_s1 + $0xc8] sm:$0xff]  ;;  %v7656_v34 = vld [vmem:[%s9425_s1 + $0x160] sm:$0xff]  ;;  %vm2642_vm5 = vsmask.f32 256  ;;  %s6713_s21 = sshll.u32 %s7416_s27, 5 }
  0x24   : > { %s307_s18 = scalar_lea.vmem %s9424_s0, %s7045_s15  ;;  %1281 = vmatpush.bf16.msra.mxu1 %v6756_v3  ;;  %7030 = vmatpush.bf16.msra.mxu3 %v6756_v3  ;;  %v6751_v27 = vld [vmem:[%s9425_s1 + $0x108] sm:$0xff]  ;;  %v6742_v37 = vld [vmem:[%s9425_s1 + $0xc0] sm:$0xff]  ;;  %v6725_v45 = vld [vmem:[%s9425_s1 + $0x38] sm:$0xff]  ;;  %s300_s15 = sand.u32 1, %s7404_s25  }
  0x25   : > { %s7585_s16 = scalar_lea.vmem %s307_s18, %s6717_s17  ;;  %7038 = vmatpush.bf16.msra.mxu2 %v6764_v18  ;;  %v6750_v38 = vld [vmem:[%s9425_s1 + $0x100] sm:$0xff]  ;;  %v7681_v46 = vld [vmem:[%s9425_s1 + $0x158] sm:$0xff]  ;;  %v6724_v52 = vld [vmem:[%s9425_s1 + $0x30] sm:$0xff]  ;;  %s5924_s19 = sshll.u32 %s300_s15, 6 }
  0x26   : > { %v7599_v7 = vld [vmem:[%s7585_s16 + $0xc] sm:$0xff]   ;;  %v5951_v11 = vld [vmem:[%s7585_s16 + $0x14] sm:$0x1]  ;;  %v5958_v12 = vld [vmem:[%s7585_s16 + $0x68] sm:$0x1]  ;;  %s9292_s20 = scalar_lea.vmem [#allocation6], %s5924_s19 }
  0x27   : > { %v7602_v8 = vld [vmem:[%s7585_s16 + $0xc] sm:$0xf0]  ;;  %1223 = vmatpush.bf16.msra.mxu0 %v6747_v4  ;;  %v808_v15 = vunpack.c.l.b16 %v5951_v11  ;;  %v815_v16 = vunpack.c.l.b16 %v5958_v12  ;;  %v7620_v17 = vld [vmem:[%s7585_s16 + $0x60] sm:$0xff]   ;;  %v831_v22 = vshll.u32 %v7599_v7, 16  ;;  %v829_v28 = vshrl.u32 %v7599_v7, 16  ;;  %v7688_v50 = vld [vmem:[%s7585_s16 + $0x18] sm:$0xff]  }
  0x28   : > { %1282 = vmatpush.bf16.msra.mxu1 %v6755_v5  ;;  %7031 = vmatpush.bf16.msra.mxu3 %v6755_v5  ;;  %v915_v24 = vshll.u32 %v7620_v17, 16  ;;  %v913_v31 = vshrl.u32 %v7620_v17, 16  ;;  %v7659_v35 = vld [vmem:[%s7585_s16 + $0x6c] sm:$0xff]   ;;  %v5952_v43 = vld [vmem:[%s7585_s16 + $0x20] sm:$0x1]  ;;  %v843_v54 = vshll.u32 %v7688_v50, 16  ;;  %vm8489_vm6 = vmand %vm2608_vm2, %vm2609_vm3 }
  0x29   : > { %v7631_v21 = vpack.c.b16 %v808_v15, %v808_v15  ;;  %v7634_v23 = vpack.c.b16 %v815_v16, %v815_v16  ;;  %v833_v29 = vrot.slane %v831_v22, 1  ;;  %7039 = vmatpush.bf16.msra.mxu2 %v7640_v25  ;;  %v7662_v36 = vld [vmem:[%s7585_s16 + $0x6c] sm:$0xf0]  ;;  %v5959_v44 = vld [vmem:[%s7585_s16 + $0x74] sm:$0x1]  ;;  %v809_v48 = vunpack.c.l.b16 %v5952_v43  ;;  %v6723_v60 = vld [vmem:[%s9425_s1 + $0x28] sm:$0xff] }
  0x2a   : > { %v917_v32 = vrot.slane %v915_v24, 1  ;;  %v816_v51 = vunpack.c.l.b16 %v5959_v44  ;;  %v7698_v53 = vld [vmem:[%s9425_s1 + $0x150] sm:$0xff]  ;;  %v927_v57 = vshll.u32 %v7659_v35, 16  ;;  %v5954_v59 = vld [vmem:[%s7585_s16 + $0x38] sm:$0x1]  ;;  %v7715_v61 = vld [vmem:[%s9425_s1 + $0x148] sm:$0xff] }
  0x2b   : > { %1224 = vmatpush.bf16.msra.mxu0 %v6746_v9  ;;  %v836_v30 = vshll.u32 %v7631_v21, 16  ;;  %v920_v33 = vshll.u32 %v7634_v23, 16  ;;  %v834_v39 = vor.u32 %v833_v29, %v829_v28  ;;  %v7701_v55 = vpack.c.b16 %v809_v48, %v809_v48  ;;  %v6990_v58 = vld [vmem:[%s7585_s16 + $0x30] sm:$0xf0]  ;;  %v6991_v62 = vld [vmem:[%s7585_s16 + $0x30] sm:$0xe]  ;;  %vm8495_vm9 = vmand %vm2641_vm4, %vm2642_vm5 }
  0x2c   : > { %1283 = vmatpush.bf16.msra.mxu1 %v6754_v10  ;;  %7032 = vmatpush.bf16.msra.mxu3 %v6754_v10  ;;  %v7670_v41 = vor.u32 %v917_v32, %v913_v31  ;;  %v7703_v56 = vpack.c.b16 %v816_v51, %v816_v51  ;;  %v811_v63 = vunpack.c.l.b16 %v5954_v59  ;;  %v6992_v0 = vor.u32 %v6991_v62, %v6990_v58  ;;  %v7725_v9 = vld [vmem:[%s7585_s16 + $0x24] sm:$0xff]   ;;  %v5960_v22 = vld [vmem:[%s7585_s16 + $0x80] sm:$0x1]  ;;  %v6721_v24 = vld [vmem:[%s9425_s1 + $0x18] sm:$0xff]  ;;  %s5816_s8 = sshll.u32 %s9292_s20, 4  ;;  %s5801_s12 = scalar_lea.sflag [#allocation5], %s300_s15  ;;  %s5817_s8 = int_to_ptr.vmem [resolvable:$true] %s5816_s8 }
  0x2d   : > { %v838_v40 = vrot.slane %v836_v30, 1  ;;  %v922_v42 = vrot.slane %v920_v33, 1  ;;  %7040 = vmatpush.bf16.msra.mxu2 %v7656_v34  ;;  %v841_v1 = vshrl.u32 %v7688_v50, 16  ;;  %v845_v2 = vrot.slane %v843_v54, 1  ;;  %v7728_v10 = vld [vmem:[%s7585_s16 + $0x24] sm:$0xf0] }
  0x2e   : > { %v848_v3 = vshll.u32 %v7701_v55, 16  ;;  %v7720_v4 = vpack.c.b16 %v811_v63, %v811_v63  ;;  %v925_v5 = vshrl.u32 %v7659_v35, 16  ;;  %v6722_v11 = vld [vmem:[%s9425_s1 + $0x20] sm:$0xff]  ;;  %v817_v29 = vunpack.c.l.b16 %v5960_v22  ;;  %v7753_v30 = vld [vmem:[%s7585_s16 + $0x78] sm:$0xff]   ;;  %v6720_v31 = vld [vmem:[%s9425_s1 + $0x10] sm:$0xff] }
  0x2f   : > { %1225 = vmatpush.bf16.msra.mxu0 %v6745_v13  ;;  %v839_v47 = vsel %vm444_vm0, %v834_v39, %v838_v40  ;;  %v923_v49 = vsel %vm444_vm0, %v7670_v41, %v922_v42  ;;  %v6758_v12 = vld [vmem:[%s9425_s1 + $0x140] sm:$0xff]  ;;  %v997_v13 = vrot.slane %v6992_v0, 1  ;;  %v7739_v15 = vor.u32 %v845_v2, %v841_v1  ;;  %v7345_v42 = vld [vmem:[%s7585_s16 + $0x3c] sm:$0xe]  ;;  %v6719_v44 = vld [vmem:[%s9425_s1 + $0x8] sm:$0xff] }
  0x30   : > { %1284 = vmatpush.bf16.msra.mxu1 %v6753_v14  ;;  %7033 = vmatpush.bf16.msra.mxu3 %v6753_v14  ;;  %v998_v14 = vrot.slane %v7720_v4, 1  ;;  %v850_v16 = vrot.slane %v848_v3, 1  ;;  %v855_v33 = vshll.u32 %v7725_v9, 16  ;;  %v7767_v39 = vpack.c.b16 %v817_v29, %v817_v29  ;;  %v7790_v2 = vld [vmem:[%s7585_s16 + $0x30] sm:$0xff]   ;;  %v5957_v29 = vld [vmem:[%s7585_s16 + $0x5c] sm:$0x1] }
  0x31   : > { %7041 = vmatpush.bf16.msra.mxu2 %v7681_v46  ;;  %v939_v40 = vshll.u32 %v7753_v30, 16  ;;  %v937_v51 = vshrl.u32 %v7753_v30, 16  ;;  %v867_v3 = vshll.u32 %v7790_v2, 16  ;;  %vm2891_vm4 = vsmask.f32 4352 }
  0x32   : > { %v944_v54 = vshll.u32 %v7767_v39, 16 }
  0x33   : > { %1226 = vmatpush.bf16.msra.mxu0 %v6744_v19 }
  0x34   : > { %1285 = vmatpush.bf16.msra.mxu1 %v6752_v20  ;;  %7034 = vmatpush.bf16.msra.mxu3 %v6752_v20  ;;  %v5953_v20 = vld [vmem:[%s7585_s16 + $0x2c] sm:$0x1]  ;;  %v946_v63 = vrot.slane %v944_v54, 1 }
  0x35   : > { %7042 = vmatpush.bf16.msra.mxu2 %v7698_v53 }
  0x37   : > { %1227 = vmatpush.bf16.msra.mxu0 %v6743_v26  ;;  %v851_v26 = vsel %vm444_vm0, %v7739_v15, %v850_v16  ;;  %v869_v16 = vrot.slane %v867_v3, 1 }
  0x38   : > { %1286 = vmatpush.bf16.msra.mxu1 %v6751_v27  ;;  %7035 = vmatpush.bf16.msra.mxu3 %v6751_v27  ;;  %v810_v27 = vunpack.c.l.b16 %v5953_v20 }
  0x39   : > { %7043 = vmatpush.bf16.msra.mxu2 %v7715_v61 }
  0x3a   : > { %v7759_v32 = vpack.c.b16 %v810_v27, %v810_v27  ;;  %v5944_v27 = vld [vmem:[%s7585_s16 + $0x54] sm:$0xff]  }
  0x3b   : > { %1228 = vmatpush.bf16.msra.mxu0 %v6742_v37  ;;  %v7344_v37 = vld [vmem:[%s7585_s16 + $0x3c] sm:$0xf0] }
  0x3c   : > { %1287 = vmatpush.bf16.msra.mxu1 %v6750_v38  ;;  %7036 = vmatpush.bf16.msra.mxu3 %v6750_v38  ;;  %v5955_v38 = vld [vmem:[%s7585_s16 + $0x44] sm:$0x1]  ;;  %v860_v48 = vshll.u32 %v7759_v32, 16 }
  0x3d   : > { %7044 = vmatpush.bf16.msra.mxu2 %v6758_v12  ;;  %v812_v43 = vunpack.c.l.b16 %v5955_v38 }
  0x3e   : > { %1229 = vmatmul.bf16.vlgmr.msra.gmra.mxu0 %v7599_v7  ;;  %v932_v7 = vshll.u32 %v7703_v56, 16 }
  0x3f   : > { %1339 = vmatpush.bf16.msrb.mxu0 %v7596_v6  ;;  %1288 = vmatmul.bf16.vlgmr.msra.gmra.mxu1 %v839_v47  ;;  %v929_v6 = vrot.slane %v927_v57, 1  ;;  %v857_v47 = vrot.slane %v855_v33, 1  ;;  %v814_v33 = vunpack.c.l.b16 %v5957_v29  ;;  %v1016_v29 = vrot.slane %v7767_v39, 1  ;;  %v6733_v39 = vld [vmem:[%s9425_s1 + $0x78] sm:$0xff] }
  0x40   : > { %1542 = vmatpush.bf16.msrb.mxu3 %v6725_v45  ;;  %v934_v19 = vrot.slane %v932_v7, 1  ;;  %v7775_v45 = vpack.c.b16 %v812_v43, %v812_v43  ;;  %v6994_v7 = vld [vmem:[%s7585_s16 + $0x48] sm:$0xe] }
  0x41   : > { %1323 = vmatmul.bf16.vlgmr.msra.gmra.mxu3 %v923_v49  ;;  %v7346_v49 = vor.u32 %v7345_v42, %v7344_v37  ;;  %v824_v37 = vpack.c.b16 %v814_v33, %v814_v33  ;;  %v7863_v33 = vld [vmem:[%s7585_s16 + $0x3c] sm:$0xf0] }
  0x42   : > { %v1001_v58 = vrot.slane %v7775_v45, 1  ;;  %v884_v43 = vshll.u32 %v7775_v45, 16 }
  0x43   : > { %1340 = vmatpush.bf16.msrb.mxu0 %v6764_v18  ;;  %v930_v18 = vor.u32 %v929_v6, %v925_v5  ;;  %v1000_v57 = vrot.slane %v7346_v49, 1  ;;  %v6993_v5 = vld [vmem:[%s7585_s16 + $0x48] sm:$0xf0]  ;;  %v5956_v6 = vld [vmem:[%s7585_s16 + $0x50] sm:$0x1] }
  0x44   : > { %1543 = vmatpush.bf16.msrb.mxu3 %v6724_v52  ;;  %v941_v52 = vrot.slane %v939_v40, 1 }
  0x45   : > { %v935_v28 = vsel %vm444_vm0, %v930_v18, %v934_v19  ;;  %v1002_v0 = vsel %vm605_vm1, %v1000_v57, %v1001_v58  ;;  %v872_v18 = vshll.u32 %v7720_v4, 16  ;;  %v6996_v57 = vld [vmem:[%s7585_s16 + $0x60] sm:$0xf0]  ;;  %v6997_v58 = vld [vmem:[%s7585_s16 + $0x60] sm:$0xe] }
  0x46   : > { %v942_v62 = vor.u32 %v941_v52, %v937_v51  ;;  %v886_v51 = vrot.slane %v884_v43, 1  ;;  %v6732_v43 = vld [vmem:[%s9425_s1 + $0x70] sm:$0xff] }
  0x47   : > { %1341 = vmatpush.bf16.msrb.mxu0 %v7640_v25  ;;  %v999_v25 = vsel %vm605_vm1, %v997_v13, %v998_v14  ;;  %v865_v14 = vshrl.u32 %v7790_v2, 16  ;;  %v874_v22 = vrot.slane %v872_v18, 1 }
  0x48   : > { %1544 = vmatpush.bf16.msrb.mxu3 %v6723_v60  ;;  %1362 = vmatmul.bf16.vlgmr.msra.gmra.mxu2 %v999_v25  ;;  %v862_v60 = vrot.slane %v860_v48, 1  ;;  %v947_v1 = vsel %vm444_vm0, %v942_v62, %v946_v63  ;;  %v1007_v48 = vrot.slane %v824_v37, 1 }
  0x49   : > { %v7799_v20 = vor.u32 %v869_v16, %v865_v14  ;;  %v7844_v14 = vld [vmem:[%s7585_s16 + $0x24] sm:$0xff]  }
  0x4a   : > { %v7847_v16 = vld [vmem:[%s7585_s16 + $0x24] sm:$0xf0] }
  0x4b   : > { %1342 = vmatpush.bf16.msrb.mxu0 %v7656_v34  ;;  %v7763_v34 = vld [vmem:[%s7585_s16 + $0x3c] sm:$0xff]   ;;  %v875_v25 = vsel %vm444_vm0, %v7799_v20, %v874_v22 }
  0x4c   : > { %1545 = vmatpush.bf16.msrb.mxu3 %v6722_v11  ;;  %v813_v11 = vunpack.c.l.b16 %v5956_v6  ;;  %v879_v4 = vshll.u32 %v7763_v34, 16  ;;  %v877_v40 = vshrl.u32 %v7763_v34, 16  ;;  %v903_v6 = vshll.u32 %v5944_v27, 16 }
  0x4e   : > { %1234 = vmatmul.bf16.gmra.mxu0 %v7688_v50  ;;  %v823_v13 = vpack.c.b16 %v813_v11, %v813_v11  ;;  %v881_v42 = vrot.slane %v879_v4, 1 }
  0x4f   : > { %1343 = vmatpush.bf16.msrb.mxu0 %v7681_v46  ;;  %1293 = vmatmul.bf16.gmra.mxu1 %v851_v26  ;;  %v853_v46 = vshrl.u32 %v7725_v9, 16  ;;  %v7805_v26 = vld [vmem:[%s7585_s16] sm:$0xff]  }
  0x50   : > { %1546 = vmatpush.bf16.msrb.mxu3 %v6721_v24  ;;  %v1004_v19 = vrot.slane %v823_v13, 1  ;;  %v882_v49 = vor.u32 %v881_v42, %v877_v40  ;;  %v896_v63 = vshll.u32 %v823_v13, 16  ;;  %v908_v13 = vshll.u32 %v824_v37, 16 }
  0x51   : > { %1328 = vmatmul.bf16.gmra.mxu3 %v935_v28  ;;  %v858_v59 = vor.u32 %v857_v47, %v853_v46  ;;  %v7347_v28 = vld [vmem:[%s7585_s16 + $0x54] sm:$0xf0]  ;;  %v7820_v46 = vld [vmem:[%s7585_s16 + $0xc] sm:$0xf0] }
  0x52   : > { %v887_v54 = vsel %vm444_vm0, %v882_v49, %v886_v51  ;;  %v910_v22 = vrot.slane %v908_v13, 1  ;;  %v6987_v13 = vld [vmem:[%s7585_s16 + $0x18] sm:$0xf0] }
  0x53   : > { %1344 = vmatpush.bf16.msrb.mxu0 %v7698_v53  ;;  %v6718_v53 = vld [vmem:[%s9425_s1] sm:$0xff] }
  0x54   : > { %1547 = vmatpush.bf16.msrb.mxu3 %v6720_v31  ;;  %v7348_v31 = vld [vmem:[%s7585_s16 + $0x54] sm:$0xe] }
  0x55   : > { %v7349_v38 = vor.u32 %v7348_v31, %v7347_v28  ;;  %v7860_v31 = vld [vmem:[%s7585_s16 + $0x3c] sm:$0xff]  }
  0x57   : > { %1345 = vmatpush.bf16.msrb.mxu0 %v7715_v61  ;;  %v863_v61 = vsel %vm444_vm0, %v858_v59, %v862_v60  ;;  %v1006_v47 = vrot.slane %v7349_v38, 1  ;;  %v6998_v59 = vor.u32 %v6997_v58, %v6996_v57 }
  0x58   : > { %1548 = vmatpush.bf16.msrb.mxu3 %v6719_v44  ;;  %1367 = vmatmul.bf16.gmra.mxu2 %v1002_v0  ;;  %v7817_v44 = vld [vmem:[%s7585_s16 + $0xc] sm:$0xff]  }
  0x59   : > { %v1008_v52 = vsel %vm605_vm1, %v1006_v47, %v1007_v48  ;;  %v1009_v0 = vrot.slane %v6998_v59, 1 }
  0x5b   : > { %1346 = vmatpush.bf16.msrb.mxu0 %v6758_v12  ;;  %v6995_v12 = vor.u32 %v6994_v7, %v6993_v5  ;;  %v7136_v7 = vld [vmem:[%s7585_s16 + $0x6c] sm:$0xe] }
  0x5c   : > { %1549 = vmatpush.bf16.msrb.mxu3 %v6718_v53  ;;  %v7825_v53 = vld [vmem:[%s7585_s16 + $0x48] sm:$0xff]   ;;  %v7137_v11 = vor.u32 %v7136_v7, %v7662_v36 }
  0x5d   : > { %v891_v45 = vshll.u32 %v7825_v53, 16  ;;  %v889_v60 = vshrl.u32 %v7825_v53, 16 }
  0x5e   : > { %1239 = vmatmul.bf16.gmra.mxu0 %v7725_v9  ;;  %v1003_v9 = vrot.slane %v6995_v12, 1  ;;  %v905_v12 = vrot.slane %v903_v6, 1  ;;  %v1012_v18 = vrot.slane %v7137_v11, 1 }
  0x5f   : > { %1298 = vmatmul.bf16.gmra.mxu1 %v863_v61  ;;  %v893_v62 = vrot.slane %v891_v45, 1  ;;  %v1010_v61 = vrot.slane %v7634_v23, 1  ;;  %v901_v23 = vshrl.u32 %v5944_v27, 16  ;;  %1601 = vmatpush.bf16.msra.mxu0 %v6733_v39  ;;  %v6741_v45 = vld [vmem:[%s9425_s1 + $0xb8] sm:$0xff]  ;;  %v6735_v39 = vld [vmem:[%s9425_s1 + $0x88] sm:$0xff] }
  0x60   : > { %v1005_v24 = vsel %vm605_vm1, %v1003_v9, %v1004_v19  ;;  %v1013_v9 = vrot.slane %v7703_v56, 1  ;;  %1660 = vmatpush.bf16.msrb.mxu1 %v6741_v45  ;;  %v6968_v45 = vld [vmem:[%s7585_s16] sm:$0xe] }
  0x61   : > { %1333 = vmatmul.bf16.gmra.mxu3 %v947_v1  ;;  %v7834_v1 = vor.u32 %v893_v62, %v889_v60  ;;  %v1011_v3 = vsel %vm605_vm1, %v1009_v0, %v1010_v61  ;;  %v906_v19 = vor.u32 %v905_v12, %v901_v23  ;;  %v7908_v62 = vld [vmem:[%s7585_s16 + $0x54] sm:$0xf0]  ;;  %v6738_v12 = vld [vmem:[%s9425_s1 + $0xa0] sm:$0xff] }
  0x62   : > { %v6729_v0 = vld [vmem:[%s9425_s1 + $0x58] sm:$0xff] }
  0x63   : > { %v911_v36 = vsel %vm444_vm0, %v906_v19, %v910_v22  ;;  %1602 = vmatpush.bf16.msra.mxu0 %v6732_v43  ;;  %v6727_v22 = vld [vmem:[%s9425_s1 + $0x48] sm:$0xff] }
  0x68   : > { %1372 = vmatmul.bf16.gmra.mxu2 %v1005_v24  ;;  %v6999_v24 = vld [vmem:[%s7585_s16 + $0x78] sm:$0xf0] }
  0x6e   : > { %1244 = vmatmul.bf16.gmra.mxu0 %v7790_v2 }
  0x6f   : > { %1303 = vmatmul.bf16.gmra.mxu1 %v875_v25  ;;  %v7000_v25 = vld [vmem:[%s7585_s16 + $0x78] sm:$0xe] }
  0x70   : > { %v7001_v4 = vor.u32 %v7000_v25, %v6999_v24  ;;  %v6736_v25 = vld [vmem:[%s9425_s1 + $0x90] sm:$0xff] }
  0x71   : > { %1550 = vmatmul.bf16.vlgmr.msrb.gmra.mxu3 %v7805_v26 }
  0x72   : > { %v1015_v28 = vrot.slane %v7001_v4, 1  ;;  %v334_v4 = vld [vmem:[%s7585_s16 + $0x8] sm:$0x1] }
  0x73   : > { %v424_v43 = vunpack.c.l.b16 %v334_v4 }
  0x74   : > { %v1017_v56 = vsel %vm605_vm1, %v1015_v28, %v1016_v29  ;;  %v6781_v29 = vld [vmem:[%s9425_s1 + $0x1f8] sm:$0xff] }
  0x75   : > { %2305 = vmatpush.bf16.msra.mxu3 %v6781_v29  ;;  %v7145_v29 = vld [vmem:[%s7585_s16 + $0xc] sm:$0xe] }
  0x78   : > { %1377 = vmatmul.bf16.gmra.mxu2 %v1008_v52  ;;  %v7139_v52 = vld [vmem:[%s7585_s16 + $0xc] sm:$0xe] }
  0x7e   : > { %1249 = vmatmul.bf16.gmra.mxu0 %v7763_v34  ;;  %v898_v34 = vrot.slane %v896_v63, 1  ;;  %v6740_v63 = vld [vmem:[%s9425_s1 + $0xb0] sm:$0xff] }
  0x7f   : > { %1308 = vmatmul.bf16.gmra.mxu1 %v887_v54  ;;  %v6730_v54 = vld [vmem:[%s9425_s1 + $0x60] sm:$0xff] }
  0x80   : > { %v899_v5 = vsel %vm444_vm0, %v7834_v1, %v898_v34  ;;  %1661 = vmatpush.bf16.msrb.mxu1 %v6740_v63  ;;  %v989_v34 = vrot.slane %v7631_v21, 1  ;;  %v6728_v21 = vld [vmem:[%s9425_s1 + $0x50] sm:$0xff]  ;;  %v7142_v63 = vld [vmem:[%s7585_s16 + $0x24] sm:$0xe] }
  0x81   : > { %1555 = vmatmul.bf16.gmra.mxu3 %v7817_v44 }
  0x88   : > { %1382 = vmatmul.bf16.gmra.mxu2 %v1011_v3 }
  0x8e   : > { %1254 = vmatmul.bf16.gmra.mxu0 %v7825_v53 }
  0x8f   : > { %1313 = vmatmul.bf16.gmra.mxu1 %v899_v5 }
  0x91   : > { %1560 = vmatmul.bf16.gmra.mxu3 %v7688_v50  ;;  %v1014_v50 = vsel %vm605_vm1, %v1012_v18, %v1013_v9  ;;  %v6988_v18 = vld [vmem:[%s7585_s16 + $0x18] sm:$0xe] }
  0x92   : > { %v6737_v9 = vld [vmem:[%s9425_s1 + $0x98] sm:$0xff]  ;;  %v6989_v24 = vor.u32 %v6988_v18, %v6987_v13  ;;  %v7143_v18 = vor.u32 %v7142_v63, %v7728_v10 }
  0x98   : > { %1387 = vmatmul.bf16.gmra.mxu2 %v1014_v50 }
  0x9e   : > { %1259 = vmatmul.bf16.gmra.mxu0 %v5944_v27 }
  0x9f   : > { %1318 = vmatmul.bf16.gmra.mxu1 %v911_v36 }
  0xa1   : > { %1565 = vmatmul.bf16.gmra.mxu3 %v7844_v14 }
  0xa8   : > { %1392 = vmatmul.bf16.gmra.mxu2 %v1017_v56  ;;  %v6726_v56 = vld [vmem:[%s9425_s1 + $0x40] sm:$0xff] }
  0xae   : > { %1264 = vmatmul.bf16.gmra.mxu0 %v7620_v17 }
  0xb1   : > { %1570 = vmatmul.bf16.gmra.mxu3 %v7790_v2 }
  0xbb   : > { %v1230_v27 = vpop.f32.mrf.mxu0 }
  0xbc   : > { %v1289_v37 = vpop.f32.mrf.mxu1 }
  0xbd   : > { %v7865_v38 = vadd.f32 %v1289_v37, %v1230_v27  ;;  %v991_v27 = vrot.slane %v6989_v24, 1  ;;  %v992_v37 = vrot.slane %v7701_v55, 1  ;;  %v6734_v55 = vld [vmem:[%s9425_s1 + $0x80] sm:$0xff]  ;;  %v335_v24 = vld [vmem:[%s7585_s16 + $0x14] sm:$0x1] }
  0xbe   : > { %1269 = vmatmul.bf16.gmra.mxu0 %v7659_v35  ;;  %v6731_v35 = vld [vmem:[%s9425_s1 + $0x68] sm:$0xff]  ;;  %v425_v4 = vunpack.c.l.b16 %v335_v24 }
  0xbf   : > { %1603 = vmatpush.bf16.msra.mxu0 %v6731_v35 }
  0xc1   : > { %1575 = vmatmul.bf16.gmra.mxu3 %v7860_v31 }
  0xc3   : > { %v7874_v2 = vpop.f32.mrf.mxu0  ;;  %1604 = vmatpush.bf16.msra.mxu0 %v6730_v54  ;;  %v6967_v54 = vld [vmem:[%s7585_s16] sm:$0xf0] }
  0xc4   : > { %v7872_v40 = vpop.f32.mrf.mxu3  ;;  %v7876_v42 = vpop.f32.mrf.mxu1 }
  0xc7   : > { %1605 = vmatpush.bf16.msra.mxu0 %v6729_v0  ;;  %v434_v0 = vpack.c.b16 %v424_v43, %v424_v43 }
  0xcb   : > { %v1235_v48 = vpop.f32.mrf.mxu0  ;;  %v1363_v58 = vpop.f32.mrf.mxu2  ;;  %1606 = vmatpush.bf16.msra.mxu0 %v6728_v21 }
  0xcc   : > { %v7881_v47 = vpop.f32.mrf.mxu3  ;;  %v1294_v49 = vpop.f32.mrf.mxu1 }
  0xcd   : > { %v7886_v51 = vadd.f32 %v1294_v49, %v1235_v48 }
  0xce   : > { %1274 = vmatmul.bf16.gmra.mxu0 %v7753_v30  ;;  %v7140_v30 = vor.u32 %v7139_v52, %v7602_v8  ;;  %v6739_v8 = vld [vmem:[%s9425_s1 + $0xa8] sm:$0xff]  ;;  %v993_v52 = vsel %vm605_vm1, %v991_v27, %v992_v37  ;;  %v6780_v37 = vld [vmem:[%s9425_s1 + $0x1f0] sm:$0xff] }
  0xcf   : > { %1662 = vmatpush.bf16.msrb.mxu1 %v6739_v8  ;;  %1607 = vmatpush.bf16.msra.mxu0 %v6727_v22  ;;  %v6789_v8 = vld [vmem:[%s9425_s1 + $0x238] sm:$0xff]  ;;  %v7991_v22 = vld [vmem:[%s7585_s16 + $0x6c] sm:$0xf0] }
  0xd0   : > { %v988_v61 = vrot.slane %v7140_v30, 1  ;;  %2306 = vmatpush.bf16.msra.mxu3 %v6780_v37 }
  0xd1   : > { %1580 = vmatmul.bf16.gmra.mxu3 %v7825_v53  ;;  %v7905_v53 = vld [vmem:[%s7585_s16 + $0x54] sm:$0xff]  }
  0xd2   : > { %v990_v7 = vsel %vm605_vm1, %v988_v61, %v989_v34  ;;  %v6969_v61 = vor.u32 %v6968_v45, %v6967_v54 }
  0xd3   : > { %v7899_v59 = vpop.f32.mrf.mxu0  ;;  %v7925_v23 = vpop.f32.mrf.mxu2  ;;  %1663 = vmatpush.bf16.msrb.mxu1 %v6738_v12  ;;  %1608 = vmatpush.bf16.msra.mxu0 %v6726_v56 }
  0xd4   : > { %v7897_v57 = vpop.f32.mrf.mxu3  ;;  %v7901_v60 = vpop.f32.mrf.mxu1 }
  0xd7   : > { %1664 = vmatpush.bf16.msrb.mxu1 %v6737_v9  ;;  %v7988_v9 = vld [vmem:[%s7585_s16 + $0x6c] sm:$0xff]  }
  0xdb   : > { %v1240_v5 = vpop.f32.mrf.mxu0  ;;  %v1368_v28 = vpop.f32.mrf.mxu2  ;;  %1665 = vmatpush.bf16.msrb.mxu1 %v6736_v25  ;;  %v995_v25 = vrot.slane %v7759_v32, 1 }
  0xdc   : > { %v7920_v3 = vpop.f32.mrf.mxu3  ;;  %v1299_v6 = vpop.f32.mrf.mxu1 }
  0xdd   : > { %9438 = vst [vmem:[#allocation9_spill] sm:$0xff] %v7920_v3  ;;  %v7923_v11 = vadd.f32 %v1299_v6, %v1240_v5  ;;  %v606_v5 = vrot.slane %v6969_v61, 1  ;;  %v607_v6 = vrot.slane %v434_v0, 1  ;;  %v446_v61 = vshrl.u32 %v7805_v26, 16 }
  0xde   : > { %1347 = vmatmul.bf16.vlgmr.msrb.gmra.mxu0 %v990_v7 }
  0xdf   : > { %1666 = vmatpush.bf16.msrb.mxu1 %v6735_v39  ;;  %2364 = vmatpush.bf16.msrb.mxu0 %v6789_v8  ;;  %v608_v21 = vsel %vm605_vm1, %v606_v5, %v607_v6  ;;  %v453_v5 = vshll.u32 %v434_v0, 16  ;;  %v6788_v6 = vld [vmem:[%s9425_s1 + $0x230] sm:$0xff] }
  0xe1   : > { %1585 = vmatmul.bf16.gmra.mxu3 %v7905_v53 }
  0xe3   : > { %v7944_v50 = vpop.f32.mrf.mxu0  ;;  %1667 = vmatpush.bf16.msrb.mxu1 %v6734_v55  ;;  %v7977_v7 = vpop.f32.mrf.mxu2  ;;  %2365 = vmatpush.bf16.msrb.mxu0 %v6788_v6 }
  0xe4   : > { %v7939_v19 = vpop.f32.mrf.mxu3  ;;  %v7946_v36 = vpop.f32.mrf.mxu1 }
  0xe6   : > { %1668 = vmatmul.bf16.vlgmr.msrb.gmra.mxu1 %v608_v21 }
  0xeb   : > { %v1245_v48 = vpop.f32.mrf.mxu0  ;;  %v1373_v27 = vpop.f32.mrf.mxu2 }
  0xec   : > { %v7962_v35 = vpop.f32.mrf.mxu3  ;;  %v1304_v49 = vpop.f32.mrf.mxu1 }
  0xed   : > { %9439 = vst [vmem:[#allocation10_spill] sm:$0xff] %v7962_v35  ;;  %v1305_v30 = vadd.f32 %v1304_v49, %v1245_v48  ;;  %v435_v49 = vpack.c.b16 %v425_v4, %v425_v4 }
  0xee   : > { %1352 = vmatmul.bf16.gmra.mxu0 %v993_v52  ;;  %v7146_v52 = vor.u32 %v7145_v29, %v7820_v46 }
  0xef   : > { %v7971_v34 = vadd.f32 %v1363_v58, %v1305_v30  ;;  %v610_v45 = vrot.slane %v435_v49, 1  ;;  %v448_v30 = vshll.u32 %v7805_v26, 16 }
  0xf0   : > { %v609_v32 = vrot.slane %v7146_v52, 1 }
  0xf1   : > { %1590 = vmatmul.bf16.gmra.mxu3 %v7620_v17  ;;  %v994_v17 = vrot.slane %v7143_v18, 1  ;;  %v450_v8 = vrot.slane %v448_v30, 1  ;;  %v336_v18 = vld [vmem:[%s7585_s16 + $0x20] sm:$0x1] }
  0xf2   : > { %v611_v63 = vsel %vm605_vm1, %v609_v32, %v610_v45  ;;  %v6779_v32 = vld [vmem:[%s9425_s1 + $0x1e8] sm:$0xff] }
  0xf3   : > { %v7982_v12 = vpop.f32.mrf.mxu0  ;;  %v996_v10 = vsel %vm605_vm1, %v994_v17, %v995_v25  ;;  %v8018_v21 = vpop.f32.mrf.mxu2  ;;  %v451_v24 = vor.u32 %v450_v8, %v446_v61  ;;  %v455_v17 = vrot.slane %v453_v5, 1  ;;  %v426_v25 = vunpack.c.l.b16 %v336_v18  ;;  %2307 = vmatpush.bf16.msra.mxu3 %v6779_v32 }
  0xf4   : > { %v7980_v58 = vpop.f32.mrf.mxu3  ;;  %v7984_v13 = vpop.f32.mrf.mxu1  ;;  %v458_v18 = vshrl.u32 %v7817_v44, 16 }
  0xf5   : > { %v456_v37 = vsel %vm444_vm0, %v451_v24, %v455_v17  ;;  %v465_v17 = vshll.u32 %v435_v49, 16 }
  0xf6   : > { %1673 = vmatmul.bf16.gmra.mxu1 %v611_v63  ;;  %v460_v63 = vshll.u32 %v7817_v44, 16 }
  0xf8   : > { %v462_v24 = vrot.slane %v460_v63, 1 }
  0xfb   : > { %v1250_v39 = vpop.f32.mrf.mxu0  ;;  %v1378_v61 = vpop.f32.mrf.mxu2 }
  0xfc   : > { %v7996_v56 = vpop.f32.mrf.mxu3  ;;  %v1309_v43 = vpop.f32.mrf.mxu1 }
  0xfd   : > { %v1310_v48 = vadd.f32 %v1309_v43, %v1250_v39  ;;  %v6970_v39 = vld [vmem:[%s7585_s16 + $0x18] sm:$0xf0]  ;;  %v6971_v43 = vld [vmem:[%s7585_s16 + $0x18] sm:$0xe] }
  0xfe   : > { %1357 = vmatmul.bf16.gmra.mxu0 %v996_v10  ;;  %v436_v10 = vpack.c.b16 %v426_v25, %v426_v25  ;;  %v337_v25 = vld [vmem:[%s7585_s16 + $0x2c] sm:$0x1] }
  0xff   : > { %v8003_v54 = vadd.f32 %v1368_v28, %v1310_v48  ;;  %v6972_v48 = vor.u32 %v6971_v43, %v6970_v39  ;;  %v467_v39 = vrot.slane %v465_v17, 1  ;;  %v427_v43 = vunpack.c.l.b16 %v337_v25 }
 0x100   : > { %v613_v30 = vrot.slane %v436_v10, 1 }
 0x101   : > { %1595 = vmatmul.bf16.gmra.mxu3 %v7988_v9  ;;  %v612_v45 = vrot.slane %v6972_v48, 1  ;;  %v7148_v48 = vld [vmem:[%s7585_s16 + $0x24] sm:$0xe]  ;;  %v437_v63 = vpack.c.b16 %v427_v43, %v427_v43  ;;  %v338_v43 = vld [vmem:[%s7585_s16 + $0x38] sm:$0x1] }
 0x103   : > { %v8011_v46 = vpop.f32.mrf.mxu0  ;;  %v614_v8 = vsel %vm605_vm1, %v612_v45, %v613_v30 }
 0x104   : > { %v8008_v55 = vpop.f32.mrf.mxu3  ;;  %v8013_v28 = vpop.f32.mrf.mxu1 }
 0x106   : > { %1678 = vmatmul.bf16.gmra.mxu1 %v614_v8  ;;  %v7149_v8 = vor.u32 %v7148_v48, %v7847_v16  ;;  %v6778_v16 = vld [vmem:[%s9425_s1 + $0x1e0] sm:$0xff] }
 0x107   : > { %2308 = vmatpush.bf16.msra.mxu3 %v6778_v16 }
 0x10b   : > { %v1255_v4 = vpop.f32.mrf.mxu0 }
 0x10c   : > { %v8021_v26 = vpop.f32.mrf.mxu3  ;;  %v1314_v29 = vpop.f32.mrf.mxu1 }
 0x10d   : > { %v1315_v0 = vadd.f32 %v1314_v29, %v1255_v4  ;;  %v6773_v4 = vld [vmem:[%s9425_s1 + $0x1b8] sm:$0xff]  ;;  %v6787_v29 = vld [vmem:[%s9425_s1 + $0x228] sm:$0xff] }
 0x10e   : > { %1609 = vmatmul.bf16.vlgmr.msra.gmra.mxu0 %v456_v37  ;;  %v463_v37 = vor.u32 %v462_v24, %v458_v18  ;;  %2246 = vmatpush.bf16.msrb.mxu2 %v6773_v4  ;;  %v615_v18 = vrot.slane %v7149_v8, 1  ;;  %v616_v24 = vrot.slane %v437_v63, 1  ;;  %v6974_v8 = vld [vmem:[%s7585_s16 + $0x30] sm:$0xe] }
 0x10f   : > { %v8026_v52 = vadd.f32 %v1373_v27, %v1315_v0  ;;  %2366 = vmatpush.bf16.msrb.mxu0 %v6787_v29  ;;  %v8047_v0 = vpop.f32.mrf.mxu2 }
 0x110   : > { %v468_v45 = vsel %vm444_vm0, %v463_v37, %v467_v39  ;;  %v617_v17 = vsel %vm605_vm1, %v615_v18, %v616_v24  ;;  %v477_v39 = vshll.u32 %v436_v10, 16  ;;  %v6786_v10 = vld [vmem:[%s9425_s1 + $0x220] sm:$0xff] }
 0x112   : > { %v479_v48 = vrot.slane %v477_v39, 1 }
 0x113   : > { %v8035_v27 = vpop.f32.mrf.mxu0  ;;  %2367 = vmatpush.bf16.msrb.mxu0 %v6786_v10 }
 0x114   : > { %v8033_v5 = vpop.f32.mrf.mxu3  ;;  %v8037_v6 = vpop.f32.mrf.mxu1 }
 0x116   : > { %1683 = vmatmul.bf16.gmra.mxu1 %v617_v17 }
 0x117   : > { %v1383_v37 = vpop.f32.mrf.mxu2 }
 0x11b   : > { %v1260_v49 = vpop.f32.mrf.mxu0 }
 0x11c   : > { %v8050_v44 = vpop.f32.mrf.mxu3  ;;  %v1319_v32 = vpop.f32.mrf.mxu1 }
 0x11d   : > { %v1320_v30 = vadd.f32 %v1319_v32, %v1260_v49  ;;  %v428_v49 = vunpack.c.l.b16 %v338_v43 }
 0x11e   : > { %1614 = vmatmul.bf16.gmra.mxu0 %v468_v45  ;;  %v480_v45 = vsel %vm444_vm0, %v7739_v15, %v479_v48  ;;  %v484_v15 = vshll.u32 %v7844_v14, 16 }
 0x11f   : > { %v8054_v35 = vadd.f32 %v1378_v61, %v1320_v30  ;;  %v6772_v61 = vld [vmem:[%s9425_s1 + $0x1b0] sm:$0xff]  ;;  %v438_v24 = vpack.c.b16 %v428_v49, %v428_v49 }
 0x120   : > { %2247 = vmatpush.bf16.msrb.mxu2 %v6772_v61  ;;  %v6973_v30 = vld [vmem:[%s7585_s16 + $0x30] sm:$0xf0]  ;;  %v486_v10 = vrot.slane %v484_v15, 1 }
 0x121   : > { %v6975_v17 = vor.u32 %v6974_v8, %v6973_v30  ;;  %v619_v61 = vrot.slane %v438_v24, 1  ;;  %v339_v30 = vld [vmem:[%s7585_s16 + $0x44] sm:$0x1]  ;;  %v6777_v8 = vld [vmem:[%s9425_s1 + $0x1d8] sm:$0xff] }
 0x122   : > { %2309 = vmatpush.bf16.msra.mxu3 %v6777_v8 }
 0x123   : > { %v8060_v29 = vpop.f32.mrf.mxu0  ;;  %v618_v16 = vrot.slane %v6975_v17, 1 }
 0x124   : > { %v1566_v25 = vpop.f32.mrf.mxu3 }
 0x125   : > { %v8058_v4 = vadd.f32 %v1566_v25, %v7971_v34  ;;  %v8079_v25 = vpop.f32.mrf.mxu2  ;;  %v620_v43 = vsel %vm605_vm1, %v618_v16, %v619_v61  ;;  %v429_v16 = vunpack.c.l.b16 %v339_v30  ;;  %v7151_v61 = vld [vmem:[%s7585_s16 + $0x3c] sm:$0xe]  ;;  %v6770_v30 = vld [vmem:[%s9425_s1 + $0x1a0] sm:$0xff] }
 0x126   : > { %1688 = vmatmul.bf16.gmra.mxu1 %v620_v43 }
 0x12b   : > { %v1265_v32 = vpop.f32.mrf.mxu0 }
 0x12c   : > { %v8069_v34 = vpop.f32.mrf.mxu3  ;;  %v1325_v18 = vadd.f32 %v7872_v40, %v1265_v32  ;;  %v482_v32 = vshrl.u32 %v7844_v14, 16 }
 0x12e   : > { %v8081_v39 = vadd.f32 %v1383_v37, %v1325_v18  ;;  %1619 = vmatmul.bf16.gmra.mxu0 %v480_v45  ;;  %v489_v37 = vshll.u32 %v437_v63, 16  ;;  %v6771_v45 = vld [vmem:[%s9425_s1 + $0x1a8] sm:$0xff]  ;;  %v1388_v18 = vpop.f32.mrf.mxu2  ;;  %v487_v17 = vor.u32 %v486_v10, %v482_v32  ;;  %v6785_v32 = vld [vmem:[%s9425_s1 + $0x218] sm:$0xff] }
 0x12f   : > { %2248 = vmatpush.bf16.msrb.mxu2 %v6771_v45  ;;  %v7152_v45 = vor.u32 %v7151_v61, %v7863_v33  ;;  %2368 = vmatpush.bf16.msrb.mxu0 %v6785_v32 }
 0x131   : > { %v621_v10 = vrot.slane %v7152_v45, 1 }
 0x133   : > { %v8088_v49 = vpop.f32.mrf.mxu0  ;;  %2249 = vmatpush.bf16.msrb.mxu2 %v6770_v30 }
 0x134   : > { %v1571_v48 = vpop.f32.mrf.mxu3 }
 0x135   : > { %v8086_v40 = vadd.f32 %v1571_v48, %v8003_v54  ;;  %v491_v54 = vrot.slane %v489_v37, 1  ;;  %v439_v48 = vpack.c.b16 %v429_v16, %v429_v16  ;;  %v340_v16 = vld [vmem:[%s7585_s16 + $0x50] sm:$0x1] }
 0x136   : > { %v8113_v33 = vpop.f32.mrf.mxu2 }
 0x137   : > { %v492_v63 = vsel %vm444_vm0, %v487_v17, %v491_v54  ;;  %v622_v37 = vrot.slane %v439_v48, 1  ;;  %9440 = vst [vmem:[#allocation11_spill] sm:$0xff] %v8113_v33  ;;  %v501_v54 = vshll.u32 %v438_v24, 16 }
 0x139   : > { %v503_v61 = vrot.slane %v501_v54, 1  ;;  %v6769_v54 = vld [vmem:[%s9425_s1 + $0x198] sm:$0xff] }
 0x13a   : > { %2250 = vmatpush.bf16.msrb.mxu2 %v6769_v54 }
 0x13b   : > { %v1270_v14 = vpop.f32.mrf.mxu0  ;;  %v504_v32 = vsel %vm444_vm0, %v7799_v20, %v503_v61  ;;  %v508_v61 = vshll.u32 %v7860_v31, 16 }
 0x13c   : > { %v8099_v43 = vpop.f32.mrf.mxu3  ;;  %v1330_v15 = vadd.f32 %v7897_v57, %v1270_v14  ;;  %v623_v57 = vsel %vm605_vm1, %v621_v10, %v622_v37  ;;  %v430_v14 = vunpack.c.l.b16 %v340_v16  ;;  %v6776_v10 = vld [vmem:[%s9425_s1 + $0x1d0] sm:$0xff]  ;;  %v6976_v37 = vld [vmem:[%s7585_s16 + $0x48] sm:$0xf0] }
 0x13d   : > { %1693 = vmatmul.bf16.gmra.mxu1 %v623_v57  ;;  %2310 = vmatpush.bf16.msra.mxu3 %v6776_v10  ;;  %v513_v10 = vshll.u32 %v439_v48, 16 }
 0x13e   : > { %v8104_v3 = vadd.f32 %v1388_v18, %v1330_v15  ;;  %1624 = vmatmul.bf16.gmra.mxu0 %v492_v63  ;;  %v1393_v45 = vpop.f32.mrf.mxu2  ;;  %v440_v57 = vpack.c.b16 %v430_v14, %v430_v14 }
 0x140   : > { %v625_v16 = vrot.slane %v440_v57, 1 }
 0x143   : > { %v8118_v17 = vpop.f32.mrf.mxu0 }
 0x144   : > { %v1576_v8 = vpop.f32.mrf.mxu3 }
 0x145   : > { %v8116_v18 = vadd.f32 %v1576_v8, %v8026_v52  ;;  %v6977_v52 = vld [vmem:[%s7585_s16 + $0x48] sm:$0xe] }
 0x146   : > { %v6978_v24 = vor.u32 %v6977_v52, %v6976_v37  ;;  %v6784_v37 = vld [vmem:[%s9425_s1 + $0x210] sm:$0xff]  ;;  %v341_v52 = vld [vmem:[%s7585_s16 + $0x5c] sm:$0x1] }
 0x147   : > { %2369 = vmatpush.bf16.msrb.mxu0 %v6784_v37  ;;  %v431_v54 = vunpack.c.l.b16 %v341_v52  ;;  %v1292_v37 = vadd.f32 %v7876_v42, %v7874_v2 }
 0x148   : > { %v624_v20 = vrot.slane %v6978_v24, 1  ;;  %v515_v24 = vrot.slane %v513_v10, 1 }
 0x149   : > { %v441_v48 = vpack.c.b16 %v431_v54, %v431_v54 }
 0x14a   : > { %v626_v33 = vsel %vm605_vm1, %v624_v20, %v625_v16 }
 0x14b   : > { %v1275_v15 = vpop.f32.mrf.mxu0  ;;  %v628_v10 = vrot.slane %v441_v48, 1 }
 0x14c   : > { %v8121_v63 = vpop.f32.mrf.mxu3  ;;  %v1335_v30 = vadd.f32 %v7939_v19, %v1275_v15 }
 0x14d   : > { %1698 = vmatmul.bf16.gmra.mxu1 %v626_v33  ;;  %v7154_v33 = vld [vmem:[%s7585_s16 + $0x54] sm:$0xe] }
 0x14e   : > { %v8131_v8 = vadd.f32 %v1393_v45, %v1335_v30  ;;  %1629 = vmatmul.bf16.gmra.mxu0 %v504_v32  ;;  %v506_v45 = vshrl.u32 %v7860_v31, 16  ;;  %v510_v32 = vrot.slane %v508_v61, 1  ;;  %v6768_v31 = vld [vmem:[%s9425_s1 + $0x190] sm:$0xff]  ;;  %v7155_v61 = vor.u32 %v7154_v33, %v7908_v62  ;;  %v6783_v33 = vld [vmem:[%s9425_s1 + $0x208] sm:$0xff] }
 0x14f   : > { %2251 = vmatpush.bf16.msrb.mxu2 %v6768_v31  ;;  %2370 = vmatpush.bf16.msrb.mxu0 %v6783_v33 }
 0x150   : > { %v511_v30 = vor.u32 %v510_v32, %v506_v45  ;;  %v6775_v45 = vld [vmem:[%s9425_s1 + $0x1c8] sm:$0xff]  ;;  %v627_v32 = vrot.slane %v7155_v61, 1 }
 0x151   : > { %2311 = vmatpush.bf16.msra.mxu3 %v6775_v45  ;;  %v6980_v45 = vld [vmem:[%s7585_s16 + $0x60] sm:$0xe] }
 0x152   : > { %v516_v16 = vsel %vm444_vm0, %v511_v30, %v515_v24  ;;  %v525_v24 = vshll.u32 %v440_v57, 16  ;;  %v6979_v57 = vld [vmem:[%s7585_s16 + $0x60] sm:$0xf0] }
 0x153   : > { %v8141_v15 = vpop.f32.mrf.mxu0 }
 0x154   : > { %v1581_v19 = vpop.f32.mrf.mxu3  ;;  %9441 = vst [vmem:[#allocation12_spill] sm:$0xff] %v8141_v15 }
 0x155   : > { %v8139_v14 = vadd.f32 %v1581_v19, %v8054_v35 }
 0x15b   : > { %v1348_v35 = vpop.f32.mrf.mxu0 }
 0x15c   : > { %v8149_v20 = vpop.f32.mrf.mxu3  ;;  %v8153_v19 = vadd.f32 %v1348_v35, %v7865_v38  ;;  %v629_v38 = vsel %vm605_vm1, %v627_v32, %v628_v10  ;;  %v342_v35 = vld [vmem:[%s7585_s16 + $0x68] sm:$0x1] }
 0x15d   : > { %1703 = vmatmul.bf16.gmra.mxu1 %v629_v38  ;;  %v432_v31 = vunpack.c.l.b16 %v342_v35  ;;  %v6981_v38 = vor.u32 %v6980_v45, %v6979_v57  ;;  %v343_v57 = vld [vmem:[%s7585_s16 + $0x74] sm:$0x1]  ;;  %v6233_v45 = vld [vmem:[%s7585_s16 + $0x20] sm:$0x1] }
 0x15e   : > { %1634 = vmatmul.bf16.gmra.mxu0 %v516_v16  ;;  %v527_v16 = vrot.slane %v525_v24, 1 }
 0x15f   : > { %v442_v10 = vpack.c.b16 %v432_v31, %v432_v31  ;;  %v530_v31 = vshrl.u32 %v7905_v53, 16 }
 0x160   : > { %v528_v42 = vsel %vm444_vm0, %v7834_v1, %v527_v16  ;;  %v6774_v1 = vld [vmem:[%s9425_s1 + $0x1c0] sm:$0xff] }
 0x161   : > { %2312 = vmatpush.bf16.msra.mxu3 %v6774_v1 }
 0x163   : > { %v1350_v30 = vpop.f32.mrf.mxu0 }
 0x164   : > { %v1586_v52 = vpop.f32.mrf.mxu3  ;;  %v8168_v54 = vadd.f32 %v1350_v30, %v1292_v37  ;;  %v630_v37 = vrot.slane %v6981_v38, 1  ;;  %v532_v30 = vshll.u32 %v7905_v53, 16  ;;  %v6766_v38 = vld [vmem:[%s9425_s1 + $0x180] sm:$0xff]  ;;  %v433_v53 = vunpack.c.l.b16 %v343_v57 }
 0x165   : > { %v8166_v62 = vadd.f32 %v1586_v52, %v8081_v39  ;;  %v6767_v39 = vld [vmem:[%s9425_s1 + $0x188] sm:$0xff]  ;;  %v631_v52 = vrot.slane %v442_v10, 1 }
 0x166   : > { %2252 = vmatpush.bf16.msrb.mxu2 %v6767_v39 }
 0x167   : > { %v632_v24 = vsel %vm605_vm1, %v630_v37, %v631_v52  ;;  %v7002_v52 = vld [vmem:[%s7585_s16 + $0x18] sm:$0xff]  }
 0x16a   : > { %2253 = vmatpush.bf16.msrb.mxu2 %v6766_v38 }
 0x16b   : > { %v1353_v2 = vpop.f32.mrf.mxu0 }
 0x16c   : > { %v8174_v61 = vpop.f32.mrf.mxu3  ;;  %v8184_v32 = vadd.f32 %v1353_v2, %v7886_v51  ;;  %v1297_v51 = vadd.f32 %v7901_v60, %v7899_v59  ;;  %v534_v2 = vrot.slane %v532_v30, 1  ;;  %v6782_v59 = vld [vmem:[%s9425_s1 + $0x200] sm:$0xff]  ;;  %v1833_v60 = vunpack.c.l.b16 %v6233_v45  ;;  %v7157_v30 = vld [vmem:[%s7585_s16 + $0x6c] sm:$0xe] }
 0x16d   : > { %1708 = vmatmul.bf16.gmra.mxu1 %v632_v24  ;;  %2371 = vmatpush.bf16.msrb.mxu0 %v6782_v59  ;;  %v7158_v38 = vor.u32 %v7157_v30, %v7991_v22  ;;  %v6215_v22 = vld [vmem:[%s7585_s16 + $0x24] sm:$0xff]  }
 0x16e   : > { %1639 = vmatmul.bf16.gmra.mxu0 %v528_v42  ;;  %v537_v42 = vshll.u32 %v441_v48, 16  ;;  %v1856_v48 = vshll.u32 %v7002_v52, 16  ;;  %v8208_v1 = vpack.c.b16 %v1833_v60, %v1833_v60  ;;  %2254 = vmatmul.bf16.vlgmr.msrb.gmra.mxu2 %v7002_v52  ;;  %v8228_v30 = vld [vmem:[%s7585_s16 + $0x24] sm:$0xf0] }
 0x170   : > { %v539_v37 = vrot.slane %v537_v42, 1  ;;  %v1858_v15 = vrot.slane %v1856_v48, 1  ;;  %v1861_v45 = vshll.u32 %v8208_v1, 16  ;;  %v549_v48 = vshll.u32 %v442_v10, 16 }
 0x172   : > { %v1863_v57 = vrot.slane %v1861_v45, 1  ;;  %v551_v45 = vrot.slane %v549_v48, 1 }
 0x173   : > { %v1355_v16 = vpop.f32.mrf.mxu0 }
 0x174   : > { %v1591_v33 = vpop.f32.mrf.mxu3  ;;  %v8197_v39 = vadd.f32 %v1355_v16, %v1297_v51  ;;  %v1854_v51 = vshrl.u32 %v7002_v52, 16 }
 0x175   : > { %v8194_v35 = vadd.f32 %v1591_v33, %v8104_v3  ;;  %v535_v3 = vor.u32 %v534_v2, %v530_v31  ;;  %v443_v2 = vpack.c.b16 %v433_v53, %v433_v53 }
 0x176   : > { %v1859_v42 = vor.u32 %v1858_v15, %v1854_v51 }
 0x177   : > { %v540_v16 = vsel %vm444_vm0, %v535_v3, %v539_v37  ;;  %v634_v59 = vrot.slane %v443_v2, 1  ;;  %v633_v3 = vrot.slane %v7158_v38, 1  ;;  %v8235_v38 = vpop.f32.mrf.mxu1 }
 0x178   : > { %v1864_v60 = vsel %vm444_vm0, %v1859_v42, %v1863_v57  ;;  %v1868_v42 = vshll.u32 %v6215_v22, 16 }
 0x179   : > { %2313 = vmatmul.bf16.vlgmr.msra.gmra.mxu3 %v1864_v60  ;;  %v635_v37 = vsel %vm605_vm1, %v633_v3, %v634_v59  ;;  %v552_v60 = vsel %vm444_vm0, %v7670_v41, %v551_v45  ;;  %v554_v41 = vshrl.u32 %v7988_v9, 16  ;;  %v6235_v45 = vld [vmem:[%s7585_s16 + $0x38] sm:$0x1] }
 0x17b   : > { %v1358_v33 = vpop.f32.mrf.mxu0 }
 0x17c   : > { %v8211_v24 = vpop.f32.mrf.mxu3  ;;  %v8216_v31 = vadd.f32 %v1358_v33, %v7923_v11  ;;  %v1302_v11 = vadd.f32 %v7946_v36, %v7944_v50  ;;  %v6234_v33 = vld [vmem:[%s7585_s16 + $0x2c] sm:$0x1]  ;;  %v1552_v50 = vadd.f32 %v7980_v58, %v8153_v19  ;;  %v1866_v36 = vshrl.u32 %v6215_v22, 16 }
 0x17d   : > { %1713 = vmatmul.bf16.gmra.mxu1 %v635_v37  ;;  %v556_v58 = vshll.u32 %v7988_v9, 16 }
 0x17e   : > { %1644 = vmatmul.bf16.gmra.mxu0 %v540_v16  ;;  %v1834_v16 = vunpack.c.l.b16 %v6234_v33  ;;  %2259 = vmatmul.bf16.gmra.mxu2 %v6215_v22  ;;  %v561_v33 = vshll.u32 %v443_v2, 16 }
 0x17f   : > { %v8246_v19 = vpop.f32.mrf.mxu1  ;;  %v558_v22 = vrot.slane %v556_v58, 1 }
 0x180   : > { %v8233_v57 = vpack.c.b16 %v1834_v16, %v1834_v16 }
 0x182   : > { %v1873_v10 = vshll.u32 %v8233_v57, 16 }
 0x183   : > { %v1360_v53 = vpop.f32.mrf.mxu0 }
 0x184   : > { %v1596_v52 = vpop.f32.mrf.mxu3  ;;  %v8230_v51 = vadd.f32 %v1360_v53, %v1302_v11  ;;  %v1875_v11 = vrot.slane %v1873_v10, 1  ;;  %v1554_v53 = vadd.f32 %v7996_v56, %v8168_v54  ;;  %v1557_v56 = vadd.f32 %v8008_v55, %v8184_v32  ;;  %v7007_v32 = vld [vmem:[%s7585_s16 + $0x18] sm:$0xf0] }
 0x185   : > { %v8224_v15 = vadd.f32 %v1596_v52, %v8131_v8  ;;  %v1870_v8 = vrot.slane %v1868_v42, 1  ;;  %v1835_v42 = vunpack.c.l.b16 %v6235_v45  ;;  %v6219_v45 = vld [vmem:[%s7585_s16 + $0x3c] sm:$0xff]  }
 0x187   : > { %v1871_v37 = vor.u32 %v1870_v8, %v1866_v36  ;;  %v563_v36 = vrot.slane %v561_v33, 1  ;;  %v7003_v8 = vld [vmem:[%s7585_s16 + $0x30] sm:$0xff]  }
 0x188   : > { %v1880_v10 = vshll.u32 %v7003_v8, 16  ;;  %v1878_v54 = vshrl.u32 %v7003_v8, 16 }
 0x189   : > { %v1876_v52 = vsel %vm444_vm0, %v1871_v37, %v1875_v11  ;;  %v8261_v11 = vpop.f32.mrf.mxu1 }
 0x18a   : > { %2318 = vmatmul.bf16.gmra.mxu3 %v1876_v52 }
 0x18b   : > { %v1610_v59 = vpop.f32.mrf.mxu0 }
 0x18c   : > { %v8242_v3 = vadd.f32 %v1610_v59, %v1552_v50  ;;  %v559_v50 = vor.u32 %v558_v22, %v554_v41  ;;  %v8255_v59 = vpack.c.b16 %v1835_v42, %v1835_v42  ;;  %v1559_v41 = vadd.f32 %v8021_v26, %v8197_v39  ;;  %v8272_v42 = vld [vmem:[%s7585_s16 + $0x3c] sm:$0xf0] }
 0x18d   : > { %v1562_v26 = vadd.f32 %v8033_v5, %v8216_v31  ;;  %v1890_v39 = vshrl.u32 %v6219_v45, 16 }
 0x18e   : > { %1649 = vmatmul.bf16.gmra.mxu0 %v552_v60  ;;  %v1882_v60 = vrot.slane %v1880_v10, 1  ;;  %v1885_v9 = vshll.u32 %v8255_v59, 16  ;;  %v564_v37 = vsel %vm444_vm0, %v559_v50, %v563_v36  ;;  %2264 = vmatmul.bf16.gmra.mxu2 %v7003_v8  ;;  %v6236_v36 = vld [vmem:[%s7585_s16 + $0x44] sm:$0x1]  ;;  %v6829_v10 = vld [vmem:[#allocation3 + $0x138] sm:$0xff] }
 0x18f   : > { %4135 = vmatpush.bf16.msra.mxu2 %v6829_v10 }
 0x190   : > { %v1883_v58 = vor.u32 %v1882_v60, %v1878_v54  ;;  %v2014_v60 = vrot.slane %v8208_v1, 1  ;;  %v6821_v1 = vld [vmem:[#allocation3 + $0xf8] sm:$0xff] }
 0x191   : > { %v8277_v8 = vpop.f32.mrf.mxu1  ;;  %4086 = vmatpush.bf16.msra.mxu1 %v6821_v1  ;;  %v6828_v1 = vld [vmem:[#allocation3 + $0x130] sm:$0xff] }
 0x193   : > { %v1612_v48 = vpop.f32.mrf.mxu0  ;;  %4136 = vmatpush.bf16.msra.mxu2 %v6828_v1 }
 0x194   : > { %v8251_v16 = vadd.f32 %v1612_v48, %v1554_v53  ;;  %v1887_v53 = vrot.slane %v1885_v9, 1  ;;  %v7008_v48 = vld [vmem:[%s7585_s16 + $0x18] sm:$0xe]  ;;  %v1892_v9 = vshll.u32 %v6219_v45, 16 }
 0x195   : > { %v7009_v33 = vor.u32 %v7008_v48, %v7007_v32  ;;  %v7160_v48 = vld [vmem:[%s7585_s16 + $0x24] sm:$0xe] }
 0x196   : > { %v1888_v55 = vsel %vm444_vm0, %v1883_v58, %v1887_v53 }
 0x197   : > { %v2013_v54 = vrot.slane %v7009_v33, 1  ;;  %v1564_v33 = vadd.f32 %v8050_v44, %v8230_v51 }
 0x199   : > { %v8290_v31 = vpop.f32.mrf.mxu1 }
 0x19a   : > { %2323 = vmatmul.bf16.gmra.mxu3 %v1888_v55  ;;  %v2015_v55 = vsel %vm605_vm1, %v2013_v54, %v2014_v60 }
 0x19b   : > { %v1615_v2 = vpop.f32.mrf.mxu0 }
 0x19c   : > { %v8263_v52 = vadd.f32 %v1615_v2, %v1557_v56  ;;  %v1836_v56 = vunpack.c.l.b16 %v6236_v36 }
 0x19e   : > { %1654 = vmatmul.bf16.gmra.mxu0 %v564_v37  ;;  %v8280_v2 = vpack.c.b16 %v1836_v56, %v1836_v56  ;;  %v1894_v37 = vrot.slane %v1892_v9, 1  ;;  %2269 = vmatmul.bf16.gmra.mxu2 %v6219_v45  ;;  %v7161_v45 = vor.u32 %v7160_v48, %v8228_v30  ;;  %v6237_v56 = vld [vmem:[%s7585_s16 + $0x50] sm:$0x1]  ;;  %v2017_v9 = vrot.slane %v8233_v57, 1 }
 0x19f   : > { %v1837_v54 = vunpack.c.l.b16 %v6237_v56  ;;  %v1307_v48 = vadd.f32 %v7984_v13, %v7982_v12  ;;  %v7011_v56 = vld [vmem:[%s7585_s16 + $0x30] sm:$0xe] }
 0x1a0   : > { %v1897_v58 = vshll.u32 %v8280_v2, 16  ;;  %v2016_v60 = vrot.slane %v7161_v45, 1  ;;  %v7010_v45 = vld [vmem:[%s7585_s16 + $0x30] sm:$0xf0] }
 0x1a2   : > { %v2018_v51 = vsel %vm605_vm1, %v2016_v60, %v2017_v9  ;;  %v8318_v60 = vld [vmem:[%s7585_s16 + $0x54] sm:$0xf0] }
 0x1a3   : > { %v1617_v22 = vpop.f32.mrf.mxu0 }
 0x1a4   : > { %v8274_v50 = vadd.f32 %v1617_v22, %v1559_v41  ;;  %v1895_v41 = vor.u32 %v1894_v37, %v1890_v39  ;;  %v1899_v22 = vrot.slane %v1897_v58, 1  ;;  %v8300_v37 = vpack.c.b16 %v1837_v54, %v1837_v54  ;;  %v8302_v58 = vpop.f32.mrf.mxu1  ;;  %v6223_v54 = vld [vmem:[%s7585_s16 + $0x54] sm:$0xff]  }
 0x1a6   : > { %v1900_v5 = vsel %vm444_vm0, %v1895_v41, %v1899_v22  ;;  %v1909_v44 = vshll.u32 %v8300_v37, 16 }
 0x1a8   : > { %v1911_v22 = vrot.slane %v1909_v44, 1  ;;  %v1916_v44 = vshll.u32 %v6223_v54, 16 }
 0x1aa   : > { %2328 = vmatmul.bf16.gmra.mxu3 %v1900_v5 }
 0x1ab   : > { %v1620_v53 = vpop.f32.mrf.mxu0 }
 0x1ac   : > { %v8286_v32 = vadd.f32 %v1620_v53, %v1562_v26  ;;  %v7004_v26 = vld [vmem:[%s7585_s16 + $0x48] sm:$0xff]   ;;  %v8320_v9 = vpop.f32.mrf.mxu1 }
 0x1ad   : > { %v1904_v39 = vshll.u32 %v7004_v26, 16  ;;  %v1902_v53 = vshrl.u32 %v7004_v26, 16 }
 0x1ae   : > { %2372 = vmatmul.bf16.vlgmr.msrb.gmra.mxu0 %v2015_v55  ;;  %2274 = vmatmul.bf16.gmra.mxu2 %v7004_v26 }
 0x1af   : > { %v1906_v55 = vrot.slane %v1904_v39, 1  ;;  %v6238_v39 = vld [vmem:[%s7585_s16 + $0x5c] sm:$0x1] }
 0x1b1   : > { %v1907_v41 = vor.u32 %v1906_v55, %v1902_v53  ;;  %v1838_v53 = vunpack.c.l.b16 %v6238_v39  ;;  %v6239_v39 = vld [vmem:[%s7585_s16 + $0x68] sm:$0x1] }
 0x1b3   : > { %v1622_v36 = vpop.f32.mrf.mxu0  ;;  %v1912_v5 = vsel %vm444_vm0, %v1907_v41, %v1911_v22  ;;  %v1312_v22 = vadd.f32 %v8013_v28, %v8011_v46 }
 0x1b4   : > { %v8295_v10 = vadd.f32 %v1622_v36, %v1564_v33  ;;  %v6820_v33 = vld [vmem:[#allocation3 + $0xf0] sm:$0xff]  ;;  %v1366_v36 = vadd.f32 %v7925_v23, %v1307_v48  ;;  %v2020_v23 = vrot.slane %v8255_v59, 1 }
 0x1b5   : > { %4087 = vmatpush.bf16.msra.mxu1 %v6820_v33  ;;  %v7163_v33 = vld [vmem:[%s7585_s16 + $0x3c] sm:$0xe] }
 0x1b6   : > { %v1569_v12 = vadd.f32 %v8069_v34, %v1366_v36  ;;  %v1918_v34 = vrot.slane %v1916_v44, 1  ;;  %v7005_v44 = vld [vmem:[%s7585_s16 + $0x60] sm:$0xff]  }
 0x1ba   : > { %2333 = vmatmul.bf16.gmra.mxu3 %v1912_v5 }
 0x1bb   : > { %v1625_v30 = vpop.f32.mrf.mxu0 }
 0x1bc   : > { %v8309_v57 = vadd.f32 %v1625_v30, %v8058_v4  ;;  %v7012_v4 = vor.u32 %v7011_v56, %v7010_v45  ;;  %v8326_v30 = vpack.c.b16 %v1838_v53, %v1838_v53  ;;  %v8336_v45 = vpop.f32.mrf.mxu1  ;;  %v1839_v53 = vunpack.c.l.b16 %v6239_v39  ;;  %v6826_v39 = vld [vmem:[#allocation3 + $0x120] sm:$0xff] }
 0x1be   : > { %2377 = vmatmul.bf16.gmra.mxu0 %v2018_v51  ;;  %v2019_v55 = vrot.slane %v7012_v4, 1  ;;  %v1914_v51 = vshrl.u32 %v6223_v54, 16  ;;  %v1921_v48 = vshll.u32 %v8326_v30, 16  ;;  %2279 = vmatmul.bf16.gmra.mxu2 %v6223_v54  ;;  %v6819_v54 = vld [vmem:[#allocation3 + $0xe8] sm:$0xff] }
 0x1bf   : > { %4088 = vmatpush.bf16.msra.mxu1 %v6819_v54 }
 0x1c0   : > { %v2021_v41 = vsel %vm605_vm1, %v2019_v55, %v2020_v23  ;;  %v1919_v59 = vor.u32 %v1918_v34, %v1914_v51  ;;  %v1923_v36 = vrot.slane %v1921_v48, 1  ;;  %v2023_v23 = vrot.slane %v8280_v2, 1 }
 0x1c1   : > { %v8349_v34 = vpack.c.b16 %v1839_v53, %v1839_v53  ;;  %v1317_v2 = vadd.f32 %v8037_v6, %v8035_v27  ;;  %v6227_v6 = vld [vmem:[%s7585_s16 + $0x6c] sm:$0xff]   ;;  %v6240_v53 = vld [vmem:[%s7585_s16 + $0x74] sm:$0x1] }
 0x1c2   : > { %v1924_v56 = vsel %vm444_vm0, %v1919_v59, %v1923_v36 }
 0x1c3   : > { %v1627_v13 = vpop.f32.mrf.mxu0 }
 0x1c4   : > { %v8322_v26 = vadd.f32 %v1627_v13, %v1569_v12  ;;  %v6827_v12 = vld [vmem:[#allocation3 + $0x128] sm:$0xff]  ;;  %v1371_v13 = vadd.f32 %v7977_v7, %v1312_v22  ;;  %v8347_v51 = vpop.f32.mrf.mxu1  ;;  %v1928_v7 = vshll.u32 %v7005_v44, 16 }
 0x1c5   : > { %4137 = vmatpush.bf16.msra.mxu2 %v6827_v12  ;;  %v7013_v12 = vld [vmem:[%s7585_s16 + $0x48] sm:$0xf0] }
 0x1c6   : > { %v1574_v46 = vadd.f32 %v8099_v43, %v1371_v13  ;;  %v1926_v43 = vshrl.u32 %v7005_v44, 16  ;;  %v1930_v48 = vrot.slane %v1928_v7, 1  ;;  %v7014_v13 = vld [vmem:[%s7585_s16 + $0x48] sm:$0xe] }
 0x1c7   : > { %v7015_v27 = vor.u32 %v7014_v13, %v7013_v12 }
 0x1c9   : > { %4138 = vmatpush.bf16.msra.mxu2 %v6826_v39  ;;  %v6825_v39 = vld [vmem:[#allocation3 + $0x118] sm:$0xff] }
 0x1ca   : > { %2338 = vmatmul.bf16.gmra.mxu3 %v1924_v56  ;;  %v1376_v56 = vadd.f32 %v8018_v21, %v1317_v2  ;;  %v1840_v21 = vunpack.c.l.b16 %v6240_v53  ;;  %v1322_v2 = vadd.f32 %v8235_v38, %v8060_v29 }
 0x1cb   : > { %v1630_v1 = vpop.f32.mrf.mxu0 }
 0x1cc   : > { %v8333_v5 = vadd.f32 %v1630_v1, %v8086_v40  ;;  %v7164_v40 = vor.u32 %v7163_v33, %v8272_v42  ;;  %v1933_v42 = vshll.u32 %v8349_v34, 16  ;;  %v1931_v33 = vor.u32 %v1930_v48, %v1926_v43 }
 0x1cd   : > { %v8373_v7 = vpack.c.b16 %v1840_v21, %v1840_v21  ;;  %v1938_v43 = vshrl.u32 %v6227_v6, 16  ;;  %v1381_v13 = vadd.f32 %v8047_v0, %v1322_v2  ;;  %v2029_v21 = vrot.slane %v8326_v30, 1  ;;  %4139 = vmatpush.bf16.msra.mxu2 %v6825_v39 }
 0x1ce   : > { %2382 = vmatmul.bf16.gmra.mxu0 %v2021_v41  ;;  %v2022_v55 = vrot.slane %v7164_v40, 1  ;;  %2284 = vmatmul.bf16.gmra.mxu2 %v7005_v44  ;;  %v1935_v59 = vrot.slane %v1933_v42, 1  ;;  %v2026_v44 = vrot.slane %v8300_v37, 1  ;;  %v1327_v30 = vadd.f32 %v7881_v47, %v8088_v49  ;;  %v7017_v47 = vld [vmem:[%s7585_s16 + $0x60] sm:$0xe] }
 0x1cf   : > { %v1945_v42 = vshll.u32 %v8373_v7, 16 }
 0x1d0   : > { %v2024_v41 = vsel %vm605_vm1, %v2022_v55, %v2023_v23  ;;  %v1936_v36 = vsel %vm444_vm0, %v1931_v33, %v1935_v59  ;;  %v6818_v55 = vld [vmem:[#allocation3 + $0xe0] sm:$0xff]  ;;  %v2025_v23 = vrot.slane %v7015_v27, 1  ;;  %v7166_v59 = vld [vmem:[%s7585_s16 + $0x54] sm:$0xe] }
 0x1d1   : > { %4089 = vmatpush.bf16.msra.mxu1 %v6818_v55  ;;  %v7167_v29 = vor.u32 %v7166_v59, %v8318_v60  ;;  %v6241_v27 = vld [vmem:[%s7585_s16 + $0x80] sm:$0x1] }
 0x1d2   : > { %v1841_v53 = vunpack.c.l.b16 %v6241_v27 }
 0x1d3   : > { %v1632_v28 = vpop.f32.mrf.mxu0  ;;  %v2028_v55 = vrot.slane %v7167_v29, 1 }
 0x1d4   : > { %v8342_v4 = vadd.f32 %v1632_v28, %v1574_v46  ;;  %v1579_v46 = vadd.f32 %v8121_v63, %v1376_v56  ;;  %v8363_v28 = vpop.f32.mrf.mxu1  ;;  %v1940_v63 = vshll.u32 %v6227_v6, 16  ;;  %v1947_v56 = vrot.slane %v1945_v42, 1 }
 0x1d5   : > { %v2030_v42 = vsel %vm605_vm1, %v2028_v55, %v2029_v21 }
 0x1d6   : > { %v1942_v48 = vrot.slane %v1940_v63, 1 }
 0x1da   : > { %2343 = vmatmul.bf16.gmra.mxu3 %v1936_v36  ;;  %v1943_v36 = vor.u32 %v1942_v48, %v1938_v43  ;;  %v8401_v43 = vpop.f32.mrf.mxu3 }
 0x1db   : > { %v1635_v1 = vpop.f32.mrf.mxu0 }
 0x1dc   : > { %v8356_v22 = vadd.f32 %v1635_v1, %v8116_v18  ;;  %v8367_v18 = vld [vmem:[%s7585_s16 + $0x6c] sm:$0xf0]  ;;  %v8379_v33 = vpop.f32.mrf.mxu1  ;;  %v1948_v12 = vsel %vm444_vm0, %v1943_v36, %v1947_v56 }
 0x1de   : > { %2387 = vmatmul.bf16.gmra.mxu0 %v2024_v41  ;;  %v2027_v41 = vsel %vm605_vm1, %v2025_v23, %v2026_v44  ;;  %2289 = vmatmul.bf16.gmra.mxu2 %v6227_v6  ;;  %v7006_v23 = vld [vmem:[%s7585_s16 + $0x78] sm:$0xff]   ;;  %v8398_v44 = vpack.c.b16 %v1841_v53, %v1841_v53  ;;  %v2032_v53 = vrot.slane %v8349_v34, 1 }
 0x1df   : > { %v1952_v0 = vshll.u32 %v7006_v23, 16 }
 0x1e0   : > { %v1957_v60 = vshll.u32 %v8398_v44, 16 }
 0x1e1   : > { %v1954_v63 = vrot.slane %v1952_v0, 1 }
 0x1e2   : > { %v1959_v59 = vrot.slane %v1957_v60, 1  ;;  %v7169_v60 = vld [vmem:[%s7585_s16 + $0x6c] sm:$0xe] }
 0x1e3   : > { %v1637_v40 = vpop.f32.mrf.mxu0 }
 0x1e4   : > { %v8369_v54 = vadd.f32 %v1637_v40, %v1579_v46  ;;  %v1584_v46 = vadd.f32 %v8149_v20, %v1381_v13  ;;  %v8394_v6 = vpop.f32.mrf.mxu1  ;;  %v1950_v20 = vshrl.u32 %v7006_v23, 16 }
 0x1e6   : > { %v1955_v2 = vor.u32 %v1954_v63, %v1950_v20  ;;  %v6231_v20 = vld [vmem:[%s7585_s16 + $0x84] sm:$0xff]  }
 0x1e8   : > { %v1960_v36 = vsel %vm444_vm0, %v1955_v2, %v1959_v59  ;;  %v1962_v2 = vshrl.u32 %v6231_v20, 16 }
 0x1ea   : > { %2348 = vmatmul.bf16.gmra.mxu3 %v1948_v12  ;;  %v1386_v12 = vadd.f32 %v8079_v25, %v1327_v30  ;;  %v1964_v30 = vshll.u32 %v6231_v20, 16 }
 0x1eb   : > { %v1640_v1 = vpop.f32.mrf.mxu0 }
 0x1ec   : > { %v8382_v37 = vadd.f32 %v1640_v1, %v8139_v14  ;;  %v8392_v14 = vpop.f32.mrf.mxu2  ;;  %v8413_v13 = vpop.f32.mrf.mxu1  ;;  %v1589_v49 = vadd.f32 %v8174_v61, %v1386_v12  ;;  %v8430_v61 = vld [vmem:[%s7585_s16 + $0x84] sm:$0xf0]  ;;  %v7170_v12 = vor.u32 %v7169_v60, %v8367_v18 }
 0x1ee   : > { %2392 = vmatmul.bf16.gmra.mxu0 %v2027_v41  ;;  %2294 = vmatmul.bf16.gmra.mxu2 %v7006_v23  ;;  %v6817_v41 = vld [vmem:[#allocation3 + $0xd8] sm:$0xff] }
 0x1ef   : > { %4090 = vmatpush.bf16.msra.mxu1 %v6817_v41 }
 0x1f3   : > { %v1642_v40 = vpop.f32.mrf.mxu0 }
 0x1f4   : > { %v8389_v38 = vadd.f32 %v1642_v40, %v1584_v46  ;;  %v8410_v56 = vpop.f32.mrf.mxu2  ;;  %v7016_v46 = vld [vmem:[%s7585_s16 + $0x60] sm:$0xf0]  ;;  %v8423_v55 = vpop.f32.mrf.mxu1 }
 0x1f5   : > { %v7018_v40 = vor.u32 %v7017_v47, %v7016_v46 }
 0x1f7   : > { %v2031_v39 = vrot.slane %v7018_v40, 1  ;;  %v2034_v40 = vrot.slane %v7170_v12, 1 }
 0x1f9   : > { %v2033_v23 = vsel %vm605_vm1, %v2031_v39, %v2032_v53  ;;  %v2035_v39 = vrot.slane %v8373_v7, 1  ;;  %v6824_v53 = vld [vmem:[#allocation3 + $0x110] sm:$0xff]  ;;  %v7019_v7 = vld [vmem:[%s7585_s16 + $0x78] sm:$0xf0] }
 0x1fa   : > { %2353 = vmatmul.bf16.gmra.mxu3 %v1960_v36  ;;  %4140 = vmatpush.bf16.msra.mxu2 %v6824_v53  ;;  %v6823_v53 = vld [vmem:[#allocation3 + $0x108] sm:$0xff] }
 0x1fb   : > { %v1645_v48 = vpop.f32.mrf.mxu0  ;;  %v2036_v60 = vsel %vm605_vm1, %v2034_v40, %v2035_v39  ;;  %v2038_v39 = vrot.slane %v8398_v44, 1 }
 0x1fc   : > { %v8407_v1 = vadd.f32 %v1645_v48, %v8166_v62  ;;  %v2314_v29 = vpop.f32.mrf.mxu3  ;;  %v8421_v25 = vpop.f32.mrf.mxu2  ;;  %v6242_v48 = vld [vmem:[%s7585_s16 + $0x8c] sm:$0x1] }
 0x1fd   : > { %v8447_v47 = vpop.f32.mrf.mxu1 }
 0x1fe   : > { %2397 = vmatmul.bf16.gmra.mxu0 %v2030_v42  ;;  %v1842_v42 = vunpack.c.l.b16 %v6242_v48  ;;  %2299 = vmatmul.bf16.gmra.mxu2 %v6231_v20 }
 0x1ff   : > { %4141 = vmatpush.bf16.msra.mxu2 %v6823_v53  ;;  %v6835_v53 = vld [vmem:[#allocation3 + $0x168] sm:$0xff] }
 0x200   : > { %v8437_v34 = vpack.c.b16 %v1842_v42, %v1842_v42 }
 0x202   : > { %v1969_v59 = vshll.u32 %v8437_v34, 16 }
 0x203   : > { %v1647_v62 = vpop.f32.mrf.mxu0 }
 0x204   : > { %v8418_v27 = vadd.f32 %v1647_v62, %v1589_v49  ;;  %v8426_v0 = vpop.f32.mrf.mxu3  ;;  %v8439_v41 = vpop.f32.mrf.mxu2  ;;  %v1971_v49 = vrot.slane %v1969_v59, 1 }
 0x206   : > { %9442 = vst [vmem:[#allocation13_spill] sm:$0xff] %v8418_v27  ;;  %v2041_v27 = vrot.slane %v8437_v34, 1 }
 0x20b   : > { %v1650_v21 = vpop.f32.mrf.mxu0 }
 0x20c   : > { %v8433_v63 = vadd.f32 %v1650_v21, %v8194_v35  ;;  %v1966_v35 = vrot.slane %v1964_v30, 1  ;;  %v6816_v21 = vld [vmem:[#allocation3 + $0xd0] sm:$0xff]  ;;  %v8451_v18 = vpop.f32.mrf.mxu2  ;;  %v8459_v30 = vpop.f32.mrf.mxu1 }
 0x20d   : > { %v8445_v46 = vpop.f32.mrf.mxu3  ;;  %4091 = vmatpush.bf16.msra.mxu1 %v6816_v21  ;;  %v2315_v21 = vadd.f32 %v2314_v29, %v8410_v56  ;;  %v1670_v56 = vadd.f32 %v8246_v19, %v8242_v3  ;;  %v2647_v19 = vld [vmem:[#allocation2 + $0x1c] sm:$0x1] }
 0x20e   : > { %9443 = vst [vmem:[#allocation14_spill] sm:$0xff] %v8433_v63  ;;  %2402 = vmatmul.bf16.gmra.mxu0 %v2033_v23  ;;  %v1967_v62 = vor.u32 %v1966_v35, %v1962_v2  ;;  %v7020_v2 = vld [vmem:[%s7585_s16 + $0x78] sm:$0xe] }
 0x20f   : > { %v7021_v35 = vor.u32 %v7020_v2, %v7019_v7  ;;  %v8476_v7 = vstv %s6397_s2 }
 0x210   : > { %v1972_v23 = vsel %vm444_vm0, %v1967_v62, %v1971_v49  ;;  %v6837_v62 = vld [vmem:[#allocation3 + $0x178] sm:$0xff]  ;;  %vm2498_vm7 = vcmp.ge.s32.totalorder %v8476_v7, 0  ;;  %vm2508_vm8 = vcmp.lt.s32.totalorder %v8476_v7, 16 }
 0x211   : > { %2358 = vmatmul.bf16.gmra.mxu3 %v1972_v23  ;;  %v2037_v40 = vrot.slane %v7021_v35, 1  ;;  %v6836_v23 = vld [vmem:[#allocation3 + $0x170] sm:$0xff]  ;;  %v8486_v35 = vld [vmem:[%s9428_s4] ss:$0 sm:$0xff]  ;;  %vm8504_vm10 = vmand %vm2498_vm7, %vm2508_vm8 }
 0x212   : > { %4184 = vmatpush.bf16.msrb.mxu3 %v6837_v62  ;;  %v7172_v62 = vld [vmem:[%s7585_s16 + $0x84] sm:$0xe] }
 0x213   : > { %v8442_v36 = vpop.f32.mrf.mxu0  ;;  %v2039_v2 = vsel %vm605_vm1, %v2037_v40, %v2038_v39  ;;  %v2614_v39 = vld [vmem:[#allocation2 + $0x10] sm:$0x8] }
 0x214   : > { %v8463_v59 = vpop.f32.mrf.mxu2 }
 0x215   : > { %v8454_v48 = vpop.f32.mrf.mxu3 }
 0x216   : > { %4185 = vmatpush.bf16.msrb.mxu3 %v6836_v23  ;;  %v2615_v23 = vsel %vm8489_vm6, 0, %v2614_v39 }
 0x217   : > { %2616 = vst [vmem:[#allocation2 + $0x10] sm:$0x8] %v2615_v23 }
 0x21a   : > { %4186 = vmatpush.bf16.msrb.mxu3 %v6835_v53  ;;  %v2317_v53 = vadd.f32 %v8426_v0, %v8421_v25  ;;  %v6833_v25 = vld [vmem:[#allocation3 + $0x158] sm:$0xff] }
 0x21b   : > { %v1655_v20 = vpop.f32.mrf.mxu0 }
 0x21c   : > { %v8457_v42 = vadd.f32 %v1655_v20, %v8224_v15  ;;  %v8471_v15 = vpop.f32.mrf.mxu1  ;;  %v8474_v20 = vpop.f32.mrf.mxu2 }
 0x21d   : > { %v8467_v49 = vpop.f32.mrf.mxu3  ;;  %9445 = vst [vmem:[#allocation16_spill] sm:$0xff] %v8471_v15 }
 0x21e   : > { %9444 = vst [vmem:[#allocation15_spill] sm:$0xff] %v8457_v42  ;;  %2407 = vmatmul.bf16.gmra.mxu0 %v2036_v60 }
 0x21f   : > { %9446 = vst [vmem:[#allocation17_spill] sm:$0xff] %v8474_v20  ;;  %v6845_v20 = vld [vmem:[#allocation3 + $0x1b8] sm:$0xff] }
 0x220   : > { %5302 = vmatpush.bf16.msra.mxu0 %v6845_v20 }
 0x223   : > { %v8465_v12 = vpop.f32.mrf.mxu0 }
 0x224   : > { %v8508_v63 = vpop.f32.mrf.mxu1  ;;  %v8512_v39 = vpop.f32.mrf.mxu2 }
 0x225   : > { %v8479_v44 = vpop.f32.mrf.mxu3  ;;  %9454 = vst [vmem:[#allocation19_spill] sm:$0xff] %v8508_v63 }
 0x226   : > { %9447 = vst [vmem:[#allocation18_spill] sm:$0xff] %v8479_v44 }
 0x227   : > { %9455 = vst [vmem:[#allocation20_spill] sm:$0xff] %v8512_v39 }
 0x22b   : > { %v2373_v60 = vpop.f32.mrf.mxu0 }
 0x22c   : > { %v2374_v29 = vadd.f32 %v2373_v60, %v2315_v21  ;;  %v6815_v21 = vld [vmem:[#allocation3 + $0xc8] sm:$0xff]  ;;  %v2648_v60 = vsel %vm8495_vm9, 0, %v2647_v19  ;;  %v8526_v20 = vpop.f32.mrf.mxu2 }
 0x22d   : > { %4092 = vmatpush.bf16.msra.mxu1 %v6815_v21  ;;  %2649 = vst [vmem:[#allocation2 + $0x1c] sm:$0x1] %v2648_v60  ;;  %v8515_v23 = vpop.f32.mrf.mxu3  ;;  %v1672_v21 = vadd.f32 %v8261_v11, %v8251_v16  ;;  %v2489_v16 = vadd.s32 1, %v8476_v7  ;;  %v6832_v11 = vld [vmem:[#allocation3 + $0x150] sm:$0xff] }
 0x22e   : > { %v2423_v40 = vadd.f32 %v2374_v29, %v1670_v56  ;;  %2412 = vmatmul.bf16.gmra.mxu0 %v2039_v2  ;;  %v6834_v2 = vld [vmem:[#allocation3 + $0x160] sm:$0xff] }
 0x22f   : > { %4187 = vmatpush.bf16.msrb.mxu3 %v6834_v2  ;;  %v6843_v2 = vld [vmem:[#allocation3 + $0x1a8] sm:$0xff]  ;;  %vm2499_vm11 = vcmp.ge.s32.totalorder %v2489_v16, 0  ;;  %vm2509_vm12 = vcmp.lt.s32.totalorder %v2489_v16, 16  ;;  %v6830_v29 = vld [vmem:[#allocation3 + $0x140] sm:$0xff] }
 0x230   : > { %v2447_v56 = vadd.f32 %v8486_v35, %v2423_v40  ;;  %v7173_v40 = vor.u32 %v7172_v62, %v8430_v61  ;;  %v2320_v61 = vadd.f32 %v8445_v46, %v8439_v41  ;;  %vm8542_vm13 = vmand %vm2499_vm11, %vm2509_vm12 }
 0x232   : > { %v2467_v44 = vmax.f32 %v2447_v56, 0.0  ;;  %v6844_v56 = vld [vmem:[#allocation3 + $0x1b0] sm:$0xff]  ;;  %v2040_v39 = vrot.slane %v7173_v40, 1  ;;  %v1675_v40 = vadd.f32 %v8277_v8, %v8263_v52  ;;  %v8606_v8 = vadd.f32 %v8413_v13, %v8369_v54  ;;  %v9464_v13 = vld [vmem:[#allocation13_spill] sm:$0xff] }
 0x233   : > { %v2375_v19 = vpop.f32.mrf.mxu0  ;;  %4188 = vmatpush.bf16.msrb.mxu3 %v6833_v25  ;;  %5303 = vmatpush.bf16.msra.mxu0 %v6844_v56  ;;  %v6814_v56 = vld [vmem:[#allocation3 + $0xc0] sm:$0xff] }
 0x234   : > { %v2548_v60 = vsel %vm8504_vm10, %v2467_v44, 0.0  ;;  %v2376_v63 = vadd.f32 %v2375_v19, %v2317_v53  ;;  %v2644_v53 = vld [vmem:[#allocation2 + $0xc] sm:$0x1]  ;;  %v2042_v19 = vsel %vm605_vm1, %v2040_v39, %v2041_v27  ;;  %4093 = vmatpush.bf16.msra.mxu1 %v6814_v56  ;;  %vm2866_vm1 = vcmask 1042432  }
 0x235   : > { %v2568_v15 = vpack.c.bf16 %v2548_v60, %v2548_v60  ;;  %v8529_v34 = vpop.f32.mrf.mxu3  ;;  %v2645_v46 = vsel %vm8495_vm9, 0, %v2644_v53  ;;  %v6831_v39 = vld [vmem:[#allocation3 + $0x148] sm:$0xff]  ;;  %v2617_v53 = vld [vmem:[#allocation2 + $0x20] sm:$0x8] }
 0x236   : > { %v2424_v0 = vadd.f32 %v2376_v63, %v1672_v21  ;;  %v2611_v63 = vld [vmem:[#allocation2] sm:$0x8]  ;;  %v8537_v21 = vpop.f32.mrf.mxu1  ;;  %2646 = vst [vmem:[#allocation2 + $0xc] sm:$0x1] %v2645_v46  ;;  %v2618_v46 = vsel %vm8489_vm6, 0, %v2617_v53 }
 0x237   : > { %2588 = vst [vmem:[#allocation2 + $0x4] sm:$0xf] %v2568_v15  ;;  %4189 = vmatpush.bf16.msrb.mxu3 %v6832_v11  ;;  %v2612_v41 = vsel %vm8489_vm6, 0, %v2611_v63  ;;  %5304 = vmatpush.bf16.msra.mxu0 %v6843_v2  ;;  %v6822_v11 = vld [vmem:[#allocation3 + $0x100] sm:$0xff]  ;;  %v1677_v2 = vadd.f32 %v8290_v31, %v8274_v50  ;;  %v9460_v50 = vld [vmem:[#allocation10_spill] sm:$0xff] }
 0x238   : > { %v2448_v62 = vadd.f32 %v8486_v35, %v2424_v0  ;;  %2613 = vst [vmem:[#allocation2] sm:$0x8] %v2612_v41  ;;  %4142 = vmatpush.bf16.msra.mxu2 %v6822_v11 }
 0x239   : > { %2619 = vst [vmem:[#allocation2 + $0x20] sm:$0x8] %v2618_v46 }
 0x23a   : > { %v2468_v44 = vmax.f32 %v2448_v62, 0.0  ;;  %v6842_v62 = vld [vmem:[#allocation3 + $0x1a0] sm:$0xff] }
 0x23b   : > { %v2378_v15 = vpop.f32.mrf.mxu0  ;;  %4190 = vmatpush.bf16.msrb.mxu3 %v6831_v39  ;;  %5305 = vmatpush.bf16.msra.mxu0 %v6842_v62  ;;  %v2325_v62 = vadd.f32 %v8467_v49, %v8463_v59  ;;  %v1682_v59 = vadd.f32 %v8320_v9, %v8295_v10 }
 0x23c   : > { %v2549_v60 = vsel %vm8504_vm10, %v2468_v44, 0.0  ;;  %v2379_v25 = vadd.f32 %v2378_v15, %v2320_v61  ;;  %v2322_v61 = vadd.f32 %v8454_v48, %v8451_v18  ;;  %v6841_v44 = vld [vmem:[#allocation3 + $0x198] sm:$0xff]  ;;  %v2650_v15 = vld [vmem:[#allocation2 + $0x2c] sm:$0x1]  ;;  %v9458_v48 = vld [vmem:[#allocation9_spill] sm:$0xff] }
 0x23d   : > { %v2569_v27 = vpack.c.bf16 %v2549_v60, %v2549_v60  ;;  %v2651_v18 = vsel %vm8495_vm9, 0, %v2650_v15  ;;  %v9459_v60 = vld [vmem:[#allocation12_spill] sm:$0xff]  ;;  %v8562_v39 = vpop.f32.mrf.mxu3  ;;  %v6840_v15 = vld [vmem:[#allocation3 + $0x190] sm:$0xff] }
 0x23e   : > { %v2425_v0 = vadd.f32 %v2379_v25, %v1675_v40  ;;  %2417 = vmatmul.bf16.gmra.mxu0 %v2042_v19  ;;  %v1332_v40 = vadd.f32 %v9458_v48, %v8118_v17  ;;  %v1337_v31 = vadd.f32 %v9460_v50, %v9459_v60  ;;  %2652 = vst [vmem:[#allocation2 + $0x2c] sm:$0x1] %v2651_v18  ;;  %v2698_v18 = vld [vmem:[#allocation2 + $0xc] sm:$0x1] }
 0x23f   : > { %2589 = vst [vmem:[#allocation2 + $0x8] sm:$0xf] %v2569_v27  ;;  %4191 = vmatpush.bf16.msrb.mxu3 %v6830_v29  ;;  %5306 = vmatpush.bf16.msra.mxu0 %v6841_v44  ;;  %v8560_v27 = vpop.f32.mrf.mxu2  ;;  %v3333_v44 = vld [vmem:[#allocation2 + $0x1c] sm:$0x1]  ;;  %v9468_v50 = vld [vmem:[#allocation14_spill] sm:$0xff] }
 0x240   : > { %v2449_v52 = vadd.f32 %v8486_v35, %v2425_v0  ;;  %v1714_v0 = vpop.f32.mrf.mxu1  ;;  %v1396_v29 = vadd.f32 %v8392_v14, %v1337_v31  ;;  %v3485_v46 = vunpack.c.l.b16 %v3333_v44  ;;  %v9469_v31 = vld [vmem:[#allocation19_spill] sm:$0xff] }
 0x242   : > { %v2469_v16 = vmax.f32 %v2449_v52, 0.0  ;;  %v9461_v52 = vld [vmem:[#allocation11_spill] sm:$0xff]  ;;  %v1599_v53 = vadd.f32 %v8401_v43, %v1396_v29  ;;  %v6838_v29 = vld [vmem:[#allocation3 + $0x180] sm:$0xff] }
 0x243   : > { %v2380_v63 = vpop.f32.mrf.mxu0  ;;  %v1391_v17 = vadd.f32 %v9461_v52, %v1332_v40  ;;  %5307 = vmatpush.bf16.msra.mxu0 %v6840_v15 }
 0x244   : > { %v2550_v19 = vsel %vm8542_vm13, %v2469_v16, 0.0  ;;  %v2381_v41 = vadd.f32 %v2380_v63, %v2322_v61  ;;  %v2490_v16 = vadd.s32 2, %v8476_v7 }
 0x245   : > { %v2570_v25 = vpack.c.bf16 %v2550_v19, %v2550_v19  ;;  %v1594_v63 = vadd.f32 %v8211_v24, %v1391_v17  ;;  %v1680_v19 = vadd.f32 %v8302_v58, %v8286_v32  ;;  %v8584_v24 = vadd.f32 %v8347_v51, %v8322_v26 }
 0x246   : > { %v2426_v56 = vadd.f32 %v2381_v41, %v1677_v2  ;;  %v8580_v41 = vadd.f32 %v8336_v45, %v8309_v57  ;;  %v8588_v32 = vadd.f32 %v8363_v28, %v8333_v5  ;;  %vm2500_vm14 = vcmp.ge.s32.totalorder %v2490_v16, 0  ;;  %v6805_v45 = vld [vmem:[#allocation3 + $0x78] sm:$0xff]  ;;  %v8602_v5 = vpop.f32.mrf.mxu3  ;;  %v6839_v28 = vld [vmem:[#allocation3 + $0x188] sm:$0xff] }
 0x247   : > { %2590 = vst [vmem:[#allocation2 + $0x14] sm:$0xf] %v2570_v25  ;;  %vm2510_vm15 = vcmp.lt.s32.totalorder %v2490_v16, 16  ;;  %v8592_v58 = vadd.f32 %v8379_v33, %v8342_v4  ;;  %v8596_v57 = vadd.f32 %v8394_v6, %v8356_v22  ;;  %v1653_v9 = vadd.f32 %v8442_v36, %v1594_v63  ;;  %v8600_v51 = vpop.f32.mrf.mxu2  ;;  %4426 = vmatpush.bf16.msrb.mxu2 %v6805_v45  ;;  %v8650_v16 = vld [vmem:[#allocation2] sm:$0x8]  ;;  %v9471_v63 = vld [vmem:[#allocation20_spill] sm:$0xff] }
 0x248   : > { %v2450_v11 = vadd.f32 %v8486_v35, %v2426_v56  ;;  %v1658_v26 = vadd.f32 %v8465_v12, %v1599_v53  ;;  %v8610_v4 = vadd.f32 %v8423_v55, %v8382_v37  ;;  %v1716_v22 = vpop.f32.mrf.mxu1  ;;  %v2850_v6 = vunpack.c.l.b16 %v2698_v18  ;;  %vm8623_vm0 = vmand %vm2500_vm14, %vm2510_vm15  ;;  %5308 = vmatpush.bf16.msra.mxu0 %v6839_v28  ;;  %v9465_v55 = vld [vmem:[#allocation16_spill] sm:$0xff]  ;;  %v8656_v15 = vld [vmem:[#allocation2 + $0x4] sm:$0xff]  }
 0x249   : > { %v8615_v36 = vadd.f32 %v8447_v47, %v8389_v38  ;;  %v8619_v12 = vadd.f32 %v8459_v30, %v8407_v1  ;;  %v8627_v37 = vpack.c.b16 %v3485_v46, %v3485_v46  ;;  %v8631_v48 = vadd.f32 %v9465_v55, %v9464_v13  ;;  %v9466_v38 = vld [vmem:[#allocation17_spill] sm:$0xff]  ;;  %v9467_v47 = vld [vmem:[#allocation18_spill] sm:$0xff]  ;;  %v7352_v30 = vld [vmem:[#allocation2 + $0x10] sm:$0x8] }
 0x24a   : > { %v2470_v61 = vmax.f32 %v2450_v11, 0.0  ;;  %v2327_v40 = vadd.f32 %v9467_v47, %v9466_v38  ;;  %v8636_v1 = vadd.s32 3, %v8476_v7  ;;  %v8640_v25 = vadd.f32 %v9469_v31, %v9468_v50  ;;  %v2620_v28 = vld [vmem:[#allocation2 + $0x30] sm:$0x8] }
 0x24b   : > { %v2383_v2 = vpop.f32.mrf.mxu0  ;;  %v8643_v56 = vadd.f32 %v8537_v21, %v1653_v9  ;;  %v8648_v52 = vadd.f32 %v1716_v22, %v1658_v26  ;;  %v2330_v53 = vadd.f32 %v8515_v23, %v9471_v63  ;;  %v8658_v21 = vld [vmem:[#allocation2] sm:$0xf0]   ;;  %v6797_v9 = vld [vmem:[#allocation3 + $0x38] sm:$0xff]  ;;  %v8678_v26 = vld [vmem:[#allocation2 + $0x20] sm:$0x8] }
 0x24c   : > { %v2551_v49 = vsel %vm8542_vm13, %v2470_v61, 0.0  ;;  %v2384_v14 = vadd.f32 %v2383_v2, %v2325_v62  ;;  %v9470_v62 = vld [vmem:[#allocation15_spill] sm:$0xff]  ;;  %v3334_v61 = vld [vmem:[#allocation2 + $0x2c] sm:$0x1]  ;;  %5309 = vmatpush.bf16.msra.mxu0 %v6838_v29  ;;  %vm2501_vm2 = vcmp.ge.s32.totalorder %v8636_v1, 0  ;;  %vm2511_vm3 = vcmp.lt.s32.totalorder %v8636_v1, 16  ;;  %4377 = vmatpush.bf16.msrb.mxu1 %v6797_v9 }
 0x24d   : > { %v2571_v43 = vpack.c.bf16 %v2551_v49, %v2551_v49  ;;  %v8646_v11 = vadd.f32 %v1714_v0, %v9470_v62  ;;  %v8660_v0 = vpack.c.b16 %v2850_v6, %v2850_v6  ;;  %v8664_v49 = vadd.f32 %v8529_v34, %v8526_v20  ;;  %v2653_v22 = vld [vmem:[#allocation2 + $0x3c] sm:$0x1]  ;;  %vm8702_vm5 = vmand %vm2501_vm2, %vm2511_vm3  ;;  %v6804_v1 = vld [vmem:[#allocation3 + $0x70] sm:$0xff] }
 0x24e   : > { %v2427_v10 = vadd.f32 %v2384_v14, %v1680_v19  ;;  %v3502_v14 = vrot.slane %v8627_v37, 5  ;;  %v7393_v18 = vld [vmem:[#allocation2 + $0x10] sm:$0xf0]   ;;  %v8675_v20 = vadd.f32 %v8562_v39, %v8560_v27  ;;  %v2339_v27 = vpop.f32.mrf.mxu3  ;;  %v2621_v39 = vsel %vm8489_vm6, 0, %v2620_v28  ;;  %4427 = vmatpush.bf16.msrb.mxu2 %v6804_v1 }
 0x24f   : > { %2591 = vst [vmem:[#allocation2 + $0x18] sm:$0xf] %v2571_v43  ;;  %v8667_v43 = vld [vmem:[#allocation2 + $0x20] sm:$0x8]  ;;  %v8681_v45 = vpop.f32.mrf.mxu2  ;;  %v2868_v6 = vrot.slane %v8660_v0, 5  ;;  %v7353_v37 = vor.u32 %v7393_v18, %v7352_v30  ;;  %v2654_v47 = vsel %vm8495_vm9, 0, %v2653_v22 }
 0x250   : > { %v2451_v33 = vadd.f32 %v8486_v35, %v2427_v10  ;;  %v3486_v10 = vunpack.c.l.b16 %v3334_v61  ;;  %2622 = vst [vmem:[#allocation2 + $0x30] sm:$0x8] %v2621_v39  ;;  %v6852_v0 = vld [vmem:[#allocation3 + $0x1f0] sm:$0xff] }
 0x251   : > { %v3529_v50 = vshll.u32 %v7353_v37, 16  ;;  %2655 = vst [vmem:[#allocation2 + $0x3c] sm:$0x1] %v2654_v47 }
 0x252   : > { %v2471_v60 = vmax.f32 %v2451_v33, 0.0  ;;  %v2732_v33 = vunpack.c.h.b16 %v8656_v15  ;;  %v8687_v38 = vpack.c.b16 %v3486_v10, %v3486_v10 }
 0x253   : > { %v2385_v17 = vpop.f32.mrf.mxu0 }
 0x254   : > { %v2552_v44 = vsel %vm8623_vm0, %v2471_v60, 0.0  ;;  %v2386_v2 = vadd.f32 %v2385_v17, %v2327_v40  ;;  %v3526_v60 = vshrl.u32 %v7353_v37, 16 }
 0x255   : > { %v2572_v19 = vpack.c.bf16 %v2552_v44, %v2552_v44 }
 0x256   : > { %v2428_v46 = vadd.f32 %v2386_v2, %v1682_v59  ;;  %v8671_v23 = vld [vmem:[#allocation2 + $0x14] sm:$0xff]   ;;  %v3528_v63 = vrot.slane %v3526_v60, 3  ;;  %v3531_v2 = vrot.slane %v3529_v50, 4  ;;  %v8710_v50 = vadd.f32 %v8602_v5, %v8600_v51 }
 0x257   : > { %2592 = vst [vmem:[#allocation2 + $0x24] sm:$0xf] %v2572_v19  ;;  %v3367_v34 = vunpack.c.h.b16 %v8671_v23  ;;  %v3501_v29 = vrot.slane %v8671_v23, 5  ;;  %v3414_v61 = vshrl.u32 %v8671_v23, 16  ;;  %v3417_v47 = vshll.u32 %v8671_v23, 16 }
 0x258   : > { %v2452_v59 = vadd.f32 %v8486_v35, %v2428_v46  ;;  %v3532_v9 = vor.u32 %v3531_v2, %v3528_v63  ;;  %v3505_v23 = vrot.slane %v8687_v38, 5  ;;  %v2341_v63 = vpop.f32.mrf.mxu3  ;;  %v8718_v2 = vld [vmem:[#allocation2 + $0x30] sm:$0x8] }
 0x259   : > { %v3390_v13 = vpack.c.b16 %v3367_v34, %v3367_v34  ;;  %v3503_v10 = vsel %vm2866_vm1, %v3501_v29, %v3502_v14  ;;  %v3552_v34 = vshrl.u32 %v3501_v29, 16 }
 0x25a   : > { %v2472_v55 = vmax.f32 %v2452_v59, 0.0  ;;  %v3555_v59 = vshll.u32 %v3501_v29, 16  ;;  %v3560_v54 = vshrl.u32 %v3503_v10, 16  ;;  %v3563_v28 = vshll.u32 %v3503_v10, 16 }
 0x25b   : > { %v2388_v40 = vpop.f32.mrf.mxu0  ;;  %v3534_v31 = vshrl.u32 %v3390_v13, 16  ;;  %v3537_v62 = vshll.u32 %v3390_v13, 16  ;;  %v3554_v37 = vrot.slane %v3552_v34, 3  ;;  %v3416_v13 = vrot.slane %v3414_v61, 4 }
 0x25c   : > { %v2553_v30 = vsel %vm8623_vm0, %v2472_v55, 0.0  ;;  %v2389_v17 = vadd.f32 %v2388_v40, %v2330_v53  ;;  %v3557_v14 = vrot.slane %v3555_v59, 4  ;;  %v3562_v39 = vrot.slane %v3560_v54, 3 }
 0x25d   : > { %v2573_v44 = vpack.c.bf16 %v2553_v30, %v2553_v30  ;;  %v3536_v19 = vrot.slane %v3534_v31, 3  ;;  %v3539_v18 = vrot.slane %v3537_v62, 4  ;;  %v3565_v55 = vrot.slane %v3563_v28, 4  ;;  %v2282_v62 = vpop.f32.mrf.mxu2  ;;  %v8715_v30 = vld [vmem:[#allocation2 + $0x30] sm:$0x8] }
 0x25e   : > { %v2429_v46 = vadd.f32 %v2389_v17, %v8580_v41  ;;  %v8713_v31 = vadd.s32 4, %v8476_v7  ;;  %v3558_v29 = vor.u32 %v3557_v14, %v3554_v37  ;;  %v8737_v28 = vadd.f32 %v2341_v63, %v2282_v62 }
 0x25f   : > { %2593 = vst [vmem:[#allocation2 + $0x28] sm:$0xf] %v2573_v44  ;;  %v3540_v22 = vor.u32 %v3539_v18, %v3536_v19  ;;  %v3566_v61 = vor.u32 %v3565_v55, %v3562_v39  ;;  %v3419_v44 = vrot.slane %v3417_v47, 5  ;;  %v3335_v19 = vld [vmem:[#allocation2 + $0x3c] sm:$0x1]  ;;  %v8727_v18 = vadd.s32 5, %v8476_v7 }
 0x260   : > { %v2453_v53 = vadd.f32 %v8486_v35, %v2429_v46  ;;  %v8724_v46 = vadd.f32 %v2339_v27, %v8681_v45  ;;  %vm2502_vm7 = vcmp.ge.s32.totalorder %v8713_v31, 0  ;;  %vm2512_vm8 = vcmp.lt.s32.totalorder %v8713_v31, 16  ;;  %v7395_v27 = vld [vmem:[#allocation2 + $0x20] sm:$0xf0]  }
 0x261   : > { %v3541_v60 = vsel %vm2891_vm4, %v3532_v9, %v3540_v22  ;;  %v3567_v34 = vsel %vm2891_vm4, %v3558_v29, %v3566_v61  ;;  %v3420_v9 = vor.u32 %v3419_v44, %v3416_v13  ;;  %vm8756_vm10 = vmand %vm2502_vm7, %vm2512_vm8  ;;  %vm2503_vm11 = vcmp.ge.s32.totalorder %v8727_v18, 0 }
 0x262   : > { %v2473_v40 = vmax.f32 %v2453_v53, 0.0  ;;  %4094 = vmatmul.bf16.vlgmr.msra.gmra.mxu1 %v3541_v60  ;;  %4192 = vmatmul.bf16.vlgmr.msrb.gmra.mxu3 %v3567_v34  ;;  %v3487_v53 = vunpack.c.l.b16 %v3335_v19  ;;  %vm2513_vm12 = vcmp.lt.s32.totalorder %v8727_v18, 16 }
 0x263   : > { %v2390_v17 = vpop.f32.mrf.mxu0  ;;  %v3543_v22 = vshrl.u32 %v3420_v9, 16  ;;  %v3546_v37 = vshll.u32 %v3420_v9, 16  ;;  %vm8798_vm13 = vmand %vm2503_vm11, %vm2513_vm12 }
 0x264   : > { %v2554_v51 = vsel %vm8702_vm5, %v2473_v40, 0.0  ;;  %v2391_v5 = vadd.f32 %v2390_v17, %v8664_v49  ;;  %v7394_v49 = vld [vmem:[#allocation2 + $0x20] sm:$0xf0]   ;;  %v8742_v55 = vpack.c.b16 %v3487_v53, %v3487_v53  ;;  %v7361_v17 = vor.u32 %v7395_v27, %v8678_v26 }
 0x265   : > { %v2574_v10 = vpack.c.bf16 %v2554_v51, %v2554_v51  ;;  %v3545_v47 = vrot.slane %v3543_v22, 3  ;;  %v3548_v40 = vrot.slane %v3546_v37, 4  ;;  %v7357_v60 = vor.u32 %v7394_v49, %v8667_v43 }
 0x266   : > { %v2430_v59 = vadd.f32 %v2391_v5, %v8584_v24  ;;  %v8733_v54 = vld [vmem:[#allocation2 + $0x24] sm:$0xff]   ;;  %v6796_v24 = vld [vmem:[#allocation3 + $0x30] sm:$0xff]  ;;  %v4742_v27 = vshrl.u32 %v7361_v17, 16  ;;  %v4745_v22 = vshll.u32 %v7361_v17, 16 }
 0x267   : > { %v8735_v45 = vld [vmem:[#allocation2 + $0x24] sm:$0xff]   ;;  %2594 = vst [vmem:[#allocation2 + $0x34] sm:$0xf] %v2574_v10  ;;  %v3370_v13 = vunpack.c.h.b16 %v8733_v54  ;;  %4378 = vmatpush.bf16.msrb.mxu1 %v6796_v24  ;;  %v3549_v61 = vor.u32 %v3548_v40, %v3545_v47  ;;  %v3569_v63 = vshrl.u32 %v7357_v60, 16  ;;  %v3572_v19 = vshll.u32 %v7357_v60, 16  ;;  %v2285_v40 = vpop.f32.mrf.mxu2  ;;  %v2344_v60 = vpop.f32.mrf.mxu3 }
 0x268   : > { %v2454_v14 = vadd.f32 %v8486_v35, %v2430_v59  ;;  %v4583_v39 = vunpack.c.h.b16 %v8735_v45  ;;  %v3504_v41 = vrot.slane %v8733_v54, 5  ;;  %v4747_v47 = vrot.slane %v4745_v22, 4 }
 0x269   : > { %v3392_v1 = vpack.c.b16 %v3370_v13, %v3370_v13  ;;  %4143 = vmatmul.bf16.vlgmr.msra.gmra.mxu2 %v3549_v61  ;;  %v3571_v43 = vrot.slane %v3569_v63, 3  ;;  %v3574_v59 = vrot.slane %v3572_v19, 4 }
 0x26a   : > { %v2474_v62 = vmax.f32 %v2454_v14, 0.0  ;;  %v4606_v29 = vpack.c.b16 %v4583_v39, %v4583_v39  ;;  %v4744_v39 = vrot.slane %v4742_v27, 3  ;;  %v3506_v17 = vsel %vm2866_vm1, %v3504_v41, %v3505_v23 }
 0x26b   : > { %v2393_v44 = vpop.f32.mrf.mxu0  ;;  %v3577_v51 = vshrl.u32 %v3392_v1, 16  ;;  %v3580_v34 = vshll.u32 %v3392_v1, 16  ;;  %v3575_v37 = vor.u32 %v3574_v59, %v3571_v43  ;;  %v3598_v19 = vshll.u32 %v3504_v41, 16 }
 0x26c   : > { %v2555_v5 = vsel %vm8702_vm5, %v2474_v62, 0.0  ;;  %v2394_v10 = vadd.f32 %v2393_v44, %v8675_v20  ;;  %v4750_v13 = vshrl.u32 %v4606_v29, 16  ;;  %v4753_v24 = vshll.u32 %v4606_v29, 16 }
 0x26d   : > { %v2575_v9 = vpack.c.bf16 %v2555_v5, %v2555_v5  ;;  %v3579_v49 = vrot.slane %v3577_v51, 3  ;;  %v3582_v26 = vrot.slane %v3580_v34, 4  ;;  %v3595_v29 = vshrl.u32 %v3504_v41, 16 }
 0x26e   : > { %v2431_v53 = vadd.f32 %v2394_v10, %v8588_v32  ;;  %v4752_v1 = vrot.slane %v4750_v13, 3  ;;  %v4755_v62 = vrot.slane %v4753_v24, 4  ;;  %v4748_v63 = vor.u32 %v4747_v47, %v4744_v39  ;;  %v7396_v41 = vld [vmem:[#allocation2 + $0x30] sm:$0xf0]  }
 0x26f   : > { %2595 = vst [vmem:[#allocation2 + $0x38] sm:$0xf] %v2575_v9  ;;  %v3583_v20 = vor.u32 %v3582_v26, %v3579_v49  ;;  %v3597_v31 = vrot.slane %v3595_v29, 3  ;;  %v3603_v10 = vshrl.u32 %v3506_v17, 16  ;;  %v3606_v34 = vshll.u32 %v3506_v17, 16  ;;  %v6803_v9 = vld [vmem:[#allocation3 + $0x68] sm:$0xff] }
 0x270   : > { %v2455_v14 = vadd.f32 %v8486_v35, %v2431_v53  ;;  %v4756_v51 = vor.u32 %v4755_v62, %v4752_v1  ;;  %v3600_v59 = vrot.slane %v3598_v19, 4  ;;  %v3422_v23 = vshrl.u32 %v8733_v54, 16  ;;  %4428 = vmatpush.bf16.msrb.mxu2 %v6803_v9  ;;  %v6795_v1 = vld [vmem:[#allocation3 + $0x28] sm:$0xff] }
 0x271   : > { %v3584_v44 = vsel %vm2891_vm4, %v3575_v37, %v3583_v20  ;;  %v3605_v26 = vrot.slane %v3603_v10, 3  ;;  %v3608_v27 = vrot.slane %v3606_v34, 4  ;;  %v3425_v24 = vshll.u32 %v8733_v54, 16  ;;  %v7397_v20 = vld [vmem:[#allocation2 + $0x30] sm:$0xf0]   ;;  %4379 = vmatpush.bf16.msrb.mxu1 %v6795_v1 }
 0x272   : > { %v2475_v61 = vmax.f32 %v2455_v14, 0.0  ;;  %4099 = vmatmul.bf16.gmra.mxu1 %v3584_v44  ;;  %v4757_v53 = vsel %vm2891_vm4, %v4748_v63, %v4756_v51  ;;  %v3601_v37 = vor.u32 %v3600_v59, %v3597_v31  ;;  %v3424_v13 = vrot.slane %v3422_v23, 4  ;;  %v8785_v51 = vpop.f32.mrf.mxu2 }
 0x273   : > { %v2395_v5 = vpop.f32.mrf.mxu0  ;;  %5310 = vmatmul.bf16.vlgmr.msra.gmra.mxu0 %v4757_v53  ;;  %v3609_v39 = vor.u32 %v3608_v27, %v3605_v26  ;;  %v8777_v47 = vadd.f32 %v2344_v60, %v2285_v40  ;;  %v3427_v54 = vrot.slane %v3425_v24, 5  ;;  %v7369_v40 = vor.u32 %v7397_v20, %v8718_v2 }
 0x274   : > { %v2556_v43 = vsel %vm8756_vm10, %v2475_v61, 0.0  ;;  %v2396_v38 = vadd.f32 %v2395_v5, %v8710_v50  ;;  %v7365_v61 = vor.u32 %v7396_v41, %v8715_v30  ;;  %v8787_v5 = vpop.f32.mrf.mxu3 }
 0x275   : > { %v2576_v49 = vpack.c.bf16 %v2556_v43, %v2556_v43  ;;  %v3610_v29 = vsel %vm2891_vm4, %v3601_v37, %v3609_v39  ;;  %v3428_v19 = vor.u32 %v3427_v54, %v3424_v13  ;;  %v4785_v41 = vshrl.u32 %v7369_v40, 16 }
 0x276   : > { %v2432_v22 = vadd.f32 %v2396_v38, %v8592_v58  ;;  %v8773_v50 = vld [vmem:[#allocation2 + $0x34] sm:$0xff]   ;;  %4197 = vmatmul.bf16.gmra.mxu3 %v3610_v29  ;;  %v3612_v10 = vshrl.u32 %v7365_v61, 16  ;;  %v3615_v34 = vshll.u32 %v7365_v61, 16  ;;  %v4788_v20 = vshll.u32 %v7369_v40, 16 }
 0x277   : > { %v8775_v14 = vld [vmem:[#allocation2 + $0x34] sm:$0xff]   ;;  %2596 = vst [vmem:[#allocation2 + $0x44] sm:$0xf] %v2576_v49  ;;  %v3373_v58 = vunpack.c.h.b16 %v8773_v50  ;;  %v3586_v38 = vshrl.u32 %v3428_v19, 16  ;;  %v3589_v59 = vshll.u32 %v3428_v19, 16 }
 0x278   : > { %v2456_v62 = vadd.f32 %v8486_v35, %v2432_v22  ;;  %v4586_v17 = vunpack.c.h.b16 %v8775_v14  ;;  %v3614_v53 = vrot.slane %v3612_v10, 3  ;;  %v3617_v2 = vrot.slane %v3615_v34, 4 }
 0x279   : > { %v3394_v44 = vpack.c.b16 %v3373_v58, %v3373_v58  ;;  %v3588_v27 = vrot.slane %v3586_v38, 3  ;;  %v3591_v22 = vrot.slane %v3589_v59, 4 }
 0x27a   : > { %v2476_v63 = vmax.f32 %v2456_v62, 0.0  ;;  %v4608_v60 = vpack.c.b16 %v4586_v17, %v4586_v17  ;;  %v3618_v24 = vor.u32 %v3617_v2, %v3614_v53  ;;  %v4787_v62 = vrot.slane %v4785_v41, 3 }
 0x27b   : > { %v2398_v31 = vpop.f32.mrf.mxu0  ;;  %v3620_v9 = vshrl.u32 %v3394_v44, 16  ;;  %v3623_v43 = vshll.u32 %v3394_v44, 16  ;;  %v3592_v39 = vor.u32 %v3591_v22, %v3588_v27  ;;  %v3507_v17 = vrot.slane %v8773_v50, 5  ;;  %v2623_v22 = vld [vmem:[#allocation2 + $0x40] sm:$0x8] }
 0x27c   : > { %v2557_v30 = vsel %vm8756_vm10, %v2476_v63, 0.0  ;;  %v2399_v23 = vadd.f32 %v2398_v31, %v8724_v46  ;;  %v4793_v1 = vshrl.u32 %v4608_v60, 16  ;;  %v4796_v54 = vshll.u32 %v4608_v60, 16  ;;  %v2349_v38 = vpop.f32.mrf.mxu3 }
 0x27d   : > { %v2577_v49 = vpack.c.bf16 %v2557_v30, %v2557_v30  ;;  %v3622_v26 = vrot.slane %v3620_v9, 3  ;;  %v3625_v13 = vrot.slane %v3623_v43, 4  ;;  %4148 = vmatmul.bf16.gmra.mxu2 %v3592_v39  ;;  %v3508_v63 = vrot.slane %v8742_v55, 5  ;;  %v2290_v30 = vpop.f32.mrf.mxu2  ;;  %v6802_v39 = vld [vmem:[#allocation3 + $0x60] sm:$0xff] }
 0x27e   : > { %v2433_v37 = vadd.f32 %v2399_v23, %v8596_v57  ;;  %v4790_v57 = vrot.slane %v4788_v20, 4  ;;  %v4795_v44 = vrot.slane %v4793_v1, 3  ;;  %v4798_v40 = vrot.slane %v4796_v54, 4  ;;  %v6794_v54 = vld [vmem:[#allocation3 + $0x20] sm:$0xff]  ;;  %4429 = vmatpush.bf16.msrb.mxu2 %v6802_v39 }
 0x27f   : > { %2597 = vst [vmem:[#allocation2 + $0x48] sm:$0xf] %v2577_v49  ;;  %v3626_v58 = vor.u32 %v3625_v13, %v3622_v26  ;;  %v3638_v31 = vshrl.u32 %v3507_v17, 16  ;;  %v3641_v10 = vshll.u32 %v3507_v17, 16  ;;  %v3509_v9 = vsel %vm2866_vm1, %v3507_v17, %v3508_v63  ;;  %v8813_v13 = vld [vmem:[#allocation2 + $0x40] sm:$0xf0]   ;;  %4380 = vmatpush.bf16.msrb.mxu1 %v6794_v54 }
 0x280   : > { %v2457_v32 = vadd.f32 %v8486_v35, %v2433_v37  ;;  %v4791_v19 = vor.u32 %v4790_v57, %v4787_v62  ;;  %v3430_v43 = vshrl.u32 %v8773_v50, 16  ;;  %v4799_v23 = vor.u32 %v4798_v40, %v4795_v44  ;;  %v7371_v57 = vld [vmem:[#allocation2 + $0x40] sm:$0xf0]  }
 0x281   : > { %v3627_v61 = vsel %vm2891_vm4, %v3618_v24, %v3626_v58  ;;  %v3640_v55 = vrot.slane %v3638_v31, 3  ;;  %v3643_v49 = vrot.slane %v3641_v10, 4  ;;  %v3646_v2 = vshrl.u32 %v3509_v9, 16 }
 0x282   : > { %v2477_v29 = vmax.f32 %v2457_v32, 0.0  ;;  %4104 = vmatmul.bf16.gmra.mxu1 %v3627_v61  ;;  %v3649_v26 = vshll.u32 %v3509_v9, 16  ;;  %v3432_v27 = vrot.slane %v3430_v43, 4  ;;  %v3433_v41 = vshll.u32 %v8773_v50, 16 }
 0x283   : > { %v2400_v18 = vpop.f32.mrf.mxu0  ;;  %v3644_v24 = vor.u32 %v3643_v49, %v3640_v55  ;;  %v8819_v20 = vadd.f32 %v8787_v5, %v8785_v51  ;;  %v3648_v32 = vrot.slane %v3646_v2, 3  ;;  %v2494_v1 = vadd.s32 6, %v8476_v7  ;;  %v2656_v51 = vld [vmem:[#allocation2 + $0x4c] sm:$0x1] }
 0x284   : > { %v2558_v34 = vsel %vm8798_vm13, %v2477_v29, 0.0  ;;  %v2401_v60 = vadd.f32 %v2400_v18, %v8737_v28  ;;  %v4800_v28 = vsel %vm2891_vm4, %v4791_v19, %v4799_v23  ;;  %v3651_v58 = vrot.slane %v3649_v26, 4  ;;  %v2351_v55 = vpop.f32.mrf.mxu3 }
 0x285   : > { %v2578_v59 = vpack.c.bf16 %v2558_v34, %v2558_v34  ;;  %5315 = vmatmul.bf16.gmra.mxu0 %v4800_v28  ;;  %v3435_v17 = vrot.slane %v3433_v41, 5  ;;  %v8825_v29 = vadd.f32 %v2349_v38, %v2290_v30  ;;  %v2624_v50 = vsel %vm8489_vm6, 0, %v2623_v22  ;;  %v2292_v23 = vpop.f32.mrf.mxu2 }
 0x286   : > { %v2434_v53 = vadd.f32 %v2401_v60, %v8606_v8  ;;  %v8811_v37 = vld [vmem:[#allocation2 + $0x44] sm:$0xff]   ;;  %v3652_v61 = vor.u32 %v3651_v58, %v3648_v32  ;;  %vm2504_vm14 = vcmp.ge.s32.totalorder %v2494_v1, 0  ;;  %vm2514_vm15 = vcmp.lt.s32.totalorder %v2494_v1, 16  ;;  %2625 = vst [vmem:[#allocation2 + $0x40] sm:$0x8] %v2624_v50 }
 0x287   : > { %2598 = vst [vmem:[#allocation2 + $0x54] sm:$0xf] %v2578_v59  ;;  %v8823_v62 = vld [vmem:[#allocation2 + $0x44] sm:$0xff]   ;;  %v3436_v44 = vor.u32 %v3435_v17, %v3432_v27  ;;  %v3376_v19 = vunpack.c.h.b16 %v8811_v37  ;;  %v2657_v34 = vsel %vm8495_vm9, 0, %v2656_v51  ;;  %v3510_v22 = vrot.slane %v8811_v37, 5  ;;  %vm8842_vm0 = vmand %vm2504_vm14, %vm2514_vm15 }
 0x288   : > { %v2458_v8 = vadd.f32 %v8486_v35, %v2434_v53  ;;  %v4589_v40 = vunpack.c.h.b16 %v8823_v62  ;;  %v3653_v31 = vsel %vm2891_vm4, %v3644_v24, %v3652_v61  ;;  %2658 = vst [vmem:[#allocation2 + $0x4c] sm:$0x1] %v2657_v34  ;;  %v8846_v32 = vadd.f32 %v2351_v55, %v2292_v23 }
 0x289   : > { %4202 = vmatmul.bf16.gmra.mxu3 %v3653_v31  ;;  %v3629_v9 = vshrl.u32 %v3436_v44, 16  ;;  %v3632_v43 = vshll.u32 %v3436_v44, 16  ;;  %v3396_v30 = vpack.c.b16 %v3376_v19, %v3376_v19  ;;  %v3681_v51 = vshrl.u32 %v3510_v22, 16 }
 0x28a   : > { %v2478_v5 = vmax.f32 %v2458_v8, 0.0  ;;  %v4610_v59 = vpack.c.b16 %v4589_v40, %v4589_v40 }
 0x28b   : > { %v2403_v63 = vpop.f32.mrf.mxu0  ;;  %v3631_v46 = vrot.slane %v3629_v9, 3  ;;  %v3634_v49 = vrot.slane %v3632_v43, 4  ;;  %v3663_v53 = vshrl.u32 %v3396_v30, 16  ;;  %v3666_v2 = vshll.u32 %v3396_v30, 16 }
 0x28c   : > { %v2559_v18 = vsel %vm8798_vm13, %v2478_v5, 0.0  ;;  %v2404_v10 = vadd.f32 %v2403_v63, %v8777_v47  ;;  %v4836_v26 = vshrl.u32 %v4610_v59, 16  ;;  %v4839_v27 = vshll.u32 %v4610_v59, 16 }
 0x28d   : > { %v2579_v60 = vpack.c.bf16 %v2559_v18, %v2559_v18  ;;  %v3635_v28 = vor.u32 %v3634_v49, %v3631_v46  ;;  %v3665_v41 = vrot.slane %v3663_v53, 3  ;;  %v3668_v39 = vrot.slane %v3666_v2, 4  ;;  %v7180_v8 = vld [vmem:[#allocation2 + $0x40] sm:$0x8]  ;;  %v2626_v46 = vld [vmem:[#allocation2 + $0x50] sm:$0x8] }
 0x28e   : > { %v2435_v38 = vadd.f32 %v2404_v10, %v8610_v4  ;;  %v7176_v4 = vld [vmem:[#allocation2 + $0x40] sm:$0x8]  ;;  %v4838_v54 = vrot.slane %v4836_v26, 3  ;;  %v4841_v17 = vrot.slane %v4839_v27, 4  ;;  %v3684_v5 = vshll.u32 %v3510_v22, 16  ;;  %v6801_v26 = vld [vmem:[#allocation3 + $0x58] sm:$0xff] }
 0x28f   : > { %2599 = vst [vmem:[#allocation2 + $0x58] sm:$0xf] %v2579_v60  ;;  %4153 = vmatmul.bf16.gmra.mxu2 %v3635_v28  ;;  %v7177_v61 = vor.u32 %v8813_v13, %v7176_v4  ;;  %v7181_v44 = vor.u32 %v7371_v57, %v7180_v8  ;;  %v3336_v19 = vld [vmem:[#allocation2 + $0x4c] sm:$0x1]  ;;  %v8852_v10 = vrot.slane %v3681_v51, 3  ;;  %v3438_v13 = vshrl.u32 %v8811_v37, 16  ;;  %v2295_v8 = vpop.f32.mrf.mxu2 }
 0x290   : > { %v2459_v47 = vadd.f32 %v8486_v35, %v2435_v38  ;;  %v3669_v35 = vor.u32 %v3668_v39, %v3665_v41  ;;  %v4842_v18 = vor.u32 %v4841_v17, %v4838_v54  ;;  %v3488_v31 = vunpack.c.l.b16 %v3336_v19  ;;  %v8859_v49 = vld [vmem:[%s9428_s4] ss:$0 sm:$0xff]  ;;  %v6793_v27 = vld [vmem:[#allocation3 + $0x18] sm:$0xff]  ;;  %4430 = vmatpush.bf16.msrb.mxu2 %v6801_v26  ;;  %v7372_v19 = vld [vmem:[#allocation2 + $0x50] sm:$0xf0]  }
 0x291   : > { %v3655_v34 = vshrl.u32 %v7177_v61, 16  ;;  %v3658_v60 = vshll.u32 %v7177_v61, 16  ;;  %v4828_v9 = vshrl.u32 %v7181_v44, 16  ;;  %v4831_v43 = vshll.u32 %v7181_v44, 16  ;;  %4381 = vmatpush.bf16.msrb.mxu1 %v6793_v27 }
 0x292   : > { %v2479_v58 = vmax.f32 %v2459_v47, 0.0  ;;  %v3496_v38 = vpack.c.b16 %v3488_v31, %v3488_v31  ;;  %v3686_v59 = vrot.slane %v3684_v5, 4  ;;  %v3441_v41 = vshll.u32 %v8811_v37, 16 }
 0x293   : > { %v2405_v50 = vpop.f32.mrf.mxu0  ;;  %v3657_v57 = vrot.slane %v3655_v34, 3  ;;  %v3660_v23 = vrot.slane %v3658_v60, 4  ;;  %v4833_v55 = vrot.slane %v4831_v43, 4  ;;  %v2495_v39 = vadd.s32 7, %v8476_v7  ;;  %v2659_v34 = vld [vmem:[#allocation2 + $0x5c] sm:$0x1] }
 0x294   : > { %v2560_v1 = vsel %vm8842_vm0, %v2479_v58, 0.0  ;;  %v2406_v63 = vadd.f32 %v2405_v50, %v8819_v20  ;;  %v4830_v20 = vrot.slane %v4828_v9, 3  ;;  %v3511_v2 = vrot.slane %v3496_v38, 5  ;;  %v2354_v58 = vpop.f32.mrf.mxu3 }
 0x295   : > { %v2580_v40 = vpack.c.bf16 %v2560_v1, %v2560_v1  ;;  %v3687_v47 = vor.u32 %v3686_v59, %v8852_v10  ;;  %v3661_v28 = vor.u32 %v3660_v23, %v3657_v57  ;;  %v8866_v51 = vadd.f32 %v2354_v58, %v2295_v8 }
 0x296   : > { %v2436_v30 = vadd.f32 %v2406_v63, %v8615_v36  ;;  %v3440_v36 = vrot.slane %v3438_v13, 4  ;;  %v4834_v4 = vor.u32 %v4833_v55, %v4830_v20  ;;  %v3512_v17 = vsel %vm2866_vm1, %v3510_v22, %v3511_v2  ;;  %v8872_v63 = vld [vmem:[#allocation2 + $0x54] sm:$0xff]  }
 0x297   : > { %2600 = vst [vmem:[#allocation2 + $0x64] sm:$0xf] %v2580_v40  ;;  %v2627_v5 = vsel %vm8489_vm6, 0, %v2626_v46  ;;  %v3670_v1 = vsel %vm2891_vm4, %v3661_v28, %v3669_v35  ;;  %v3689_v37 = vshrl.u32 %v3512_v17, 16  ;;  %v3692_v44 = vshll.u32 %v3512_v17, 16  ;;  %v8877_v10 = vld [vmem:[#allocation2 + $0x54] sm:$0xff]   ;;  %v2297_v17 = vpop.f32.mrf.mxu2 }
 0x298   : > { %v2460_v53 = vadd.f32 %v8859_v49, %v2436_v30  ;;  %v4843_v61 = vsel %vm2891_vm4, %v4834_v4, %v4842_v18  ;;  %2628 = vst [vmem:[#allocation2 + $0x50] sm:$0x8] %v2627_v5  ;;  %4109 = vmatmul.bf16.gmra.mxu1 %v3670_v1  ;;  %v3443_v40 = vrot.slane %v3441_v41, 5  ;;  %vm2505_vm2 = vcmp.ge.s32.totalorder %v2495_v39, 0  ;;  %v7373_v35 = vld [vmem:[#allocation2 + $0x50] sm:$0xf0]  }
 0x299   : > { %5320 = vmatmul.bf16.gmra.mxu0 %v4843_v61  ;;  %v3691_v60 = vrot.slane %v3689_v37, 3  ;;  %v3694_v9 = vrot.slane %v3692_v44, 4  ;;  %vm2515_vm3 = vcmp.lt.s32.totalorder %v2495_v39, 16  ;;  %v3379_v38 = vunpack.c.h.b16 %v8872_v63 }
 0x29a   : > { %v2480_v54 = vmax.f32 %v2460_v53, 0.0  ;;  %v3444_v43 = vor.u32 %v3443_v40, %v3440_v36  ;;  %v4592_v59 = vunpack.c.h.b16 %v8877_v10  ;;  %vm8887_vm5 = vmand %vm2505_vm2, %vm2515_vm3 }
 0x29b   : > { %v2408_v50 = vpop.f32.mrf.mxu0  ;;  %v3695_v24 = vor.u32 %v3694_v9, %v3691_v60  ;;  %v3398_v20 = vpack.c.b16 %v3379_v38, %v3379_v38 }
 0x29c   : > { %v2561_v22 = vsel %vm8842_vm0, %v2480_v54, 0.0  ;;  %v2409_v31 = vadd.f32 %v2408_v50, %v8825_v29  ;;  %v2660_v29 = vsel %vm8495_vm9, 0, %v2659_v34  ;;  %v3672_v13 = vshrl.u32 %v3444_v43, 16  ;;  %v2356_v50 = vpop.f32.mrf.mxu3 }
 0x29d   : > { %v2581_v18 = vpack.c.bf16 %v2561_v22, %v2561_v22  ;;  %v3675_v57 = vshll.u32 %v3444_v43, 16  ;;  %2661 = vst [vmem:[#allocation2 + $0x5c] sm:$0x1] %v2660_v29  ;;  %v3696_v55 = vsel %vm2891_vm4, %v3687_v47, %v3695_v24  ;;  %v4612_v46 = vpack.c.b16 %v4592_v59, %v4592_v59 }
 0x29e   : > { %v2437_v30 = vadd.f32 %v2409_v31, %v8619_v12  ;;  %4207 = vmatmul.bf16.gmra.mxu3 %v3696_v55  ;;  %v3674_v53 = vrot.slane %v3672_v13, 3  ;;  %v3706_v27 = vshrl.u32 %v3398_v20, 16  ;;  %v3709_v4 = vshll.u32 %v3398_v20, 16 }
 0x29f   : > { %2601 = vst [vmem:[#allocation2 + $0x68] sm:$0xf] %v2581_v18  ;;  %v3677_v2 = vrot.slane %v3675_v57, 4  ;;  %v7184_v26 = vld [vmem:[#allocation2 + $0x50] sm:$0x8]  ;;  %v4879_v8 = vshrl.u32 %v4612_v46, 16  ;;  %v8895_v43 = vadd.f32 %v2356_v50, %v2297_v17 }
 0x2a0   : > { %v2461_v23 = vadd.f32 %v8859_v49, %v2437_v30  ;;  %v7188_v41 = vld [vmem:[#allocation2 + $0x50] sm:$0x8]  ;;  %v4882_v58 = vshll.u32 %v4612_v46, 16  ;;  %v3708_v39 = vrot.slane %v3706_v27, 3  ;;  %v7185_v1 = vor.u32 %v7372_v19, %v7184_v26 }
 0x2a1   : > { %v3678_v54 = vor.u32 %v3677_v2, %v3674_v53  ;;  %v3711_v61 = vrot.slane %v3709_v4, 4  ;;  %v4881_v37 = vrot.slane %v4879_v8, 3  ;;  %v7189_v44 = vor.u32 %v7373_v35, %v7188_v41 }
 0x2a2   : > { %v2481_v36 = vmax.f32 %v2461_v23, 0.0  ;;  %v4884_v22 = vrot.slane %v4882_v58, 4  ;;  %v3513_v31 = vrot.slane %v8872_v63, 5  ;;  %v3698_v34 = vshrl.u32 %v7185_v1, 16 }
 0x2a3   : > { %v2410_v28 = vpop.f32.mrf.mxu0  ;;  %4158 = vmatmul.bf16.gmra.mxu2 %v3678_v54  ;;  %v3701_v18 = vshll.u32 %v7185_v1, 16  ;;  %v3712_v60 = vor.u32 %v3711_v61, %v3708_v39  ;;  %v4871_v30 = vshrl.u32 %v7189_v44, 16  ;;  %v4874_v38 = vshll.u32 %v7189_v44, 16  ;;  %v2629_v54 = vld [vmem:[#allocation2 + $0x60] sm:$0x8] }
 0x2a4   : > { %v2562_v47 = vsel %vm8887_vm5, %v2481_v36, 0.0  ;;  %v2411_v40 = vadd.f32 %v2410_v28, %v8846_v32  ;;  %v3337_v9 = vld [vmem:[#allocation2 + $0x5c] sm:$0x1]  ;;  %v4885_v24 = vor.u32 %v4884_v22, %v4881_v37  ;;  %v3700_v59 = vrot.slane %v3698_v34, 3  ;;  %v8908_v1 = vld [vmem:[#allocation2 + $0x60] sm:$0xf0]  }
 0x2a5   : > { %v2582_v5 = vpack.c.bf16 %v2562_v47, %v2562_v47  ;;  %v3703_v29 = vrot.slane %v3701_v18, 4  ;;  %v3489_v35 = vunpack.c.l.b16 %v3337_v9  ;;  %v3724_v13 = vshrl.u32 %v3513_v31, 16  ;;  %v7375_v18 = vld [vmem:[#allocation2 + $0x60] sm:$0xf0]   ;;  %v2300_v9 = vpop.f32.mrf.mxu2 }
 0x2a6   : > { %v2438_v19 = vadd.f32 %v2411_v40, %v8631_v48  ;;  %v4873_v57 = vrot.slane %v4871_v30, 3  ;;  %v4876_v32 = vrot.slane %v4874_v38, 4  ;;  %v3727_v20 = vshll.u32 %v3513_v31, 16  ;;  %v8915_v34 = vld [vmem:[#allocation2 + $0x64] sm:$0xff]   ;;  %v2359_v30 = vpop.f32.mrf.mxu3  ;;  %v6792_v38 = vld [vmem:[#allocation3 + $0x10] sm:$0xff] }
 0x2a7   : > { %2602 = vst [vmem:[#allocation2 + $0x74] sm:$0xf] %v2582_v5  ;;  %v3704_v46 = vor.u32 %v3703_v29, %v3700_v59  ;;  %v3497_v53 = vpack.c.b16 %v3489_v35, %v3489_v35  ;;  %v3726_v2 = vrot.slane %v3724_v13, 3  ;;  %v3446_v36 = vshrl.u32 %v8872_v63, 16  ;;  %v8906_v5 = vld [vmem:[#allocation2 + $0x64] sm:$0xff]   ;;  %4382 = vmatpush.bf16.msrb.mxu1 %v6792_v38 }
 0x2a8   : > { %v2462_v23 = vadd.f32 %v8859_v49, %v2438_v19  ;;  %v4877_v26 = vor.u32 %v4876_v32, %v4873_v57  ;;  %v3729_v28 = vrot.slane %v3727_v20, 4  ;;  %v3449_v48 = vshll.u32 %v8872_v63, 16 }
 0x2a9   : > { %v3713_v4 = vsel %vm2891_vm4, %v3704_v46, %v3712_v60  ;;  %v3514_v41 = vrot.slane %v3497_v53, 5  ;;  %v3448_v8 = vrot.slane %v3446_v36, 4  ;;  %v2630_v12 = vsel %vm8489_vm6, 0, %v2629_v54  ;;  %v6800_v60 = vld [vmem:[#allocation3 + $0x50] sm:$0xff] }
 0x2aa   : > { %v2482_v27 = vmax.f32 %v2462_v23, 0.0  ;;  %4114 = vmatmul.bf16.gmra.mxu1 %v3713_v4  ;;  %v4886_v47 = vsel %vm2891_vm4, %v4877_v26, %v4885_v24  ;;  %v3730_v17 = vor.u32 %v3729_v28, %v3726_v2  ;;  %v3451_v50 = vrot.slane %v3449_v48, 5  ;;  %2631 = vst [vmem:[#allocation2 + $0x60] sm:$0x8] %v2630_v12  ;;  %4431 = vmatpush.bf16.msrb.mxu2 %v6800_v60  ;;  %v2662_v26 = vld [vmem:[#allocation2 + $0x6c] sm:$0x1] }
 0x2ab   : > { %v2413_v55 = vpop.f32.mrf.mxu0  ;;  %5325 = vmatmul.bf16.gmra.mxu0 %v4886_v47  ;;  %v3515_v61 = vsel %vm2866_vm1, %v3513_v31, %v3514_v41  ;;  %v3382_v57 = vunpack.c.h.b16 %v8906_v5  ;;  %v4595_v32 = vunpack.c.h.b16 %v8915_v34  ;;  %v8932_v47 = vrot.slane %v8906_v5, 5 }
 0x2ac   : > { %v2414_v58 = vadd.f32 %v2413_v55, %v8866_v51  ;;  %v2563_v39 = vsel %vm8887_vm5, %v2482_v27, 0.0  ;;  %v2496_v51 = vadd.s32 8, %v8476_v7  ;;  %v3732_v44 = vshrl.u32 %v3515_v61, 16 }
 0x2ad   : > { %v2583_v63 = vpack.c.bf16 %v2563_v39, %v2563_v39  ;;  %v3735_v22 = vshll.u32 %v3515_v61, 16  ;;  %v3452_v40 = vor.u32 %v3451_v50, %v3448_v8  ;;  %v3400_v2 = vpack.c.b16 %v3382_v57, %v3382_v57 }
 0x2ae   : > { %v2439_v37 = vadd.f32 %v2414_v58, %v8640_v25  ;;  %vm2506_vm7 = vcmp.ge.s32.totalorder %v2496_v51, 0  ;;  %vm2516_vm8 = vcmp.lt.s32.totalorder %v2496_v51, 16  ;;  %v3734_v25 = vrot.slane %v3732_v44, 3  ;;  %v2361_v50 = vpop.f32.mrf.mxu3 }
 0x2af   : > { %2603 = vst [vmem:[#allocation2 + $0x78] sm:$0xf] %v2583_v63  ;;  %v3737_v24 = vrot.slane %v3735_v22, 4  ;;  %v3715_v19 = vshrl.u32 %v3452_v40, 16  ;;  %v3718_v59 = vshll.u32 %v3452_v40, 16  ;;  %vm8918_vm10 = vmand %vm2506_vm7, %vm2516_vm8  ;;  %v4614_v36 = vpack.c.b16 %v4595_v32, %v4595_v32 }
 0x2b0   : > { %v2463_v31 = vadd.f32 %v8859_v49, %v2439_v37  ;;  %v3749_v4 = vshrl.u32 %v3400_v2, 16  ;;  %v3752_v41 = vshll.u32 %v3400_v2, 16  ;;  %v3454_v39 = vshrl.u32 %v8906_v5, 16  ;;  %v2632_v2 = vld [vmem:[#allocation2 + $0x70] sm:$0x8] }
 0x2b1   : > { %v3738_v23 = vor.u32 %v3737_v24, %v3734_v25  ;;  %v3717_v20 = vrot.slane %v3715_v19, 3  ;;  %v3720_v55 = vrot.slane %v3718_v59, 4  ;;  %v4922_v8 = vshrl.u32 %v4614_v36, 16  ;;  %v7192_v63 = vld [vmem:[#allocation2 + $0x60] sm:$0x8] }
 0x2b2   : > { %v2483_v13 = vmax.f32 %v2463_v31, 0.0  ;;  %v4925_v58 = vshll.u32 %v4614_v36, 16  ;;  %v3751_v61 = vrot.slane %v3749_v4, 3  ;;  %v3754_v37 = vrot.slane %v3752_v41, 4  ;;  %v7196_v51 = vld [vmem:[#allocation2 + $0x60] sm:$0x8] }
 0x2b3   : > { %v2415_v35 = vpop.f32.mrf.mxu0  ;;  %v3739_v27 = vsel %vm2891_vm4, %v3730_v17, %v3738_v23  ;;  %v3721_v28 = vor.u32 %v3720_v55, %v3717_v20  ;;  %v2302_v17 = vpop.f32.mrf.mxu2  ;;  %v2360_v44 = vadd.f32 %v2359_v30, %v2300_v9  ;;  %v4924_v40 = vrot.slane %v4922_v8, 3  ;;  %v6813_v36 = vld [vmem:[#allocation3 + $0xb8] sm:$0xff]  ;;  %v6799_v4 = vld [vmem:[#allocation3 + $0x48] sm:$0xff] }
 0x2b4   : > { %v2416_v46 = vadd.f32 %v2415_v35, %v8895_v43  ;;  %v2564_v53 = vsel %vm8918_vm10, %v2483_v13, 0.0  ;;  %4212 = vmatmul.bf16.gmra.mxu3 %v3739_v27  ;;  %v2663_v43 = vsel %vm8495_vm9, 0, %v2662_v26  ;;  %v8935_v22 = vadd.f32 %v2361_v50, %v2302_v17  ;;  %4432 = vmatpush.bf16.msrb.mxu2 %v6799_v4 }
 0x2b5   : > { %v2584_v48 = vpack.c.bf16 %v2564_v53, %v2564_v53  ;;  %4163 = vmatmul.bf16.gmra.mxu2 %v3721_v28  ;;  %v4927_v12 = vrot.slane %v4925_v58, 4  ;;  %2664 = vst [vmem:[#allocation2 + $0x6c] sm:$0x1] %v2663_v43  ;;  %v3755_v60 = vor.u32 %v3754_v37, %v3751_v61  ;;  %v3767_v31 = vshrl.u32 %v8932_v47, 16  ;;  %4475 = vmatpush.bf16.msra.mxu3 %v6813_v36  ;;  %v7376_v61 = vld [vmem:[#allocation2 + $0x70] sm:$0xf0]  }
 0x2b6   : > { %v2440_v54 = vadd.f32 %v2416_v46, %v8643_v56  ;;  %v3770_v25 = vshll.u32 %v8932_v47, 16  ;;  %v7193_v24 = vor.u32 %v8908_v1, %v7192_v63  ;;  %v7197_v19 = vor.u32 %v7375_v18, %v7196_v51  ;;  %v8954_v63 = vld [vmem:[#allocation2 + $0x74] sm:$0xff]  }
 0x2b7   : > { %2604 = vst [vmem:[#allocation2 + $0x84] sm:$0xf] %v2584_v48  ;;  %v4928_v59 = vor.u32 %v4927_v12, %v4924_v40  ;;  %v3456_v35 = vrot.slane %v3454_v39, 4  ;;  %v8941_v9 = vrot.slane %v3767_v31, 3  ;;  %v3457_v57 = vshll.u32 %v8906_v5, 16  ;;  %v6812_v37 = vld [vmem:[#allocation3 + $0xb0] sm:$0xff] }
 0x2b8   : > { %v2464_v38 = vadd.f32 %v8859_v49, %v2440_v54  ;;  %v8943_v30 = vrot.slane %v3770_v25, 4  ;;  %v3741_v32 = vshrl.u32 %v7193_v24, 16  ;;  %v3744_v23 = vshll.u32 %v7193_v24, 16  ;;  %v6791_v54 = vld [vmem:[#allocation3 + $0x8] sm:$0xff]  ;;  %v7377_v40 = vld [vmem:[#allocation2 + $0x70] sm:$0xf0]  }
 0x2b9   : > { %v4914_v20 = vshrl.u32 %v7197_v19, 16  ;;  %v4917_v55 = vshll.u32 %v7197_v19, 16  ;;  %v3459_v18 = vrot.slane %v3457_v57, 5  ;;  %v2497_v29 = vadd.s32 9, %v8476_v7  ;;  %v8957_v7 = vld [vmem:[#allocation2 + $0x74] sm:$0xff]   ;;  %4383 = vmatpush.bf16.msrb.mxu1 %v6791_v54  ;;  %4476 = vmatpush.bf16.msra.mxu3 %v6812_v37 }
 0x2ba   : > { %v2484_v13 = vmax.f32 %v2464_v38, 0.0  ;;  %v3773_v1 = vor.u32 %v8943_v30, %v8941_v9  ;;  %v3743_v26 = vrot.slane %v3741_v32, 3  ;;  %v3746_v27 = vrot.slane %v3744_v23, 4  ;;  %v2665_v25 = vld [vmem:[#allocation2 + $0x7c] sm:$0x1]  ;;  %v6811_v32 = vld [vmem:[#allocation3 + $0xa8] sm:$0xff] }
 0x2bb   : > { %v2418_v56 = vpop.f32.mrf.mxu0  ;;  %v4916_v28 = vrot.slane %v4914_v20, 3  ;;  %v4919_v48 = vrot.slane %v4917_v55, 4  ;;  %v3460_v8 = vor.u32 %v3459_v18, %v3456_v35  ;;  %v2633_v50 = vsel %vm8489_vm6, 0, %v2632_v2  ;;  %v2635_v9 = vld [vmem:[#allocation2 + $0x80] sm:$0x8] }
 0x2bc   : > { %v2565_v46 = vsel %vm8918_vm10, %v2484_v13, 0.0  ;;  %v2419_v53 = vadd.f32 %v2418_v56, %v2360_v44  ;;  %v3338_v41 = vld [vmem:[#allocation2 + $0x6c] sm:$0x1]  ;;  %v3747_v43 = vor.u32 %v3746_v27, %v3743_v26  ;;  %vm2507_vm11 = vcmp.ge.s32.totalorder %v2497_v29, 0  ;;  %2634 = vst [vmem:[#allocation2 + $0x70] sm:$0x8] %v2633_v50 }
 0x2bd   : > { %v2585_v5 = vpack.c.bf16 %v2565_v46, %v2565_v46  ;;  %v4920_v39 = vor.u32 %v4919_v48, %v4916_v28  ;;  %v3490_v17 = vunpack.c.l.b16 %v3338_v41  ;;  %v3758_v51 = vshrl.u32 %v3460_v8, 16  ;;  %v6810_v28 = vld [vmem:[#allocation3 + $0xa0] sm:$0xff]  ;;  %4477 = vmatpush.bf16.msra.mxu3 %v6811_v32 }
 0x2be   : > { %v2441_v58 = vadd.f32 %v2419_v53, %v8646_v11  ;;  %v3761_v44 = vshll.u32 %v3460_v8, 16  ;;  %v3756_v12 = vsel %vm2891_vm4, %v3747_v43, %v3755_v60  ;;  %vm2517_vm12 = vcmp.lt.s32.totalorder %v2497_v29, 16  ;;  %v6798_v30 = vld [vmem:[#allocation3 + $0x40] sm:$0xff] }
 0x2bf   : > { %2605 = vst [vmem:[#allocation2 + $0x88] sm:$0xf] %v2585_v5  ;;  %v4929_v56 = vsel %vm2891_vm4, %v4920_v39, %v4928_v59  ;;  %v3498_v38 = vpack.c.b16 %v3490_v17, %v3490_v17  ;;  %4119 = vmatmul.bf16.gmra.mxu1 %v3756_v12  ;;  %v3760_v24 = vrot.slane %v3758_v51, 3  ;;  %vm8962_vm13 = vmand %vm2507_vm11, %vm2517_vm12  ;;  %v3385_v60 = vunpack.c.h.b16 %v8954_v63  ;;  %4433 = vmatpush.bf16.msrb.mxu2 %v6798_v30 }
 0x2c0   : > { %v2465_v11 = vadd.f32 %v8859_v49, %v2441_v58  ;;  %5330 = vmatmul.bf16.gmra.mxu0 %v4929_v56  ;;  %v3763_v19 = vrot.slane %v3761_v44, 4  ;;  %v4598_v59 = vunpack.c.h.b16 %v8957_v7  ;;  %v2666_v46 = vsel %vm8495_vm9, 0, %v2665_v25 }
 0x2c1   : > { %v3517_v57 = vrot.slane %v3498_v38, 5  ;;  %v3402_v2 = vpack.c.b16 %v3385_v60, %v3385_v60  ;;  %2667 = vst [vmem:[#allocation2 + $0x7c] sm:$0x1] %v2666_v46  ;;  %4478 = vmatpush.bf16.msra.mxu3 %v6810_v28 }
 0x2c2   : > { %v2485_v35 = vmax.f32 %v2465_v11, 0.0  ;;  %v3764_v23 = vor.u32 %v3763_v19, %v3760_v24  ;;  %v4616_v27 = vpack.c.b16 %v4598_v59, %v4598_v59 }
 0x2c3   : > { %v2420_v31 = vpop.f32.mrf.mxu0  ;;  %v3518_v18 = vsel %vm2866_vm1, %v8932_v47, %v3517_v57  ;;  %v3792_v48 = vshrl.u32 %v3402_v2, 16  ;;  %v3795_v4 = vshll.u32 %v3402_v2, 16  ;;  %v8981_v47 = vld [vmem:[#allocation2 + $0x80] sm:$0xf0]   ;;  %v7200_v29 = vld [vmem:[#allocation2 + $0x70] sm:$0x8] }
 0x2c4   : > { %v2566_v20 = vsel %vm8962_vm13, %v2485_v35, 0.0  ;;  %v2421_v55 = vadd.f32 %v2420_v31, %v8935_v22  ;;  %v3775_v36 = vshrl.u32 %v3518_v18, 16  ;;  %v3778_v26 = vshll.u32 %v3518_v18, 16  ;;  %v7204_v54 = vld [vmem:[#allocation2 + $0x70] sm:$0x8] }
 0x2c5   : > { %v2586_v53 = vpack.c.bf16 %v2566_v20, %v2566_v20  ;;  %4168 = vmatmul.bf16.gmra.mxu2 %v3764_v23  ;;  %v8977_v22 = vrot.slane %v8954_v63, 5  ;;  %v3794_v39 = vrot.slane %v3792_v48, 3  ;;  %v3797_v17 = vrot.slane %v3795_v4, 4 }
 0x2c6   : > { %v2442_v5 = vadd.f32 %v2421_v55, %v8648_v52  ;;  %v8979_v41 = vld [vmem:[#allocation2 + $0x84] sm:$0xff]   ;;  %v3777_v8 = vrot.slane %v3775_v36, 3  ;;  %v3780_v58 = vrot.slane %v3778_v26, 4  ;;  %v4965_v37 = vshrl.u32 %v4616_v27, 16 }
 0x2c7   : > { %2606 = vst [vmem:[#allocation2 + $0x94] sm:$0xf] %v2586_v53  ;;  %v3388_v43 = vunpack.c.h.b16 %v8979_v41  ;;  %v4968_v51 = vshll.u32 %v4616_v27, 16  ;;  %v7201_v44 = vor.u32 %v7376_v61, %v7200_v29  ;;  %v3798_v11 = vor.u32 %v3797_v17, %v3794_v39  ;;  %v6809_v61 = vld [vmem:[#allocation3 + $0x98] sm:$0xff]  ;;  %v6808_v53 = vld [vmem:[#allocation3 + $0x90] sm:$0xff] }
 0x2c8   : > { %v3781_v50 = vor.u32 %v3780_v58, %v3777_v8  ;;  %v2466_v52 = vadd.f32 %v8859_v49, %v2442_v5  ;;  %v7205_v12 = vor.u32 %v7377_v40, %v7204_v54  ;;  %v3810_v56 = vshrl.u32 %v8977_v22, 16  ;;  %v3339_v19 = vld [vmem:[#allocation2 + $0x7c] sm:$0x1]  ;;  %4479 = vmatpush.bf16.msra.mxu3 %v6809_v61  ;;  %v8999_v54 = vld [vmem:[#allocation2 + $0x84] sm:$0xff]  }
 0x2c9   : > { %v4967_v31 = vrot.slane %v4965_v37, 3  ;;  %v4970_v25 = vrot.slane %v4968_v51, 4  ;;  %v3784_v35 = vshrl.u32 %v7201_v44, 16  ;;  %v3787_v57 = vshll.u32 %v7201_v44, 16  ;;  %v7379_v39 = vld [vmem:[#allocation2 + $0x80] sm:$0xf0]  }
 0x2ca   : > { %v3782_v38 = vsel %vm2891_vm4, %v3773_v1, %v3781_v50  ;;  %v2486_v24 = vmax.f32 %v2466_v52, 0.0  ;;  %v4957_v60 = vshrl.u32 %v7205_v12, 16  ;;  %v4960_v49 = vshll.u32 %v7205_v12, 16  ;;  %v6790_v1 = vld [vmem:[#allocation3] sm:$0xff]  ;;  %v2668_v51 = vld [vmem:[#allocation2 + $0x8c] sm:$0x1] }
 0x2cb   : > { %4217 = vmatmul.bf16.gmra.mxu3 %v3782_v38  ;;  %v4971_v59 = vor.u32 %v4970_v25, %v4967_v31  ;;  %v3491_v32 = vunpack.c.l.b16 %v3339_v19  ;;  %v8992_v23 = vrot.slane %v3810_v56, 3  ;;  %v3786_v20 = vrot.slane %v3784_v35, 3  ;;  %4384 = vmatpush.bf16.msrb.mxu1 %v6790_v1 }
 0x2cc   : > { %v2567_v40 = vsel %vm8962_vm13, %v2486_v24, 0.0  ;;  %v3789_v55 = vrot.slane %v3787_v57, 4  ;;  %v4959_v46 = vrot.slane %v4957_v60, 3  ;;  %v4962_v18 = vrot.slane %v4960_v49, 4  ;;  %4480 = vmatpush.bf16.msra.mxu3 %v6808_v53 }
 0x2cd   : > { %v2587_v2 = vpack.c.bf16 %v2567_v40, %v2567_v40  ;;  %v3499_v36 = vpack.c.b16 %v3491_v32, %v3491_v32  ;;  %v3813_v26 = vshll.u32 %v8977_v22, 16  ;;  %v3462_v27 = vshrl.u32 %v8954_v63, 16 }
 0x2ce   : > { %v3790_v13 = vor.u32 %v3789_v55, %v3786_v20  ;;  %v4963_v28 = vor.u32 %v4962_v18, %v4959_v46  ;;  %v3465_v48 = vshll.u32 %v8954_v63, 16  ;;  %v2636_v4 = vsel %vm8489_vm6, 0, %v2635_v9  ;;  %v6807_v63 = vld [vmem:[#allocation3 + $0x88] sm:$0xff]  ;;  %v9023_v30 = vld [vmem:[#allocation2 + $0x90] sm:$0xf0]  }
 0x2cf   : > { %2607 = vst [vmem:[#allocation2 + $0x98] sm:$0xf] %v2587_v2  ;;  %v3520_v5 = vrot.slane %v3499_v36, 5  ;;  %v3815_v8 = vrot.slane %v3813_v26, 4  ;;  %v3464_v58 = vrot.slane %v3462_v27, 4  ;;  %v3404_v29 = vpack.c.b16 %v3388_v43, %v3388_v43 }
 0x2d0   : > { %v3799_v17 = vsel %vm2891_vm4, %v3790_v13, %v3798_v11  ;;  %v4972_v50 = vsel %vm2891_vm4, %v4963_v28, %v4971_v59  ;;  %v3467_v37 = vrot.slane %v3465_v48, 5  ;;  %2637 = vst [vmem:[#allocation2 + $0x80] sm:$0x8] %v2636_v4  ;;  %v9005_v52 = vor.u32 %v8658_v21, %v8650_v16  ;;  %v6806_v21 = vld [vmem:[#allocation3 + $0x80] sm:$0xff]  ;;  %4481 = vmatpush.bf16.msra.mxu3 %v6807_v63  ;;  %v2638_v36 = vld [vmem:[#allocation2 + $0x90] sm:$0x8] }
 0x2d1   : > { %4124 = vmatmul.bf16.gmra.mxu1 %v3799_v17  ;;  %5335 = vmatmul.bf16.gmra.mxu0 %v4972_v50  ;;  %v3521_v43 = vsel %vm2866_vm1, %v8977_v22, %v3520_v5  ;;  %v3835_v44 = vshrl.u32 %v3404_v29, 16  ;;  %v3838_v12 = vshll.u32 %v3404_v29, 16  ;;  %v3816_v31 = vor.u32 %v3815_v8, %v8992_v23 }
 0x2d2   : > { %v3818_v56 = vshrl.u32 %v3521_v43, 16  ;;  %v3821_v11 = vshll.u32 %v3521_v43, 16  ;;  %v3468_v38 = vor.u32 %v3467_v37, %v3464_v58  ;;  %v4601_v24 = vunpack.c.h.b16 %v8999_v54  ;;  %v6861_v37 = vld [vmem:[#allocation3 + $0x238] sm:$0xff] }
 0x2d3   : > { %v9010_v25 = vrot.slane %v3835_v44, 3  ;;  %v2669_v16 = vsel %vm8495_vm9, 0, %v2668_v51  ;;  %v9015_v22 = vrot.slane %v3838_v12, 4  ;;  %v9018_v61 = vrot.slane %v8979_v41, 5  ;;  %5400 = vmatpush.bf16.msra.mxu2 %v6861_v37 }
 0x2d4   : > { %v3820_v19 = vrot.slane %v3818_v56, 3  ;;  %v3823_v35 = vrot.slane %v3821_v11, 4  ;;  %v3801_v57 = vshrl.u32 %v3468_v38, 16  ;;  %v3804_v60 = vshll.u32 %v3468_v38, 16  ;;  %2670 = vst [vmem:[#allocation2 + $0x8c] sm:$0x1] %v2669_v16  ;;  %4482 = vmatpush.bf16.msra.mxu3 %v6806_v21 }
 0x2d5   : > { %v4618_v49 = vpack.c.b16 %v4601_v24, %v4601_v24  ;;  %v3470_v23 = vshrl.u32 %v8979_v41, 16  ;;  %v9028_v18 = vpack.c.b16 %v2732_v33, %v2732_v33  ;;  %v3841_v26 = vor.u32 %v9015_v22, %v9010_v25  ;;  %v6853_v56 = vld [vmem:[#allocation3 + $0x1f8] sm:$0xff] }
 0x2d6   : > { %v3824_v59 = vor.u32 %v3823_v35, %v3820_v19  ;;  %v3803_v40 = vrot.slane %v3801_v57, 3  ;;  %v3806_v32 = vrot.slane %v3804_v60, 4  ;;  %v9021_v9 = vld [vmem:[#allocation2 + $0x94] sm:$0xff]   ;;  %v2893_v48 = vshrl.u32 %v9005_v52, 16  ;;  %5351 = vmatpush.bf16.msra.mxu1 %v6853_v56 }
 0x2d7   : > { %v7208_v1 = vld [vmem:[#allocation2 + $0x80] sm:$0x8]  ;;  %v5008_v55 = vshrl.u32 %v4618_v49, 16  ;;  %v5011_v46 = vshll.u32 %v4618_v49, 16  ;;  %v3473_v5 = vshll.u32 %v8979_v41, 16  ;;  %v3853_v58 = vshrl.u32 %v9018_v61, 16 }
 0x2d8   : > { %v7212_v20 = vld [vmem:[#allocation2 + $0x80] sm:$0x8]  ;;  %v3825_v53 = vsel %vm2891_vm4, %v3816_v31, %v3824_v59  ;;  %v3807_v2 = vor.u32 %v3806_v32, %v3803_v40  ;;  %v7209_v4 = vor.u32 %v8981_v47, %v7208_v1  ;;  %v3472_v29 = vrot.slane %v3470_v23, 4  ;;  %v2678_v56 = vld [vmem:[#allocation2 + $0x14] sm:$0xff]  }
 0x2d9   : > { %v5010_v27 = vrot.slane %v5008_v55, 3  ;;  %v5013_v13 = vrot.slane %v5011_v46, 4  ;;  %v7213_v33 = vor.u32 %v7379_v39, %v7212_v20  ;;  %v2639_v17 = vsel %vm8489_vm6, 0, %v2638_v36 }
 0x2da   : > { %4173 = vmatmul.bf16.gmra.mxu2 %v3807_v2  ;;  %v4604_v50 = vunpack.c.h.b16 %v9021_v9  ;;  %v3827_v51 = vshrl.u32 %v7209_v4, 16  ;;  %v3830_v63 = vshll.u32 %v7209_v4, 16  ;;  %2640 = vst [vmem:[#allocation2 + $0x90] sm:$0x8] %v2639_v17  ;;  %v3856_v39 = vshll.u32 %v9018_v61, 16  ;;  %5352 = vmatpush.bf16.msra.mxu1 %v6852_v0 }
 0x2db   : > { %4222 = vmatmul.bf16.gmra.mxu3 %v3825_v53  ;;  %v3340_v8 = vld [vmem:[#allocation2 + $0x8c] sm:$0x1]  ;;  %v5000_v43 = vshrl.u32 %v7213_v33, 16  ;;  %v5003_v44 = vshll.u32 %v7213_v33, 16  ;;  %v5014_v12 = vor.u32 %v5013_v13, %v5010_v27  ;;  %v3475_v41 = vrot.slane %v3473_v5, 5 }
 0x2dc   : > { %v3492_v47 = vunpack.c.l.b16 %v3340_v8  ;;  %v3829_v11 = vrot.slane %v3827_v51, 3  ;;  %v3832_v38 = vrot.slane %v3830_v63, 4  ;;  %v4620_v16 = vpack.c.b16 %v4604_v50, %v4604_v50 }
 0x2dd   : > { %v5002_v31 = vrot.slane %v5000_v43, 3  ;;  %v5005_v42 = vrot.slane %v5003_v44, 4  ;;  %v3476_v24 = vor.u32 %v3475_v41, %v3472_v29  ;;  %v3855_v35 = vrot.slane %v3853_v58, 3 }
 0x2de   : > { %v3500_v25 = vpack.c.b16 %v3492_v47, %v3492_v47  ;;  %v3833_v21 = vor.u32 %v3832_v38, %v3829_v11  ;;  %v2896_v57 = vshll.u32 %v9005_v52, 16  ;;  %v3858_v22 = vrot.slane %v3856_v39, 4  ;;  %v7385_v11 = vld [vmem:[#allocation2 + $0x10] sm:$0xf0]  }
 0x2df   : > { %v9033_v28 = vpop.f32.mrf.mxu1  ;;  %v5006_v19 = vor.u32 %v5005_v42, %v5002_v31  ;;  %v3844_v49 = vshrl.u32 %v3476_v24, 16  ;;  %v3847_v59 = vshll.u32 %v3476_v24, 16  ;;  %v2779_v1 = vshrl.u32 %v8656_v15, 16  ;;  %v7220_v42 = vld [vmem:[#allocation2 + $0x10] sm:$0x8] }
 0x2e0   : > { %v3523_v60 = vrot.slane %v3500_v25, 5  ;;  %v3842_v40 = vsel %vm2891_vm4, %v3833_v21, %v3841_v26  ;;  %v2782_v20 = vshll.u32 %v8656_v15, 16  ;;  %v5051_v2 = vshrl.u32 %v4620_v16, 16  ;;  %v6860_v21 = vld [vmem:[#allocation3 + $0x230] sm:$0xff] }
 0x2e1   : > { %v5015_v32 = vsel %vm2891_vm4, %v5006_v19, %v5014_v12  ;;  %4129 = vmatmul.bf16.gmra.mxu1 %v3842_v40  ;;  %v3846_v52 = vrot.slane %v3844_v49, 3  ;;  %v3849_v46 = vrot.slane %v3847_v59, 4  ;;  %v7216_v53 = vld [vmem:[#allocation2 + $0x90] sm:$0x8]  ;;  %v5054_v26 = vshll.u32 %v4620_v16, 16  ;;  %5401 = vmatpush.bf16.msra.mxu2 %v6860_v21 }
 0x2e2   : > { %5340 = vmatmul.bf16.gmra.mxu0 %v5015_v32  ;;  %v3524_v55 = vsel %vm2866_vm1, %v9018_v61, %v3523_v60  ;;  %v3859_v13 = vor.u32 %v3858_v22, %v3855_v35  ;;  %v2901_v4 = vshrl.u32 %v9028_v18, 16  ;;  %v2904_v33 = vshll.u32 %v9028_v18, 16  ;;  %v2699_v16 = vld [vmem:[#allocation2 + $0x1c] sm:$0x1] }
 0x2e3   : > { %v3861_v36 = vshrl.u32 %v3524_v55, 16  ;;  %v3864_v27 = vshll.u32 %v3524_v55, 16  ;;  %v2867_v5 = vrot.slane %v8656_v15, 5  ;;  %v3850_v29 = vor.u32 %v3849_v46, %v3846_v52 }
 0x2e4   : > { %v7217_v17 = vor.u32 %v9023_v30, %v7216_v53  ;;  %v2895_v61 = vrot.slane %v2893_v48, 3  ;;  %v5053_v50 = vrot.slane %v5051_v2, 3  ;;  %v2781_v37 = vrot.slane %v2779_v1, 4 }
 0x2e5   : > { %v3863_v8 = vrot.slane %v3861_v36, 3  ;;  %v3866_v58 = vrot.slane %v3864_v27, 4  ;;  %v2784_v51 = vrot.slane %v2782_v20, 5  ;;  %v5056_v12 = vrot.slane %v5054_v26, 4 }
 0x2e6   : > { %v5043_v43 = vshrl.u32 %v7217_v17, 16  ;;  %v5046_v44 = vshll.u32 %v7217_v17, 16  ;;  %v2898_v47 = vrot.slane %v2896_v57, 4  ;;  %v2903_v39 = vrot.slane %v2901_v4, 3 }
 0x2e7   : > { %v9046_v23 = vpop.f32.mrf.mxu1  ;;  %v3867_v63 = vor.u32 %v3866_v58, %v3863_v8  ;;  %v2906_v41 = vrot.slane %v2904_v33, 4  ;;  %v2869_v15 = vsel %vm2866_vm1, %v2867_v5, %v2868_v6  ;;  %v2919_v25 = vshrl.u32 %v2867_v5, 16 }
 0x2e8   : > { %v5045_v48 = vrot.slane %v5043_v43, 3  ;;  %v5048_v38 = vrot.slane %v5046_v44, 4  ;;  %v2785_v24 = vor.u32 %v2784_v51, %v2781_v37  ;;  %v5057_v6 = vor.u32 %v5056_v12, %v5053_v50 }
 0x2e9   : > { %v3868_v30 = vsel %vm2891_vm4, %v3859_v13, %v3867_v63  ;;  %v2735_v57 = vunpack.c.h.b16 %v2678_v56  ;;  %v2922_v60 = vshll.u32 %v2867_v5, 16  ;;  %v2927_v22 = vshrl.u32 %v2869_v15, 16 }
 0x2ea   : > { %4178 = vmatmul.bf16.gmra.mxu2 %v3850_v29  ;;  %v5049_v19 = vor.u32 %v5048_v38, %v5045_v48  ;;  %v2930_v49 = vshll.u32 %v2869_v15, 16  ;;  %v2899_v59 = vor.u32 %v2898_v47, %v2895_v61  ;;  %v2851_v40 = vunpack.c.l.b16 %v2699_v16  ;;  %v2681_v15 = vld [vmem:[#allocation2 + $0x24] sm:$0xff]  }
 0x2eb   : > { %4227 = vmatmul.bf16.gmra.mxu3 %v3868_v30  ;;  %v2921_v32 = vrot.slane %v2919_v25, 3  ;;  %v2910_v20 = vshrl.u32 %v2785_v24, 16  ;;  %v2913_v55 = vshll.u32 %v2785_v24, 16  ;;  %v2924_v52 = vrot.slane %v2922_v60, 4  ;;  %v6859_v25 = vld [vmem:[#allocation3 + $0x228] sm:$0xff] }
 0x2ec   : > { %v4144_v18 = vpop.f32.mrf.mxu2  ;;  %v5058_v1 = vsel %vm2891_vm4, %v5049_v19, %v5057_v6  ;;  %v2929_v46 = vrot.slane %v2927_v22, 3  ;;  %v2932_v53 = vrot.slane %v2930_v49, 4  ;;  %v7221_v2 = vor.u32 %v7385_v11, %v7220_v42  ;;  %v7224_v42 = vld [vmem:[#allocation2 + $0x20] sm:$0x8]  ;;  %v6851_v24 = vld [vmem:[#allocation3 + $0x1e8] sm:$0xff]  ;;  %5402 = vmatpush.bf16.msra.mxu2 %v6859_v25 }
 0x2ed   : > { %v9061_v31 = vadd.f32 %v4144_v18, %v9033_v28  ;;  %v2907_v28 = vor.u32 %v2906_v41, %v2903_v39  ;;  %v2757_v27 = vpack.c.b16 %v2735_v57, %v2735_v57  ;;  %v2859_v26 = vpack.c.b16 %v2851_v40, %v2851_v40  ;;  %v7386_v18 = vld [vmem:[#allocation2 + $0x20] sm:$0xf0]   ;;  %5353 = vmatpush.bf16.msra.mxu1 %v6851_v24 }
 0x2ee   : > { %v2912_v13 = vrot.slane %v2910_v20, 3  ;;  %v2915_v4 = vrot.slane %v2913_v55, 4  ;;  %v2787_v5 = vshrl.u32 %v2678_v56, 16  ;;  %v2790_v8 = vshll.u32 %v2678_v56, 16  ;;  %v6858_v25 = vld [vmem:[#allocation3 + $0x220] sm:$0xff] }
 0x2ef   : > { %v9063_v35 = vpop.f32.mrf.mxu1  ;;  %v2908_v36 = vsel %vm2891_vm4, %v2899_v59, %v2907_v28  ;;  %v2925_v58 = vor.u32 %v2924_v52, %v2921_v32  ;;  %v2933_v29 = vor.u32 %v2932_v53, %v2929_v46  ;;  %v2936_v17 = vshrl.u32 %v7221_v2, 16  ;;  %v6850_v24 = vld [vmem:[#allocation3 + $0x1e0] sm:$0xff] }
 0x2f0   : > { %v2939_v61 = vshll.u32 %v7221_v2, 16  ;;  %v2944_v50 = vshrl.u32 %v2757_v27, 16  ;;  %v2947_v37 = vshll.u32 %v2757_v27, 16  ;;  %v2870_v51 = vrot.slane %v2678_v56, 5  ;;  %v2700_v56 = vld [vmem:[#allocation2 + $0x2c] sm:$0x1]  ;;  %5403 = vmatpush.bf16.msra.mxu2 %v6858_v25 }
 0x2f1   : > { %4385 = vmatmul.bf16.vlgmr.msrb.gmra.mxu1 %v2908_v36  ;;  %v2871_v63 = vrot.slane %v2859_v26, 5  ;;  %v2916_v44 = vor.u32 %v2915_v4, %v2912_v13  ;;  %v2789_v12 = vrot.slane %v2787_v5, 4  ;;  %v2792_v47 = vrot.slane %v2790_v8, 5  ;;  %v7232_v25 = vld [vmem:[#allocation2 + $0x40] sm:$0x8] }
 0x2f2   : > { %5345 = vmatmul.bf16.gmra.mxu0 %v5058_v1  ;;  %v2934_v39 = vsel %vm2891_vm4, %v2925_v58, %v2933_v29  ;;  %v2938_v41 = vrot.slane %v2936_v17, 3  ;;  %v2941_v11 = vrot.slane %v2939_v61, 4  ;;  %v2946_v30 = vrot.slane %v2944_v50, 3  ;;  %5354 = vmatpush.bf16.msra.mxu1 %v6850_v24 }
 0x2f3   : > { %v2949_v48 = vrot.slane %v2947_v37, 4  ;;  %v2872_v38 = vsel %vm2866_vm1, %v2870_v51, %v2871_v63  ;;  %v2962_v16 = vshrl.u32 %v2870_v51, 16  ;;  %v2793_v21 = vor.u32 %v2792_v47, %v2789_v12  ;;  %v2684_v47 = vld [vmem:[#allocation2 + $0x34] sm:$0xff]  }
 0x2f4   : > { %v9067_v33 = vpop.f32.mrf.mxu2  ;;  %v2738_v0 = vunpack.c.h.b16 %v2681_v15  ;;  %v2965_v19 = vshll.u32 %v2870_v51, 16  ;;  %v2970_v6 = vshrl.u32 %v2872_v38, 16  ;;  %v2973_v57 = vshll.u32 %v2872_v38, 16 }
 0x2f5   : > { %v2942_v60 = vor.u32 %v2941_v11, %v2938_v41  ;;  %v2950_v22 = vor.u32 %v2949_v48, %v2946_v30  ;;  %v2852_v59 = vunpack.c.l.b16 %v2700_v56  ;;  %v2964_v40 = vrot.slane %v2962_v16, 3  ;;  %v7228_v56 = vld [vmem:[#allocation2 + $0x30] sm:$0x8] }
 0x2f6   : > { %v2953_v32 = vshrl.u32 %v2793_v21, 16  ;;  %v2956_v1 = vshll.u32 %v2793_v21, 16  ;;  %v2967_v55 = vrot.slane %v2965_v19, 4  ;;  %v2972_v52 = vrot.slane %v2970_v6, 3  ;;  %v2701_v21 = vld [vmem:[#allocation2 + $0x3c] sm:$0x1] }
 0x2f7   : > { %v9069_v43 = vpop.f32.mrf.mxu1  ;;  %v2975_v46 = vrot.slane %v2973_v57, 4  ;;  %v7225_v53 = vor.u32 %v7386_v18, %v7224_v42  ;;  %v2951_v2 = vsel %vm2891_vm4, %v2942_v60, %v2950_v22  ;;  %v2759_v36 = vpack.c.b16 %v2738_v0, %v2738_v0 }
 0x2f8   : > { %v2860_v27 = vpack.c.b16 %v2852_v59, %v2852_v59  ;;  %v2955_v26 = vrot.slane %v2953_v32, 3  ;;  %v2958_v13 = vrot.slane %v2956_v1, 4  ;;  %v2795_v4 = vshrl.u32 %v2681_v15, 16 }
 0x2f9   : > { %v2798_v5 = vshll.u32 %v2681_v15, 16  ;;  %v2968_v8 = vor.u32 %v2967_v55, %v2964_v40  ;;  %v2979_v58 = vshrl.u32 %v7225_v53, 16  ;;  %v2982_v29 = vshll.u32 %v7225_v53, 16 }
 0x2fa   : > { %4434 = vmatmul.bf16.vlgmr.msrb.gmra.mxu2 %v2916_v44  ;;  %v2987_v61 = vshrl.u32 %v2759_v36, 16  ;;  %v2990_v50 = vshll.u32 %v2759_v36, 16  ;;  %v2873_v37 = vrot.slane %v2681_v15, 5  ;;  %v2874_v51 = vrot.slane %v2860_v27, 5 }
 0x2fb   : > { %4483 = vmatmul.bf16.vlgmr.msra.gmra.mxu3 %v2934_v39  ;;  %v2959_v63 = vor.u32 %v2958_v13, %v2955_v26  ;;  %v2797_v44 = vrot.slane %v2795_v4, 4  ;;  %v2800_v12 = vrot.slane %v2798_v5, 5  ;;  %v7387_v39 = vld [vmem:[#allocation2 + $0x30] sm:$0xf0]   ;;  %v2981_v18 = vrot.slane %v2979_v58, 3 }
 0x2fc   : > { %v2984_v11 = vrot.slane %v2982_v29, 4  ;;  %v2989_v30 = vrot.slane %v2987_v61, 3  ;;  %v2992_v48 = vrot.slane %v2990_v50, 4  ;;  %v2875_v38 = vsel %vm2866_vm1, %v2873_v37, %v2874_v51 }
 0x2fd   : > { %v2741_v15 = vunpack.c.h.b16 %v2684_v47  ;;  %v2801_v16 = vor.u32 %v2800_v12, %v2797_v44  ;;  %v3005_v0 = vshrl.u32 %v2873_v37, 16  ;;  %v3008_v19 = vshll.u32 %v2873_v37, 16 }
 0x2fe   : > { %v3013_v6 = vshrl.u32 %v2875_v38, 16  ;;  %v3016_v57 = vshll.u32 %v2875_v38, 16  ;;  %v2985_v60 = vor.u32 %v2984_v11, %v2981_v18  ;;  %v2993_v22 = vor.u32 %v2992_v48, %v2989_v30  ;;  %v2687_v11 = vld [vmem:[#allocation2 + $0x44] sm:$0xff]  }
 0x2ff   : > { %v4105_v20 = vpop.f32.mrf.mxu1  ;;  %v2853_v59 = vunpack.c.l.b16 %v2701_v21  ;;  %v2996_v40 = vshrl.u32 %v2801_v16, 16  ;;  %v2999_v32 = vshll.u32 %v2801_v16, 16  ;;  %v3007_v55 = vrot.slane %v3005_v0, 3  ;;  %v7388_v30 = vld [vmem:[#allocation2 + $0x40] sm:$0xf0]   ;;  %v6857_v16 = vld [vmem:[#allocation3 + $0x218] sm:$0xff] }
 0x300   : > { %v4149_v49 = vpop.f32.mrf.mxu2  ;;  %v3018_v53 = vrot.slane %v3016_v57, 4  ;;  %v7229_v36 = vor.u32 %v7387_v39, %v7228_v56  ;;  %v2761_v27 = vpack.c.b16 %v2741_v15, %v2741_v15  ;;  %v2803_v13 = vshrl.u32 %v2684_v47, 16  ;;  %v6849_v21 = vld [vmem:[#allocation3 + $0x1d8] sm:$0xff]  ;;  %5404 = vmatpush.bf16.msra.mxu2 %v6857_v16 }
 0x301   : > { %v9074_v28 = vadd.f32 %v4149_v49, %v9063_v35  ;;  %4390 = vmatmul.bf16.gmra.mxu1 %v2951_v2  ;;  %v2976_v35 = vor.u32 %v2975_v46, %v2972_v52  ;;  %v3010_v52 = vrot.slane %v3008_v19, 4  ;;  %v3015_v46 = vrot.slane %v3013_v6, 3  ;;  %v2702_v19 = vld [vmem:[#allocation2 + $0x4c] sm:$0x1] }
 0x302   : > { %v2994_v2 = vsel %vm2891_vm4, %v2985_v60, %v2993_v22  ;;  %v2861_v26 = vpack.c.b16 %v2853_v59, %v2853_v59  ;;  %v2806_v4 = vshll.u32 %v2684_v47, 16  ;;  %v2998_v5 = vrot.slane %v2996_v40, 3  ;;  %5355 = vmatpush.bf16.msra.mxu1 %v6849_v21 }
 0x303   : > { %v2977_v41 = vsel %vm2891_vm4, %v2968_v8, %v2976_v35  ;;  %v3001_v8 = vrot.slane %v2999_v32, 4  ;;  %v3011_v58 = vor.u32 %v3010_v52, %v3007_v55  ;;  %v3019_v29 = vor.u32 %v3018_v53, %v3015_v46 }
 0x304   : > { %v3022_v61 = vshrl.u32 %v7229_v36, 16  ;;  %v3030_v50 = vshrl.u32 %v2761_v27, 16  ;;  %v3033_v37 = vshll.u32 %v2761_v27, 16  ;;  %v2876_v51 = vrot.slane %v2684_v47, 5 }
 0x305   : > { %v2805_v44 = vrot.slane %v2803_v13, 4  ;;  %v2808_v12 = vrot.slane %v2806_v4, 5  ;;  %v3020_v39 = vsel %vm2891_vm4, %v3011_v58, %v3019_v29  ;;  %v2744_v0 = vunpack.c.h.b16 %v2687_v11 }
 0x306   : > { %v3024_v48 = vrot.slane %v3022_v61, 3  ;;  %v3032_v56 = vrot.slane %v3030_v50, 3  ;;  %v3035_v15 = vrot.slane %v3033_v37, 4  ;;  %v3048_v6 = vshrl.u32 %v2876_v51, 16  ;;  %v9093_v50 = vpop.f32.mrf.mxu3 }
 0x307   : > { %v9081_v42 = vpop.f32.mrf.mxu1  ;;  %v2809_v47 = vor.u32 %v2808_v12, %v2805_v44  ;;  %v3051_v57 = vshll.u32 %v2876_v51, 16  ;;  %v2854_v55 = vunpack.c.l.b16 %v2702_v19  ;;  %v2763_v13 = vpack.c.b16 %v2744_v0, %v2744_v0  ;;  %v7236_v19 = vld [vmem:[#allocation2 + $0x50] sm:$0x8] }
 0x308   : > { %v9077_v17 = vpop.f32.mrf.mxu2  ;;  %v3036_v22 = vor.u32 %v3035_v15, %v3032_v56  ;;  %v3050_v46 = vrot.slane %v3048_v6, 3  ;;  %v2811_v61 = vshrl.u32 %v2687_v11, 16  ;;  %vm5489_vm6 = vsmask.f32 3328 }
 0x309   : > { %v3039_v32 = vshrl.u32 %v2809_v47, 16  ;;  %v3042_v52 = vshll.u32 %v2809_v47, 16  ;;  %v3053_v53 = vrot.slane %v3051_v57, 4  ;;  %v3073_v12 = vshrl.u32 %v2763_v13, 16 }
 0x30a   : > { %4439 = vmatmul.bf16.gmra.mxu2 %v2959_v63  ;;  %v2877_v63 = vrot.slane %v2861_v26, 5  ;;  %v2813_v56 = vrot.slane %v2811_v61, 4 }
 0x30b   : > { %4488 = vmatmul.bf16.gmra.mxu3 %v2977_v41  ;;  %v3002_v41 = vor.u32 %v3001_v8, %v2998_v5  ;;  %v3041_v4 = vrot.slane %v3039_v32, 3  ;;  %v2862_v8 = vpack.c.b16 %v2854_v55, %v2854_v55  ;;  %v3044_v58 = vrot.slane %v3042_v52, 4  ;;  %v6848_v52 = vld [vmem:[#allocation3 + $0x1d0] sm:$0xff] }
 0x30c   : > { %v2878_v24 = vsel %vm2866_vm1, %v2876_v51, %v2877_v63  ;;  %v3054_v37 = vor.u32 %v3053_v53, %v3050_v46  ;;  %v3075_v21 = vrot.slane %v3073_v12, 3  ;;  %5356 = vmatpush.bf16.msra.mxu1 %v6848_v52 }
 0x30d   : > { %v3059_v59 = vshll.u32 %v2878_v24, 16 }
 0x30f   : > { %v3061_v26 = vrot.slane %v3059_v59, 4  ;;  %v2703_v59 = vld [vmem:[#allocation2 + $0x5c] sm:$0x1] }
 0x311   : > { %4395 = vmatmul.bf16.gmra.mxu1 %v2994_v2  ;;  %v7233_v2 = vor.u32 %v7388_v30, %v7232_v25  ;;  %v2880_v30 = vrot.slane %v2862_v8, 5 }
 0x312   : > { %v4154_v49 = vpop.f32.mrf.mxu2 }
 0x313   : > { %v9083_v1 = vadd.f32 %v4154_v49, %v4105_v20  ;;  %v3025_v20 = vshll.u32 %v7229_v36, 16  ;;  %v3056_v49 = vshrl.u32 %v2878_v24, 16  ;;  %v3065_v51 = vshrl.u32 %v7233_v2, 16  ;;  %v2690_v24 = vld [vmem:[#allocation2 + $0x54] sm:$0xff]  }
 0x314   : > { %v3068_v44 = vshll.u32 %v7233_v2, 16 }
 0x315   : > { %v4110_v35 = vpop.f32.mrf.mxu1  ;;  %v3027_v38 = vrot.slane %v3025_v20, 4  ;;  %v3058_v27 = vrot.slane %v3056_v49, 3  ;;  %v2814_v20 = vshll.u32 %v2687_v11, 16  ;;  %v3067_v25 = vrot.slane %v3065_v51, 3 }
 0x316   : > { %v3070_v16 = vrot.slane %v3068_v44, 4  ;;  %v2747_v49 = vunpack.c.h.b16 %v2690_v24 }
 0x317   : > { %v3028_v60 = vor.u32 %v3027_v38, %v3024_v48  ;;  %v3062_v63 = vor.u32 %v3061_v26, %v3058_v27  ;;  %v3045_v48 = vor.u32 %v3044_v58, %v3041_v4  ;;  %v2816_v15 = vrot.slane %v2814_v20, 5  ;;  %v9099_v27 = vpop.f32.mrf.mxu3 }
 0x318   : > { %v3071_v46 = vor.u32 %v3070_v16, %v3067_v25  ;;  %v2855_v26 = vunpack.c.l.b16 %v2703_v59  ;;  %v2765_v51 = vpack.c.b16 %v2747_v49, %v2747_v49  ;;  %v2693_v59 = vld [vmem:[#allocation2 + $0x64] sm:$0xff]  }
 0x319   : > { %v3037_v36 = vsel %vm2891_vm4, %v3028_v60, %v3036_v22  ;;  %v3063_v47 = vsel %vm2891_vm4, %v3054_v37, %v3062_v63  ;;  %v2817_v22 = vor.u32 %v2816_v15, %v2813_v56 }
 0x31a   : > { %v9087_v18 = vpop.f32.mrf.mxu2  ;;  %4444 = vmatmul.bf16.gmra.mxu2 %v3002_v41  ;;  %v3076_v41 = vshll.u32 %v2763_v13, 16  ;;  %v2863_v63 = vpack.c.b16 %v2855_v26, %v2855_v26  ;;  %v3119_v16 = vshll.u32 %v2765_v51, 16  ;;  %v2750_v26 = vunpack.c.h.b16 %v2693_v59 }
 0x31b   : > { %4493 = vmatmul.bf16.gmra.mxu3 %v3020_v39  ;;  %v2879_v39 = vrot.slane %v2687_v11, 5  ;;  %v6856_v11 = vld [vmem:[#allocation3 + $0x210] sm:$0xff]  ;;  %v3082_v13 = vshrl.u32 %v2817_v22, 16  ;;  %v3085_v4 = vshll.u32 %v2817_v22, 16 }
 0x31c   : > { %v3078_v0 = vrot.slane %v3076_v41, 4  ;;  %5405 = vmatpush.bf16.msra.mxu2 %v6856_v11  ;;  %v2819_v41 = vshrl.u32 %v2690_v24, 16 }
 0x31d   : > { %v4112_v40 = vpop.f32.mrf.mxu1  ;;  %v2881_v57 = vsel %vm2866_vm1, %v2879_v39, %v2880_v30  ;;  %v3091_v32 = vshrl.u32 %v2879_v39, 16  ;;  %v3094_v55 = vshll.u32 %v2879_v39, 16  ;;  %v3084_v44 = vrot.slane %v3082_v13, 3  ;;  %v2704_v13 = vld [vmem:[#allocation2 + $0x6c] sm:$0x1] }
 0x31e   : > { %v3079_v53 = vor.u32 %v3078_v0, %v3075_v21  ;;  %v3099_v2 = vshrl.u32 %v2881_v57, 16  ;;  %v3087_v12 = vrot.slane %v3085_v4, 4  ;;  %v2822_v39 = vshll.u32 %v2690_v24, 16 }
 0x31f   : > { %v2882_v21 = vrot.slane %v2690_v24, 5  ;;  %v2883_v0 = vrot.slane %v2863_v63, 5  ;;  %v9104_v11 = vpop.f32.mrf.mxu3  ;;  %v6855_v24 = vld [vmem:[#allocation3 + $0x208] sm:$0xff] }
 0x320   : > { %v3080_v58 = vsel %vm2891_vm4, %v3071_v46, %v3079_v53  ;;  %v3101_v61 = vrot.slane %v3099_v2, 3  ;;  %v3121_v46 = vrot.slane %v3119_v16, 4  ;;  %5406 = vmatpush.bf16.msra.mxu2 %v6855_v24  ;;  %v6847_v63 = vld [vmem:[#allocation3 + $0x1c8] sm:$0xff]  ;;  %v2885_v24 = vrot.slane %v2693_v59, 5 }
 0x321   : > { %4400 = vmatmul.bf16.gmra.mxu1 %v3037_v36  ;;  %v3102_v36 = vshll.u32 %v2881_v57, 16  ;;  %v2824_v57 = vrot.slane %v2822_v39, 5  ;;  %v2884_v53 = vsel %vm2866_vm1, %v2882_v21, %v2883_v0  ;;  %v4199_v3 = vadd.f32 %v9104_v11, %v9074_v28 }
 0x322   : > { %5357 = vmatpush.bf16.msra.mxu1 %v6847_v63  ;;  %v4723_v28 = vrot.slane %v8823_v62, 5 }
 0x323   : > { %v3104_v20 = vrot.slane %v3102_v36, 4 }
 0x325   : > { %v3105_v25 = vor.u32 %v3104_v20, %v3101_v61  ;;  %v3142_v20 = vshrl.u32 %v2884_v53, 16 }
 0x326   : > { %v4159_v5 = vpop.f32.mrf.mxu2 }
 0x327   : > { %v9091_v29 = vadd.f32 %v4159_v5, %v4110_v35  ;;  %v4115_v38 = vpop.f32.mrf.mxu1  ;;  %v7389_v35 = vld [vmem:[#allocation2 + $0x50] sm:$0xf0]   ;;  %v3093_v5 = vrot.slane %v3091_v32, 3  ;;  %v7390_v32 = vld [vmem:[#allocation2 + $0x60] sm:$0xf0]   ;;  %v9111_v16 = vpop.f32.mrf.mxu3 }
 0x328   : > { %v7237_v8 = vor.u32 %v7389_v35, %v7236_v19  ;;  %v3116_v35 = vshrl.u32 %v2765_v51, 16  ;;  %v3088_v19 = vor.u32 %v3087_v12, %v3084_v44  ;;  %v3145_v51 = vshll.u32 %v2884_v53, 16 }
 0x329   : > { %v2856_v44 = vunpack.c.l.b16 %v2704_v13 }
 0x32a   : > { %4449 = vmatmul.bf16.gmra.mxu2 %v3045_v48  ;;  %v3108_v56 = vshrl.u32 %v7237_v8, 16  ;;  %v3111_v15 = vshll.u32 %v7237_v8, 16  ;;  %v3118_v52 = vrot.slane %v3116_v35, 3  ;;  %v3137_v8 = vshll.u32 %v2882_v21, 16 }
 0x32b   : > { %4498 = vmatmul.bf16.gmra.mxu3 %v3063_v47  ;;  %v2767_v35 = vpack.c.b16 %v2750_v26, %v2750_v26 }
 0x32c   : > { %v3110_v22 = vrot.slane %v3108_v56, 3  ;;  %v3113_v49 = vrot.slane %v3111_v15, 4  ;;  %v3122_v61 = vor.u32 %v3121_v46, %v3118_v52  ;;  %v3144_v15 = vrot.slane %v3142_v20, 3 }
 0x32e   : > { %v4161_v6 = vpop.f32.mrf.mxu2 }
 0x32f   : > { %v9097_v60 = vadd.f32 %v4161_v6, %v4112_v40  ;;  %v3096_v40 = vrot.slane %v3094_v55, 4  ;;  %v4117_v37 = vpop.f32.mrf.mxu1  ;;  %v2821_v6 = vrot.slane %v2819_v41, 4 }
 0x331   : > { %4405 = vmatmul.bf16.gmra.mxu1 %v3080_v58  ;;  %v3097_v30 = vor.u32 %v3096_v40, %v3093_v5  ;;  %v2825_v36 = vor.u32 %v2824_v57, %v2821_v6  ;;  %v3114_v5 = vor.u32 %v3113_v49, %v3110_v22  ;;  %v3134_v40 = vshrl.u32 %v2882_v21, 16 }
 0x332   : > { %v2827_v6 = vshrl.u32 %v2693_v59, 16  ;;  %v2830_v57 = vshll.u32 %v2693_v59, 16 }
 0x333   : > { %v3106_v55 = vsel %vm2891_vm4, %v3097_v30, %v3105_v25  ;;  %v3125_v12 = vshrl.u32 %v2825_v36, 16  ;;  %v3128_v41 = vshll.u32 %v2825_v36, 16  ;;  %v3136_v39 = vrot.slane %v3134_v40, 3  ;;  %v2696_v40 = vld [vmem:[#allocation2 + $0x74] sm:$0xff]  }
 0x334   : > { %v3139_v30 = vrot.slane %v3137_v8, 4  ;;  %v3123_v56 = vsel %vm2891_vm4, %v3114_v5, %v3122_v61  ;;  %v3147_v25 = vrot.slane %v3145_v51, 4  ;;  %v2829_v13 = vrot.slane %v2827_v6, 4  ;;  %v7391_v8 = vld [vmem:[#allocation2 + $0x70] sm:$0xf0]  }
 0x335   : > { %v3127_v0 = vrot.slane %v3125_v12, 3  ;;  %v2753_v59 = vunpack.c.h.b16 %v2696_v40 }
 0x336   : > { %v3140_v22 = vor.u32 %v3139_v30, %v3136_v39  ;;  %v2705_v39 = vld [vmem:[#allocation2 + $0x7c] sm:$0x1]  ;;  %v9117_v30 = vpop.f32.mrf.mxu3 }
 0x338   : > { %v4164_v48 = vpop.f32.mrf.mxu2 }
 0x339   : > { %v9102_v47 = vadd.f32 %v4164_v48, %v4115_v38  ;;  %v7240_v38 = vld [vmem:[#allocation2 + $0x60] sm:$0x8] }
 0x33a   : > { %4454 = vmatmul.bf16.gmra.mxu2 %v3088_v19  ;;  %v7241_v48 = vor.u32 %v7390_v32, %v7240_v38  ;;  %v3130_v19 = vrot.slane %v3128_v41, 4  ;;  %v3159_v32 = vshrl.u32 %v2767_v35, 16  ;;  %v3162_v38 = vshll.u32 %v2767_v35, 16 }
 0x33b   : > { %4503 = vmatmul.bf16.gmra.mxu3 %v3106_v55  ;;  %v3148_v55 = vor.u32 %v3147_v25, %v3144_v15 }
 0x33c   : > { %v4120_v2 = vpop.f32.mrf.mxu1  ;;  %v3151_v49 = vshrl.u32 %v7241_v48, 16  ;;  %v3154_v46 = vshll.u32 %v7241_v48, 16  ;;  %v3131_v26 = vor.u32 %v3130_v19, %v3127_v0  ;;  %v3161_v51 = vrot.slane %v3159_v32, 3  ;;  %v6846_v19 = vld [vmem:[#allocation3 + $0x1c0] sm:$0xff] }
 0x33d   : > { %v3149_v61 = vsel %vm2891_vm4, %v3140_v22, %v3148_v55  ;;  %v3164_v63 = vrot.slane %v3162_v38, 4  ;;  %v3177_v48 = vshrl.u32 %v2885_v24, 16  ;;  %5358 = vmatpush.bf16.msra.mxu1 %v6846_v19 }
 0x33e   : > { %v3153_v5 = vrot.slane %v3151_v49, 3  ;;  %v3156_v20 = vrot.slane %v3154_v46, 4 }
 0x33f   : > { %v3165_v35 = vor.u32 %v3164_v63, %v3161_v51 }
 0x340   : > { %v4166_v4 = vpop.f32.mrf.mxu2  ;;  %v3157_v25 = vor.u32 %v3156_v20, %v3153_v5  ;;  %v2838_v20 = vshll.u32 %v2696_v40, 16 }
 0x341   : > { %v9108_v58 = vadd.f32 %v4166_v4, %v4117_v37  ;;  %4410 = vmatmul.bf16.gmra.mxu1 %v3123_v56  ;;  %v2864_v37 = vpack.c.b16 %v2856_v44, %v2856_v44  ;;  %v2832_v4 = vrot.slane %v2830_v57, 5  ;;  %v7244_v44 = vld [vmem:[#allocation2 + $0x70] sm:$0x8]  ;;  %v3180_v56 = vshll.u32 %v2885_v24, 16 }
 0x342   : > { %v2857_v57 = vunpack.c.l.b16 %v2705_v39  ;;  %v7245_v32 = vor.u32 %v7391_v8, %v7244_v44  ;;  %v3166_v38 = vsel %vm2891_vm4, %v3157_v25, %v3165_v35  ;;  %v2888_v8 = vrot.slane %v2696_v40, 5 }
 0x343   : > { %v2886_v36 = vrot.slane %v2864_v37, 5  ;;  %v2833_v41 = vor.u32 %v2832_v4, %v2829_v13  ;;  %v3182_v46 = vrot.slane %v3180_v56, 4 }
 0x344   : > { %v4122_v21 = vpop.f32.mrf.mxu1  ;;  %v2865_v13 = vpack.c.b16 %v2857_v57, %v2857_v57  ;;  %v3194_v51 = vshrl.u32 %v7245_v32, 16  ;;  %v4549_v57 = vld [vmem:[#allocation2 + $0x2c] sm:$0x1] }
 0x345   : > { %v2887_v12 = vsel %vm2866_vm1, %v2885_v24, %v2886_v36  ;;  %v3168_v49 = vshrl.u32 %v2833_v41, 16  ;;  %v3171_v55 = vshll.u32 %v2833_v41, 16 }
 0x346   : > { %v3185_v37 = vshrl.u32 %v2887_v12, 16  ;;  %v3188_v0 = vshll.u32 %v2887_v12, 16  ;;  %v2889_v44 = vrot.slane %v2865_v13, 5  ;;  %v3196_v35 = vrot.slane %v3194_v51, 3 }
 0x347   : > { %v3170_v4 = vrot.slane %v3168_v49, 3  ;;  %v3173_v5 = vrot.slane %v3171_v55, 4 }
 0x348   : > { %v4169_v52 = vpop.f32.mrf.mxu2  ;;  %v3187_v24 = vrot.slane %v3185_v37, 3  ;;  %v3190_v36 = vrot.slane %v3188_v0, 4  ;;  %v2890_v49 = vsel %vm2866_vm1, %v2888_v8, %v2889_v44 }
 0x349   : > { %v9113_v53 = vadd.f32 %v4169_v52, %v4120_v2  ;;  %v6854_v2 = vld [vmem:[#allocation3 + $0x200] sm:$0xff]  ;;  %v3179_v52 = vrot.slane %v3177_v48, 3  ;;  %v9122_v48 = vpop.f32.mrf.mxu3  ;;  %v3174_v56 = vor.u32 %v3173_v5, %v3170_v4  ;;  %v3228_v4 = vshrl.u32 %v2890_v49, 16 }
 0x34a   : > { %4459 = vmatmul.bf16.gmra.mxu2 %v3131_v26  ;;  %v2769_v26 = vpack.c.b16 %v2753_v59, %v2753_v59  ;;  %v3191_v12 = vor.u32 %v3190_v36, %v3187_v24  ;;  %v2840_v59 = vrot.slane %v2838_v20, 5  ;;  %v3223_v24 = vshll.u32 %v2888_v8, 16 }
 0x34b   : > { %4508 = vmatmul.bf16.gmra.mxu3 %v3149_v61  ;;  %5407 = vmatpush.bf16.msra.mxu2 %v6854_v2  ;;  %v2835_v61 = vshrl.u32 %v2696_v40, 16  ;;  %v3183_v63 = vor.u32 %v3182_v46, %v3179_v52  ;;  %v4630_v52 = vshrl.u32 %v8735_v45, 16  ;;  %v4633_v40 = vshll.u32 %v8735_v45, 16 }
 0x34c   : > { %v3202_v41 = vshrl.u32 %v2769_v26, 16  ;;  %v3205_v39 = vshll.u32 %v2769_v26, 16  ;;  %v4701_v36 = vunpack.c.l.b16 %v4549_v57  ;;  %v3231_v5 = vshll.u32 %v2890_v49, 16 }
 0x34d   : > { %v2837_v25 = vrot.slane %v2835_v61, 4  ;;  %v3192_v0 = vsel %vm2891_vm4, %v3183_v63, %v3191_v12  ;;  %v4635_v63 = vrot.slane %v4633_v40, 5  ;;  %v4717_v57 = vrot.slane %v8735_v45, 5 }
 0x34e   : > { %v4125_v15 = vpop.f32.mrf.mxu1  ;;  %v3204_v19 = vrot.slane %v3202_v41, 3  ;;  %v4638_v45 = vshrl.u32 %v8775_v14, 16 }
 0x34f   : > { %v2841_v55 = vor.u32 %v2840_v59, %v2837_v25  ;;  %v3233_v25 = vrot.slane %v3231_v5, 4  ;;  %v4771_v5 = vshll.u32 %v4717_v57, 16 }
 0x350   : > { %v4171_v6 = vpop.f32.mrf.mxu2 }
 0x351   : > { %v9119_v22 = vadd.f32 %v4171_v6, %v4122_v21  ;;  %4415 = vmatmul.bf16.gmra.mxu1 %v3166_v38  ;;  %v3197_v21 = vshll.u32 %v7245_v32, 16  ;;  %v3207_v6 = vrot.slane %v3205_v39, 4  ;;  %v3220_v38 = vshrl.u32 %v2888_v8, 16  ;;  %v9130_v12 = vpop.f32.mrf.mxu3 }
 0x352   : > { %v3211_v20 = vshrl.u32 %v2841_v55, 16  ;;  %v3214_v51 = vshll.u32 %v2841_v55, 16  ;;  %v3225_v39 = vrot.slane %v3223_v24, 4  ;;  %v4709_v8 = vpack.c.b16 %v4701_v36, %v4701_v36 }
 0x353   : > { %v3199_v37 = vrot.slane %v3197_v21, 4  ;;  %v3208_v13 = vor.u32 %v3207_v6, %v3204_v19  ;;  %v4632_v21 = vrot.slane %v4630_v52, 4  ;;  %v3222_v41 = vrot.slane %v3220_v38, 3 }
 0x354   : > { %v3216_v59 = vrot.slane %v3214_v51, 4  ;;  %v4718_v49 = vrot.slane %v4709_v8, 5  ;;  %v4768_v36 = vshrl.u32 %v4717_v57, 16 }
 0x355   : > { %v3200_v32 = vor.u32 %v3199_v37, %v3196_v35  ;;  %v4636_v35 = vor.u32 %v4635_v63, %v4632_v21  ;;  %v4641_v63 = vshll.u32 %v8775_v14, 16 }
 0x356   : > { %v4127_v2 = vpop.f32.mrf.mxu1  ;;  %v4719_v38 = vsel %vm2866_vm1, %v4717_v57, %v4718_v49  ;;  %v4770_v8 = vrot.slane %v4768_v36, 3 }
 0x357   : > { %v3209_v44 = vsel %vm2891_vm4, %v3200_v32, %v3208_v13  ;;  %v4759_v40 = vshrl.u32 %v4636_v35, 16  ;;  %v4550_v13 = vld [vmem:[#allocation2 + $0x3c] sm:$0x1]  ;;  %v4776_v51 = vshrl.u32 %v4719_v38, 16  ;;  %v4779_v21 = vshll.u32 %v4719_v38, 16 }
 0x359   : > { %v9138_v24 = vpop.f32.mrf.mxu3 }
 0x35a   : > { %4464 = vmatmul.bf16.gmra.mxu2 %v3174_v56  ;;  %v3230_v56 = vrot.slane %v3228_v4, 3 }
 0x35b   : > { %4513 = vmatmul.bf16.gmra.mxu3 %v3192_v0  ;;  %v3226_v0 = vor.u32 %v3225_v39, %v3222_v41  ;;  %v4702_v39 = vunpack.c.l.b16 %v4550_v13 }
 0x35c   : > { %v3234_v6 = vor.u32 %v3233_v25, %v3230_v56 }
 0x35d   : > { %v4174_v46 = vpop.f32.mrf.mxu2  ;;  %v4710_v57 = vpack.c.b16 %v4702_v39, %v4702_v39 }
 0x35e   : > { %v9128_v26 = vadd.f32 %v4174_v46, %v4125_v15  ;;  %v4130_v61 = vpop.f32.mrf.mxu1  ;;  %v3213_v15 = vrot.slane %v3211_v20, 3  ;;  %v4762_v46 = vshll.u32 %v4636_v35, 16  ;;  %v3235_v32 = vsel %vm2891_vm4, %v3226_v0, %v3234_v6 }
 0x35f   : > { %v4781_v0 = vrot.slane %v4779_v21, 4  ;;  %v4643_v6 = vrot.slane %v4641_v63, 5 }
 0x360   : > { %v3217_v52 = vor.u32 %v3216_v59, %v3213_v15  ;;  %v4764_v4 = vrot.slane %v4762_v46, 4  ;;  %v4773_v15 = vrot.slane %v4771_v5, 4  ;;  %v4640_v59 = vrot.slane %v4638_v45, 4  ;;  %v4551_v5 = vld [vmem:[#allocation2 + $0x4c] sm:$0x1] }
 0x361   : > { %4420 = vmatmul.bf16.gmra.mxu1 %v3209_v44  ;;  %v4194_v44 = vadd.f32 %v9093_v50, %v9061_v31  ;;  %v4721_v31 = vrot.slane %v4710_v57, 5 }
 0x365   : > { %v4176_v37 = vpop.f32.mrf.mxu2 }
 0x366   : > { %v9133_v19 = vadd.f32 %v4176_v37, %v4127_v2  ;;  %v4132_v55 = vpop.f32.mrf.mxu1  ;;  %v4761_v2 = vrot.slane %v4759_v40, 3  ;;  %v4778_v37 = vrot.slane %v4776_v51, 3 }
 0x368   : > { %v4765_v25 = vor.u32 %v4764_v4, %v4761_v2  ;;  %v4782_v40 = vor.u32 %v4781_v0, %v4778_v37  ;;  %v2671_v2 = vld [vmem:[#allocation2 + $0x9c] sm:$0x1] }
 0x369   : > { %v2672_v45 = vsel %vm8495_vm9, 0, %v2671_v2  ;;  %vm5490_vm9 = vsmask.f32 7440 }
 0x36a   : > { %4469 = vmatmul.bf16.gmra.mxu2 %v3217_v52  ;;  %v4774_v52 = vor.u32 %v4773_v15, %v4770_v8  ;;  %2673 = vst [vmem:[#allocation2 + $0x9c] sm:$0x1] %v2672_v45  ;;  %v4703_v15 = vunpack.c.l.b16 %v4551_v5 }
 0x36b   : > { %4518 = vmatmul.bf16.gmra.mxu3 %v3235_v32  ;;  %v4720_v32 = vrot.slane %v8775_v14, 5  ;;  %v4649_v14 = vshll.u32 %v8823_v62, 16 }
 0x36c   : > { %v4783_v38 = vsel %vm2891_vm4, %v4774_v52, %v4782_v40 }
 0x36d   : > { %v4179_v20 = vpop.f32.mrf.mxu2  ;;  %v4722_v4 = vsel %vm2866_vm1, %v4720_v32, %v4721_v31  ;;  %v4814_v51 = vshll.u32 %v4720_v32, 16  ;;  %v4651_v57 = vrot.slane %v4649_v14, 5  ;;  %v4711_v31 = vpack.c.b16 %v4703_v15, %v4703_v15 }
 0x36e   : > { %v9142_v41 = vadd.f32 %v4179_v20, %v4130_v61  ;;  %v4386_v56 = vpop.f32.mrf.mxu1  ;;  %v4644_v61 = vor.u32 %v4643_v6, %v4640_v59  ;;  %v4811_v20 = vshrl.u32 %v4720_v32, 16 }
 0x36f   : > { %v4387_v35 = vadd.f32 %v4386_v56, %v4194_v44  ;;  %v4819_v44 = vshrl.u32 %v4722_v4, 16  ;;  %v4822_v56 = vshll.u32 %v4722_v4, 16  ;;  %v4816_v0 = vrot.slane %v4814_v51, 4 }
 0x370   : > { %v4802_v36 = vshrl.u32 %v4644_v61, 16  ;;  %v4805_v13 = vshll.u32 %v4644_v61, 16  ;;  %v4813_v37 = vrot.slane %v4811_v20, 3  ;;  %v4724_v11 = vrot.slane %v4711_v31, 5  ;;  %v4552_v20 = vld [vmem:[#allocation2 + $0x5c] sm:$0x1] }
 0x371   : > { %5359 = vmatmul.bf16.vlgmr.msra.gmra.mxu1 %v4765_v25  ;;  %v4147_v25 = vadd.f32 %v9067_v33, %v9046_v23  ;;  %v4821_v40 = vrot.slane %v4819_v44, 3  ;;  %v4824_v61 = vrot.slane %v4822_v56, 4  ;;  %v4854_v51 = vshrl.u32 %v4723_v28, 16 }
 0x372   : > { %v4804_v63 = vrot.slane %v4802_v36, 3  ;;  %v4807_v39 = vrot.slane %v4805_v13, 4  ;;  %v4704_v56 = vunpack.c.l.b16 %v4552_v20 }
 0x373   : > { %v4196_v32 = vadd.f32 %v9099_v27, %v4147_v25  ;;  %v4825_v36 = vor.u32 %v4824_v61, %v4821_v40  ;;  %v4725_v27 = vsel %vm2866_vm1, %v4723_v28, %v4724_v11  ;;  %v4152_v25 = vadd.f32 %v9077_v17, %v9069_v43 }
 0x374   : > { %v4808_v52 = vor.u32 %v4807_v39, %v4804_v63  ;;  %v4657_v63 = vshll.u32 %v8877_v10, 16  ;;  %v4865_v44 = vshll.u32 %v4725_v27, 16  ;;  %v4157_v43 = vadd.f32 %v9087_v18, %v9081_v42 }
 0x375   : > { %v4181_v49 = vpop.f32.mrf.mxu2 }
 0x376   : > { %v9146_v46 = vadd.f32 %v4181_v49, %v4132_v55  ;;  %v4388_v50 = vpop.f32.mrf.mxu1  ;;  %v4646_v55 = vshrl.u32 %v8823_v62, 16  ;;  %v4862_v62 = vshrl.u32 %v4725_v27, 16  ;;  %v4659_v40 = vrot.slane %v4657_v63, 5 }
 0x377   : > { %v4389_v23 = vadd.f32 %v4388_v50, %v4196_v32  ;;  %v4857_v50 = vshll.u32 %v4723_v28, 16  ;;  %v4867_v31 = vrot.slane %v4865_v44, 4  ;;  %v4206_v11 = vadd.f32 %v9122_v48, %v4157_v43 }
 0x378   : > { %v4648_v6 = vrot.slane %v4646_v55, 4  ;;  %v4864_v32 = vrot.slane %v4862_v62, 3  ;;  %v4662_v48 = vshrl.u32 %v8915_v34, 16  ;;  %v4665_v63 = vshll.u32 %v8915_v34, 16 }
 0x379   : > { %v4209_v44 = vadd.f32 %v9130_v12, %v9091_v29 }
 0x37a   : > { %5408 = vmatmul.bf16.vlgmr.msra.gmra.mxu2 %v4783_v38  ;;  %v4652_v33 = vor.u32 %v4651_v57, %v4648_v6  ;;  %v4817_v38 = vor.u32 %v4816_v0, %v4813_v37  ;;  %v4856_v37 = vrot.slane %v4854_v51, 3  ;;  %v4859_v57 = vrot.slane %v4857_v50, 4 }
 0x37c   : > { %v4845_v4 = vshrl.u32 %v4652_v33, 16  ;;  %v4848_v5 = vshll.u32 %v4652_v33, 16  ;;  %v4826_v45 = vsel %vm2891_vm4, %v4817_v38, %v4825_v36  ;;  %v4201_v33 = vadd.f32 %v9111_v16, %v4152_v25 }
 0x37d   : > { %v4435_v21 = vpop.f32.mrf.mxu2  ;;  %v4726_v38 = vrot.slane %v8877_v10, 5 }
 0x37e   : > { %v9157_v8 = vadd.f32 %v4435_v21, %v4387_v35  ;;  %v4391_v59 = vpop.f32.mrf.mxu1  ;;  %v4847_v55 = vrot.slane %v4845_v4, 3  ;;  %v4850_v14 = vrot.slane %v4848_v5, 4  ;;  %v4654_v21 = vshrl.u32 %v8877_v10, 16 }
 0x37f   : > { %v4392_v49 = vadd.f32 %v4391_v59, %v4199_v3  ;;  %v9173_v3 = vpop.f32.mrf.mxu3  ;;  %v4204_v59 = vadd.f32 %v9117_v30, %v9083_v1  ;;  %v4860_v1 = vor.u32 %v4859_v57, %v4856_v37  ;;  %v4868_v30 = vor.u32 %v4867_v31, %v4864_v32 }
 0x380   : > { %v4851_v6 = vor.u32 %v4850_v14, %v4847_v55  ;;  %v4897_v20 = vshrl.u32 %v4726_v38, 16  ;;  %v4900_v51 = vshll.u32 %v4726_v38, 16 }
 0x381   : > { %5364 = vmatmul.bf16.gmra.mxu1 %v4808_v52  ;;  %v4656_v52 = vrot.slane %v4654_v21, 4  ;;  %v4869_v42 = vsel %vm2891_vm4, %v4860_v1, %v4868_v30 }
 0x382   : > { %v4902_v37 = vrot.slane %v4900_v51, 4 }
 0x385   : > { %v4437_v35 = vpop.f32.mrf.mxu2 }
 0x386   : > { %v9162_v13 = vadd.f32 %v4437_v35, %v4389_v23  ;;  %v4393_v2 = vpop.f32.mrf.mxu1  ;;  %v4712_v23 = vpack.c.b16 %v4704_v56, %v4704_v56  ;;  %v4899_v56 = vrot.slane %v4897_v20, 3 }
 0x387   : > { %v4394_v17 = vadd.f32 %v4393_v2, %v4201_v33  ;;  %v9184_v16 = vpop.f32.mrf.mxu3  ;;  %v4553_v2 = vld [vmem:[#allocation2 + $0x6c] sm:$0x1] }
 0x388   : > { %v4727_v36 = vrot.slane %v4712_v23, 5  ;;  %v4903_v23 = vor.u32 %v4902_v37, %v4899_v56 }
 0x38a   : > { %5413 = vmatmul.bf16.gmra.mxu2 %v4826_v45  ;;  %v4728_v18 = vsel %vm2866_vm1, %v4726_v38, %v4727_v36 }
 0x38b   : > { %v4905_v55 = vshrl.u32 %v4728_v18, 16  ;;  %v4908_v14 = vshll.u32 %v4728_v18, 16 }
 0x38d   : > { %v4440_v39 = vpop.f32.mrf.mxu2 }
 0x38e   : > { %v9171_v15 = vadd.f32 %v4440_v39, %v4392_v49  ;;  %v4396_v0 = vpop.f32.mrf.mxu1  ;;  %v4660_v49 = vor.u32 %v4659_v40, %v4656_v52  ;;  %v4705_v39 = vunpack.c.l.b16 %v4553_v2  ;;  %v4664_v52 = vrot.slane %v4662_v48, 4 }
 0x38f   : > { %v4397_v61 = vadd.f32 %v4396_v0, %v4204_v59  ;;  %v4907_v0 = vrot.slane %v4905_v55, 3  ;;  %v4667_v40 = vrot.slane %v4665_v63, 5  ;;  %v9194_v31 = vpop.f32.mrf.mxu3 }
 0x390   : > { %v4888_v5 = vshrl.u32 %v4660_v49, 16  ;;  %v4891_v45 = vshll.u32 %v4660_v49, 16  ;;  %v4713_v32 = vpack.c.b16 %v4705_v39, %v4705_v39  ;;  %v4211_v49 = vadd.f32 %v9138_v24, %v9097_v60 }
 0x391   : > { %5369 = vmatmul.bf16.gmra.mxu1 %v4851_v6  ;;  %v4910_v6 = vrot.slane %v4908_v14, 4  ;;  %v4668_v43 = vor.u32 %v4667_v40, %v4664_v52 }
 0x392   : > { %v4890_v10 = vrot.slane %v4888_v5, 3  ;;  %v4893_v50 = vrot.slane %v4891_v45, 4  ;;  %v4730_v29 = vrot.slane %v4713_v32, 5 }
 0x393   : > { %v4911_v33 = vor.u32 %v4910_v6, %v4907_v0  ;;  %v4931_v38 = vshrl.u32 %v4668_v43, 16  ;;  %v4934_v36 = vshll.u32 %v4668_v43, 16 }
 0x394   : > { %v4894_v59 = vor.u32 %v4893_v50, %v4890_v10  ;;  %v4214_v50 = vadd.f32 %v9173_v3, %v9102_v47  ;;  %v4216_v3 = vadd.f32 %v9184_v16, %v9108_v58  ;;  %v4681_v58 = vshll.u32 %v8999_v54, 16 }
 0x395   : > { %v4442_v35 = vpop.f32.mrf.mxu2  ;;  %v4912_v1 = vsel %vm2891_vm4, %v4903_v23, %v4911_v33  ;;  %v4933_v24 = vrot.slane %v4931_v38, 3  ;;  %v4936_v2 = vrot.slane %v4934_v36, 4 }
 0x396   : > { %v9181_v28 = vadd.f32 %v4442_v35, %v4394_v17  ;;  %v4398_v4 = vpop.f32.mrf.mxu1  ;;  %v4729_v17 = vrot.slane %v8915_v34, 5  ;;  %v4670_v34 = vshrl.u32 %v8957_v7, 16 }
 0x397   : > { %v4399_v27 = vadd.f32 %v4398_v4, %v4206_v11  ;;  %v4554_v4 = vld [vmem:[#allocation2 + $0x7c] sm:$0x1]  ;;  %v9205_v18 = vpop.f32.mrf.mxu3  ;;  %v4937_v56 = vor.u32 %v4936_v2, %v4933_v24 }
 0x398   : > { %v4731_v11 = vsel %vm2866_vm1, %v4729_v17, %v4730_v29  ;;  %v4940_v5 = vshrl.u32 %v4729_v17, 16  ;;  %v4943_v45 = vshll.u32 %v4729_v17, 16  ;;  %v4706_v51 = vunpack.c.l.b16 %v4554_v4 }
 0x399   : > { %v4951_v20 = vshll.u32 %v4731_v11, 16  ;;  %v4672_v63 = vrot.slane %v4670_v34, 4  ;;  %v4678_v4 = vshrl.u32 %v8999_v54, 16 }
 0x39a   : > { %5418 = vmatmul.bf16.gmra.mxu2 %v4869_v42  ;;  %v4948_v42 = vshrl.u32 %v4731_v11, 16  ;;  %v4942_v55 = vrot.slane %v4940_v5, 3 }
 0x39c   : > { %v4950_v48 = vrot.slane %v4948_v42, 3 }
 0x39d   : > { %v4445_v21 = vpop.f32.mrf.mxu2 }
 0x39e   : > { %v9190_v62 = vadd.f32 %v4445_v21, %v4397_v61  ;;  %v4401_v25 = vpop.f32.mrf.mxu1  ;;  %v4945_v21 = vrot.slane %v4943_v45, 4  ;;  %v4219_v45 = vadd.f32 %v9194_v31, %v9113_v53  ;;  %v4221_v31 = vadd.f32 %v9205_v18, %v9119_v22 }
 0x39f   : > { %v4402_v57 = vadd.f32 %v4401_v25, %v4209_v44  ;;  %v4953_v25 = vrot.slane %v4951_v20, 4  ;;  %v4223_v47 = vpop.f32.mrf.mxu3  ;;  %v4686_v22 = vshrl.u32 %v9021_v9, 16  ;;  %v4689_v18 = vshll.u32 %v9021_v9, 16 }
 0x3a0   : > { %v4946_v6 = vor.u32 %v4945_v21, %v4942_v55  ;;  %v4683_v55 = vrot.slane %v4681_v58, 5 }
 0x3a1   : > { %5374 = vmatmul.bf16.gmra.mxu1 %v4894_v59  ;;  %v4714_v59 = vpack.c.b16 %v4706_v51, %v4706_v51  ;;  %v4954_v52 = vor.u32 %v4953_v25, %v4950_v48  ;;  %v4688_v58 = vrot.slane %v4686_v22, 4 }
 0x3a3   : > { %v4733_v40 = vrot.slane %v4714_v59, 5  ;;  %v4955_v17 = vsel %vm2891_vm4, %v4946_v6, %v4954_v52 }
 0x3a5   : > { %v4447_v61 = vpop.f32.mrf.mxu2 }
 0x3a6   : > { %v9197_v12 = vadd.f32 %v4447_v61, %v4399_v27  ;;  %v4403_v35 = vpop.f32.mrf.mxu1  ;;  %v4673_v27 = vshll.u32 %v8957_v7, 16 }
 0x3a7   : > { %v4404_v30 = vadd.f32 %v4403_v35, %v4211_v49  ;;  %v4555_v49 = vld [vmem:[#allocation2 + $0x8c] sm:$0x1]  ;;  %v4225_v20 = vpop.f32.mrf.mxu3 }
 0x3a8   : > { %v4675_v39 = vrot.slane %v4673_v27, 5  ;;  %v4707_v16 = vunpack.c.l.b16 %v4555_v49 }
 0x3aa   : > { %5423 = vmatmul.bf16.gmra.mxu2 %v4912_v1  ;;  %v4676_v37 = vor.u32 %v4675_v39, %v4672_v63 }
 0x3ac   : > { %v4974_v33 = vshrl.u32 %v4676_v37, 16  ;;  %v4977_v61 = vshll.u32 %v4676_v37, 16 }
 0x3ad   : > { %v4450_v60 = vpop.f32.mrf.mxu2 }
 0x3ae   : > { %v9207_v10 = vadd.f32 %v4450_v60, %v4402_v57  ;;  %v4406_v14 = vpop.f32.mrf.mxu1  ;;  %v4732_v57 = vrot.slane %v8957_v7, 5  ;;  %v4976_v7 = vrot.slane %v4974_v33, 3  ;;  %v4979_v38 = vrot.slane %v4977_v61, 4 }
 0x3af   : > { %v4407_v44 = vadd.f32 %v4406_v14, %v4214_v50  ;;  %v4680_v50 = vrot.slane %v4678_v4, 4  ;;  %v4715_v14 = vpack.c.b16 %v4707_v16, %v4707_v16  ;;  %v4691_v16 = vrot.slane %v4689_v18, 5 }
 0x3b0   : > { %v4734_v29 = vsel %vm2866_vm1, %v4732_v57, %v4733_v40  ;;  %v4983_v35 = vshrl.u32 %v4732_v57, 16  ;;  %v4986_v1 = vshll.u32 %v4732_v57, 16  ;;  %v4980_v27 = vor.u32 %v4979_v38, %v4976_v7  ;;  %v4228_v57 = vpop.f32.mrf.mxu3  ;;  %v4556_v40 = vld [vmem:[#allocation2 + $0x9c] sm:$0x1] }
 0x3b1   : > { %5379 = vmatmul.bf16.gmra.mxu1 %v4937_v56  ;;  %v4994_v36 = vshll.u32 %v4734_v29, 16  ;;  %v4684_v39 = vor.u32 %v4683_v55, %v4680_v50  ;;  %v4736_v56 = vrot.slane %v4715_v14, 5  ;;  %v4708_v49 = vunpack.c.l.b16 %v4556_v40 }
 0x3b2   : > { %v4985_v42 = vrot.slane %v4983_v35, 3  ;;  %v4988_v60 = vrot.slane %v4986_v1, 4  ;;  %v4224_v35 = vadd.f32 %v4223_v47, %v9128_v26  ;;  %v4738_v26 = vrot.slane %v9021_v9, 5 }
 0x3b3   : > { %v4996_v2 = vrot.slane %v4994_v36, 4  ;;  %v5020_v6 = vshll.u32 %v4684_v39, 16 }
 0x3b4   : > { %v4989_v21 = vor.u32 %v4988_v60, %v4985_v42 }
 0x3b5   : > { %v4452_v0 = vpop.f32.mrf.mxu2 }
 0x3b6   : > { %v9212_v32 = vadd.f32 %v4452_v0, %v4404_v30  ;;  %v4408_v23 = vpop.f32.mrf.mxu1  ;;  %v4991_v30 = vshrl.u32 %v4734_v29, 16  ;;  %v5017_v0 = vshrl.u32 %v4684_v39, 16  ;;  %v5069_v39 = vshrl.u32 %v4738_v26, 16 }
 0x3b7   : > { %v4409_v43 = vadd.f32 %v4408_v23, %v4216_v3 }
 0x3b8   : > { %v4993_v24 = vrot.slane %v4991_v30, 3  ;;  %v4230_v42 = vpop.f32.mrf.mxu3 }
 0x3ba   : > { %5428 = vmatmul.bf16.gmra.mxu2 %v4955_v17  ;;  %v4997_v48 = vor.u32 %v4996_v2, %v4993_v24  ;;  %v5022_v17 = vrot.slane %v5020_v6, 4  ;;  %v4692_v24 = vor.u32 %v4691_v16, %v4688_v58 }
 0x3bc   : > { %v4998_v59 = vsel %vm2891_vm4, %v4989_v21, %v4997_v48  ;;  %v5060_v21 = vshrl.u32 %v4692_v24, 16  ;;  %v5063_v48 = vshll.u32 %v4692_v24, 16 }
 0x3bd   : > { %v4455_v11 = vpop.f32.mrf.mxu2 }
 0x3be   : > { %v9220_v5 = vadd.f32 %v4455_v11, %v4407_v44  ;;  %v4411_v34 = vpop.f32.mrf.mxu1  ;;  %v4735_v44 = vrot.slane %v8999_v54, 5 }
 0x3bf   : > { %v4412_v51 = vadd.f32 %v4411_v34, %v4219_v45  ;;  %v4716_v45 = vpack.c.b16 %v4708_v49, %v4708_v49  ;;  %v4231_v49 = vadd.f32 %v4230_v42, %v9146_v46 }
 0x3c0   : > { %v4737_v52 = vsel %vm2866_vm1, %v4735_v44, %v4736_v56  ;;  %v5026_v3 = vshrl.u32 %v4735_v44, 16  ;;  %v5029_v23 = vshll.u32 %v4735_v44, 16  ;;  %v5072_v44 = vshll.u32 %v4738_v26, 16  ;;  %v5311_v56 = vpop.f32.mrf.mxu0 }
 0x3c1   : > { %5384 = vmatmul.bf16.gmra.mxu1 %v4980_v27  ;;  %v5034_v54 = vshrl.u32 %v4737_v52, 16  ;;  %v5037_v33 = vshll.u32 %v4737_v52, 16  ;;  %v4739_v47 = vrot.slane %v4716_v45, 5  ;;  %v5071_v52 = vrot.slane %v5069_v39, 3  ;;  %v6687_v45 = vld [vmem:[%s7585_s16 + $0x1c] sm:$0xf] }
 0x3c2   : > { %v5028_v7 = vrot.slane %v5026_v3, 3  ;;  %v5031_v38 = vrot.slane %v5029_v23, 4  ;;  %v5074_v40 = vrot.slane %v5072_v44, 4  ;;  %v5506_v46 = vshrl.u32 %v6687_v45, 16 }
 0x3c3   : > { %v5036_v30 = vrot.slane %v5034_v54, 3  ;;  %v5039_v36 = vrot.slane %v5037_v33, 4  ;;  %v5502_v24 = vshll.u32 %v6687_v45, 16 }
 0x3c4   : > { %v5032_v27 = vor.u32 %v5031_v38, %v5028_v7 }
 0x3c5   : > { %v4457_v63 = vpop.f32.mrf.mxu2  ;;  %v5040_v60 = vor.u32 %v5039_v36, %v5036_v30  ;;  %v6686_v36 = vld [vmem:[%s7585_s16 + $0x18] sm:$0xf] }
 0x3c6   : > { %v9225_v53 = vadd.f32 %v4457_v63, %v4409_v43  ;;  %v4413_v25 = vpop.f32.mrf.mxu1  ;;  %v5019_v43 = vrot.slane %v5017_v0, 3  ;;  %v4740_v63 = vsel %vm2866_vm1, %v4738_v26, %v4739_v47  ;;  %v5493_v58 = vshrl.u32 %v6686_v36, 16  ;;  %vm9263_vm1 = vmor %vm5489_vm6, %vm5490_vm9 }
 0x3c7   : > { %v4414_v37 = vadd.f32 %v4413_v25, %v4221_v31  ;;  %v5041_v14 = vsel %vm2891_vm4, %v5032_v27, %v5040_v60  ;;  %v5062_v25 = vrot.slane %v5060_v21, 3  ;;  %v5080_v9 = vshll.u32 %v4740_v63, 16 }
 0x3c8   : > { %v5023_v4 = vor.u32 %v5022_v17, %v5019_v43  ;;  %v5075_v43 = vor.u32 %v5074_v40, %v5071_v52  ;;  %v5313_v18 = vpop.f32.mrf.mxu0  ;;  %v5496_v16 = vshll.u32 %v6686_v36, 16  ;;  %v5495_v27 = vrot.slane %v5493_v58, 4  ;;  %v9271_v40 = vld [vmem:[%s9429_s5] ss:$0 sm:$0xff] }
 0x3c9   : > { %v5082_v33 = vrot.slane %v5080_v9, 4  ;;  %v5508_v47 = vrot.slane %v5506_v46, 4 }
 0x3ca   : > { %5433 = vmatmul.bf16.gmra.mxu2 %v4998_v59  ;;  %v5065_v59 = vrot.slane %v5063_v48, 4  ;;  %v5498_v60 = vrot.slane %v5496_v16, 5 }
 0x3cc   : > { %v5066_v23 = vor.u32 %v5065_v59, %v5062_v25 }
 0x3cd   : > { %v4460_v61 = vpop.f32.mrf.mxu2 }
 0x3ce   : > { %v9233_v29 = vadd.f32 %v4460_v61, %v4412_v51  ;;  %v4416_v1 = vpop.f32.mrf.mxu1  ;;  %v4226_v51 = vadd.f32 %v4225_v20, %v9133_v19  ;;  %v4484_v19 = vpop.f32.mrf.mxu3  ;;  %v4229_v20 = vadd.f32 %v4228_v57, %v9142_v41 }
 0x3cf   : > { %v4417_v11 = vadd.f32 %v4416_v1, %v4224_v35  ;;  %v4485_v59 = vadd.f32 %v4484_v19, %v9157_v8  ;;  %v6690_v19 = vld [vmem:[%s7585_s16 + $0x28] sm:$0xf] }
 0x3d0   : > { %v5526_v36 = vshll.u32 %v6690_v19, 16 }
 0x3d1   : > { %5389 = vmatmul.bf16.gmra.mxu1 %v5023_v4 }
 0x3d5   : > { %v4462_v34 = vpop.f32.mrf.mxu2 }
 0x3d6   : > { %v9236_v2 = vadd.f32 %v4462_v34, %v4414_v37  ;;  %v4418_v50 = vpop.f32.mrf.mxu1  ;;  %v5077_v37 = vshrl.u32 %v4740_v63, 16  ;;  %v4486_v41 = vpop.f32.mrf.mxu3 }
 0x3d7   : > { %v4419_v55 = vadd.f32 %v4418_v50, %v4226_v51  ;;  %v6688_v51 = vld [vmem:[%s7585_s16 + $0x20] sm:$0x1] }
 0x3d8   : > { %v5079_v54 = vrot.slane %v5077_v37, 3  ;;  %v5512_v44 = vshll.u32 %v6688_v51, 16 }
 0x3da   : > { %5438 = vmatmul.bf16.gmra.mxu2 %v5041_v14  ;;  %v5083_v17 = vor.u32 %v5082_v33, %v5079_v54  ;;  %v5504_v14 = vrot.slane %v5502_v24, 5 }
 0x3dc   : > { %v5084_v1 = vsel %vm2891_vm4, %v5075_v43, %v5083_v17  ;;  %v5509_v39 = vor.u32 %v5508_v47, %v5504_v14  ;;  %v5530_v17 = vshrl.u32 %v6690_v19, 16 }
 0x3dd   : > { %v4465_v31 = vpop.f32.mrf.mxu2 }
 0x3de   : > { %v9242_v0 = vadd.f32 %v4465_v31, %v4417_v11  ;;  %v4421_v6 = vpop.f32.mrf.mxu1  ;;  %v5316_v11 = vpop.f32.mrf.mxu0 }
 0x3df   : > { %v4422_v3 = vadd.f32 %v4421_v6, %v4229_v20  ;;  %v9252_v4 = vpop.f32.mrf.mxu3  ;;  %v6689_v20 = vld [vmem:[%s7585_s16 + $0x24] sm:$0xf]  ;;  %v5510_v6 = vrot.slane %v5509_v39, 4 }
 0x3e0   : > { %v5520_v54 = vshll.u32 %v6689_v20, 16 }
 0x3e1   : > { %5394 = vmatmul.bf16.gmra.mxu1 %v5066_v23  ;;  %v5517_v23 = vshrl.u32 %v6689_v20, 16  ;;  %v6692_v20 = vld [vmem:[%s7585_s16 + $0x30] sm:$0xf] }
 0x3e5   : > { %v4467_v61 = vpop.f32.mrf.mxu2 }
 0x3e6   : > { %v9245_v22 = vadd.f32 %v4467_v61, %v4419_v55  ;;  %v4423_v35 = vpop.f32.mrf.mxu1  ;;  %v9258_v50 = vpop.f32.mrf.mxu0  ;;  %v5499_v55 = vor.u32 %v5498_v60, %v5495_v27  ;;  %v6691_v60 = vld [vmem:[%s7585_s16 + $0x2c] sm:$0x1] }
 0x3e7   : > { %v4424_v57 = vadd.f32 %v4423_v35, %v4231_v49  ;;  %v9260_v48 = vpop.f32.mrf.mxu3  ;;  %v4487_v49 = vadd.f32 %v4486_v41, %v9162_v13  ;;  %v5528_v41 = vrot.slane %v5526_v36, 5 }
 0x3e8   : > { %v5500_v25 = vrot.slane %v5499_v55, 4  ;;  %v5536_v55 = vshll.u32 %v6691_v60, 16 }
 0x3ea   : > { %5443 = vmatmul.bf16.gmra.mxu2 %v5084_v1 }
 0x3ed   : > { %v4470_v7 = vpop.f32.mrf.mxu2 }
 0x3ee   : > { %v9249_v38 = vadd.f32 %v4470_v7, %v4422_v3  ;;  %v5360_v30 = vpop.f32.mrf.mxu1  ;;  %v5505_v3 = vsel %vm9263_vm1, %v5500_v25, %v5504_v14  ;;  %v9276_v33 = vpop.f32.mrf.mxu0 }
 0x3ef   : > { %v5361_v21 = vadd.f32 %v5360_v30, %v5311_v56  ;;  %v5514_v56 = vrot.slane %v5512_v44, 5  ;;  %v5700_v35 = vunpack.c.l.bf16 %v5505_v3  ;;  %v9282_v7 = vpop.f32.mrf.mxu3  ;;  %v5522_v30 = vrot.slane %v5520_v54, 5 }
 0x3f0   : > { %v5541_v3 = vshrl.u32 %v6692_v20, 16 }
 0x3f1   : > { %v5515_v43 = vsel %vm9263_vm1, %v5510_v6, %v5514_v56 }
 0x3f2   : > { %v5701_v16 = vunpack.c.l.bf16 %v5515_v43 }
 0x3f5   : > { %v4472_v34 = vpop.f32.mrf.mxu2 }
 0x3f6   : > { %v9255_v42 = vadd.f32 %v4472_v34, %v4424_v57  ;;  %v5362_v26 = vpop.f32.mrf.mxu1  ;;  %v5532_v34 = vrot.slane %v5530_v17, 4  ;;  %v5323_v39 = vpop.f32.mrf.mxu0 }
 0x3f7   : > { %v5363_v8 = vadd.f32 %v5362_v26, %v5313_v18  ;;  %v5519_v18 = vrot.slane %v5517_v23, 4  ;;  %v4496_v6 = vpop.f32.mrf.mxu3  ;;  %v5544_v23 = vshll.u32 %v6692_v20, 16 }
 0x3f8   : > { %v5533_v51 = vor.u32 %v5532_v34, %v5528_v41  ;;  %v6694_v34 = vld [vmem:[%s7585_s16 + $0x38] sm:$0x1] }
 0x3f9   : > { %v5523_v13 = vor.u32 %v5522_v30, %v5519_v18 }
 0x3fb   : > { %v5524_v44 = vrot.slane %v5523_v13, 4 }
 0x3fd   : > { %v5409_v63 = vpop.f32.mrf.mxu2 }
 0x3fe   : > { %v5410_v31 = vadd.f32 %v5409_v63, %v5361_v21  ;;  %v5365_v9 = vpop.f32.mrf.mxu1  ;;  %v5326_v36 = vpop.f32.mrf.mxu0 }
 0x3ff   : > { %v5366_v24 = vadd.f32 %v5365_v9, %v5316_v11  ;;  %v5534_v11 = vrot.slane %v5533_v51, 4  ;;  %v5538_v9 = vrot.slane %v5536_v55, 5 }
 0x400   : > { %v5449_v52 = vadd.f32 %v5410_v31, %v4485_v59  ;;  %v4490_v31 = vadd.f32 %v9252_v4, %v9171_v15 }
 0x401   : > { %v5539_v4 = vsel %vm9263_vm1, %v5534_v11, %v5538_v9 }
 0x402   : > { %v5720_v57 = vadd.f32 %v9271_v40, %v5449_v52  ;;  %v5529_v52 = vsel %vm9263_vm1, %v5524_v44, %v5528_v41  ;;  %v5703_v30 = vunpack.c.l.bf16 %v5539_v4  ;;  %v6695_v44 = vld [vmem:[%s7585_s16 + $0x3c] sm:$0xf] }
 0x403   : > { %v5702_v43 = vunpack.c.l.bf16 %v5529_v52  ;;  %v5565_v11 = vshrl.u32 %v6695_v44, 16  ;;  %v5568_v9 = vshll.u32 %v6695_v44, 16  ;;  %v6696_v52 = vld [vmem:[%s7585_s16 + $0x40] sm:$0xf] }
 0x404   : > { %v5736_v46 = vadd.f32 %v5720_v57, %v5700_v35  ;;  %v5543_v35 = vrot.slane %v5541_v3, 4  ;;  %v5546_v57 = vrot.slane %v5544_v23, 5 }
 0x405   : > { %v5411_v61 = vpop.f32.mrf.mxu2 }
 0x406   : > { %v5412_v1 = vadd.f32 %v5411_v61, %v5363_v8  ;;  %v5367_v45 = vpop.f32.mrf.mxu1  ;;  %v5752_v14 = vmax.f32 %v5736_v46, 0.0  ;;  %v6693_v8 = vld [vmem:[%s7585_s16 + $0x34] sm:$0xf]  ;;  %v4492_v61 = vadd.f32 %v9260_v48, %v9181_v28  ;;  %v4499_v46 = vpop.f32.mrf.mxu3 }
 0x407   : > { %v5368_v54 = vadd.f32 %v5367_v45, %v9258_v50  ;;  %v5554_v19 = vshrl.u32 %v6693_v8, 16 }
 0x408   : > { %v5450_v58 = vadd.f32 %v5412_v1, %v4487_v49  ;;  %v5550_v1 = vshll.u32 %v6693_v8, 16 }
 0x40a   : > { %v5721_v27 = vadd.f32 %v9271_v40, %v5450_v58  ;;  %v5556_v58 = vrot.slane %v5554_v19, 4  ;;  %v5552_v28 = vrot.slane %v5550_v1, 5  ;;  %v5567_v19 = vrot.slane %v5565_v11, 4 }
 0x40c   : > { %v5737_v26 = vadd.f32 %v5721_v27, %v5701_v16  ;;  %v5547_v27 = vor.u32 %v5546_v57, %v5543_v35  ;;  %v5557_v41 = vor.u32 %v5556_v58, %v5552_v28 }
 0x40d   : > { %v5414_v47 = vpop.f32.mrf.mxu2 }
 0x40e   : > { %v5753_v21 = vmax.f32 %v5737_v26, 0.0  ;;  %v5415_v63 = vadd.f32 %v5414_v47, %v5366_v24  ;;  %v5370_v59 = vpop.f32.mrf.mxu1  ;;  %v5560_v24 = vshll.u32 %v6694_v34, 16  ;;  %v5548_v55 = vrot.slane %v5547_v27, 4  ;;  %v4501_v3 = vpop.f32.mrf.mxu3 }
 0x40f   : > { %v5371_v48 = vadd.f32 %v5370_v59, %v9276_v33  ;;  %v5328_v33 = vpop.f32.mrf.mxu0 }
 0x410   : > { %v6926_v25 = vpack.c.bf16 %v5753_v21, %v5752_v14  ;;  %v5451_v56 = vadd.f32 %v5415_v63, %v4490_v31  ;;  %v4495_v14 = vadd.f32 %v9282_v7, %v9190_v62  ;;  %v5558_v31 = vrot.slane %v5557_v41, 4 }
 0x411   : > { %v5553_v59 = vsel %vm9263_vm1, %v5548_v55, %v5552_v28  ;;  %v5578_v7 = vshrl.u32 %v6696_v52, 16  ;;  %v4500_v41 = vadd.f32 %v4499_v46, %v9207_v10  ;;  %v4502_v10 = vadd.f32 %v4501_v3, %v9212_v32 }
 0x412   : > { %6927 = vst [vmem:[%s9292_s20] sm:$0xff] %v6926_v25   ;;  %v5722_v17 = vadd.f32 %v9271_v40, %v5451_v56  ;;  %v5562_v25 = vrot.slane %v5560_v24, 5  ;;  %v5704_v8 = vunpack.c.l.bf16 %v5553_v59 }
 0x413   : > { %v5580_v35 = vrot.slane %v5578_v7, 4 }
 0x414   : > { %v5738_v16 = vadd.f32 %v5722_v17, %v5702_v43  ;;  %v5563_v62 = vsel %vm9263_vm1, %v5558_v31, %v5562_v25  ;;  %v5574_v43 = vshll.u32 %v6696_v52, 16  ;;  %v6699_v31 = vld [vmem:[%s7585_s16 + $0x4c] sm:$0xf] }
 0x415   : > { %v5416_v15 = vpop.f32.mrf.mxu2  ;;  %v5602_v59 = vshrl.u32 %v6699_v31, 16 }
 0x416   : > { %v5417_v49 = vadd.f32 %v5416_v15, %v5368_v54  ;;  %v5372_v50 = vpop.f32.mrf.mxu1  ;;  %v5754_v26 = vmax.f32 %v5738_v16, 0.0  ;;  %v4497_v54 = vadd.f32 %v4496_v6, %v9197_v12 }
 0x417   : > { %v5373_v56 = vadd.f32 %v5372_v50, %v5323_v39  ;;  %v5576_v50 = vrot.slane %v5574_v43, 5  ;;  %v5331_v6 = vpop.f32.mrf.mxu0 }
 0x418   : > { %v5452_v18 = vadd.f32 %v5417_v49, %v4492_v61  ;;  %v5570_v61 = vrot.slane %v5568_v9, 5  ;;  %v5705_v49 = vunpack.c.l.bf16 %v5563_v62  ;;  %v5598_v62 = vshll.u32 %v6699_v31, 16 }
 0x41a   : > { %v5723_v45 = vadd.f32 %v9271_v40, %v5452_v18  ;;  %v6697_v18 = vld [vmem:[%s7585_s16 + $0x44] sm:$0x1]  ;;  %v5600_v32 = vrot.slane %v5598_v62, 5 }
 0x41b   : > { %v5584_v34 = vshll.u32 %v6697_v18, 16 }
 0x41c   : > { %v5739_v60 = vadd.f32 %v5723_v45, %v5703_v30  ;;  %v5571_v30 = vor.u32 %v5570_v61, %v5567_v19  ;;  %v5581_v45 = vor.u32 %v5580_v35, %v5576_v50  ;;  %v6700_v61 = vld [vmem:[%s7585_s16 + $0x50] sm:$0x1] }
 0x41d   : > { %v5419_v13 = vpop.f32.mrf.mxu2  ;;  %v5586_v55 = vrot.slane %v5584_v34, 5  ;;  %v5608_v35 = vshll.u32 %v6700_v61, 16 }
 0x41e   : > { %v5755_v47 = vmax.f32 %v5739_v60, 0.0  ;;  %v5420_v51 = vadd.f32 %v5419_v13, %v5371_v48  ;;  %v5375_v63 = vpop.f32.mrf.mxu1  ;;  %v4504_v60 = vpop.f32.mrf.mxu3  ;;  %v5572_v13 = vrot.slane %v5571_v30, 4 }
 0x41f   : > { %v5376_v58 = vadd.f32 %v5375_v63, %v5326_v36 }
 0x420   : > { %v6931_v21 = vpack.c.bf16 %v5755_v47, %v5754_v26  ;;  %v5453_v20 = vadd.f32 %v5420_v51, %v4495_v14  ;;  %v6698_v47 = vld [vmem:[%s7585_s16 + $0x48] sm:$0xf]  ;;  %v5582_v51 = vrot.slane %v5581_v45, 4  ;;  %v5577_v14 = vsel %vm9263_vm1, %v5572_v13, %v5576_v50 }
 0x421   : > { %v5592_v63 = vshll.u32 %v6698_v47, 16  ;;  %v5706_v46 = vunpack.c.l.bf16 %v5577_v14  ;;  %v4505_v50 = vadd.f32 %v4504_v60, %v9220_v5 }
 0x422   : > { %7022 = vst [vmem:[%s9292_s20 + $0x8] sm:$0xff] %v6931_v21   ;;  %v5724_v15 = vadd.f32 %v9271_v40, %v5453_v20  ;;  %v5589_v21 = vshrl.u32 %v6698_v47, 16  ;;  %v5587_v20 = vsel %vm9263_vm1, %v5582_v51, %v5586_v55 }
 0x424   : > { %v5740_v57 = vadd.f32 %v5724_v15, %v5704_v8  ;;  %v5591_v52 = vrot.slane %v5589_v21, 4  ;;  %v5604_v15 = vrot.slane %v5602_v59, 4 }
 0x425   : > { %v5421_v23 = vpop.f32.mrf.mxu2 }
 0x426   : > { %v5422_v4 = vadd.f32 %v5421_v23, %v5373_v56  ;;  %v5377_v39 = vpop.f32.mrf.mxu1  ;;  %v5756_v27 = vmax.f32 %v5740_v57, 0.0  ;;  %v5333_v56 = vpop.f32.mrf.mxu0  ;;  %v5594_v23 = vrot.slane %v5592_v63, 5 }
 0x427   : > { %v5378_v44 = vadd.f32 %v5377_v39, %v5328_v33  ;;  %v4506_v8 = vpop.f32.mrf.mxu3  ;;  %v5605_v39 = vor.u32 %v5604_v15, %v5600_v32 }
 0x428   : > { %v5454_v17 = vadd.f32 %v5422_v4, %v4497_v54  ;;  %v5707_v54 = vunpack.c.l.bf16 %v5587_v20  ;;  %v5595_v43 = vor.u32 %v5594_v23, %v5591_v52  ;;  %v4507_v51 = vadd.f32 %v4506_v8, %v9225_v53 }
 0x429   : > { %v5606_v34 = vrot.slane %v5605_v39, 4 }
 0x42a   : > { %v5725_v1 = vadd.f32 %v9271_v40, %v5454_v17  ;;  %v5596_v30 = vrot.slane %v5595_v43, 4 }
 0x42c   : > { %v5741_v12 = vadd.f32 %v5725_v1, %v5705_v49 }
 0x42d   : > { %v5424_v16 = vpop.f32.mrf.mxu2 }
 0x42e   : > { %v5757_v28 = vmax.f32 %v5741_v12, 0.0  ;;  %v5425_v48 = vadd.f32 %v5424_v16, %v5376_v58  ;;  %v5380_v26 = vpop.f32.mrf.mxu1  ;;  %v6701_v16 = vld [vmem:[%s7585_s16 + $0x54] sm:$0xf]  ;;  %v5336_v45 = vpop.f32.mrf.mxu0 }
 0x42f   : > { %v5381_v3 = vadd.f32 %v5380_v26, %v5331_v6  ;;  %v5613_v13 = vshrl.u32 %v6701_v16, 16  ;;  %v6702_v26 = vld [vmem:[%s7585_s16 + $0x58] sm:$0xf] }
 0x430   : > { %v6936_v24 = vpack.c.bf16 %v5757_v28, %v5756_v27  ;;  %v5455_v36 = vadd.f32 %v5425_v48, %v4500_v41  ;;  %v5610_v27 = vrot.slane %v5608_v35, 5  ;;  %v4509_v28 = vpop.f32.mrf.mxu3  ;;  %v5601_v48 = vsel %vm9263_vm1, %v5596_v30, %v5600_v32  ;;  %v6704_v32 = vld [vmem:[%s7585_s16 + $0x60] sm:$0xf]  ;;  %v6705_v30 = vld [vmem:[%s7585_s16 + $0x64] sm:$0xf] }
 0x431   : > { %v5616_v41 = vshll.u32 %v6701_v16, 16  ;;  %v5626_v60 = vshrl.u32 %v6702_v26, 16  ;;  %v5708_v55 = vunpack.c.l.bf16 %v5601_v48  ;;  %v5615_v21 = vrot.slane %v5613_v13, 4 }
 0x432   : > { %7023 = vst [vmem:[%s9292_s20 + $0x10] sm:$0xff] %v6936_v24   ;;  %v5726_v11 = vadd.f32 %v9271_v40, %v5455_v36  ;;  %v5611_v5 = vsel %vm9263_vm1, %v5606_v34, %v5610_v27  ;;  %v4510_v61 = vadd.f32 %v4509_v28, %v9233_v29  ;;  %v5646_v13 = vshll.u32 %v6705_v30, 16 }
 0x433   : > { %v5618_v63 = vrot.slane %v5616_v41, 5  ;;  %v5628_v59 = vrot.slane %v5626_v60, 4  ;;  %v6706_v60 = vld [vmem:[%s7585_s16 + $0x68] sm:$0x1] }
 0x434   : > { %v5742_v4 = vadd.f32 %v5726_v11, %v5706_v46  ;;  %v6703_v11 = vld [vmem:[%s7585_s16 + $0x5c] sm:$0x1] }
 0x435   : > { %v5426_v25 = vpop.f32.mrf.mxu2 }
 0x436   : > { %v5427_v9 = vadd.f32 %v5426_v25, %v5378_v44  ;;  %v5382_v33 = vpop.f32.mrf.mxu1  ;;  %v5758_v57 = vmax.f32 %v5742_v4, 0.0  ;;  %v5622_v44 = vshll.u32 %v6702_v26, 16  ;;  %v5709_v25 = vunpack.c.l.bf16 %v5611_v5 }
 0x437   : > { %v5383_v24 = vadd.f32 %v5382_v33, %v5333_v56  ;;  %v5619_v56 = vor.u32 %v5618_v63, %v5615_v21  ;;  %v5632_v33 = vshll.u32 %v6703_v11, 16 }
 0x438   : > { %v5456_v7 = vadd.f32 %v5427_v9, %v4502_v10  ;;  %v5338_v9 = vpop.f32.mrf.mxu0  ;;  %v5624_v52 = vrot.slane %v5622_v44, 5  ;;  %v4511_v62 = vpop.f32.mrf.mxu3  ;;  %v5656_v44 = vshll.u32 %v6706_v60, 16 }
 0x439   : > { %v4512_v16 = vadd.f32 %v4511_v62, %v9236_v2 }
 0x43a   : > { %v5727_v19 = vadd.f32 %v9271_v40, %v5456_v7 }
 0x43c   : > { %v5743_v17 = vadd.f32 %v5727_v19, %v5707_v54  ;;  %v5629_v54 = vor.u32 %v5628_v59, %v5624_v52  ;;  %v5620_v19 = vrot.slane %v5619_v56, 4 }
 0x43d   : > { %v5429_v49 = vpop.f32.mrf.mxu2 }
 0x43e   : > { %v5759_v1 = vmax.f32 %v5743_v17, 0.0  ;;  %v5430_v18 = vadd.f32 %v5429_v49, %v5381_v3  ;;  %v5385_v12 = vpop.f32.mrf.mxu1  ;;  %v5630_v3 = vrot.slane %v5629_v54, 4  ;;  %v5634_v17 = vrot.slane %v5632_v33, 5 }
 0x43f   : > { %v5386_v53 = vadd.f32 %v5385_v12, %v5336_v45  ;;  %v5625_v39 = vsel %vm9263_vm1, %v5620_v19, %v5624_v52  ;;  %v5650_v12 = vshrl.u32 %v6705_v30, 16 }
 0x440   : > { %v6941_v58 = vpack.c.bf16 %v5759_v1, %v5758_v57  ;;  %v5457_v6 = vadd.f32 %v5430_v18, %v4505_v50  ;;  %v5637_v57 = vshrl.u32 %v6704_v32, 16  ;;  %v5640_v1 = vshll.u32 %v6704_v32, 16  ;;  %v5341_v50 = vpop.f32.mrf.mxu0 }
 0x441   : > { %v5635_v29 = vsel %vm9263_vm1, %v5630_v3, %v5634_v17  ;;  %v5710_v45 = vunpack.c.l.bf16 %v5625_v39  ;;  %v5652_v26 = vrot.slane %v5650_v12, 4 }
 0x442   : > { %7024 = vst [vmem:[%s9292_s20 + $0x18] sm:$0xff] %v6941_v58   ;;  %v5728_v36 = vadd.f32 %v9271_v40, %v5457_v6  ;;  %v4514_v6 = vpop.f32.mrf.mxu3  ;;  %v5639_v28 = vrot.slane %v5637_v57, 4  ;;  %v5642_v48 = vrot.slane %v5640_v1, 5 }
 0x444   : > { %v5744_v10 = vadd.f32 %v5728_v36, %v5708_v55  ;;  %v5648_v55 = vrot.slane %v5646_v13, 5 }
 0x445   : > { %v5431_v47 = vpop.f32.mrf.mxu2 }
 0x446   : > { %v5432_v14 = vadd.f32 %v5431_v47, %v5383_v24  ;;  %v5387_v20 = vpop.f32.mrf.mxu1  ;;  %v5760_v8 = vmax.f32 %v5744_v10, 0.0  ;;  %v5711_v24 = vunpack.c.l.bf16 %v5635_v29  ;;  %v5653_v63 = vor.u32 %v5652_v26, %v5648_v55 }
 0x447   : > { %v5388_v18 = vadd.f32 %v5387_v20, %v5338_v9  ;;  %v6707_v9 = vld [vmem:[%s7585_s16 + $0x6c] sm:$0xf] }
 0x448   : > { %v5458_v31 = vadd.f32 %v5432_v14, %v4507_v51  ;;  %v5643_v51 = vor.u32 %v5642_v48, %v5639_v28  ;;  %v5343_v59 = vpop.f32.mrf.mxu0  ;;  %v5654_v52 = vrot.slane %v5653_v63, 4  ;;  %v5664_v54 = vshll.u32 %v6707_v9, 16 }
 0x44a   : > { %v5729_v46 = vadd.f32 %v9271_v40, %v5458_v31  ;;  %v5644_v10 = vrot.slane %v5643_v51, 4  ;;  %v4516_v56 = vpop.f32.mrf.mxu3 }
 0x44b   : > { %v4517_v19 = vadd.f32 %v4516_v56, %v9245_v22 }
 0x44c   : > { %v5745_v23 = vadd.f32 %v5729_v46, %v5709_v25  ;;  %v4515_v46 = vadd.f32 %v4514_v6, %v9242_v0  ;;  %v5649_v62 = vsel %vm9263_vm1, %v5644_v10, %v5648_v55 }
 0x44d   : > { %v5434_v7 = vpop.f32.mrf.mxu2 }
 0x44e   : > { %v5761_v15 = vmax.f32 %v5745_v23, 0.0  ;;  %v5435_v4 = vadd.f32 %v5434_v7, %v5386_v53  ;;  %v5390_v35 = vpop.f32.mrf.mxu1  ;;  %v5658_v53 = vrot.slane %v5656_v44, 5  ;;  %v5661_v7 = vshrl.u32 %v6707_v9, 16 }
 0x44f   : > { %v5391_v36 = vadd.f32 %v5390_v35, %v5341_v50 }
 0x450   : > { %v6946_v43 = vpack.c.bf16 %v5761_v15, %v5760_v8  ;;  %v5459_v49 = vadd.f32 %v5435_v4, %v4510_v61  ;;  %v6708_v8 = vld [vmem:[%s7585_s16 + $0x70] sm:$0xf]  ;;  %v5659_v4 = vsel %vm9263_vm1, %v5654_v52, %v5658_v53  ;;  %v5712_v61 = vunpack.c.l.bf16 %v5649_v62  ;;  %v5346_v1 = vpop.f32.mrf.mxu0 }
 0x451   : > { %v5674_v0 = vshrl.u32 %v6708_v8, 16  ;;  %v5663_v17 = vrot.slane %v5661_v7, 4  ;;  %v5670_v39 = vshll.u32 %v6708_v8, 16  ;;  %v5713_v57 = vunpack.c.l.bf16 %v5659_v4 }
 0x452   : > { %7025 = vst [vmem:[%s9292_s20 + $0x20] sm:$0xff] %v6946_v43   ;;  %v5730_v34 = vadd.f32 %v9271_v40, %v5459_v49  ;;  %v5666_v49 = vrot.slane %v5664_v54, 5  ;;  %v4519_v29 = vpop.f32.mrf.mxu3 }
 0x453   : > { %v5672_v22 = vrot.slane %v5670_v39, 5 }
 0x454   : > { %v5746_v47 = vadd.f32 %v5730_v34, %v5710_v45  ;;  %v5667_v12 = vor.u32 %v5666_v49, %v5663_v17 }
 0x455   : > { %v5436_v58 = vpop.f32.mrf.mxu2 }
 0x456   : > { %v5437_v27 = vadd.f32 %v5436_v58, %v5388_v18  ;;  %v5392_v14 = vpop.f32.mrf.mxu1  ;;  %v5762_v31 = vmax.f32 %v5746_v47, 0.0  ;;  %v5676_v18 = vrot.slane %v5674_v0, 4  ;;  %v6709_v58 = vld [vmem:[%s7585_s16 + $0x74] sm:$0x1]  ;;  %s6862_s16 = sshll.u32 %s7412_s26, 4 }
 0x457   : > { %v5393_v33 = vadd.f32 %v5392_v14, %v5343_v59  ;;  %v5680_v6 = vshll.u32 %v6709_v58, 16  ;;  %s5813_s23 = sadd.s32 %s6862_s16, %s6713_s21  ;;  %s7296_s21 = scalar_lea.hbm %s9431_s7, 256 }
 0x458   : > { %v5460_v41 = vadd.f32 %v5437_v27, %v4512_v16  ;;  %v5677_v27 = vor.u32 %v5676_v18, %v5672_v22  ;;  %v5348_v55 = vpop.f32.mrf.mxu0  ;;  %s6714_s26 = sshll.u32 %s5813_s23, 2 }
 0x459   : > { %v5682_v60 = vrot.slane %v5680_v6, 5  ;;  %s5815_s17 = scalar_lea.hbm %s9431_s7, %s6714_s26 }
 0x45a   : > { %v5731_v5 = vadd.f32 %v9271_v40, %v5460_v41  ;;  %v5668_v41 = vrot.slane %v5667_v12, 4  ;;  %v4521_v14 = vpop.f32.mrf.mxu3  ;;  %s5818_s18 = sshll.u32 %s5815_s17, 4  ;;  %s5819_s18 = int_to_ptr.hbm [resolvable:$true] %s5818_s18 }
 0x45b   : > { %v4522_v63 = vadd.f32 %v4521_v14, %v9255_v42  ;;  %s7290_s30 = sshra.s32 %s5819_s18, 4  ;;  %s7291_s30 = int_to_ptr.hbm [resolvable:$true] %s7290_s30 }
 0x45c   : > { %v5747_v2 = vadd.f32 %v5731_v5, %v5711_v24  ;;  %v4520_v24 = vadd.f32 %v4519_v29, %v9249_v38  ;;  %v5678_v5 = vrot.slane %v5677_v27, 4  ;;  %s7292_s11 = scalar_lea.hbm %s7291_s30, 64  ;;  %p7297_p6 = scmp.lt.s32.totalorder %s7291_s30, %s9431_s7 }
 0x45d   : > { %v5439_v21 = vpop.f32.mrf.mxu2  ;;  %p7293_p2 = scmp.ne.s32.totalorder %s7291_s30, %s7292_s11  ;;  %p7298_p7 = scmp.lt.s32.totalorder %s7296_s21, %s7292_s11 }
 0x45e   : > { %v5763_v25 = vmax.f32 %v5747_v2, 0.0  ;;  %v5440_v20 = vadd.f32 %v5439_v21, %v5391_v36  ;;  %v5395_v3 = vpop.f32.mrf.mxu1  ;;  %v5673_v36 = vsel %vm9263_vm1, %v5668_v41, %v5672_v22  ;;  %v5683_v38 = vsel %vm9263_vm1, %v5678_v5, %v5682_v60 }
 0x45f   : > { %v5396_v16 = vadd.f32 %v5395_v3, %v5346_v1  ;;  %v5714_v44 = vunpack.c.l.bf16 %v5673_v36  ;;  %v5715_v59 = vunpack.c.l.bf16 %v5683_v38  ;;  %p7294_p4 = pnand %p7293_p2, %p7527_p3  ;;  %p7299_p9 = por %p7298_p7, %p7297_p6 }
 0x460   : > { %v6951_v11 = vpack.c.bf16 %v5763_v25, %v5762_v31  ;;  %v5461_v23 = vadd.f32 %v5440_v20, %v4515_v46 }
 0x461   : > { %p7295_p5 = pneg %p7294_p4 }
 0x462   : > { %7026 = vst [vmem:[%s9292_s20 + $0x28] sm:$0xff] %v6951_v11   ;;  %v5732_v43 = vadd.f32 %v9271_v40, %v5461_v23 }
 0x463   : > { %p7300_p10 = pnand %p7299_p9, %p7295_p5 }
 0x464   : > { %v5748_v30 = vadd.f32 %v5732_v43, %v5712_v61 }
 0x465   : > { %v5441_v15 = vpop.f32.mrf.mxu2 }
 0x466   : > { %v5442_v32 = vadd.f32 %v5441_v15, %v5393_v33  ;;  %v5764_v28 = vmax.f32 %v5748_v30, 0.0  ;;  %v5397_v47 = vpop.f32.mrf.mxu1 }
 0x467   : > { %v5398_v2 = vadd.f32 %v5397_v47, %v5348_v55 }
 0x468   : > { %v5462_v35 = vadd.f32 %v5442_v32, %v4517_v19 }
 0x46a   : > { %v5733_v50 = vadd.f32 %v9271_v40, %v5462_v35 }
 0x46c   : > { %v5749_v45 = vadd.f32 %v5733_v50, %v5713_v57 }
 0x46d   : > { %v5444_v34 = vpop.f32.mrf.mxu2 }
 0x46e   : > { %v5765_v48 = vmax.f32 %v5749_v45, 0.0  ;;  %v5445_v13 = vadd.f32 %v5444_v34, %v5396_v16 }
 0x470   : > { %v6956_v26 = vpack.c.bf16 %v5765_v48, %v5764_v28  ;;  %v5463_v51 = vadd.f32 %v5445_v13, %v4520_v24 }
 0x472   : > { %7027 = vst [vmem:[%s9292_s20 + $0x30] sm:$0xff] %v6956_v26   ;;  %v5734_v31 = vadd.f32 %v9271_v40, %v5463_v51 }
 0x474   : > { %v5750_v10 = vadd.f32 %v5734_v31, %v5714_v44 }
 0x475   : > { %v5446_v21 = vpop.f32.mrf.mxu2 }
 0x476   : > { %v5447_v25 = vadd.f32 %v5446_v21, %v5398_v2  ;;  %v5766_v42 = vmax.f32 %v5750_v10, 0.0 }
 0x478   : > { %v5464_v20 = vadd.f32 %v5447_v25, %v4522_v63 }
 0x47a   : > { %v5735_v46 = vadd.f32 %v9271_v40, %v5464_v20 }
 0x47c   : > { %v5751_v37 = vadd.f32 %v5735_v46, %v5715_v59 }
 0x47e   : > { %v5767_v11 = vmax.f32 %v5751_v37, 0.0 }
 0x480   : > { %v6961_v9 = vpack.c.bf16 %v5767_v11, %v5766_v42 }
 0x482   : > { %7028 = vst [vmem:[%s9292_s20 + $0x38] sm:$0xff] %v6961_v9  }
 0x483   : > { %7303 = shalt.err (!%p7300_p10)
}
 0x484   : > { %s7433_s15 = smov 64   ;;  %s7434_s20 = smov 4  }
 0x485   : > { %7050 = dma.vmem_to_hbm [thread:$0]  (%p7527_p3), %s5817_s8, 1024, %s5819_s18, %s5801_s12, %s7433_s15, %s7433_s15, %s7434_s20  }
 0x486 PF: > { %p7062_p11 = scmp.ge.s32.totalorder %s7428_s6, 2  ;;  %s5833_s27 = sand.u32 1, %s7400_s24  }
 0x487   : > { %s5834_s2 = scalar_lea.sflag [#allocation5], %s5833_s27 }
 0x488   : > { %p7057_p12 = pnand %p7062_p11, %p7536_p8 }
 0x48a   : > { %p7058_p13 = pneg %p7057_p12 }
 0x48c   : > { %7341 = dma.done.wait (%p7058_p13), %s5834_s2, 1024  }
 0x48d   : > { %7343 = vsyncadd (%p7058_p13), %s5834_s2, 4294966272  ;;  %s21_s6 = sadd.s32 1, %s7428_s6   ;;  %s9488_s24 = smov %s7404_s25 }
 0x48e   : > { %p18_p0 = scmp.ge.s32.totalorder %s21_s6, 6   ;;  %s9489_s25 = smov %s7408_s3 }
 0x48f   : > { %s9490_s3 = smov %s7557_s22  ;;  %s9491_s26 = smov %s7420_s28 }
 0x490   : > { %s9492_s27 = smov %s7424_s29  ;;  %s9493_s28 = smov %s9496_s9 }
 0x491   : > { %s9494_s29 = smov %s9500_s10  ;;  %20 = sbr.rel (!%p18_p0) target bundleno = 8 (0x8), region = 97 }
 0x496   :  { %5840 = vsyncpa [#allocation4], 1 }
 0x497   :  { %5842 = vsyncpa [#allocation4 + $0x1], 1 }
 0x498   :  { %5843 = vsyncpa [#allocation5], 1 }
 0x499   :  { %5845 = vsyncpa [#allocation5 + $0x1], 1 }

// kernel: tpu_custom_call.1
= control target key start
LH: loop header
LB: loop body
LE: loop exit
PB: predicated region body
PF: predicated region fallthrough
CT: control target
= control target key end

     0   :  { %s9424_s0 = inlined_call_operand.vmem [shape: bf16[2,20,18,128], index: 0, kind: input, shape index: {}]   ;;  %s9425_s1 = inlined_call_operand.vmem [shape: bf16[3,384,128], index: 1, kind: input, shape index: {}]   ;;  %s9426_s2 = inlined_call_operand.hbm [shape: bf16[3,384,128], index: 2, kind: input, shape index: {}]   ;;  %s9427_s3 = inlined_call_operand.vmem [shape: bf16[128,128], index: 3, kind: input, shape index: {}]   ;;  %s9428_s4 = inlined_call_operand.vmem [shape: f32[1,128], index: 4, kind: input, shape index: {}]   ;;  %s9429_s5 = inlined_call_operand.vmem [shape: f32[1,128], index: 5, kind: input, shape index: {}]   ;;  %s9430_s6 = inlined_call_operand.vmem [shape: f32[1,128], index: 6, kind: input, shape index: {}]   ;;  %s9431_s7 = inlined_call_operand.hbm [shape: bf16[2,16,16,128], index: 7, kind: output, shape index: {}]  }
   0x1   :  { %9432 = sst [smem:[#allocation21_spill]] %s9426_s2 }
   0x2   :  { %12 = vsyncpa [#allocation4], 0 }
   0x3   :  { %13 = vsyncpa [#allocation5], 0 }
   0x4   :  { %15 = vsyncpa [#allocation5 + $0x1], 0  ;;  %s7475_s24 = smov 0   ;;  %s7477_s25 = smov 0  }
   0x5   :  { %s7479_s3 = smov 0   ;;  %s7481_s26 = smov 0  }
   0x6   :  { %s7483_s27 = smov 0   ;;  %s7485_s28 = smov 0  }
   0x7   :  { %s7487_s29 = smov 0   ;;  %s7489_s6 = smov 0  }
   0x8 LB: > { %s5917_s30 = sadd.s32 4294967295, %s7428_s6   ;;  %s5918_s8 = sadd.s32 4294967294, %s7428_s6   ;;  %s7428_s6 = sphi %s7489_s6, %s21_s6   ;;  %s7424_s29 = sphi %s7487_s29, %s9494_s29   ;;  %s7420_s28 = sphi %s7485_s28, %s9493_s28   ;;  %s7416_s27 = sphi %s7483_s27, %s9492_s27   ;;  %s7412_s26 = sphi %s7481_s26, %s9491_s26   ;;  %s7408_s3 = sphi %s7479_s3, %s9490_s3   ;;  %s7404_s25 = sphi %s7477_s25, %s9489_s25   ;;  %s7400_s24 = sphi %s7475_s24, %s9488_s24  }
   0x9   : > { %s30_s9 = sadd.s32 1, %s7420_s28  ;;  %s33_s10 = sadd.s32 1, %s7424_s29 }
   0xa   : > { %p31_p0 = scmp.ge.s32.totalorder %s30_s9, 2  ;;  %s194_s11 = sadd.s32 1, %s7408_s3 }
   0xb   : > { %p204_p1 = scmp.ne.s32.totalorder %s7408_s3, %s7404_s25  ;;  %p205_p2 = scmp.eq.s32.totalorder %s5917_s30, 3 }
   0xc   : > { %s9496_s9 = smov (%p31_p0, %s30_s9), 0  ;;  %s9498_s10 = smov (!%p31_p0, %s33_s10), %s7424_s29 }
   0xd   : > { %s190_s12 = ssub.s32 %s7420_s28, %s9496_s9  ;;  %p7527_p3 = por %p205_p2, %p204_p1 }
   0xe   : > { %p35_p4 = scmp.ge.s32.totalorder %s9498_s10, 2  ;;  %p210_p5 = scmp.ne.s32.totalorder %s7404_s25, %s7400_s24 }
   0xf   : > { %p211_p6 = scmp.eq.s32.totalorder %s5918_s8, 3  ;;  %p5919_p7 = scmp.ge.s32.totalorder %s7428_s6, 1 }
  0x10   : > { %s9500_s10 = smov (%p35_p4, %s9498_s10), 0  ;;  %p218_p9 = scmp.lt.s32.totalorder %s7428_s6, 5 }
  0x11   : > { %p7536_p8 = por %p211_p6, %p210_p5  ;;  %s189_s15 = ssub.s32 %s7424_s29, %s9500_s10 }
  0x12   : > { %s191_s16 = sor.u32 %s190_s12, %s189_s15  ;;  %p7543_p10 = pnand %p5919_p7, %p218_p9 }
  0x13   : > { %p192_p11 = scmp.eq.s32.totalorder %s191_s16, 0  ;;  %p7547_p12 = scmp.eq.s32.totalorder %s5917_s30, 0 }
  0x14   : > { %p7052_p13 = pneg %p7543_p10  ;;  %s9437_s2 = sld [smem:[#allocation21_spill]] }
  0x15   : > { %s7557_s22 = scalar_select %p192_p11, %s7408_s3, %s194_s11  }
  0x16   : > { %s7430_s23 = smov [#allocation3]   ;;  %p7053_p0 = pnand %p7547_p12, %p7052_p13 }
  0x17   : > { %s234_s8 = sshll.u32 %s7430_s23, 4  ;;  %s7431_s12 = smov 64   ;;  %s235_s8 = int_to_ptr.vmem [resolvable:$true] %s234_s8 }
  0x18   : > { %s7432_s30 = smov 4   ;;  %270 = sbr.rel (%p7543_p10) target bundleno = 1158 (0x486), region = 48 }
  0x1a   : > { %s232_s21 = sshll.u32 %s9437_s2, 4  ;;  %s233_s21 = int_to_ptr.hbm [resolvable:$true] %s232_s21 }
  0x1b   : > { %7055 = dma.hbm_to_vmem [thread:$0]  (!%p7053_p0), %s233_s21, 9216, %s235_s8, [#allocation4], %s7431_s12, %s7431_s12, %s7432_s30  }
  0x1d   : > { %7337 = dma.done.wait (%p7547_p12), [#allocation4], 9216  }
  0x1e   : > { %7339 = vsyncadd (%p7547_p12), [#allocation4], 4294958080  ;;  %p303_p1 = scmp.lt.s32.totalorder %s7416_s27, 1  ;;  %v6749_v0 = vld [vmem:[%s9425_s1 + $0xf8] sm:$0xff]  ;;  %s6717_s17 = smul.u32 96, %s7412_s26  ;;  %v6748_v2 = vld [vmem:[%s9425_s1 + $0xf0] sm:$0xff] }
  0x1f   : > { %v6757_v1 = vld [vmem:[%s9425_s1 + $0x138] sm:$0xff]  ;;  %1221 = vmatpush.bf16.msra.mxu0 %v6749_v0  ;;  %v6756_v3 = vld [vmem:[%s9425_s1 + $0x130] sm:$0xff]  ;;  %v6747_v4 = vld [vmem:[%s9425_s1 + $0xe8] sm:$0xff]  ;;  %vm444_vm0 = vsmask.f32 7424  ;;  %vm605_vm1 = vcmask 1046528  }
  0x20   : > { %s304_s11 = scalar_select %p303_p1, %s7416_s27, 1  ;;  %1280 = vmatpush.bf16.msra.mxu1 %v6757_v1  ;;  %7029 = vmatpush.bf16.msra.mxu3 %v6757_v1  ;;  %v6755_v5 = vld [vmem:[%s9425_s1 + $0x128] sm:$0xff]  ;;  %v7596_v6 = vld [vmem:[%s9425_s1 + $0x178] sm:$0xff]  ;;  %v6746_v9 = vld [vmem:[%s9425_s1 + $0xe0] sm:$0xff]  ;;  %vm2608_vm2 = vcmask 1043459   ;;  %vm2641_vm4 = vcmask 1040384  }
  0x21   : > { %7037 = vmatpush.bf16.msra.mxu2 %v7596_v6  ;;  %v6754_v10 = vld [vmem:[%s9425_s1 + $0x120] sm:$0xff]  ;;  %v6745_v13 = vld [vmem:[%s9425_s1 + $0xd8] sm:$0xff]  ;;  %v6764_v18 = vld [vmem:[%s9425_s1 + $0x170] sm:$0xff]  ;;  %s5926_s23 = sshll.u32 %s7412_s26, 3  ;;  %vm2609_vm3 = vsmask.f32 7950 }
  0x22   : > { %s7045_s15 = smul.u32 240, %s304_s11  ;;  %v6753_v14 = vld [vmem:[%s9425_s1 + $0x118] sm:$0xff]  ;;  %v6744_v19 = vld [vmem:[%s9425_s1 + $0xd0] sm:$0xff]  ;;  %v7640_v25 = vld [vmem:[%s9425_s1 + $0x168] sm:$0xff]  ;;  %s6397_s2 = sadd.s32 4294967295, %s5926_s23 }
  0x23   : > { %1222 = vmatpush.bf16.msra.mxu0 %v6748_v2  ;;  %v6752_v20 = vld [vmem:[%s9425_s1 + $0x110] sm:$0xff]  ;;  %v6743_v26 = vld [vmem:[%s9425_s1 + $0xc8] sm:$0xff]  ;;  %v7656_v34 = vld [vmem:[%s9425_s1 + $0x160] sm:$0xff]  ;;  %vm2642_vm5 = vsmask.f32 256  ;;  %s6713_s21 = sshll.u32 %s7416_s27, 5 }
  0x24   : > { %s307_s18 = scalar_lea.vmem %s9424_s0, %s7045_s15  ;;  %1281 = vmatpush.bf16.msra.mxu1 %v6756_v3  ;;  %7030 = vmatpush.bf16.msra.mxu3 %v6756_v3  ;;  %v6751_v27 = vld [vmem:[%s9425_s1 + $0x108] sm:$0xff]  ;;  %v6742_v37 = vld [vmem:[%s9425_s1 + $0xc0] sm:$0xff]  ;;  %v6725_v45 = vld [vmem:[%s9425_s1 + $0x38] sm:$0xff]  ;;  %s300_s15 = sand.u32 1, %s7404_s25  }
  0x25   : > { %s7585_s16 = scalar_lea.vmem %s307_s18, %s6717_s17  ;;  %7038 = vmatpush.bf16.msra.mxu2 %v6764_v18  ;;  %v6750_v38 = vld [vmem:[%s9425_s1 + $0x100] sm:$0xff]  ;;  %v7681_v46 = vld [vmem:[%s9425_s1 + $0x158] sm:$0xff]  ;;  %v6724_v52 = vld [vmem:[%s9425_s1 + $0x30] sm:$0xff]  ;;  %s5924_s19 = sshll.u32 %s300_s15, 6 }
  0x26   : > { %v7599_v7 = vld [vmem:[%s7585_s16 + $0xc] sm:$0xff]   ;;  %v5951_v11 = vld [vmem:[%s7585_s16 + $0x14] sm:$0x1]  ;;  %v5958_v12 = vld [vmem:[%s7585_s16 + $0x68] sm:$0x1]  ;;  %s9292_s20 = scalar_lea.vmem [#allocation6], %s5924_s19 }
  0x27   : > { %v7602_v8 = vld [vmem:[%s7585_s16 + $0xc] sm:$0xf0]  ;;  %1223 = vmatpush.bf16.msra.mxu0 %v6747_v4  ;;  %v808_v15 = vunpack.c.l.b16 %v5951_v11  ;;  %v815_v16 = vunpack.c.l.b16 %v5958_v12  ;;  %v7620_v17 = vld [vmem:[%s7585_s16 + $0x60] sm:$0xff]   ;;  %v831_v22 = vshll.u32 %v7599_v7, 16  ;;  %v829_v28 = vshrl.u32 %v7599_v7, 16  ;;  %v7688_v50 = vld [vmem:[%s7585_s16 + $0x18] sm:$0xff]  }
  0x28   : > { %1282 = vmatpush.bf16.msra.mxu1 %v6755_v5  ;;  %7031 = vmatpush.bf16.msra.mxu3 %v6755_v5  ;;  %v915_v24 = vshll.u32 %v7620_v17, 16  ;;  %v913_v31 = vshrl.u32 %v7620_v17, 16  ;;  %v7659_v35 = vld [vmem:[%s7585_s16 + $0x6c] sm:$0xff]   ;;  %v5952_v43 = vld [vmem:[%s7585_s16 + $0x20] sm:$0x1]  ;;  %v843_v54 = vshll.u32 %v7688_v50, 16  ;;  %vm8489_vm6 = vmand %vm2608_vm2, %vm2609_vm3 }
  0x29   : > { %v7631_v21 = vpack.c.b16 %v808_v15, %v808_v15  ;;  %v7634_v23 = vpack.c.b16 %v815_v16, %v815_v16  ;;  %v833_v29 = vrot.slane %v831_v22, 1  ;;  %7039 = vmatpush.bf16.msra.mxu2 %v7640_v25  ;;  %v7662_v36 = vld [vmem:[%s7585_s16 + $0x6c] sm:$0xf0]  ;;  %v5959_v44 = vld [vmem:[%s7585_s16 + $0x74] sm:$0x1]  ;;  %v809_v48 = vunpack.c.l.b16 %v5952_v43  ;;  %v6723_v60 = vld [vmem:[%s9425_s1 + $0x28] sm:$0xff] }
  0x2a   : > { %v917_v32 = vrot.slane %v915_v24, 1  ;;  %v816_v51 = vunpack.c.l.b16 %v5959_v44  ;;  %v7698_v53 = vld [vmem:[%s9425_s1 + $0x150] sm:$0xff]  ;;  %v927_v57 = vshll.u32 %v7659_v35, 16  ;;  %v5954_v59 = vld [vmem:[%s7585_s16 + $0x38] sm:$0x1]  ;;  %v7715_v61 = vld [vmem:[%s9425_s1 + $0x148] sm:$0xff] }
  0x2b   : > { %1224 = vmatpush.bf16.msra.mxu0 %v6746_v9  ;;  %v836_v30 = vshll.u32 %v7631_v21, 16  ;;  %v920_v33 = vshll.u32 %v7634_v23, 16  ;;  %v834_v39 = vor.u32 %v833_v29, %v829_v28  ;;  %v7701_v55 = vpack.c.b16 %v809_v48, %v809_v48  ;;  %v6990_v58 = vld [vmem:[%s7585_s16 + $0x30] sm:$0xf0]  ;;  %v6991_v62 = vld [vmem:[%s7585_s16 + $0x30] sm:$0xe]  ;;  %vm8495_vm9 = vmand %vm2641_vm4, %vm2642_vm5 }
  0x2c   : > { %1283 = vmatpush.bf16.msra.mxu1 %v6754_v10  ;;  %7032 = vmatpush.bf16.msra.mxu3 %v6754_v10  ;;  %v7670_v41 = vor.u32 %v917_v32, %v913_v31  ;;  %v7703_v56 = vpack.c.b16 %v816_v51, %v816_v51  ;;  %v811_v63 = vunpack.c.l.b16 %v5954_v59  ;;  %v6992_v0 = vor.u32 %v6991_v62, %v6990_v58  ;;  %v7725_v9 = vld [vmem:[%s7585_s16 + $0x24] sm:$0xff]   ;;  %v5960_v22 = vld [vmem:[%s7585_s16 + $0x80] sm:$0x1]  ;;  %v6721_v24 = vld [vmem:[%s9425_s1 + $0x18] sm:$0xff]  ;;  %s5816_s8 = sshll.u32 %s9292_s20, 4  ;;  %s5801_s12 = scalar_lea.sflag [#allocation5], %s300_s15  ;;  %s5817_s8 = int_to_ptr.vmem [resolvable:$true] %s5816_s8 }
  0x2d   : > { %v838_v40 = vrot.slane %v836_v30, 1  ;;  %v922_v42 = vrot.slane %v920_v33, 1  ;;  %7040 = vmatpush.bf16.msra.mxu2 %v7656_v34  ;;  %v841_v1 = vshrl.u32 %v7688_v50, 16  ;;  %v845_v2 = vrot.slane %v843_v54, 1  ;;  %v7728_v10 = vld [vmem:[%s7585_s16 + $0x24] sm:$0xf0] }
  0x2e   : > { %v848_v3 = vshll.u32 %v7701_v55, 16  ;;  %v7720_v4 = vpack.c.b16 %v811_v63, %v811_v63  ;;  %v925_v5 = vshrl.u32 %v7659_v35, 16  ;;  %v6722_v11 = vld [vmem:[%s9425_s1 + $0x20] sm:$0xff]  ;;  %v817_v29 = vunpack.c.l.b16 %v5960_v22  ;;  %v7753_v30 = vld [vmem:[%s7585_s16 + $0x78] sm:$0xff]   ;;  %v6720_v31 = vld [vmem:[%s9425_s1 + $0x10] sm:$0xff] }
  0x2f   : > { %1225 = vmatpush.bf16.msra.mxu0 %v6745_v13  ;;  %v839_v47 = vsel %vm444_vm0, %v834_v39, %v838_v40  ;;  %v923_v49 = vsel %vm444_vm0, %v7670_v41, %v922_v42  ;;  %v6758_v12 = vld [vmem:[%s9425_s1 + $0x140] sm:$0xff]  ;;  %v997_v13 = vrot.slane %v6992_v0, 1  ;;  %v7739_v15 = vor.u32 %v845_v2, %v841_v1  ;;  %v7345_v42 = vld [vmem:[%s7585_s16 + $0x3c] sm:$0xe]  ;;  %v6719_v44 = vld [vmem:[%s9425_s1 + $0x8] sm:$0xff] }
  0x30   : > { %1284 = vmatpush.bf16.msra.mxu1 %v6753_v14  ;;  %7033 = vmatpush.bf16.msra.mxu3 %v6753_v14  ;;  %v998_v14 = vrot.slane %v7720_v4, 1  ;;  %v850_v16 = vrot.slane %v848_v3, 1  ;;  %v855_v33 = vshll.u32 %v7725_v9, 16  ;;  %v7767_v39 = vpack.c.b16 %v817_v29, %v817_v29  ;;  %v7790_v2 = vld [vmem:[%s7585_s16 + $0x30] sm:$0xff]   ;;  %v5957_v29 = vld [vmem:[%s7585_s16 + $0x5c] sm:$0x1] }
  0x31   : > { %7041 = vmatpush.bf16.msra.mxu2 %v7681_v46  ;;  %v939_v40 = vshll.u32 %v7753_v30, 16  ;;  %v937_v51 = vshrl.u32 %v7753_v30, 16  ;;  %v867_v3 = vshll.u32 %v7790_v2, 16  ;;  %vm2891_vm4 = vsmask.f32 4352 }
  0x32   : > { %v944_v54 = vshll.u32 %v7767_v39, 16 }
  0x33   : > { %1226 = vmatpush.bf16.msra.mxu0 %v6744_v19 }
  0x34   : > { %1285 = vmatpush.bf16.msra.mxu1 %v6752_v20  ;;  %7034 = vmatpush.bf16.msra.mxu3 %v6752_v20  ;;  %v5953_v20 = vld [vmem:[%s7585_s16 + $0x2c] sm:$0x1]  ;;  %v946_v63 = vrot.slane %v944_v54, 1 }
  0x35   : > { %7042 = vmatpush.bf16.msra.mxu2 %v7698_v53 }
  0x37   : > { %1227 = vmatpush.bf16.msra.mxu0 %v6743_v26  ;;  %v851_v26 = vsel %vm444_vm0, %v7739_v15, %v850_v16  ;;  %v869_v16 = vrot.slane %v867_v3, 1 }
  0x38   : > { %1286 = vmatpush.bf16.msra.mxu1 %v6751_v27  ;;  %7035 = vmatpush.bf16.msra.mxu3 %v6751_v27  ;;  %v810_v27 = vunpack.c.l.b16 %v5953_v20 }
  0x39   : > { %7043 = vmatpush.bf16.msra.mxu2 %v7715_v61 }
  0x3a   : > { %v7759_v32 = vpack.c.b16 %v810_v27, %v810_v27  ;;  %v5944_v27 = vld [vmem:[%s7585_s16 + $0x54] sm:$0xff]  }
  0x3b   : > { %1228 = vmatpush.bf16.msra.mxu0 %v6742_v37  ;;  %v7344_v37 = vld [vmem:[%s7585_s16 + $0x3c] sm:$0xf0] }
  0x3c   : > { %1287 = vmatpush.bf16.msra.mxu1 %v6750_v38  ;;  %7036 = vmatpush.bf16.msra.mxu3 %v6750_v38  ;;  %v5955_v38 = vld [vmem:[%s7585_s16 + $0x44] sm:$0x1]  ;;  %v860_v48 = vshll.u32 %v7759_v32, 16 }
  0x3d   : > { %7044 = vmatpush.bf16.msra.mxu2 %v6758_v12  ;;  %v812_v43 = vunpack.c.l.b16 %v5955_v38 }
  0x3e   : > { %1229 = vmatmul.bf16.vlgmr.msra.gmra.mxu0 %v7599_v7  ;;  %v932_v7 = vshll.u32 %v7703_v56, 16 }
  0x3f   : > { %1339 = vmatpush.bf16.msrb.mxu0 %v7596_v6  ;;  %1288 = vmatmul.bf16.vlgmr.msra.gmra.mxu1 %v839_v47  ;;  %v929_v6 = vrot.slane %v927_v57, 1  ;;  %v857_v47 = vrot.slane %v855_v33, 1  ;;  %v814_v33 = vunpack.c.l.b16 %v5957_v29  ;;  %v1016_v29 = vrot.slane %v7767_v39, 1  ;;  %v6733_v39 = vld [vmem:[%s9425_s1 + $0x78] sm:$0xff] }
  0x40   : > { %1542 = vmatpush.bf16.msrb.mxu3 %v6725_v45  ;;  %v934_v19 = vrot.slane %v932_v7, 1  ;;  %v7775_v45 = vpack.c.b16 %v812_v43, %v812_v43  ;;  %v6994_v7 = vld [vmem:[%s7585_s16 + $0x48] sm:$0xe] }
  0x41   : > { %1323 = vmatmul.bf16.vlgmr.msra.gmra.mxu3 %v923_v49  ;;  %v7346_v49 = vor.u32 %v7345_v42, %v7344_v37  ;;  %v824_v37 = vpack.c.b16 %v814_v33, %v814_v33  ;;  %v7863_v33 = vld [vmem:[%s7585_s16 + $0x3c] sm:$0xf0] }
  0x42   : > { %v1001_v58 = vrot.slane %v7775_v45, 1  ;;  %v884_v43 = vshll.u32 %v7775_v45, 16 }
  0x43   : > { %1340 = vmatpush.bf16.msrb.mxu0 %v6764_v18  ;;  %v930_v18 = vor.u32 %v929_v6, %v925_v5  ;;  %v1000_v57 = vrot.slane %v7346_v49, 1  ;;  %v6993_v5 = vld [vmem:[%s7585_s16 + $0x48] sm:$0xf0]  ;;  %v5956_v6 = vld [vmem:[%s7585_s16 + $0x50] sm:$0x1] }
  0x44   : > { %1543 = vmatpush.bf16.msrb.mxu3 %v6724_v52  ;;  %v941_v52 = vrot.slane %v939_v40, 1 }
  0x45   : > { %v935_v28 = vsel %vm444_vm0, %v930_v18, %v934_v19  ;;  %v1002_v0 = vsel %vm605_vm1, %v1000_v57, %v1001_v58  ;;  %v872_v18 = vshll.u32 %v7720_v4, 16  ;;  %v6996_v57 = vld [vmem:[%s7585_s16 + $0x60] sm:$0xf0]  ;;  %v6997_v58 = vld [vmem:[%s7585_s16 + $0x60] sm:$0xe] }
  0x46   : > { %v942_v62 = vor.u32 %v941_v52, %v937_v51  ;;  %v886_v51 = vrot.slane %v884_v43, 1  ;;  %v6732_v43 = vld [vmem:[%s9425_s1 + $0x70] sm:$0xff] }
  0x47   : > { %1341 = vmatpush.bf16.msrb.mxu0 %v7640_v25  ;;  %v999_v25 = vsel %vm605_vm1, %v997_v13, %v998_v14  ;;  %v865_v14 = vshrl.u32 %v7790_v2, 16  ;;  %v874_v22 = vrot.slane %v872_v18, 1 }
  0x48   : > { %1544 = vmatpush.bf16.msrb.mxu3 %v6723_v60  ;;  %1362 = vmatmul.bf16.vlgmr.msra.gmra.mxu2 %v999_v25  ;;  %v862_v60 = vrot.slane %v860_v48, 1  ;;  %v947_v1 = vsel %vm444_vm0, %v942_v62, %v946_v63  ;;  %v1007_v48 = vrot.slane %v824_v37, 1 }
  0x49   : > { %v7799_v20 = vor.u32 %v869_v16, %v865_v14  ;;  %v7844_v14 = vld [vmem:[%s7585_s16 + $0x24] sm:$0xff]  }
  0x4a   : > { %v7847_v16 = vld [vmem:[%s7585_s16 + $0x24] sm:$0xf0] }
  0x4b   : > { %1342 = vmatpush.bf16.msrb.mxu0 %v7656_v34  ;;  %v7763_v34 = vld [vmem:[%s7585_s16 + $0x3c] sm:$0xff]   ;;  %v875_v25 = vsel %vm444_vm0, %v7799_v20, %v874_v22 }
  0x4c   : > { %1545 = vmatpush.bf16.msrb.mxu3 %v6722_v11  ;;  %v813_v11 = vunpack.c.l.b16 %v5956_v6  ;;  %v879_v4 = vshll.u32 %v7763_v34, 16  ;;  %v877_v40 = vshrl.u32 %v7763_v34, 16  ;;  %v903_v6 = vshll.u32 %v5944_v27, 16 }
  0x4e   : > { %1234 = vmatmul.bf16.gmra.mxu0 %v7688_v50  ;;  %v823_v13 = vpack.c.b16 %v813_v11, %v813_v11  ;;  %v881_v42 = vrot.slane %v879_v4, 1 }
  0x4f   : > { %1343 = vmatpush.bf16.msrb.mxu0 %v7681_v46  ;;  %1293 = vmatmul.bf16.gmra.mxu1 %v851_v26  ;;  %v853_v46 = vshrl.u32 %v7725_v9, 16  ;;  %v7805_v26 = vld [vmem:[%s7585_s16] sm:$0xff]  }
  0x50   : > { %1546 = vmatpush.bf16.msrb.mxu3 %v6721_v24  ;;  %v1004_v19 = vrot.slane %v823_v13, 1  ;;  %v882_v49 = vor.u32 %v881_v42, %v877_v40  ;;  %v896_v63 = vshll.u32 %v823_v13, 16  ;;  %v908_v13 = vshll.u32 %v824_v37, 16 }
  0x51   : > { %1328 = vmatmul.bf16.gmra.mxu3 %v935_v28  ;;  %v858_v59 = vor.u32 %v857_v47, %v853_v46  ;;  %v7347_v28 = vld [vmem:[%s7585_s16 + $0x54] sm:$0xf0]  ;;  %v7820_v46 = vld [vmem:[%s7585_s16 + $0xc] sm:$0xf0] }
  0x52   : > { %v887_v54 = vsel %vm444_vm0, %v882_v49, %v886_v51  ;;  %v910_v22 = vrot.slane %v908_v13, 1  ;;  %v6987_v13 = vld [vmem:[%s7585_s16 + $0x18] sm:$0xf0] }
  0x53   : > { %1344 = vmatpush.bf16.msrb.mxu0 %v7698_v53  ;;  %v6718_v53 = vld [vmem:[%s9425_s1] sm:$0xff] }
  0x54   : > { %1547 = vmatpush.bf16.msrb.mxu3 %v6720_v31  ;;  %v7348_v31 = vld [vmem:[%s7585_s16 + $0x54] sm:$0xe] }
  0x55   : > { %v7349_v38 = vor.u32 %v7348_v31, %v7347_v28  ;;  %v7860_v31 = vld [vmem:[%s7585_s16 + $0x3c] sm:$0xff]  }
  0x57   : > { %1345 = vmatpush.bf16.msrb.mxu0 %v7715_v61  ;;  %v863_v61 = vsel %vm444_vm0, %v858_v59, %v862_v60  ;;  %v1006_v47 = vrot.slane %v7349_v38, 1  ;;  %v6998_v59 = vor.u32 %v6997_v58, %v6996_v57 }
  0x58   : > { %1548 = vmatpush.bf16.msrb.mxu3 %v6719_v44  ;;  %1367 = vmatmul.bf16.gmra.mxu2 %v1002_v0  ;;  %v7817_v44 = vld [vmem:[%s7585_s16 + $0xc] sm:$0xff]  }
  0x59   : > { %v1008_v52 = vsel %vm605_vm1, %v1006_v47, %v1007_v48  ;;  %v1009_v0 = vrot.slane %v6998_v59, 1 }
  0x5b   : > { %1346 = vmatpush.bf16.msrb.mxu0 %v6758_v12  ;;  %v6995_v12 = vor.u32 %v6994_v7, %v6993_v5  ;;  %v7136_v7 = vld [vmem:[%s7585_s16 + $0x6c] sm:$0xe] }
  0x5c   : > { %1549 = vmatpush.bf16.msrb.mxu3 %v6718_v53  ;;  %v7825_v53 = vld [vmem:[%s7585_s16 + $0x48] sm:$0xff]   ;;  %v7137_v11 = vor.u32 %v7136_v7, %v7662_v36 }
  0x5d   : > { %v891_v45 = vshll.u32 %v7825_v53, 16  ;;  %v889_v60 = vshrl.u32 %v7825_v53, 16 }
  0x5e   : > { %1239 = vmatmul.bf16.gmra.mxu0 %v7725_v9  ;;  %v1003_v9 = vrot.slane %v6995_v12, 1  ;;  %v905_v12 = vrot.slane %v903_v6, 1  ;;  %v1012_v18 = vrot.slane %v7137_v11, 1 }
  0x5f   : > { %1298 = vmatmul.bf16.gmra.mxu1 %v863_v61  ;;  %v893_v62 = vrot.slane %v891_v45, 1  ;;  %v1010_v61 = vrot.slane %v7634_v23, 1  ;;  %v901_v23 = vshrl.u32 %v5944_v27, 16  ;;  %1601 = vmatpush.bf16.msra.mxu0 %v6733_v39  ;;  %v6741_v45 = vld [vmem:[%s9425_s1 + $0xb8] sm:$0xff]  ;;  %v6735_v39 = vld [vmem:[%s9425_s1 + $0x88] sm:$0xff] }
  0x60   : > { %v1005_v24 = vsel %vm605_vm1, %v1003_v9, %v1004_v19  ;;  %v1013_v9 = vrot.slane %v7703_v56, 1  ;;  %1660 = vmatpush.bf16.msrb.mxu1 %v6741_v45  ;;  %v6968_v45 = vld [vmem:[%s7585_s16] sm:$0xe] }
  0x61   : > { %1333 = vmatmul.bf16.gmra.mxu3 %v947_v1  ;;  %v7834_v1 = vor.u32 %v893_v62, %v889_v60  ;;  %v1011_v3 = vsel %vm605_vm1, %v1009_v0, %v1010_v61  ;;  %v906_v19 = vor.u32 %v905_v12, %v901_v23  ;;  %v7908_v62 = vld [vmem:[%s7585_s16 + $0x54] sm:$0xf0]  ;;  %v6738_v12 = vld [vmem:[%s9425_s1 + $0xa0] sm:$0xff] }
  0x62   : > { %v6729_v0 = vld [vmem:[%s9425_s1 + $0x58] sm:$0xff] }
  0x63   : > { %v911_v36 = vsel %vm444_vm0, %v906_v19, %v910_v22  ;;  %1602 = vmatpush.bf16.msra.mxu0 %v6732_v43  ;;  %v6727_v22 = vld [vmem:[%s9425_s1 + $0x48] sm:$0xff] }
  0x68   : > { %1372 = vmatmul.bf16.gmra.mxu2 %v1005_v24  ;;  %v6999_v24 = vld [vmem:[%s7585_s16 + $0x78] sm:$0xf0] }
  0x6e   : > { %1244 = vmatmul.bf16.gmra.mxu0 %v7790_v2 }
  0x6f   : > { %1303 = vmatmul.bf16.gmra.mxu1 %v875_v25  ;;  %v7000_v25 = vld [vmem:[%s7585_s16 + $0x78] sm:$0xe] }
  0x70   : > { %v7001_v4 = vor.u32 %v7000_v25, %v6999_v24  ;;  %v6736_v25 = vld [vmem:[%s9425_s1 + $0x90] sm:$0xff] }
  0x71   : > { %1550 = vmatmul.bf16.vlgmr.msrb.gmra.mxu3 %v7805_v26 }
  0x72   : > { %v1015_v28 = vrot.slane %v7001_v4, 1  ;;  %v334_v4 = vld [vmem:[%s7585_s16 + $0x8] sm:$0x1] }
  0x73   : > { %v424_v43 = vunpack.c.l.b16 %v334_v4 }
  0x74   : > { %v1017_v56 = vsel %vm605_vm1, %v1015_v28, %v1016_v29  ;;  %v6781_v29 = vld [vmem:[%s9425_s1 + $0x1f8] sm:$0xff] }
  0x75   : > { %2305 = vmatpush.bf16.msra.mxu3 %v6781_v29  ;;  %v7145_v29 = vld [vmem:[%s7585_s16 + $0xc] sm:$0xe] }
  0x78   : > { %1377 = vmatmul.bf16.gmra.mxu2 %v1008_v52  ;;  %v7139_v52 = vld [vmem:[%s7585_s16 + $0xc] sm:$0xe] }
  0x7e   : > { %1249 = vmatmul.bf16.gmra.mxu0 %v7763_v34  ;;  %v898_v34 = vrot.slane %v896_v63, 1  ;;  %v6740_v63 = vld [vmem:[%s9425_s1 + $0xb0] sm:$0xff] }
  0x7f   : > { %1308 = vmatmul.bf16.gmra.mxu1 %v887_v54  ;;  %v6730_v54 = vld [vmem:[%s9425_s1 + $0x60] sm:$0xff] }
  0x80   : > { %v899_v5 = vsel %vm444_vm0, %v7834_v1, %v898_v34  ;;  %1661 = vmatpush.bf16.msrb.mxu1 %v6740_v63  ;;  %v989_v34 = vrot.slane %v7631_v21, 1  ;;  %v6728_v21 = vld [vmem:[%s9425_s1 + $0x50] sm:$0xff]  ;;  %v7142_v63 = vld [vmem:[%s7585_s16 + $0x24] sm:$0xe] }
  0x81   : > { %1555 = vmatmul.bf16.gmra.mxu3 %v7817_v44 }
  0x88   : > { %1382 = vmatmul.bf16.gmra.mxu2 %v1011_v3 }
  0x8e   : > { %1254 = vmatmul.bf16.gmra.mxu0 %v7825_v53 }
  0x8f   : > { %1313 = vmatmul.bf16.gmra.mxu1 %v899_v5 }
  0x91   : > { %1560 = vmatmul.bf16.gmra.mxu3 %v7688_v50  ;;  %v1014_v50 = vsel %vm605_vm1, %v1012_v18, %v1013_v9  ;;  %v6988_v18 = vld [vmem:[%s7585_s16 + $0x18] sm:$0xe] }
  0x92   : > { %v6737_v9 = vld [vmem:[%s9425_s1 + $0x98] sm:$0xff]  ;;  %v6989_v24 = vor.u32 %v6988_v18, %v6987_v13  ;;  %v7143_v18 = vor.u32 %v7142_v63, %v7728_v10 }
  0x98   : > { %1387 = vmatmul.bf16.gmra.mxu2 %v1014_v50 }
  0x9e   : > { %1259 = vmatmul.bf16.gmra.mxu0 %v5944_v27 }
  0x9f   : > { %1318 = vmatmul.bf16.gmra.mxu1 %v911_v36 }
  0xa1   : > { %1565 = vmatmul.bf16.gmra.mxu3 %v7844_v14 }
  0xa8   : > { %1392 = vmatmul.bf16.gmra.mxu2 %v1017_v56  ;;  %v6726_v56 = vld [vmem:[%s9425_s1 + $0x40] sm:$0xff] }
  0xae   : > { %1264 = vmatmul.bf16.gmra.mxu0 %v7620_v17 }
  0xb1   : > { %1570 = vmatmul.bf16.gmra.mxu3 %v7790_v2 }
  0xbb   : > { %v1230_v27 = vpop.f32.mrf.mxu0 }
  0xbc   : > { %v1289_v37 = vpop.f32.mrf.mxu1 }
  0xbd   : > { %v7865_v38 = vadd.f32 %v1289_v37, %v1230_v27  ;;  %v991_v27 = vrot.slane %v6989_v24, 1  ;;  %v992_v37 = vrot.slane %v7701_v55, 1  ;;  %v6734_v55 = vld [vmem:[%s9425_s1 + $0x80] sm:$0xff]  ;;  %v335_v24 = vld [vmem:[%s7585_s16 + $0x14] sm:$0x1] }
  0xbe   : > { %1269 = vmatmul.bf16.gmra.mxu0 %v7659_v35  ;;  %v6731_v35 = vld [vmem:[%s9425_s1 + $0x68] sm:$0xff]  ;;  %v425_v4 = vunpack.c.l.b16 %v335_v24 }
  0xbf   : > { %1603 = vmatpush.bf16.msra.mxu0 %v6731_v35 }
  0xc1   : > { %1575 = vmatmul.bf16.gmra.mxu3 %v7860_v31 }
  0xc3   : > { %v7874_v2 = vpop.f32.mrf.mxu0  ;;  %1604 = vmatpush.bf16.msra.mxu0 %v6730_v54  ;;  %v6967_v54 = vld [vmem:[%s7585_s16] sm:$0xf0] }
  0xc4   : > { %v7872_v40 = vpop.f32.mrf.mxu3  ;;  %v7876_v42 = vpop.f32.mrf.mxu1 }
  0xc7   : > { %1605 = vmatpush.bf16.msra.mxu0 %v6729_v0  ;;  %v434_v0 = vpack.c.b16 %v424_v43, %v424_v43 }
  0xcb   : > { %v1235_v48 = vpop.f32.mrf.mxu0  ;;  %v1363_v58 = vpop.f32.mrf.mxu2  ;;  %1606 = vmatpush.bf16.msra.mxu0 %v6728_v21 }
  0xcc   : > { %v7881_v47 = vpop.f32.mrf.mxu3  ;;  %v1294_v49 = vpop.f32.mrf.mxu1 }
  0xcd   : > { %v7886_v51 = vadd.f32 %v1294_v49, %v1235_v48 }
  0xce   : > { %1274 = vmatmul.bf16.gmra.mxu0 %v7753_v30  ;;  %v7140_v30 = vor.u32 %v7139_v52, %v7602_v8  ;;  %v6739_v8 = vld [vmem:[%s9425_s1 + $0xa8] sm:$0xff]  ;;  %v993_v52 = vsel %vm605_vm1, %v991_v27, %v992_v37  ;;  %v6780_v37 = vld [vmem:[%s9425_s1 + $0x1f0] sm:$0xff] }
  0xcf   : > { %1662 = vmatpush.bf16.msrb.mxu1 %v6739_v8  ;;  %1607 = vmatpush.bf16.msra.mxu0 %v6727_v22  ;;  %v6789_v8 = vld [vmem:[%s9425_s1 + $0x238] sm:$0xff]  ;;  %v7991_v22 = vld [vmem:[%s7585_s16 + $0x6c] sm:$0xf0] }
  0xd0   : > { %v988_v61 = vrot.slane %v7140_v30, 1  ;;  %2306 = vmatpush.bf16.msra.mxu3 %v6780_v37 }
  0xd1   : > { %1580 = vmatmul.bf16.gmra.mxu3 %v7825_v53  ;;  %v7905_v53 = vld [vmem:[%s7585_s16 + $0x54] sm:$0xff]  }
  0xd2   : > { %v990_v7 = vsel %vm605_vm1, %v988_v61, %v989_v34  ;;  %v6969_v61 = vor.u32 %v6968_v45, %v6967_v54 }
  0xd3   : > { %v7899_v59 = vpop.f32.mrf.mxu0  ;;  %v7925_v23 = vpop.f32.mrf.mxu2  ;;  %1663 = vmatpush.bf16.msrb.mxu1 %v6738_v12  ;;  %1608 = vmatpush.bf16.msra.mxu0 %v6726_v56 }
  0xd4   : > { %v7897_v57 = vpop.f32.mrf.mxu3  ;;  %v7901_v60 = vpop.f32.mrf.mxu1 }
  0xd7   : > { %1664 = vmatpush.bf16.msrb.mxu1 %v6737_v9  ;;  %v7988_v9 = vld [vmem:[%s7585_s16 + $0x6c] sm:$0xff]  }
  0xdb   : > { %v1240_v5 = vpop.f32.mrf.mxu0  ;;  %v1368_v28 = vpop.f32.mrf.mxu2  ;;  %1665 = vmatpush.bf16.msrb.mxu1 %v6736_v25  ;;  %v995_v25 = vrot.slane %v7759_v32, 1 }
  0xdc   : > { %v7920_v3 = vpop.f32.mrf.mxu3  ;;  %v1299_v6 = vpop.f32.mrf.mxu1 }
  0xdd   : > { %9438 = vst [vmem:[#allocation9_spill] sm:$0xff] %v7920_v3  ;;  %v7923_v11 = vadd.f32 %v1299_v6, %v1240_v5  ;;  %v606_v5 = vrot.slane %v6969_v61, 1  ;;  %v607_v6 = vrot.slane %v434_v0, 1  ;;  %v446_v61 = vshrl.u32 %v7805_v26, 16 }
  0xde   : > { %1347 = vmatmul.bf16.vlgmr.msrb.gmra.mxu0 %v990_v7 }
  0xdf   : > { %1666 = vmatpush.bf16.msrb.mxu1 %v6735_v39  ;;  %2364 = vmatpush.bf16.msrb.mxu0 %v6789_v8  ;;  %v608_v21 = vsel %vm605_vm1, %v606_v5, %v607_v6  ;;  %v453_v5 = vshll.u32 %v434_v0, 16  ;;  %v6788_v6 = vld [vmem:[%s9425_s1 + $0x230] sm:$0xff] }
  0xe1   : > { %1585 = vmatmul.bf16.gmra.mxu3 %v7905_v53 }
  0xe3   : > { %v7944_v50 = vpop.f32.mrf.mxu0  ;;  %1667 = vmatpush.bf16.msrb.mxu1 %v6734_v55  ;;  %v7977_v7 = vpop.f32.mrf.mxu2  ;;  %2365 = vmatpush.bf16.msrb.mxu0 %v6788_v6 }
  0xe4   : > { %v7939_v19 = vpop.f32.mrf.mxu3  ;;  %v7946_v36 = vpop.f32.mrf.mxu1 }
  0xe6   : > { %1668 = vmatmul.bf16.vlgmr.msrb.gmra.mxu1 %v608_v21 }
  0xeb   : > { %v1245_v48 = vpop.f32.mrf.mxu0  ;;  %v1373_v27 = vpop.f32.mrf.mxu2 }
  0xec   : > { %v7962_v35 = vpop.f32.mrf.mxu3  ;;  %v1304_v49 = vpop.f32.mrf.mxu1 }
  0xed   : > { %9439 = vst [vmem:[#allocation10_spill] sm:$0xff] %v7962_v35  ;;  %v1305_v30 = vadd.f32 %v1304_v49, %v1245_v48  ;;  %v435_v49 = vpack.c.b16 %v425_v4, %v425_v4 }
  0xee   : > { %1352 = vmatmul.bf16.gmra.mxu0 %v993_v52  ;;  %v7146_v52 = vor.u32 %v7145_v29, %v7820_v46 }
  0xef   : > { %v7971_v34 = vadd.f32 %v1363_v58, %v1305_v30  ;;  %v610_v45 = vrot.slane %v435_v49, 1  ;;  %v448_v30 = vshll.u32 %v7805_v26, 16 }
  0xf0   : > { %v609_v32 = vrot.slane %v7146_v52, 1 }
  0xf1   : > { %1590 = vmatmul.bf16.gmra.mxu3 %v7620_v17  ;;  %v994_v17 = vrot.slane %v7143_v18, 1  ;;  %v450_v8 = vrot.slane %v448_v30, 1  ;;  %v336_v18 = vld [vmem:[%s7585_s16 + $0x20] sm:$0x1] }
  0xf2   : > { %v611_v63 = vsel %vm605_vm1, %v609_v32, %v610_v45  ;;  %v6779_v32 = vld [vmem:[%s9425_s1 + $0x1e8] sm:$0xff] }
  0xf3   : > { %v7982_v12 = vpop.f32.mrf.mxu0  ;;  %v996_v10 = vsel %vm605_vm1, %v994_v17, %v995_v25  ;;  %v8018_v21 = vpop.f32.mrf.mxu2  ;;  %v451_v24 = vor.u32 %v450_v8, %v446_v61  ;;  %v455_v17 = vrot.slane %v453_v5, 1  ;;  %v426_v25 = vunpack.c.l.b16 %v336_v18  ;;  %2307 = vmatpush.bf16.msra.mxu3 %v6779_v32 }
  0xf4   : > { %v7980_v58 = vpop.f32.mrf.mxu3  ;;  %v7984_v13 = vpop.f32.mrf.mxu1  ;;  %v458_v18 = vshrl.u32 %v7817_v44, 16 }
  0xf5   : > { %v456_v37 = vsel %vm444_vm0, %v451_v24, %v455_v17  ;;  %v465_v17 = vshll.u32 %v435_v49, 16 }
  0xf6   : > { %1673 = vmatmul.bf16.gmra.mxu1 %v611_v63  ;;  %v460_v63 = vshll.u32 %v7817_v44, 16 }
  0xf8   : > { %v462_v24 = vrot.slane %v460_v63, 1 }
  0xfb   : > { %v1250_v39 = vpop.f32.mrf.mxu0  ;;  %v1378_v61 = vpop.f32.mrf.mxu2 }
  0xfc   : > { %v7996_v56 = vpop.f32.mrf.mxu3  ;;  %v1309_v43 = vpop.f32.mrf.mxu1 }
  0xfd   : > { %v1310_v48 = vadd.f32 %v1309_v43, %v1250_v39  ;;  %v6970_v39 = vld [vmem:[%s7585_s16 + $0x18] sm:$0xf0]  ;;  %v6971_v43 = vld [vmem:[%s7585_s16 + $0x18] sm:$0xe] }
  0xfe   : > { %1357 = vmatmul.bf16.gmra.mxu0 %v996_v10  ;;  %v436_v10 = vpack.c.b16 %v426_v25, %v426_v25  ;;  %v337_v25 = vld [vmem:[%s7585_s16 + $0x2c] sm:$0x1] }
  0xff   : > { %v8003_v54 = vadd.f32 %v1368_v28, %v1310_v48  ;;  %v6972_v48 = vor.u32 %v6971_v43, %v6970_v39  ;;  %v467_v39 = vrot.slane %v465_v17, 1  ;;  %v427_v43 = vunpack.c.l.b16 %v337_v25 }
 0x100   : > { %v613_v30 = vrot.slane %v436_v10, 1 }
 0x101   : > { %1595 = vmatmul.bf16.gmra.mxu3 %v7988_v9  ;;  %v612_v45 = vrot.slane %v6972_v48, 1  ;;  %v7148_v48 = vld [vmem:[%s7585_s16 + $0x24] sm:$0xe]  ;;  %v437_v63 = vpack.c.b16 %v427_v43, %v427_v43  ;;  %v338_v43 = vld [vmem:[%s7585_s16 + $0x38] sm:$0x1] }
 0x103   : > { %v8011_v46 = vpop.f32.mrf.mxu0  ;;  %v614_v8 = vsel %vm605_vm1, %v612_v45, %v613_v30 }
 0x104   : > { %v8008_v55 = vpop.f32.mrf.mxu3  ;;  %v8013_v28 = vpop.f32.mrf.mxu1 }
 0x106   : > { %1678 = vmatmul.bf16.gmra.mxu1 %v614_v8  ;;  %v7149_v8 = vor.u32 %v7148_v48, %v7847_v16  ;;  %v6778_v16 = vld [vmem:[%s9425_s1 + $0x1e0] sm:$0xff] }
 0x107   : > { %2308 = vmatpush.bf16.msra.mxu3 %v6778_v16 }
 0x10b   : > { %v1255_v4 = vpop.f32.mrf.mxu0 }
 0x10c   : > { %v8021_v26 = vpop.f32.mrf.mxu3  ;;  %v1314_v29 = vpop.f32.mrf.mxu1 }
 0x10d   : > { %v1315_v0 = vadd.f32 %v1314_v29, %v1255_v4  ;;  %v6773_v4 = vld [vmem:[%s9425_s1 + $0x1b8] sm:$0xff]  ;;  %v6787_v29 = vld [vmem:[%s9425_s1 + $0x228] sm:$0xff] }
 0x10e   : > { %1609 = vmatmul.bf16.vlgmr.msra.gmra.mxu0 %v456_v37  ;;  %v463_v37 = vor.u32 %v462_v24, %v458_v18  ;;  %2246 = vmatpush.bf16.msrb.mxu2 %v6773_v4  ;;  %v615_v18 = vrot.slane %v7149_v8, 1  ;;  %v616_v24 = vrot.slane %v437_v63, 1  ;;  %v6974_v8 = vld [vmem:[%s7585_s16 + $0x30] sm:$0xe] }
 0x10f   : > { %v8026_v52 = vadd.f32 %v1373_v27, %v1315_v0  ;;  %2366 = vmatpush.bf16.msrb.mxu0 %v6787_v29  ;;  %v8047_v0 = vpop.f32.mrf.mxu2 }
 0x110   : > { %v468_v45 = vsel %vm444_vm0, %v463_v37, %v467_v39  ;;  %v617_v17 = vsel %vm605_vm1, %v615_v18, %v616_v24  ;;  %v477_v39 = vshll.u32 %v436_v10, 16  ;;  %v6786_v10 = vld [vmem:[%s9425_s1 + $0x220] sm:$0xff] }
 0x112   : > { %v479_v48 = vrot.slane %v477_v39, 1 }
 0x113   : > { %v8035_v27 = vpop.f32.mrf.mxu0  ;;  %2367 = vmatpush.bf16.msrb.mxu0 %v6786_v10 }
 0x114   : > { %v8033_v5 = vpop.f32.mrf.mxu3  ;;  %v8037_v6 = vpop.f32.mrf.mxu1 }
 0x116   : > { %1683 = vmatmul.bf16.gmra.mxu1 %v617_v17 }
 0x117   : > { %v1383_v37 = vpop.f32.mrf.mxu2 }
 0x11b   : > { %v1260_v49 = vpop.f32.mrf.mxu0 }
 0x11c   : > { %v8050_v44 = vpop.f32.mrf.mxu3  ;;  %v1319_v32 = vpop.f32.mrf.mxu1 }
 0x11d   : > { %v1320_v30 = vadd.f32 %v1319_v32, %v1260_v49  ;;  %v428_v49 = vunpack.c.l.b16 %v338_v43 }
 0x11e   : > { %1614 = vmatmul.bf16.gmra.mxu0 %v468_v45  ;;  %v480_v45 = vsel %vm444_vm0, %v7739_v15, %v479_v48  ;;  %v484_v15 = vshll.u32 %v7844_v14, 16 }
 0x11f   : > { %v8054_v35 = vadd.f32 %v1378_v61, %v1320_v30  ;;  %v6772_v61 = vld [vmem:[%s9425_s1 + $0x1b0] sm:$0xff]  ;;  %v438_v24 = vpack.c.b16 %v428_v49, %v428_v49 }
 0x120   : > { %2247 = vmatpush.bf16.msrb.mxu2 %v6772_v61  ;;  %v6973_v30 = vld [vmem:[%s7585_s16 + $0x30] sm:$0xf0]  ;;  %v486_v10 = vrot.slane %v484_v15, 1 }
 0x121   : > { %v6975_v17 = vor.u32 %v6974_v8, %v6973_v30  ;;  %v619_v61 = vrot.slane %v438_v24, 1  ;;  %v339_v30 = vld [vmem:[%s7585_s16 + $0x44] sm:$0x1]  ;;  %v6777_v8 = vld [vmem:[%s9425_s1 + $0x1d8] sm:$0xff] }
 0x122   : > { %2309 = vmatpush.bf16.msra.mxu3 %v6777_v8 }
 0x123   : > { %v8060_v29 = vpop.f32.mrf.mxu0  ;;  %v618_v16 = vrot.slane %v6975_v17, 1 }
 0x124   : > { %v1566_v25 = vpop.f32.mrf.mxu3 }
 0x125   : > { %v8058_v4 = vadd.f32 %v1566_v25, %v7971_v34  ;;  %v8079_v25 = vpop.f32.mrf.mxu2  ;;  %v620_v43 = vsel %vm605_vm1, %v618_v16, %v619_v61  ;;  %v429_v16 = vunpack.c.l.b16 %v339_v30  ;;  %v7151_v61 = vld [vmem:[%s7585_s16 + $0x3c] sm:$0xe]  ;;  %v6770_v30 = vld [vmem:[%s9425_s1 + $0x1a0] sm:$0xff] }
 0x126   : > { %1688 = vmatmul.bf16.gmra.mxu1 %v620_v43 }
 0x12b   : > { %v1265_v32 = vpop.f32.mrf.mxu0 }
 0x12c   : > { %v8069_v34 = vpop.f32.mrf.mxu3  ;;  %v1325_v18 = vadd.f32 %v7872_v40, %v1265_v32  ;;  %v482_v32 = vshrl.u32 %v7844_v14, 16 }
 0x12e   : > { %v8081_v39 = vadd.f32 %v1383_v37, %v1325_v18  ;;  %1619 = vmatmul.bf16.gmra.mxu0 %v480_v45  ;;  %v489_v37 = vshll.u32 %v437_v63, 16  ;;  %v6771_v45 = vld [vmem:[%s9425_s1 + $0x1a8] sm:$0xff]  ;;  %v1388_v18 = vpop.f32.mrf.mxu2  ;;  %v487_v17 = vor.u32 %v486_v10, %v482_v32  ;;  %v6785_v32 = vld [vmem:[%s9425_s1 + $0x218] sm:$0xff] }
 0x12f   : > { %2248 = vmatpush.bf16.msrb.mxu2 %v6771_v45  ;;  %v7152_v45 = vor.u32 %v7151_v61, %v7863_v33  ;;  %2368 = vmatpush.bf16.msrb.mxu0 %v6785_v32 }
 0x131   : > { %v621_v10 = vrot.slane %v7152_v45, 1 }
 0x133   : > { %v8088_v49 = vpop.f32.mrf.mxu0  ;;  %2249 = vmatpush.bf16.msrb.mxu2 %v6770_v30 }
 0x134   : > { %v1571_v48 = vpop.f32.mrf.mxu3 }
 0x135   : > { %v8086_v40 = vadd.f32 %v1571_v48, %v8003_v54  ;;  %v491_v54 = vrot.slane %v489_v37, 1  ;;  %v439_v48 = vpack.c.b16 %v429_v16, %v429_v16  ;;  %v340_v16 = vld [vmem:[%s7585_s16 + $0x50] sm:$0x1] }
 0x136   : > { %v8113_v33 = vpop.f32.mrf.mxu2 }
 0x137   : > { %v492_v63 = vsel %vm444_vm0, %v487_v17, %v491_v54  ;;  %v622_v37 = vrot.slane %v439_v48, 1  ;;  %9440 = vst [vmem:[#allocation11_spill] sm:$0xff] %v8113_v33  ;;  %v501_v54 = vshll.u32 %v438_v24, 16 }
 0x139   : > { %v503_v61 = vrot.slane %v501_v54, 1  ;;  %v6769_v54 = vld [vmem:[%s9425_s1 + $0x198] sm:$0xff] }
 0x13a   : > { %2250 = vmatpush.bf16.msrb.mxu2 %v6769_v54 }
 0x13b   : > { %v1270_v14 = vpop.f32.mrf.mxu0  ;;  %v504_v32 = vsel %vm444_vm0, %v7799_v20, %v503_v61  ;;  %v508_v61 = vshll.u32 %v7860_v31, 16 }
 0x13c   : > { %v8099_v43 = vpop.f32.mrf.mxu3  ;;  %v1330_v15 = vadd.f32 %v7897_v57, %v1270_v14  ;;  %v623_v57 = vsel %vm605_vm1, %v621_v10, %v622_v37  ;;  %v430_v14 = vunpack.c.l.b16 %v340_v16  ;;  %v6776_v10 = vld [vmem:[%s9425_s1 + $0x1d0] sm:$0xff]  ;;  %v6976_v37 = vld [vmem:[%s7585_s16 + $0x48] sm:$0xf0] }
 0x13d   : > { %1693 = vmatmul.bf16.gmra.mxu1 %v623_v57  ;;  %2310 = vmatpush.bf16.msra.mxu3 %v6776_v10  ;;  %v513_v10 = vshll.u32 %v439_v48, 16 }
 0x13e   : > { %v8104_v3 = vadd.f32 %v1388_v18, %v1330_v15  ;;  %1624 = vmatmul.bf16.gmra.mxu0 %v492_v63  ;;  %v1393_v45 = vpop.f32.mrf.mxu2  ;;  %v440_v57 = vpack.c.b16 %v430_v14, %v430_v14 }
 0x140   : > { %v625_v16 = vrot.slane %v440_v57, 1 }
 0x143   : > { %v8118_v17 = vpop.f32.mrf.mxu0 }
 0x144   : > { %v1576_v8 = vpop.f32.mrf.mxu3 }
 0x145   : > { %v8116_v18 = vadd.f32 %v1576_v8, %v8026_v52  ;;  %v6977_v52 = vld [vmem:[%s7585_s16 + $0x48] sm:$0xe] }
 0x146   : > { %v6978_v24 = vor.u32 %v6977_v52, %v6976_v37  ;;  %v6784_v37 = vld [vmem:[%s9425_s1 + $0x210] sm:$0xff]  ;;  %v341_v52 = vld [vmem:[%s7585_s16 + $0x5c] sm:$0x1] }
 0x147   : > { %2369 = vmatpush.bf16.msrb.mxu0 %v6784_v37  ;;  %v431_v54 = vunpack.c.l.b16 %v341_v52  ;;  %v1292_v37 = vadd.f32 %v7876_v42, %v7874_v2 }
 0x148   : > { %v624_v20 = vrot.slane %v6978_v24, 1  ;;  %v515_v24 = vrot.slane %v513_v10, 1 }
 0x149   : > { %v441_v48 = vpack.c.b16 %v431_v54, %v431_v54 }
 0x14a   : > { %v626_v33 = vsel %vm605_vm1, %v624_v20, %v625_v16 }
 0x14b   : > { %v1275_v15 = vpop.f32.mrf.mxu0  ;;  %v628_v10 = vrot.slane %v441_v48, 1 }
 0x14c   : > { %v8121_v63 = vpop.f32.mrf.mxu3  ;;  %v1335_v30 = vadd.f32 %v7939_v19, %v1275_v15 }
 0x14d   : > { %1698 = vmatmul.bf16.gmra.mxu1 %v626_v33  ;;  %v7154_v33 = vld [vmem:[%s7585_s16 + $0x54] sm:$0xe] }
 0x14e   : > { %v8131_v8 = vadd.f32 %v1393_v45, %v1335_v30  ;;  %1629 = vmatmul.bf16.gmra.mxu0 %v504_v32  ;;  %v506_v45 = vshrl.u32 %v7860_v31, 16  ;;  %v510_v32 = vrot.slane %v508_v61, 1  ;;  %v6768_v31 = vld [vmem:[%s9425_s1 + $0x190] sm:$0xff]  ;;  %v7155_v61 = vor.u32 %v7154_v33, %v7908_v62  ;;  %v6783_v33 = vld [vmem:[%s9425_s1 + $0x208] sm:$0xff] }
 0x14f   : > { %2251 = vmatpush.bf16.msrb.mxu2 %v6768_v31  ;;  %2370 = vmatpush.bf16.msrb.mxu0 %v6783_v33 }
 0x150   : > { %v511_v30 = vor.u32 %v510_v32, %v506_v45  ;;  %v6775_v45 = vld [vmem:[%s9425_s1 + $0x1c8] sm:$0xff]  ;;  %v627_v32 = vrot.slane %v7155_v61, 1 }
 0x151   : > { %2311 = vmatpush.bf16.msra.mxu3 %v6775_v45  ;;  %v6980_v45 = vld [vmem:[%s7585_s16 + $0x60] sm:$0xe] }
 0x152   : > { %v516_v16 = vsel %vm444_vm0, %v511_v30, %v515_v24  ;;  %v525_v24 = vshll.u32 %v440_v57, 16  ;;  %v6979_v57 = vld [vmem:[%s7585_s16 + $0x60] sm:$0xf0] }
 0x153   : > { %v8141_v15 = vpop.f32.mrf.mxu0 }
 0x154   : > { %v1581_v19 = vpop.f32.mrf.mxu3  ;;  %9441 = vst [vmem:[#allocation12_spill] sm:$0xff] %v8141_v15 }
 0x155   : > { %v8139_v14 = vadd.f32 %v1581_v19, %v8054_v35 }
 0x15b   : > { %v1348_v35 = vpop.f32.mrf.mxu0 }
 0x15c   : > { %v8149_v20 = vpop.f32.mrf.mxu3  ;;  %v8153_v19 = vadd.f32 %v1348_v35, %v7865_v38  ;;  %v629_v38 = vsel %vm605_vm1, %v627_v32, %v628_v10  ;;  %v342_v35 = vld [vmem:[%s7585_s16 + $0x68] sm:$0x1] }
 0x15d   : > { %1703 = vmatmul.bf16.gmra.mxu1 %v629_v38  ;;  %v432_v31 = vunpack.c.l.b16 %v342_v35  ;;  %v6981_v38 = vor.u32 %v6980_v45, %v6979_v57  ;;  %v343_v57 = vld [vmem:[%s7585_s16 + $0x74] sm:$0x1]  ;;  %v6233_v45 = vld [vmem:[%s7585_s16 + $0x20] sm:$0x1] }
 0x15e   : > { %1634 = vmatmul.bf16.gmra.mxu0 %v516_v16  ;;  %v527_v16 = vrot.slane %v525_v24, 1 }
 0x15f   : > { %v442_v10 = vpack.c.b16 %v432_v31, %v432_v31  ;;  %v530_v31 = vshrl.u32 %v7905_v53, 16 }
 0x160   : > { %v528_v42 = vsel %vm444_vm0, %v7834_v1, %v527_v16  ;;  %v6774_v1 = vld [vmem:[%s9425_s1 + $0x1c0] sm:$0xff] }
 0x161   : > { %2312 = vmatpush.bf16.msra.mxu3 %v6774_v1 }
 0x163   : > { %v1350_v30 = vpop.f32.mrf.mxu0 }
 0x164   : > { %v1586_v52 = vpop.f32.mrf.mxu3  ;;  %v8168_v54 = vadd.f32 %v1350_v30, %v1292_v37  ;;  %v630_v37 = vrot.slane %v6981_v38, 1  ;;  %v532_v30 = vshll.u32 %v7905_v53, 16  ;;  %v6766_v38 = vld [vmem:[%s9425_s1 + $0x180] sm:$0xff]  ;;  %v433_v53 = vunpack.c.l.b16 %v343_v57 }
 0x165   : > { %v8166_v62 = vadd.f32 %v1586_v52, %v8081_v39  ;;  %v6767_v39 = vld [vmem:[%s9425_s1 + $0x188] sm:$0xff]  ;;  %v631_v52 = vrot.slane %v442_v10, 1 }
 0x166   : > { %2252 = vmatpush.bf16.msrb.mxu2 %v6767_v39 }
 0x167   : > { %v632_v24 = vsel %vm605_vm1, %v630_v37, %v631_v52  ;;  %v7002_v52 = vld [vmem:[%s7585_s16 + $0x18] sm:$0xff]  }
 0x16a   : > { %2253 = vmatpush.bf16.msrb.mxu2 %v6766_v38 }
 0x16b   : > { %v1353_v2 = vpop.f32.mrf.mxu0 }
 0x16c   : > { %v8174_v61 = vpop.f32.mrf.mxu3  ;;  %v8184_v32 = vadd.f32 %v1353_v2, %v7886_v51  ;;  %v1297_v51 = vadd.f32 %v7901_v60, %v7899_v59  ;;  %v534_v2 = vrot.slane %v532_v30, 1  ;;  %v6782_v59 = vld [vmem:[%s9425_s1 + $0x200] sm:$0xff]  ;;  %v1833_v60 = vunpack.c.l.b16 %v6233_v45  ;;  %v7157_v30 = vld [vmem:[%s7585_s16 + $0x6c] sm:$0xe] }
 0x16d   : > { %1708 = vmatmul.bf16.gmra.mxu1 %v632_v24  ;;  %2371 = vmatpush.bf16.msrb.mxu0 %v6782_v59  ;;  %v7158_v38 = vor.u32 %v7157_v30, %v7991_v22  ;;  %v6215_v22 = vld [vmem:[%s7585_s16 + $0x24] sm:$0xff]  }
 0x16e   : > { %1639 = vmatmul.bf16.gmra.mxu0 %v528_v42  ;;  %v537_v42 = vshll.u32 %v441_v48, 16  ;;  %v1856_v48 = vshll.u32 %v7002_v52, 16  ;;  %v8208_v1 = vpack.c.b16 %v1833_v60, %v1833_v60  ;;  %2254 = vmatmul.bf16.vlgmr.msrb.gmra.mxu2 %v7002_v52  ;;  %v8228_v30 = vld [vmem:[%s7585_s16 + $0x24] sm:$0xf0] }
 0x170   : > { %v539_v37 = vrot.slane %v537_v42, 1  ;;  %v1858_v15 = vrot.slane %v1856_v48, 1  ;;  %v1861_v45 = vshll.u32 %v8208_v1, 16  ;;  %v549_v48 = vshll.u32 %v442_v10, 16 }
 0x172   : > { %v1863_v57 = vrot.slane %v1861_v45, 1  ;;  %v551_v45 = vrot.slane %v549_v48, 1 }
 0x173   : > { %v1355_v16 = vpop.f32.mrf.mxu0 }
 0x174   : > { %v1591_v33 = vpop.f32.mrf.mxu3  ;;  %v8197_v39 = vadd.f32 %v1355_v16, %v1297_v51  ;;  %v1854_v51 = vshrl.u32 %v7002_v52, 16 }
 0x175   : > { %v8194_v35 = vadd.f32 %v1591_v33, %v8104_v3  ;;  %v535_v3 = vor.u32 %v534_v2, %v530_v31  ;;  %v443_v2 = vpack.c.b16 %v433_v53, %v433_v53 }
 0x176   : > { %v1859_v42 = vor.u32 %v1858_v15, %v1854_v51 }
 0x177   : > { %v540_v16 = vsel %vm444_vm0, %v535_v3, %v539_v37  ;;  %v634_v59 = vrot.slane %v443_v2, 1  ;;  %v633_v3 = vrot.slane %v7158_v38, 1  ;;  %v8235_v38 = vpop.f32.mrf.mxu1 }
 0x178   : > { %v1864_v60 = vsel %vm444_vm0, %v1859_v42, %v1863_v57  ;;  %v1868_v42 = vshll.u32 %v6215_v22, 16 }
 0x179   : > { %2313 = vmatmul.bf16.vlgmr.msra.gmra.mxu3 %v1864_v60  ;;  %v635_v37 = vsel %vm605_vm1, %v633_v3, %v634_v59  ;;  %v552_v60 = vsel %vm444_vm0, %v7670_v41, %v551_v45  ;;  %v554_v41 = vshrl.u32 %v7988_v9, 16  ;;  %v6235_v45 = vld [vmem:[%s7585_s16 + $0x38] sm:$0x1] }
 0x17b   : > { %v1358_v33 = vpop.f32.mrf.mxu0 }
 0x17c   : > { %v8211_v24 = vpop.f32.mrf.mxu3  ;;  %v8216_v31 = vadd.f32 %v1358_v33, %v7923_v11  ;;  %v1302_v11 = vadd.f32 %v7946_v36, %v7944_v50  ;;  %v6234_v33 = vld [vmem:[%s7585_s16 + $0x2c] sm:$0x1]  ;;  %v1552_v50 = vadd.f32 %v7980_v58, %v8153_v19  ;;  %v1866_v36 = vshrl.u32 %v6215_v22, 16 }
 0x17d   : > { %1713 = vmatmul.bf16.gmra.mxu1 %v635_v37  ;;  %v556_v58 = vshll.u32 %v7988_v9, 16 }
 0x17e   : > { %1644 = vmatmul.bf16.gmra.mxu0 %v540_v16  ;;  %v1834_v16 = vunpack.c.l.b16 %v6234_v33  ;;  %2259 = vmatmul.bf16.gmra.mxu2 %v6215_v22  ;;  %v561_v33 = vshll.u32 %v443_v2, 16 }
 0x17f   : > { %v8246_v19 = vpop.f32.mrf.mxu1  ;;  %v558_v22 = vrot.slane %v556_v58, 1 }
 0x180   : > { %v8233_v57 = vpack.c.b16 %v1834_v16, %v1834_v16 }
 0x182   : > { %v1873_v10 = vshll.u32 %v8233_v57, 16 }
 0x183   : > { %v1360_v53 = vpop.f32.mrf.mxu0 }
 0x184   : > { %v1596_v52 = vpop.f32.mrf.mxu3  ;;  %v8230_v51 = vadd.f32 %v1360_v53, %v1302_v11  ;;  %v1875_v11 = vrot.slane %v1873_v10, 1  ;;  %v1554_v53 = vadd.f32 %v7996_v56, %v8168_v54  ;;  %v1557_v56 = vadd.f32 %v8008_v55, %v8184_v32  ;;  %v7007_v32 = vld [vmem:[%s7585_s16 + $0x18] sm:$0xf0] }
 0x185   : > { %v8224_v15 = vadd.f32 %v1596_v52, %v8131_v8  ;;  %v1870_v8 = vrot.slane %v1868_v42, 1  ;;  %v1835_v42 = vunpack.c.l.b16 %v6235_v45  ;;  %v6219_v45 = vld [vmem:[%s7585_s16 + $0x3c] sm:$0xff]  }
 0x187   : > { %v1871_v37 = vor.u32 %v1870_v8, %v1866_v36  ;;  %v563_v36 = vrot.slane %v561_v33, 1  ;;  %v7003_v8 = vld [vmem:[%s7585_s16 + $0x30] sm:$0xff]  }
 0x188   : > { %v1880_v10 = vshll.u32 %v7003_v8, 16  ;;  %v1878_v54 = vshrl.u32 %v7003_v8, 16 }
 0x189   : > { %v1876_v52 = vsel %vm444_vm0, %v1871_v37, %v1875_v11  ;;  %v8261_v11 = vpop.f32.mrf.mxu1 }
 0x18a   : > { %2318 = vmatmul.bf16.gmra.mxu3 %v1876_v52 }
 0x18b   : > { %v1610_v59 = vpop.f32.mrf.mxu0 }
 0x18c   : > { %v8242_v3 = vadd.f32 %v1610_v59, %v1552_v50  ;;  %v559_v50 = vor.u32 %v558_v22, %v554_v41  ;;  %v8255_v59 = vpack.c.b16 %v1835_v42, %v1835_v42  ;;  %v1559_v41 = vadd.f32 %v8021_v26, %v8197_v39  ;;  %v8272_v42 = vld [vmem:[%s7585_s16 + $0x3c] sm:$0xf0] }
 0x18d   : > { %v1562_v26 = vadd.f32 %v8033_v5, %v8216_v31  ;;  %v1890_v39 = vshrl.u32 %v6219_v45, 16 }
 0x18e   : > { %1649 = vmatmul.bf16.gmra.mxu0 %v552_v60  ;;  %v1882_v60 = vrot.slane %v1880_v10, 1  ;;  %v1885_v9 = vshll.u32 %v8255_v59, 16  ;;  %v564_v37 = vsel %vm444_vm0, %v559_v50, %v563_v36  ;;  %2264 = vmatmul.bf16.gmra.mxu2 %v7003_v8  ;;  %v6236_v36 = vld [vmem:[%s7585_s16 + $0x44] sm:$0x1]  ;;  %v6829_v10 = vld [vmem:[#allocation3 + $0x138] sm:$0xff] }
 0x18f   : > { %4135 = vmatpush.bf16.msra.mxu2 %v6829_v10 }
 0x190   : > { %v1883_v58 = vor.u32 %v1882_v60, %v1878_v54  ;;  %v2014_v60 = vrot.slane %v8208_v1, 1  ;;  %v6821_v1 = vld [vmem:[#allocation3 + $0xf8] sm:$0xff] }
 0x191   : > { %v8277_v8 = vpop.f32.mrf.mxu1  ;;  %4086 = vmatpush.bf16.msra.mxu1 %v6821_v1  ;;  %v6828_v1 = vld [vmem:[#allocation3 + $0x130] sm:$0xff] }
 0x193   : > { %v1612_v48 = vpop.f32.mrf.mxu0  ;;  %4136 = vmatpush.bf16.msra.mxu2 %v6828_v1 }
 0x194   : > { %v8251_v16 = vadd.f32 %v1612_v48, %v1554_v53  ;;  %v1887_v53 = vrot.slane %v1885_v9, 1  ;;  %v7008_v48 = vld [vmem:[%s7585_s16 + $0x18] sm:$0xe]  ;;  %v1892_v9 = vshll.u32 %v6219_v45, 16 }
 0x195   : > { %v7009_v33 = vor.u32 %v7008_v48, %v7007_v32  ;;  %v7160_v48 = vld [vmem:[%s7585_s16 + $0x24] sm:$0xe] }
 0x196   : > { %v1888_v55 = vsel %vm444_vm0, %v1883_v58, %v1887_v53 }
 0x197   : > { %v2013_v54 = vrot.slane %v7009_v33, 1  ;;  %v1564_v33 = vadd.f32 %v8050_v44, %v8230_v51 }
 0x199   : > { %v8290_v31 = vpop.f32.mrf.mxu1 }
 0x19a   : > { %2323 = vmatmul.bf16.gmra.mxu3 %v1888_v55  ;;  %v2015_v55 = vsel %vm605_vm1, %v2013_v54, %v2014_v60 }
 0x19b   : > { %v1615_v2 = vpop.f32.mrf.mxu0 }
 0x19c   : > { %v8263_v52 = vadd.f32 %v1615_v2, %v1557_v56  ;;  %v1836_v56 = vunpack.c.l.b16 %v6236_v36 }
 0x19e   : > { %1654 = vmatmul.bf16.gmra.mxu0 %v564_v37  ;;  %v8280_v2 = vpack.c.b16 %v1836_v56, %v1836_v56  ;;  %v1894_v37 = vrot.slane %v1892_v9, 1  ;;  %2269 = vmatmul.bf16.gmra.mxu2 %v6219_v45  ;;  %v7161_v45 = vor.u32 %v7160_v48, %v8228_v30  ;;  %v6237_v56 = vld [vmem:[%s7585_s16 + $0x50] sm:$0x1]  ;;  %v2017_v9 = vrot.slane %v8233_v57, 1 }
 0x19f   : > { %v1837_v54 = vunpack.c.l.b16 %v6237_v56  ;;  %v1307_v48 = vadd.f32 %v7984_v13, %v7982_v12  ;;  %v7011_v56 = vld [vmem:[%s7585_s16 + $0x30] sm:$0xe] }
 0x1a0   : > { %v1897_v58 = vshll.u32 %v8280_v2, 16  ;;  %v2016_v60 = vrot.slane %v7161_v45, 1  ;;  %v7010_v45 = vld [vmem:[%s7585_s16 + $0x30] sm:$0xf0] }
 0x1a2   : > { %v2018_v51 = vsel %vm605_vm1, %v2016_v60, %v2017_v9  ;;  %v8318_v60 = vld [vmem:[%s7585_s16 + $0x54] sm:$0xf0] }
 0x1a3   : > { %v1617_v22 = vpop.f32.mrf.mxu0 }
 0x1a4   : > { %v8274_v50 = vadd.f32 %v1617_v22, %v1559_v41  ;;  %v1895_v41 = vor.u32 %v1894_v37, %v1890_v39  ;;  %v1899_v22 = vrot.slane %v1897_v58, 1  ;;  %v8300_v37 = vpack.c.b16 %v1837_v54, %v1837_v54  ;;  %v8302_v58 = vpop.f32.mrf.mxu1  ;;  %v6223_v54 = vld [vmem:[%s7585_s16 + $0x54] sm:$0xff]  }
 0x1a6   : > { %v1900_v5 = vsel %vm444_vm0, %v1895_v41, %v1899_v22  ;;  %v1909_v44 = vshll.u32 %v8300_v37, 16 }
 0x1a8   : > { %v1911_v22 = vrot.slane %v1909_v44, 1  ;;  %v1916_v44 = vshll.u32 %v6223_v54, 16 }
 0x1aa   : > { %2328 = vmatmul.bf16.gmra.mxu3 %v1900_v5 }
 0x1ab   : > { %v1620_v53 = vpop.f32.mrf.mxu0 }
 0x1ac   : > { %v8286_v32 = vadd.f32 %v1620_v53, %v1562_v26  ;;  %v7004_v26 = vld [vmem:[%s7585_s16 + $0x48] sm:$0xff]   ;;  %v8320_v9 = vpop.f32.mrf.mxu1 }
 0x1ad   : > { %v1904_v39 = vshll.u32 %v7004_v26, 16  ;;  %v1902_v53 = vshrl.u32 %v7004_v26, 16 }
 0x1ae   : > { %2372 = vmatmul.bf16.vlgmr.msrb.gmra.mxu0 %v2015_v55  ;;  %2274 = vmatmul.bf16.gmra.mxu2 %v7004_v26 }
 0x1af   : > { %v1906_v55 = vrot.slane %v1904_v39, 1  ;;  %v6238_v39 = vld [vmem:[%s7585_s16 + $0x5c] sm:$0x1] }
 0x1b1   : > { %v1907_v41 = vor.u32 %v1906_v55, %v1902_v53  ;;  %v1838_v53 = vunpack.c.l.b16 %v6238_v39  ;;  %v6239_v39 = vld [vmem:[%s7585_s16 + $0x68] sm:$0x1] }
 0x1b3   : > { %v1622_v36 = vpop.f32.mrf.mxu0  ;;  %v1912_v5 = vsel %vm444_vm0, %v1907_v41, %v1911_v22  ;;  %v1312_v22 = vadd.f32 %v8013_v28, %v8011_v46 }
 0x1b4   : > { %v8295_v10 = vadd.f32 %v1622_v36, %v1564_v33  ;;  %v6820_v33 = vld [vmem:[#allocation3 + $0xf0] sm:$0xff]  ;;  %v1366_v36 = vadd.f32 %v7925_v23, %v1307_v48  ;;  %v2020_v23 = vrot.slane %v8255_v59, 1 }
 0x1b5   : > { %4087 = vmatpush.bf16.msra.mxu1 %v6820_v33  ;;  %v7163_v33 = vld [vmem:[%s7585_s16 + $0x3c] sm:$0xe] }
 0x1b6   : > { %v1569_v12 = vadd.f32 %v8069_v34, %v1366_v36  ;;  %v1918_v34 = vrot.slane %v1916_v44, 1  ;;  %v7005_v44 = vld [vmem:[%s7585_s16 + $0x60] sm:$0xff]  }
 0x1ba   : > { %2333 = vmatmul.bf16.gmra.mxu3 %v1912_v5 }
 0x1bb   : > { %v1625_v30 = vpop.f32.mrf.mxu0 }
 0x1bc   : > { %v8309_v57 = vadd.f32 %v1625_v30, %v8058_v4  ;;  %v7012_v4 = vor.u32 %v7011_v56, %v7010_v45  ;;  %v8326_v30 = vpack.c.b16 %v1838_v53, %v1838_v53  ;;  %v8336_v45 = vpop.f32.mrf.mxu1  ;;  %v1839_v53 = vunpack.c.l.b16 %v6239_v39  ;;  %v6826_v39 = vld [vmem:[#allocation3 + $0x120] sm:$0xff] }
 0x1be   : > { %2377 = vmatmul.bf16.gmra.mxu0 %v2018_v51  ;;  %v2019_v55 = vrot.slane %v7012_v4, 1  ;;  %v1914_v51 = vshrl.u32 %v6223_v54, 16  ;;  %v1921_v48 = vshll.u32 %v8326_v30, 16  ;;  %2279 = vmatmul.bf16.gmra.mxu2 %v6223_v54  ;;  %v6819_v54 = vld [vmem:[#allocation3 + $0xe8] sm:$0xff] }
 0x1bf   : > { %4088 = vmatpush.bf16.msra.mxu1 %v6819_v54 }
 0x1c0   : > { %v2021_v41 = vsel %vm605_vm1, %v2019_v55, %v2020_v23  ;;  %v1919_v59 = vor.u32 %v1918_v34, %v1914_v51  ;;  %v1923_v36 = vrot.slane %v1921_v48, 1  ;;  %v2023_v23 = vrot.slane %v8280_v2, 1 }
 0x1c1   : > { %v8349_v34 = vpack.c.b16 %v1839_v53, %v1839_v53  ;;  %v1317_v2 = vadd.f32 %v8037_v6, %v8035_v27  ;;  %v6227_v6 = vld [vmem:[%s7585_s16 + $0x6c] sm:$0xff]   ;;  %v6240_v53 = vld [vmem:[%s7585_s16 + $0x74] sm:$0x1] }
 0x1c2   : > { %v1924_v56 = vsel %vm444_vm0, %v1919_v59, %v1923_v36 }
 0x1c3   : > { %v1627_v13 = vpop.f32.mrf.mxu0 }
 0x1c4   : > { %v8322_v26 = vadd.f32 %v1627_v13, %v1569_v12  ;;  %v6827_v12 = vld [vmem:[#allocation3 + $0x128] sm:$0xff]  ;;  %v1371_v13 = vadd.f32 %v7977_v7, %v1312_v22  ;;  %v8347_v51 = vpop.f32.mrf.mxu1  ;;  %v1928_v7 = vshll.u32 %v7005_v44, 16 }
 0x1c5   : > { %4137 = vmatpush.bf16.msra.mxu2 %v6827_v12  ;;  %v7013_v12 = vld [vmem:[%s7585_s16 + $0x48] sm:$0xf0] }
 0x1c6   : > { %v1574_v46 = vadd.f32 %v8099_v43, %v1371_v13  ;;  %v1926_v43 = vshrl.u32 %v7005_v44, 16  ;;  %v1930_v48 = vrot.slane %v1928_v7, 1  ;;  %v7014_v13 = vld [vmem:[%s7585_s16 + $0x48] sm:$0xe] }
 0x1c7   : > { %v7015_v27 = vor.u32 %v7014_v13, %v7013_v12 }
 0x1c9   : > { %4138 = vmatpush.bf16.msra.mxu2 %v6826_v39  ;;  %v6825_v39 = vld [vmem:[#allocation3 + $0x118] sm:$0xff] }
 0x1ca   : > { %2338 = vmatmul.bf16.gmra.mxu3 %v1924_v56  ;;  %v1376_v56 = vadd.f32 %v8018_v21, %v1317_v2  ;;  %v1840_v21 = vunpack.c.l.b16 %v6240_v53  ;;  %v1322_v2 = vadd.f32 %v8235_v38, %v8060_v29 }
 0x1cb   : > { %v1630_v1 = vpop.f32.mrf.mxu0 }
 0x1cc   : > { %v8333_v5 = vadd.f32 %v1630_v1, %v8086_v40  ;;  %v7164_v40 = vor.u32 %v7163_v33, %v8272_v42  ;;  %v1933_v42 = vshll.u32 %v8349_v34, 16  ;;  %v1931_v33 = vor.u32 %v1930_v48, %v1926_v43 }
 0x1cd   : > { %v8373_v7 = vpack.c.b16 %v1840_v21, %v1840_v21  ;;  %v1938_v43 = vshrl.u32 %v6227_v6, 16  ;;  %v1381_v13 = vadd.f32 %v8047_v0, %v1322_v2  ;;  %v2029_v21 = vrot.slane %v8326_v30, 1  ;;  %4139 = vmatpush.bf16.msra.mxu2 %v6825_v39 }
 0x1ce   : > { %2382 = vmatmul.bf16.gmra.mxu0 %v2021_v41  ;;  %v2022_v55 = vrot.slane %v7164_v40, 1  ;;  %2284 = vmatmul.bf16.gmra.mxu2 %v7005_v44  ;;  %v1935_v59 = vrot.slane %v1933_v42, 1  ;;  %v2026_v44 = vrot.slane %v8300_v37, 1  ;;  %v1327_v30 = vadd.f32 %v7881_v47, %v8088_v49  ;;  %v7017_v47 = vld [vmem:[%s7585_s16 + $0x60] sm:$0xe] }
 0x1cf   : > { %v1945_v42 = vshll.u32 %v8373_v7, 16 }
 0x1d0   : > { %v2024_v41 = vsel %vm605_vm1, %v2022_v55, %v2023_v23  ;;  %v1936_v36 = vsel %vm444_vm0, %v1931_v33, %v1935_v59  ;;  %v6818_v55 = vld [vmem:[#allocation3 + $0xe0] sm:$0xff]  ;;  %v2025_v23 = vrot.slane %v7015_v27, 1  ;;  %v7166_v59 = vld [vmem:[%s7585_s16 + $0x54] sm:$0xe] }
 0x1d1   : > { %4089 = vmatpush.bf16.msra.mxu1 %v6818_v55  ;;  %v7167_v29 = vor.u32 %v7166_v59, %v8318_v60  ;;  %v6241_v27 = vld [vmem:[%s7585_s16 + $0x80] sm:$0x1] }
 0x1d2   : > { %v1841_v53 = vunpack.c.l.b16 %v6241_v27 }
 0x1d3   : > { %v1632_v28 = vpop.f32.mrf.mxu0  ;;  %v2028_v55 = vrot.slane %v7167_v29, 1 }
 0x1d4   : > { %v8342_v4 = vadd.f32 %v1632_v28, %v1574_v46  ;;  %v1579_v46 = vadd.f32 %v8121_v63, %v1376_v56  ;;  %v8363_v28 = vpop.f32.mrf.mxu1  ;;  %v1940_v63 = vshll.u32 %v6227_v6, 16  ;;  %v1947_v56 = vrot.slane %v1945_v42, 1 }
 0x1d5   : > { %v2030_v42 = vsel %vm605_vm1, %v2028_v55, %v2029_v21 }
 0x1d6   : > { %v1942_v48 = vrot.slane %v1940_v63, 1 }
 0x1da   : > { %2343 = vmatmul.bf16.gmra.mxu3 %v1936_v36  ;;  %v1943_v36 = vor.u32 %v1942_v48, %v1938_v43  ;;  %v8401_v43 = vpop.f32.mrf.mxu3 }
 0x1db   : > { %v1635_v1 = vpop.f32.mrf.mxu0 }
 0x1dc   : > { %v8356_v22 = vadd.f32 %v1635_v1, %v8116_v18  ;;  %v8367_v18 = vld [vmem:[%s7585_s16 + $0x6c] sm:$0xf0]  ;;  %v8379_v33 = vpop.f32.mrf.mxu1  ;;  %v1948_v12 = vsel %vm444_vm0, %v1943_v36, %v1947_v56 }
 0x1de   : > { %2387 = vmatmul.bf16.gmra.mxu0 %v2024_v41  ;;  %v2027_v41 = vsel %vm605_vm1, %v2025_v23, %v2026_v44  ;;  %2289 = vmatmul.bf16.gmra.mxu2 %v6227_v6  ;;  %v7006_v23 = vld [vmem:[%s7585_s16 + $0x78] sm:$0xff]   ;;  %v8398_v44 = vpack.c.b16 %v1841_v53, %v1841_v53  ;;  %v2032_v53 = vrot.slane %v8349_v34, 1 }
 0x1df   : > { %v1952_v0 = vshll.u32 %v7006_v23, 16 }
 0x1e0   : > { %v1957_v60 = vshll.u32 %v8398_v44, 16 }
 0x1e1   : > { %v1954_v63 = vrot.slane %v1952_v0, 1 }
 0x1e2   : > { %v1959_v59 = vrot.slane %v1957_v60, 1  ;;  %v7169_v60 = vld [vmem:[%s7585_s16 + $0x6c] sm:$0xe] }
 0x1e3   : > { %v1637_v40 = vpop.f32.mrf.mxu0 }
 0x1e4   : > { %v8369_v54 = vadd.f32 %v1637_v40, %v1579_v46  ;;  %v1584_v46 = vadd.f32 %v8149_v20, %v1381_v13  ;;  %v8394_v6 = vpop.f32.mrf.mxu1  ;;  %v1950_v20 = vshrl.u32 %v7006_v23, 16 }
 0x1e6   : > { %v1955_v2 = vor.u32 %v1954_v63, %v1950_v20  ;;  %v6231_v20 = vld [vmem:[%s7585_s16 + $0x84] sm:$0xff]  }
 0x1e8   : > { %v1960_v36 = vsel %vm444_vm0, %v1955_v2, %v1959_v59  ;;  %v1962_v2 = vshrl.u32 %v6231_v20, 16 }
 0x1ea   : > { %2348 = vmatmul.bf16.gmra.mxu3 %v1948_v12  ;;  %v1386_v12 = vadd.f32 %v8079_v25, %v1327_v30  ;;  %v1964_v30 = vshll.u32 %v6231_v20, 16 }
 0x1eb   : > { %v1640_v1 = vpop.f32.mrf.mxu0 }
 0x1ec   : > { %v8382_v37 = vadd.f32 %v1640_v1, %v8139_v14  ;;  %v8392_v14 = vpop.f32.mrf.mxu2  ;;  %v8413_v13 = vpop.f32.mrf.mxu1  ;;  %v1589_v49 = vadd.f32 %v8174_v61, %v1386_v12  ;;  %v8430_v61 = vld [vmem:[%s7585_s16 + $0x84] sm:$0xf0]  ;;  %v7170_v12 = vor.u32 %v7169_v60, %v8367_v18 }
 0x1ee   : > { %2392 = vmatmul.bf16.gmra.mxu0 %v2027_v41  ;;  %2294 = vmatmul.bf16.gmra.mxu2 %v7006_v23  ;;  %v6817_v41 = vld [vmem:[#allocation3 + $0xd8] sm:$0xff] }
 0x1ef   : > { %4090 = vmatpush.bf16.msra.mxu1 %v6817_v41 }
 0x1f3   : > { %v1642_v40 = vpop.f32.mrf.mxu0 }
 0x1f4   : > { %v8389_v38 = vadd.f32 %v1642_v40, %v1584_v46  ;;  %v8410_v56 = vpop.f32.mrf.mxu2  ;;  %v7016_v46 = vld [vmem:[%s7585_s16 + $0x60] sm:$0xf0]  ;;  %v8423_v55 = vpop.f32.mrf.mxu1 }
 0x1f5   : > { %v7018_v40 = vor.u32 %v7017_v47, %v7016_v46 }
 0x1f7   : > { %v2031_v39 = vrot.slane %v7018_v40, 1  ;;  %v2034_v40 = vrot.slane %v7170_v12, 1 }
 0x1f9   : > { %v2033_v23 = vsel %vm605_vm1, %v2031_v39, %v2032_v53  ;;  %v2035_v39 = vrot.slane %v8373_v7, 1  ;;  %v6824_v53 = vld [vmem:[#allocation3 + $0x110] sm:$0xff]  ;;  %v7019_v7 = vld [vmem:[%s7585_s16 + $0x78] sm:$0xf0] }
 0x1fa   : > { %2353 = vmatmul.bf16.gmra.mxu3 %v1960_v36  ;;  %4140 = vmatpush.bf16.msra.mxu2 %v6824_v53  ;;  %v6823_v53 = vld [vmem:[#allocation3 + $0x108] sm:$0xff] }
 0x1fb   : > { %v1645_v48 = vpop.f32.mrf.mxu0  ;;  %v2036_v60 = vsel %vm605_vm1, %v2034_v40, %v2035_v39  ;;  %v2038_v39 = vrot.slane %v8398_v44, 1 }
 0x1fc   : > { %v8407_v1 = vadd.f32 %v1645_v48, %v8166_v62  ;;  %v2314_v29 = vpop.f32.mrf.mxu3  ;;  %v8421_v25 = vpop.f32.mrf.mxu2  ;;  %v6242_v48 = vld [vmem:[%s7585_s16 + $0x8c] sm:$0x1] }
 0x1fd   : > { %v8447_v47 = vpop.f32.mrf.mxu1 }
 0x1fe   : > { %2397 = vmatmul.bf16.gmra.mxu0 %v2030_v42  ;;  %v1842_v42 = vunpack.c.l.b16 %v6242_v48  ;;  %2299 = vmatmul.bf16.gmra.mxu2 %v6231_v20 }
 0x1ff   : > { %4141 = vmatpush.bf16.msra.mxu2 %v6823_v53  ;;  %v6835_v53 = vld [vmem:[#allocation3 + $0x168] sm:$0xff] }
 0x200   : > { %v8437_v34 = vpack.c.b16 %v1842_v42, %v1842_v42 }
 0x202   : > { %v1969_v59 = vshll.u32 %v8437_v34, 16 }
 0x203   : > { %v1647_v62 = vpop.f32.mrf.mxu0 }
 0x204   : > { %v8418_v27 = vadd.f32 %v1647_v62, %v1589_v49  ;;  %v8426_v0 = vpop.f32.mrf.mxu3  ;;  %v8439_v41 = vpop.f32.mrf.mxu2  ;;  %v1971_v49 = vrot.slane %v1969_v59, 1 }
 0x206   : > { %9442 = vst [vmem:[#allocation13_spill] sm:$0xff] %v8418_v27  ;;  %v2041_v27 = vrot.slane %v8437_v34, 1 }
 0x20b   : > { %v1650_v21 = vpop.f32.mrf.mxu0 }
 0x20c   : > { %v8433_v63 = vadd.f32 %v1650_v21, %v8194_v35  ;;  %v1966_v35 = vrot.slane %v1964_v30, 1  ;;  %v6816_v21 = vld [vmem:[#allocation3 + $0xd0] sm:$0xff]  ;;  %v8451_v18 = vpop.f32.mrf.mxu2  ;;  %v8459_v30 = vpop.f32.mrf.mxu1 }
 0x20d   : > { %v8445_v46 = vpop.f32.mrf.mxu3  ;;  %4091 = vmatpush.bf16.msra.mxu1 %v6816_v21  ;;  %v2315_v21 = vadd.f32 %v2314_v29, %v8410_v56  ;;  %v1670_v56 = vadd.f32 %v8246_v19, %v8242_v3  ;;  %v2647_v19 = vld [vmem:[#allocation2 + $0x1c] sm:$0x1] }
 0x20e   : > { %9443 = vst [vmem:[#allocation14_spill] sm:$0xff] %v8433_v63  ;;  %2402 = vmatmul.bf16.gmra.mxu0 %v2033_v23  ;;  %v1967_v62 = vor.u32 %v1966_v35, %v1962_v2  ;;  %v7020_v2 = vld [vmem:[%s7585_s16 + $0x78] sm:$0xe] }
 0x20f   : > { %v7021_v35 = vor.u32 %v7020_v2, %v7019_v7  ;;  %v8476_v7 = vstv %s6397_s2 }
 0x210   : > { %v1972_v23 = vsel %vm444_vm0, %v1967_v62, %v1971_v49  ;;  %v6837_v62 = vld [vmem:[#allocation3 + $0x178] sm:$0xff]  ;;  %vm2498_vm7 = vcmp.ge.s32.totalorder %v8476_v7, 0  ;;  %vm2508_vm8 = vcmp.lt.s32.totalorder %v8476_v7, 16 }
 0x211   : > { %2358 = vmatmul.bf16.gmra.mxu3 %v1972_v23  ;;  %v2037_v40 = vrot.slane %v7021_v35, 1  ;;  %v6836_v23 = vld [vmem:[#allocation3 + $0x170] sm:$0xff]  ;;  %v8486_v35 = vld [vmem:[%s9428_s4] ss:$0 sm:$0xff]  ;;  %vm8504_vm10 = vmand %vm2498_vm7, %vm2508_vm8 }
 0x212   : > { %4184 = vmatpush.bf16.msrb.mxu3 %v6837_v62  ;;  %v7172_v62 = vld [vmem:[%s7585_s16 + $0x84] sm:$0xe] }
 0x213   : > { %v8442_v36 = vpop.f32.mrf.mxu0  ;;  %v2039_v2 = vsel %vm605_vm1, %v2037_v40, %v2038_v39  ;;  %v2614_v39 = vld [vmem:[#allocation2 + $0x10] sm:$0x8] }
 0x214   : > { %v8463_v59 = vpop.f32.mrf.mxu2 }
 0x215   : > { %v8454_v48 = vpop.f32.mrf.mxu3 }
 0x216   : > { %4185 = vmatpush.bf16.msrb.mxu3 %v6836_v23  ;;  %v2615_v23 = vsel %vm8489_vm6, 0, %v2614_v39 }
 0x217   : > { %2616 = vst [vmem:[#allocation2 + $0x10] sm:$0x8] %v2615_v23 }
 0x21a   : > { %4186 = vmatpush.bf16.msrb.mxu3 %v6835_v53  ;;  %v2317_v53 = vadd.f32 %v8426_v0, %v8421_v25  ;;  %v6833_v25 = vld [vmem:[#allocation3 + $0x158] sm:$0xff] }
 0x21b   : > { %v1655_v20 = vpop.f32.mrf.mxu0 }
 0x21c   : > { %v8457_v42 = vadd.f32 %v1655_v20, %v8224_v15  ;;  %v8471_v15 = vpop.f32.mrf.mxu1  ;;  %v8474_v20 = vpop.f32.mrf.mxu2 }
 0x21d   : > { %v8467_v49 = vpop.f32.mrf.mxu3  ;;  %9445 = vst [vmem:[#allocation16_spill] sm:$0xff] %v8471_v15 }
 0x21e   : > { %9444 = vst [vmem:[#allocation15_spill] sm:$0xff] %v8457_v42  ;;  %2407 = vmatmul.bf16.gmra.mxu0 %v2036_v60 }
 0x21f   : > { %9446 = vst [vmem:[#allocation17_spill] sm:$0xff] %v8474_v20  ;;  %v6845_v20 = vld [vmem:[#allocation3 + $0x1b8] sm:$0xff] }
 0x220   : > { %5302 = vmatpush.bf16.msra.mxu0 %v6845_v20 }
 0x223   : > { %v8465_v12 = vpop.f32.mrf.mxu0 }
 0x224   : > { %v8508_v63 = vpop.f32.mrf.mxu1  ;;  %v8512_v39 = vpop.f32.mrf.mxu2 }
 0x225   : > { %v8479_v44 = vpop.f32.mrf.mxu3  ;;  %9454 = vst [vmem:[#allocation19_spill] sm:$0xff] %v8508_v63 }
 0x226   : > { %9447 = vst [vmem:[#allocation18_spill] sm:$0xff] %v8479_v44 }
 0x227   : > { %9455 = vst [vmem:[#allocation20_spill] sm:$0xff] %v8512_v39 }
 0x22b   : > { %v2373_v60 = vpop.f32.mrf.mxu0 }
 0x22c   : > { %v2374_v29 = vadd.f32 %v2373_v60, %v2315_v21  ;;  %v6815_v21 = vld [vmem:[#allocation3 + $0xc8] sm:$0xff]  ;;  %v2648_v60 = vsel %vm8495_vm9, 0, %v2647_v19  ;;  %v8526_v20 = vpop.f32.mrf.mxu2 }
 0x22d   : > { %4092 = vmatpush.bf16.msra.mxu1 %v6815_v21  ;;  %2649 = vst [vmem:[#allocation2 + $0x1c] sm:$0x1] %v2648_v60  ;;  %v8515_v23 = vpop.f32.mrf.mxu3  ;;  %v1672_v21 = vadd.f32 %v8261_v11, %v8251_v16  ;;  %v2489_v16 = vadd.s32 1, %v8476_v7  ;;  %v6832_v11 = vld [vmem:[#allocation3 + $0x150] sm:$0xff] }
 0x22e   : > { %v2423_v40 = vadd.f32 %v2374_v29, %v1670_v56  ;;  %2412 = vmatmul.bf16.gmra.mxu0 %v2039_v2  ;;  %v6834_v2 = vld [vmem:[#allocation3 + $0x160] sm:$0xff] }
 0x22f   : > { %4187 = vmatpush.bf16.msrb.mxu3 %v6834_v2  ;;  %v6843_v2 = vld [vmem:[#allocation3 + $0x1a8] sm:$0xff]  ;;  %vm2499_vm11 = vcmp.ge.s32.totalorder %v2489_v16, 0  ;;  %vm2509_vm12 = vcmp.lt.s32.totalorder %v2489_v16, 16  ;;  %v6830_v29 = vld [vmem:[#allocation3 + $0x140] sm:$0xff] }
 0x230   : > { %v2447_v56 = vadd.f32 %v8486_v35, %v2423_v40  ;;  %v7173_v40 = vor.u32 %v7172_v62, %v8430_v61  ;;  %v2320_v61 = vadd.f32 %v8445_v46, %v8439_v41  ;;  %vm8542_vm13 = vmand %vm2499_vm11, %vm2509_vm12 }
 0x232   : > { %v2467_v44 = vmax.f32 %v2447_v56, 0.0  ;;  %v6844_v56 = vld [vmem:[#allocation3 + $0x1b0] sm:$0xff]  ;;  %v2040_v39 = vrot.slane %v7173_v40, 1  ;;  %v1675_v40 = vadd.f32 %v8277_v8, %v8263_v52  ;;  %v8606_v8 = vadd.f32 %v8413_v13, %v8369_v54  ;;  %v9464_v13 = vld [vmem:[#allocation13_spill] sm:$0xff] }
 0x233   : > { %v2375_v19 = vpop.f32.mrf.mxu0  ;;  %4188 = vmatpush.bf16.msrb.mxu3 %v6833_v25  ;;  %5303 = vmatpush.bf16.msra.mxu0 %v6844_v56  ;;  %v6814_v56 = vld [vmem:[#allocation3 + $0xc0] sm:$0xff] }
 0x234   : > { %v2548_v60 = vsel %vm8504_vm10, %v2467_v44, 0.0  ;;  %v2376_v63 = vadd.f32 %v2375_v19, %v2317_v53  ;;  %v2644_v53 = vld [vmem:[#allocation2 + $0xc] sm:$0x1]  ;;  %v2042_v19 = vsel %vm605_vm1, %v2040_v39, %v2041_v27  ;;  %4093 = vmatpush.bf16.msra.mxu1 %v6814_v56  ;;  %vm2866_vm1 = vcmask 1042432  }
 0x235   : > { %v2568_v15 = vpack.c.bf16 %v2548_v60, %v2548_v60  ;;  %v8529_v34 = vpop.f32.mrf.mxu3  ;;  %v2645_v46 = vsel %vm8495_vm9, 0, %v2644_v53  ;;  %v6831_v39 = vld [vmem:[#allocation3 + $0x148] sm:$0xff]  ;;  %v2617_v53 = vld [vmem:[#allocation2 + $0x20] sm:$0x8] }
 0x236   : > { %v2424_v0 = vadd.f32 %v2376_v63, %v1672_v21  ;;  %v2611_v63 = vld [vmem:[#allocation2] sm:$0x8]  ;;  %v8537_v21 = vpop.f32.mrf.mxu1  ;;  %2646 = vst [vmem:[#allocation2 + $0xc] sm:$0x1] %v2645_v46  ;;  %v2618_v46 = vsel %vm8489_vm6, 0, %v2617_v53 }
 0x237   : > { %2588 = vst [vmem:[#allocation2 + $0x4] sm:$0xf] %v2568_v15  ;;  %4189 = vmatpush.bf16.msrb.mxu3 %v6832_v11  ;;  %v2612_v41 = vsel %vm8489_vm6, 0, %v2611_v63  ;;  %5304 = vmatpush.bf16.msra.mxu0 %v6843_v2  ;;  %v6822_v11 = vld [vmem:[#allocation3 + $0x100] sm:$0xff]  ;;  %v1677_v2 = vadd.f32 %v8290_v31, %v8274_v50  ;;  %v9460_v50 = vld [vmem:[#allocation10_spill] sm:$0xff] }
 0x238   : > { %v2448_v62 = vadd.f32 %v8486_v35, %v2424_v0  ;;  %2613 = vst [vmem:[#allocation2] sm:$0x8] %v2612_v41  ;;  %4142 = vmatpush.bf16.msra.mxu2 %v6822_v11 }
 0x239   : > { %2619 = vst [vmem:[#allocation2 + $0x20] sm:$0x8] %v2618_v46 }
 0x23a   : > { %v2468_v44 = vmax.f32 %v2448_v62, 0.0  ;;  %v6842_v62 = vld [vmem:[#allocation3 + $0x1a0] sm:$0xff] }
 0x23b   : > { %v2378_v15 = vpop.f32.mrf.mxu0  ;;  %4190 = vmatpush.bf16.msrb.mxu3 %v6831_v39  ;;  %5305 = vmatpush.bf16.msra.mxu0 %v6842_v62  ;;  %v2325_v62 = vadd.f32 %v8467_v49, %v8463_v59  ;;  %v1682_v59 = vadd.f32 %v8320_v9, %v8295_v10 }
 0x23c   : > { %v2549_v60 = vsel %vm8504_vm10, %v2468_v44, 0.0  ;;  %v2379_v25 = vadd.f32 %v2378_v15, %v2320_v61  ;;  %v2322_v61 = vadd.f32 %v8454_v48, %v8451_v18  ;;  %v6841_v44 = vld [vmem:[#allocation3 + $0x198] sm:$0xff]  ;;  %v2650_v15 = vld [vmem:[#allocation2 + $0x2c] sm:$0x1]  ;;  %v9458_v48 = vld [vmem:[#allocation9_spill] sm:$0xff] }
 0x23d   : > { %v2569_v27 = vpack.c.bf16 %v2549_v60, %v2549_v60  ;;  %v2651_v18 = vsel %vm8495_vm9, 0, %v2650_v15  ;;  %v9459_v60 = vld [vmem:[#allocation12_spill] sm:$0xff]  ;;  %v8562_v39 = vpop.f32.mrf.mxu3  ;;  %v6840_v15 = vld [vmem:[#allocation3 + $0x190] sm:$0xff] }
 0x23e   : > { %v2425_v0 = vadd.f32 %v2379_v25, %v1675_v40  ;;  %2417 = vmatmul.bf16.gmra.mxu0 %v2042_v19  ;;  %v1332_v40 = vadd.f32 %v9458_v48, %v8118_v17  ;;  %v1337_v31 = vadd.f32 %v9460_v50, %v9459_v60  ;;  %2652 = vst [vmem:[#allocation2 + $0x2c] sm:$0x1] %v2651_v18  ;;  %v2698_v18 = vld [vmem:[#allocation2 + $0xc] sm:$0x1] }
 0x23f   : > { %2589 = vst [vmem:[#allocation2 + $0x8] sm:$0xf] %v2569_v27  ;;  %4191 = vmatpush.bf16.msrb.mxu3 %v6830_v29  ;;  %5306 = vmatpush.bf16.msra.mxu0 %v6841_v44  ;;  %v8560_v27 = vpop.f32.mrf.mxu2  ;;  %v3333_v44 = vld [vmem:[#allocation2 + $0x1c] sm:$0x1]  ;;  %v9468_v50 = vld [vmem:[#allocation14_spill] sm:$0xff] }
 0x240   : > { %v2449_v52 = vadd.f32 %v8486_v35, %v2425_v0  ;;  %v1714_v0 = vpop.f32.mrf.mxu1  ;;  %v1396_v29 = vadd.f32 %v8392_v14, %v1337_v31  ;;  %v3485_v46 = vunpack.c.l.b16 %v3333_v44  ;;  %v9469_v31 = vld [vmem:[#allocation19_spill] sm:$0xff] }
 0x242   : > { %v2469_v16 = vmax.f32 %v2449_v52, 0.0  ;;  %v9461_v52 = vld [vmem:[#allocation11_spill] sm:$0xff]  ;;  %v1599_v53 = vadd.f32 %v8401_v43, %v1396_v29  ;;  %v6838_v29 = vld [vmem:[#allocation3 + $0x180] sm:$0xff] }
 0x243   : > { %v2380_v63 = vpop.f32.mrf.mxu0  ;;  %v1391_v17 = vadd.f32 %v9461_v52, %v1332_v40  ;;  %5307 = vmatpush.bf16.msra.mxu0 %v6840_v15 }
 0x244   : > { %v2550_v19 = vsel %vm8542_vm13, %v2469_v16, 0.0  ;;  %v2381_v41 = vadd.f32 %v2380_v63, %v2322_v61  ;;  %v2490_v16 = vadd.s32 2, %v8476_v7 }
 0x245   : > { %v2570_v25 = vpack.c.bf16 %v2550_v19, %v2550_v19  ;;  %v1594_v63 = vadd.f32 %v8211_v24, %v1391_v17  ;;  %v1680_v19 = vadd.f32 %v8302_v58, %v8286_v32  ;;  %v8584_v24 = vadd.f32 %v8347_v51, %v8322_v26 }
 0x246   : > { %v2426_v56 = vadd.f32 %v2381_v41, %v1677_v2  ;;  %v8580_v41 = vadd.f32 %v8336_v45, %v8309_v57  ;;  %v8588_v32 = vadd.f32 %v8363_v28, %v8333_v5  ;;  %vm2500_vm14 = vcmp.ge.s32.totalorder %v2490_v16, 0  ;;  %v6805_v45 = vld [vmem:[#allocation3 + $0x78] sm:$0xff]  ;;  %v8602_v5 = vpop.f32.mrf.mxu3  ;;  %v6839_v28 = vld [vmem:[#allocation3 + $0x188] sm:$0xff] }
 0x247   : > { %2590 = vst [vmem:[#allocation2 + $0x14] sm:$0xf] %v2570_v25  ;;  %vm2510_vm15 = vcmp.lt.s32.totalorder %v2490_v16, 16  ;;  %v8592_v58 = vadd.f32 %v8379_v33, %v8342_v4  ;;  %v8596_v57 = vadd.f32 %v8394_v6, %v8356_v22  ;;  %v1653_v9 = vadd.f32 %v8442_v36, %v1594_v63  ;;  %v8600_v51 = vpop.f32.mrf.mxu2  ;;  %4426 = vmatpush.bf16.msrb.mxu2 %v6805_v45  ;;  %v8650_v16 = vld [vmem:[#allocation2] sm:$0x8]  ;;  %v9471_v63 = vld [vmem:[#allocation20_spill] sm:$0xff] }
 0x248   : > { %v2450_v11 = vadd.f32 %v8486_v35, %v2426_v56  ;;  %v1658_v26 = vadd.f32 %v8465_v12, %v1599_v53  ;;  %v8610_v4 = vadd.f32 %v8423_v55, %v8382_v37  ;;  %v1716_v22 = vpop.f32.mrf.mxu1  ;;  %v2850_v6 = vunpack.c.l.b16 %v2698_v18  ;;  %vm8623_vm0 = vmand %vm2500_vm14, %vm2510_vm15  ;;  %5308 = vmatpush.bf16.msra.mxu0 %v6839_v28  ;;  %v9465_v55 = vld [vmem:[#allocation16_spill] sm:$0xff]  ;;  %v8656_v15 = vld [vmem:[#allocation2 + $0x4] sm:$0xff]  }
 0x249   : > { %v8615_v36 = vadd.f32 %v8447_v47, %v8389_v38  ;;  %v8619_v12 = vadd.f32 %v8459_v30, %v8407_v1  ;;  %v8627_v37 = vpack.c.b16 %v3485_v46, %v3485_v46  ;;  %v8631_v48 = vadd.f32 %v9465_v55, %v9464_v13  ;;  %v9466_v38 = vld [vmem:[#allocation17_spill] sm:$0xff]  ;;  %v9467_v47 = vld [vmem:[#allocation18_spill] sm:$0xff]  ;;  %v7352_v30 = vld [vmem:[#allocation2 + $0x10] sm:$0x8] }
 0x24a   : > { %v2470_v61 = vmax.f32 %v2450_v11, 0.0  ;;  %v2327_v40 = vadd.f32 %v9467_v47, %v9466_v38  ;;  %v8636_v1 = vadd.s32 3, %v8476_v7  ;;  %v8640_v25 = vadd.f32 %v9469_v31, %v9468_v50  ;;  %v2620_v28 = vld [vmem:[#allocation2 + $0x30] sm:$0x8] }
 0x24b   : > { %v2383_v2 = vpop.f32.mrf.mxu0  ;;  %v8643_v56 = vadd.f32 %v8537_v21, %v1653_v9  ;;  %v8648_v52 = vadd.f32 %v1716_v22, %v1658_v26  ;;  %v2330_v53 = vadd.f32 %v8515_v23, %v9471_v63  ;;  %v8658_v21 = vld [vmem:[#allocation2] sm:$0xf0]   ;;  %v6797_v9 = vld [vmem:[#allocation3 + $0x38] sm:$0xff]  ;;  %v8678_v26 = vld [vmem:[#allocation2 + $0x20] sm:$0x8] }
 0x24c   : > { %v2551_v49 = vsel %vm8542_vm13, %v2470_v61, 0.0  ;;  %v2384_v14 = vadd.f32 %v2383_v2, %v2325_v62  ;;  %v9470_v62 = vld [vmem:[#allocation15_spill] sm:$0xff]  ;;  %v3334_v61 = vld [vmem:[#allocation2 + $0x2c] sm:$0x1]  ;;  %5309 = vmatpush.bf16.msra.mxu0 %v6838_v29  ;;  %vm2501_vm2 = vcmp.ge.s32.totalorder %v8636_v1, 0  ;;  %vm2511_vm3 = vcmp.lt.s32.totalorder %v8636_v1, 16  ;;  %4377 = vmatpush.bf16.msrb.mxu1 %v6797_v9 }
 0x24d   : > { %v2571_v43 = vpack.c.bf16 %v2551_v49, %v2551_v49  ;;  %v8646_v11 = vadd.f32 %v1714_v0, %v9470_v62  ;;  %v8660_v0 = vpack.c.b16 %v2850_v6, %v2850_v6  ;;  %v8664_v49 = vadd.f32 %v8529_v34, %v8526_v20  ;;  %v2653_v22 = vld [vmem:[#allocation2 + $0x3c] sm:$0x1]  ;;  %vm8702_vm5 = vmand %vm2501_vm2, %vm2511_vm3  ;;  %v6804_v1 = vld [vmem:[#allocation3 + $0x70] sm:$0xff] }
 0x24e   : > { %v2427_v10 = vadd.f32 %v2384_v14, %v1680_v19  ;;  %v3502_v14 = vrot.slane %v8627_v37, 5  ;;  %v7393_v18 = vld [vmem:[#allocation2 + $0x10] sm:$0xf0]   ;;  %v8675_v20 = vadd.f32 %v8562_v39, %v8560_v27  ;;  %v2339_v27 = vpop.f32.mrf.mxu3  ;;  %v2621_v39 = vsel %vm8489_vm6, 0, %v2620_v28  ;;  %4427 = vmatpush.bf16.msrb.mxu2 %v6804_v1 }
 0x24f   : > { %2591 = vst [vmem:[#allocation2 + $0x18] sm:$0xf] %v2571_v43  ;;  %v8667_v43 = vld [vmem:[#allocation2 + $0x20] sm:$0x8]  ;;  %v8681_v45 = vpop.f32.mrf.mxu2  ;;  %v2868_v6 = vrot.slane %v8660_v0, 5  ;;  %v7353_v37 = vor.u32 %v7393_v18, %v7352_v30  ;;  %v2654_v47 = vsel %vm8495_vm9, 0, %v2653_v22 }
 0x250   : > { %v2451_v33 = vadd.f32 %v8486_v35, %v2427_v10  ;;  %v3486_v10 = vunpack.c.l.b16 %v3334_v61  ;;  %2622 = vst [vmem:[#allocation2 + $0x30] sm:$0x8] %v2621_v39  ;;  %v6852_v0 = vld [vmem:[#allocation3 + $0x1f0] sm:$0xff] }
 0x251   : > { %v3529_v50 = vshll.u32 %v7353_v37, 16  ;;  %2655 = vst [vmem:[#allocation2 + $0x3c] sm:$0x1] %v2654_v47 }
 0x252   : > { %v2471_v60 = vmax.f32 %v2451_v33, 0.0  ;;  %v2732_v33 = vunpack.c.h.b16 %v8656_v15  ;;  %v8687_v38 = vpack.c.b16 %v3486_v10, %v3486_v10 }
 0x253   : > { %v2385_v17 = vpop.f32.mrf.mxu0 }
 0x254   : > { %v2552_v44 = vsel %vm8623_vm0, %v2471_v60, 0.0  ;;  %v2386_v2 = vadd.f32 %v2385_v17, %v2327_v40  ;;  %v3526_v60 = vshrl.u32 %v7353_v37, 16 }
 0x255   : > { %v2572_v19 = vpack.c.bf16 %v2552_v44, %v2552_v44 }
 0x256   : > { %v2428_v46 = vadd.f32 %v2386_v2, %v1682_v59  ;;  %v8671_v23 = vld [vmem:[#allocation2 + $0x14] sm:$0xff]   ;;  %v3528_v63 = vrot.slane %v3526_v60, 3  ;;  %v3531_v2 = vrot.slane %v3529_v50, 4  ;;  %v8710_v50 = vadd.f32 %v8602_v5, %v8600_v51 }
 0x257   : > { %2592 = vst [vmem:[#allocation2 + $0x24] sm:$0xf] %v2572_v19  ;;  %v3367_v34 = vunpack.c.h.b16 %v8671_v23  ;;  %v3501_v29 = vrot.slane %v8671_v23, 5  ;;  %v3414_v61 = vshrl.u32 %v8671_v23, 16  ;;  %v3417_v47 = vshll.u32 %v8671_v23, 16 }
 0x258   : > { %v2452_v59 = vadd.f32 %v8486_v35, %v2428_v46  ;;  %v3532_v9 = vor.u32 %v3531_v2, %v3528_v63  ;;  %v3505_v23 = vrot.slane %v8687_v38, 5  ;;  %v2341_v63 = vpop.f32.mrf.mxu3  ;;  %v8718_v2 = vld [vmem:[#allocation2 + $0x30] sm:$0x8] }
 0x259   : > { %v3390_v13 = vpack.c.b16 %v3367_v34, %v3367_v34  ;;  %v3503_v10 = vsel %vm2866_vm1, %v3501_v29, %v3502_v14  ;;  %v3552_v34 = vshrl.u32 %v3501_v29, 16 }
 0x25a   : > { %v2472_v55 = vmax.f32 %v2452_v59, 0.0  ;;  %v3555_v59 = vshll.u32 %v3501_v29, 16  ;;  %v3560_v54 = vshrl.u32 %v3503_v10, 16  ;;  %v3563_v28 = vshll.u32 %v3503_v10, 16 }
 0x25b   : > { %v2388_v40 = vpop.f32.mrf.mxu0  ;;  %v3534_v31 = vshrl.u32 %v3390_v13, 16  ;;  %v3537_v62 = vshll.u32 %v3390_v13, 16  ;;  %v3554_v37 = vrot.slane %v3552_v34, 3  ;;  %v3416_v13 = vrot.slane %v3414_v61, 4 }
 0x25c   : > { %v2553_v30 = vsel %vm8623_vm0, %v2472_v55, 0.0  ;;  %v2389_v17 = vadd.f32 %v2388_v40, %v2330_v53  ;;  %v3557_v14 = vrot.slane %v3555_v59, 4  ;;  %v3562_v39 = vrot.slane %v3560_v54, 3 }
 0x25d   : > { %v2573_v44 = vpack.c.bf16 %v2553_v30, %v2553_v30  ;;  %v3536_v19 = vrot.slane %v3534_v31, 3  ;;  %v3539_v18 = vrot.slane %v3537_v62, 4  ;;  %v3565_v55 = vrot.slane %v3563_v28, 4  ;;  %v2282_v62 = vpop.f32.mrf.mxu2  ;;  %v8715_v30 = vld [vmem:[#allocation2 + $0x30] sm:$0x8] }
 0x25e   : > { %v2429_v46 = vadd.f32 %v2389_v17, %v8580_v41  ;;  %v8713_v31 = vadd.s32 4, %v8476_v7  ;;  %v3558_v29 = vor.u32 %v3557_v14, %v3554_v37  ;;  %v8737_v28 = vadd.f32 %v2341_v63, %v2282_v62 }
 0x25f   : > { %2593 = vst [vmem:[#allocation2 + $0x28] sm:$0xf] %v2573_v44  ;;  %v3540_v22 = vor.u32 %v3539_v18, %v3536_v19  ;;  %v3566_v61 = vor.u32 %v3565_v55, %v3562_v39  ;;  %v3419_v44 = vrot.slane %v3417_v47, 5  ;;  %v3335_v19 = vld [vmem:[#allocation2 + $0x3c] sm:$0x1]  ;;  %v8727_v18 = vadd.s32 5, %v8476_v7 }
 0x260   : > { %v2453_v53 = vadd.f32 %v8486_v35, %v2429_v46  ;;  %v8724_v46 = vadd.f32 %v2339_v27, %v8681_v45  ;;  %vm2502_vm7 = vcmp.ge.s32.totalorder %v8713_v31, 0  ;;  %vm2512_vm8 = vcmp.lt.s32.totalorder %v8713_v31, 16  ;;  %v7395_v27 = vld [vmem:[#allocation2 + $0x20] sm:$0xf0]  }
 0x261   : > { %v3541_v60 = vsel %vm2891_vm4, %v3532_v9, %v3540_v22  ;;  %v3567_v34 = vsel %vm2891_vm4, %v3558_v29, %v3566_v61  ;;  %v3420_v9 = vor.u32 %v3419_v44, %v3416_v13  ;;  %vm8756_vm10 = vmand %vm2502_vm7, %vm2512_vm8  ;;  %vm2503_vm11 = vcmp.ge.s32.totalorder %v8727_v18, 0 }
 0x262   : > { %v2473_v40 = vmax.f32 %v2453_v53, 0.0  ;;  %4094 = vmatmul.bf16.vlgmr.msra.gmra.mxu1 %v3541_v60  ;;  %4192 = vmatmul.bf16.vlgmr.msrb.gmra.mxu3 %v3567_v34  ;;  %v3487_v53 = vunpack.c.l.b16 %v3335_v19  ;;  %vm2513_vm12 = vcmp.lt.s32.totalorder %v8727_v18, 16 }
 0x263   : > { %v2390_v17 = vpop.f32.mrf.mxu0  ;;  %v3543_v22 = vshrl.u32 %v3420_v9, 16  ;;  %v3546_v37 = vshll.u32 %v3420_v9, 16  ;;  %vm8798_vm13 = vmand %vm2503_vm11, %vm2513_vm12 }
 0x264   : > { %v2554_v51 = vsel %vm8702_vm5, %v2473_v40, 0.0  ;;  %v2391_v5 = vadd.f32 %v2390_v17, %v8664_v49  ;;  %v7394_v49 = vld [vmem:[#allocation2 + $0x20] sm:$0xf0]   ;;  %v8742_v55 = vpack.c.b16 %v3487_v53, %v3487_v53  ;;  %v7361_v17 = vor.u32 %v7395_v27, %v8678_v26 }
 0x265   : > { %v2574_v10 = vpack.c.bf16 %v2554_v51, %v2554_v51  ;;  %v3545_v47 = vrot.slane %v3543_v22, 3  ;;  %v3548_v40 = vrot.slane %v3546_v37, 4  ;;  %v7357_v60 = vor.u32 %v7394_v49, %v8667_v43 }
 0x266   : > { %v2430_v59 = vadd.f32 %v2391_v5, %v8584_v24  ;;  %v8733_v54 = vld [vmem:[#allocation2 + $0x24] sm:$0xff]   ;;  %v6796_v24 = vld [vmem:[#allocation3 + $0x30] sm:$0xff]  ;;  %v4742_v27 = vshrl.u32 %v7361_v17, 16  ;;  %v4745_v22 = vshll.u32 %v7361_v17, 16 }
 0x267   : > { %v8735_v45 = vld [vmem:[#allocation2 + $0x24] sm:$0xff]   ;;  %2594 = vst [vmem:[#allocation2 + $0x34] sm:$0xf] %v2574_v10  ;;  %v3370_v13 = vunpack.c.h.b16 %v8733_v54  ;;  %4378 = vmatpush.bf16.msrb.mxu1 %v6796_v24  ;;  %v3549_v61 = vor.u32 %v3548_v40, %v3545_v47  ;;  %v3569_v63 = vshrl.u32 %v7357_v60, 16  ;;  %v3572_v19 = vshll.u32 %v7357_v60, 16  ;;  %v2285_v40 = vpop.f32.mrf.mxu2  ;;  %v2344_v60 = vpop.f32.mrf.mxu3 }
 0x268   : > { %v2454_v14 = vadd.f32 %v8486_v35, %v2430_v59  ;;  %v4583_v39 = vunpack.c.h.b16 %v8735_v45  ;;  %v3504_v41 = vrot.slane %v8733_v54, 5  ;;  %v4747_v47 = vrot.slane %v4745_v22, 4 }
 0x269   : > { %v3392_v1 = vpack.c.b16 %v3370_v13, %v3370_v13  ;;  %4143 = vmatmul.bf16.vlgmr.msra.gmra.mxu2 %v3549_v61  ;;  %v3571_v43 = vrot.slane %v3569_v63, 3  ;;  %v3574_v59 = vrot.slane %v3572_v19, 4 }
 0x26a   : > { %v2474_v62 = vmax.f32 %v2454_v14, 0.0  ;;  %v4606_v29 = vpack.c.b16 %v4583_v39, %v4583_v39  ;;  %v4744_v39 = vrot.slane %v4742_v27, 3  ;;  %v3506_v17 = vsel %vm2866_vm1, %v3504_v41, %v3505_v23 }
 0x26b   : > { %v2393_v44 = vpop.f32.mrf.mxu0  ;;  %v3577_v51 = vshrl.u32 %v3392_v1, 16  ;;  %v3580_v34 = vshll.u32 %v3392_v1, 16  ;;  %v3575_v37 = vor.u32 %v3574_v59, %v3571_v43  ;;  %v3598_v19 = vshll.u32 %v3504_v41, 16 }
 0x26c   : > { %v2555_v5 = vsel %vm8702_vm5, %v2474_v62, 0.0  ;;  %v2394_v10 = vadd.f32 %v2393_v44, %v8675_v20  ;;  %v4750_v13 = vshrl.u32 %v4606_v29, 16  ;;  %v4753_v24 = vshll.u32 %v4606_v29, 16 }
 0x26d   : > { %v2575_v9 = vpack.c.bf16 %v2555_v5, %v2555_v5  ;;  %v3579_v49 = vrot.slane %v3577_v51, 3  ;;  %v3582_v26 = vrot.slane %v3580_v34, 4  ;;  %v3595_v29 = vshrl.u32 %v3504_v41, 16 }
 0x26e   : > { %v2431_v53 = vadd.f32 %v2394_v10, %v8588_v32  ;;  %v4752_v1 = vrot.slane %v4750_v13, 3  ;;  %v4755_v62 = vrot.slane %v4753_v24, 4  ;;  %v4748_v63 = vor.u32 %v4747_v47, %v4744_v39  ;;  %v7396_v41 = vld [vmem:[#allocation2 + $0x30] sm:$0xf0]  }
 0x26f   : > { %2595 = vst [vmem:[#allocation2 + $0x38] sm:$0xf] %v2575_v9  ;;  %v3583_v20 = vor.u32 %v3582_v26, %v3579_v49  ;;  %v3597_v31 = vrot.slane %v3595_v29, 3  ;;  %v3603_v10 = vshrl.u32 %v3506_v17, 16  ;;  %v3606_v34 = vshll.u32 %v3506_v17, 16  ;;  %v6803_v9 = vld [vmem:[#allocation3 + $0x68] sm:$0xff] }
 0x270   : > { %v2455_v14 = vadd.f32 %v8486_v35, %v2431_v53  ;;  %v4756_v51 = vor.u32 %v4755_v62, %v4752_v1  ;;  %v3600_v59 = vrot.slane %v3598_v19, 4  ;;  %v3422_v23 = vshrl.u32 %v8733_v54, 16  ;;  %4428 = vmatpush.bf16.msrb.mxu2 %v6803_v9  ;;  %v6795_v1 = vld [vmem:[#allocation3 + $0x28] sm:$0xff] }
 0x271   : > { %v3584_v44 = vsel %vm2891_vm4, %v3575_v37, %v3583_v20  ;;  %v3605_v26 = vrot.slane %v3603_v10, 3  ;;  %v3608_v27 = vrot.slane %v3606_v34, 4  ;;  %v3425_v24 = vshll.u32 %v8733_v54, 16  ;;  %v7397_v20 = vld [vmem:[#allocation2 + $0x30] sm:$0xf0]   ;;  %4379 = vmatpush.bf16.msrb.mxu1 %v6795_v1 }
 0x272   : > { %v2475_v61 = vmax.f32 %v2455_v14, 0.0  ;;  %4099 = vmatmul.bf16.gmra.mxu1 %v3584_v44  ;;  %v4757_v53 = vsel %vm2891_vm4, %v4748_v63, %v4756_v51  ;;  %v3601_v37 = vor.u32 %v3600_v59, %v3597_v31  ;;  %v3424_v13 = vrot.slane %v3422_v23, 4  ;;  %v8785_v51 = vpop.f32.mrf.mxu2 }
 0x273   : > { %v2395_v5 = vpop.f32.mrf.mxu0  ;;  %5310 = vmatmul.bf16.vlgmr.msra.gmra.mxu0 %v4757_v53  ;;  %v3609_v39 = vor.u32 %v3608_v27, %v3605_v26  ;;  %v8777_v47 = vadd.f32 %v2344_v60, %v2285_v40  ;;  %v3427_v54 = vrot.slane %v3425_v24, 5  ;;  %v7369_v40 = vor.u32 %v7397_v20, %v8718_v2 }
 0x274   : > { %v2556_v43 = vsel %vm8756_vm10, %v2475_v61, 0.0  ;;  %v2396_v38 = vadd.f32 %v2395_v5, %v8710_v50  ;;  %v7365_v61 = vor.u32 %v7396_v41, %v8715_v30  ;;  %v8787_v5 = vpop.f32.mrf.mxu3 }
 0x275   : > { %v2576_v49 = vpack.c.bf16 %v2556_v43, %v2556_v43  ;;  %v3610_v29 = vsel %vm2891_vm4, %v3601_v37, %v3609_v39  ;;  %v3428_v19 = vor.u32 %v3427_v54, %v3424_v13  ;;  %v4785_v41 = vshrl.u32 %v7369_v40, 16 }
 0x276   : > { %v2432_v22 = vadd.f32 %v2396_v38, %v8592_v58  ;;  %v8773_v50 = vld [vmem:[#allocation2 + $0x34] sm:$0xff]   ;;  %4197 = vmatmul.bf16.gmra.mxu3 %v3610_v29  ;;  %v3612_v10 = vshrl.u32 %v7365_v61, 16  ;;  %v3615_v34 = vshll.u32 %v7365_v61, 16  ;;  %v4788_v20 = vshll.u32 %v7369_v40, 16 }
 0x277   : > { %v8775_v14 = vld [vmem:[#allocation2 + $0x34] sm:$0xff]   ;;  %2596 = vst [vmem:[#allocation2 + $0x44] sm:$0xf] %v2576_v49  ;;  %v3373_v58 = vunpack.c.h.b16 %v8773_v50  ;;  %v3586_v38 = vshrl.u32 %v3428_v19, 16  ;;  %v3589_v59 = vshll.u32 %v3428_v19, 16 }
 0x278   : > { %v2456_v62 = vadd.f32 %v8486_v35, %v2432_v22  ;;  %v4586_v17 = vunpack.c.h.b16 %v8775_v14  ;;  %v3614_v53 = vrot.slane %v3612_v10, 3  ;;  %v3617_v2 = vrot.slane %v3615_v34, 4 }
 0x279   : > { %v3394_v44 = vpack.c.b16 %v3373_v58, %v3373_v58  ;;  %v3588_v27 = vrot.slane %v3586_v38, 3  ;;  %v3591_v22 = vrot.slane %v3589_v59, 4 }
 0x27a   : > { %v2476_v63 = vmax.f32 %v2456_v62, 0.0  ;;  %v4608_v60 = vpack.c.b16 %v4586_v17, %v4586_v17  ;;  %v3618_v24 = vor.u32 %v3617_v2, %v3614_v53  ;;  %v4787_v62 = vrot.slane %v4785_v41, 3 }
 0x27b   : > { %v2398_v31 = vpop.f32.mrf.mxu0  ;;  %v3620_v9 = vshrl.u32 %v3394_v44, 16  ;;  %v3623_v43 = vshll.u32 %v3394_v44, 16  ;;  %v3592_v39 = vor.u32 %v3591_v22, %v3588_v27  ;;  %v3507_v17 = vrot.slane %v8773_v50, 5  ;;  %v2623_v22 = vld [vmem:[#allocation2 + $0x40] sm:$0x8] }
 0x27c   : > { %v2557_v30 = vsel %vm8756_vm10, %v2476_v63, 0.0  ;;  %v2399_v23 = vadd.f32 %v2398_v31, %v8724_v46  ;;  %v4793_v1 = vshrl.u32 %v4608_v60, 16  ;;  %v4796_v54 = vshll.u32 %v4608_v60, 16  ;;  %v2349_v38 = vpop.f32.mrf.mxu3 }
 0x27d   : > { %v2577_v49 = vpack.c.bf16 %v2557_v30, %v2557_v30  ;;  %v3622_v26 = vrot.slane %v3620_v9, 3  ;;  %v3625_v13 = vrot.slane %v3623_v43, 4  ;;  %4148 = vmatmul.bf16.gmra.mxu2 %v3592_v39  ;;  %v3508_v63 = vrot.slane %v8742_v55, 5  ;;  %v2290_v30 = vpop.f32.mrf.mxu2  ;;  %v6802_v39 = vld [vmem:[#allocation3 + $0x60] sm:$0xff] }
 0x27e   : > { %v2433_v37 = vadd.f32 %v2399_v23, %v8596_v57  ;;  %v4790_v57 = vrot.slane %v4788_v20, 4  ;;  %v4795_v44 = vrot.slane %v4793_v1, 3  ;;  %v4798_v40 = vrot.slane %v4796_v54, 4  ;;  %v6794_v54 = vld [vmem:[#allocation3 + $0x20] sm:$0xff]  ;;  %4429 = vmatpush.bf16.msrb.mxu2 %v6802_v39 }
 0x27f   : > { %2597 = vst [vmem:[#allocation2 + $0x48] sm:$0xf] %v2577_v49  ;;  %v3626_v58 = vor.u32 %v3625_v13, %v3622_v26  ;;  %v3638_v31 = vshrl.u32 %v3507_v17, 16  ;;  %v3641_v10 = vshll.u32 %v3507_v17, 16  ;;  %v3509_v9 = vsel %vm2866_vm1, %v3507_v17, %v3508_v63  ;;  %v8813_v13 = vld [vmem:[#allocation2 + $0x40] sm:$0xf0]   ;;  %4380 = vmatpush.bf16.msrb.mxu1 %v6794_v54 }
 0x280   : > { %v2457_v32 = vadd.f32 %v8486_v35, %v2433_v37  ;;  %v4791_v19 = vor.u32 %v4790_v57, %v4787_v62  ;;  %v3430_v43 = vshrl.u32 %v8773_v50, 16  ;;  %v4799_v23 = vor.u32 %v4798_v40, %v4795_v44  ;;  %v7371_v57 = vld [vmem:[#allocation2 + $0x40] sm:$0xf0]  }
 0x281   : > { %v3627_v61 = vsel %vm2891_vm4, %v3618_v24, %v3626_v58  ;;  %v3640_v55 = vrot.slane %v3638_v31, 3  ;;  %v3643_v49 = vrot.slane %v3641_v10, 4  ;;  %v3646_v2 = vshrl.u32 %v3509_v9, 16 }
 0x282   : > { %v2477_v29 = vmax.f32 %v2457_v32, 0.0  ;;  %4104 = vmatmul.bf16.gmra.mxu1 %v3627_v61  ;;  %v3649_v26 = vshll.u32 %v3509_v9, 16  ;;  %v3432_v27 = vrot.slane %v3430_v43, 4  ;;  %v3433_v41 = vshll.u32 %v8773_v50, 16 }
 0x283   : > { %v2400_v18 = vpop.f32.mrf.mxu0  ;;  %v3644_v24 = vor.u32 %v3643_v49, %v3640_v55  ;;  %v8819_v20 = vadd.f32 %v8787_v5, %v8785_v51  ;;  %v3648_v32 = vrot.slane %v3646_v2, 3  ;;  %v2494_v1 = vadd.s32 6, %v8476_v7  ;;  %v2656_v51 = vld [vmem:[#allocation2 + $0x4c] sm:$0x1] }
 0x284   : > { %v2558_v34 = vsel %vm8798_vm13, %v2477_v29, 0.0  ;;  %v2401_v60 = vadd.f32 %v2400_v18, %v8737_v28  ;;  %v4800_v28 = vsel %vm2891_vm4, %v4791_v19, %v4799_v23  ;;  %v3651_v58 = vrot.slane %v3649_v26, 4  ;;  %v2351_v55 = vpop.f32.mrf.mxu3 }
 0x285   : > { %v2578_v59 = vpack.c.bf16 %v2558_v34, %v2558_v34  ;;  %5315 = vmatmul.bf16.gmra.mxu0 %v4800_v28  ;;  %v3435_v17 = vrot.slane %v3433_v41, 5  ;;  %v8825_v29 = vadd.f32 %v2349_v38, %v2290_v30  ;;  %v2624_v50 = vsel %vm8489_vm6, 0, %v2623_v22  ;;  %v2292_v23 = vpop.f32.mrf.mxu2 }
 0x286   : > { %v2434_v53 = vadd.f32 %v2401_v60, %v8606_v8  ;;  %v8811_v37 = vld [vmem:[#allocation2 + $0x44] sm:$0xff]   ;;  %v3652_v61 = vor.u32 %v3651_v58, %v3648_v32  ;;  %vm2504_vm14 = vcmp.ge.s32.totalorder %v2494_v1, 0  ;;  %vm2514_vm15 = vcmp.lt.s32.totalorder %v2494_v1, 16  ;;  %2625 = vst [vmem:[#allocation2 + $0x40] sm:$0x8] %v2624_v50 }
 0x287   : > { %2598 = vst [vmem:[#allocation2 + $0x54] sm:$0xf] %v2578_v59  ;;  %v8823_v62 = vld [vmem:[#allocation2 + $0x44] sm:$0xff]   ;;  %v3436_v44 = vor.u32 %v3435_v17, %v3432_v27  ;;  %v3376_v19 = vunpack.c.h.b16 %v8811_v37  ;;  %v2657_v34 = vsel %vm8495_vm9, 0, %v2656_v51  ;;  %v3510_v22 = vrot.slane %v8811_v37, 5  ;;  %vm8842_vm0 = vmand %vm2504_vm14, %vm2514_vm15 }
 0x288   : > { %v2458_v8 = vadd.f32 %v8486_v35, %v2434_v53  ;;  %v4589_v40 = vunpack.c.h.b16 %v8823_v62  ;;  %v3653_v31 = vsel %vm2891_vm4, %v3644_v24, %v3652_v61  ;;  %2658 = vst [vmem:[#allocation2 + $0x4c] sm:$0x1] %v2657_v34  ;;  %v8846_v32 = vadd.f32 %v2351_v55, %v2292_v23 }
 0x289   : > { %4202 = vmatmul.bf16.gmra.mxu3 %v3653_v31  ;;  %v3629_v9 = vshrl.u32 %v3436_v44, 16  ;;  %v3632_v43 = vshll.u32 %v3436_v44, 16  ;;  %v3396_v30 = vpack.c.b16 %v3376_v19, %v3376_v19  ;;  %v3681_v51 = vshrl.u32 %v3510_v22, 16 }
 0x28a   : > { %v2478_v5 = vmax.f32 %v2458_v8, 0.0  ;;  %v4610_v59 = vpack.c.b16 %v4589_v40, %v4589_v40 }
 0x28b   : > { %v2403_v63 = vpop.f32.mrf.mxu0  ;;  %v3631_v46 = vrot.slane %v3629_v9, 3  ;;  %v3634_v49 = vrot.slane %v3632_v43, 4  ;;  %v3663_v53 = vshrl.u32 %v3396_v30, 16  ;;  %v3666_v2 = vshll.u32 %v3396_v30, 16 }
 0x28c   : > { %v2559_v18 = vsel %vm8798_vm13, %v2478_v5, 0.0  ;;  %v2404_v10 = vadd.f32 %v2403_v63, %v8777_v47  ;;  %v4836_v26 = vshrl.u32 %v4610_v59, 16  ;;  %v4839_v27 = vshll.u32 %v4610_v59, 16 }
 0x28d   : > { %v2579_v60 = vpack.c.bf16 %v2559_v18, %v2559_v18  ;;  %v3635_v28 = vor.u32 %v3634_v49, %v3631_v46  ;;  %v3665_v41 = vrot.slane %v3663_v53, 3  ;;  %v3668_v39 = vrot.slane %v3666_v2, 4  ;;  %v7180_v8 = vld [vmem:[#allocation2 + $0x40] sm:$0x8]  ;;  %v2626_v46 = vld [vmem:[#allocation2 + $0x50] sm:$0x8] }
 0x28e   : > { %v2435_v38 = vadd.f32 %v2404_v10, %v8610_v4  ;;  %v7176_v4 = vld [vmem:[#allocation2 + $0x40] sm:$0x8]  ;;  %v4838_v54 = vrot.slane %v4836_v26, 3  ;;  %v4841_v17 = vrot.slane %v4839_v27, 4  ;;  %v3684_v5 = vshll.u32 %v3510_v22, 16  ;;  %v6801_v26 = vld [vmem:[#allocation3 + $0x58] sm:$0xff] }
 0x28f   : > { %2599 = vst [vmem:[#allocation2 + $0x58] sm:$0xf] %v2579_v60  ;;  %4153 = vmatmul.bf16.gmra.mxu2 %v3635_v28  ;;  %v7177_v61 = vor.u32 %v8813_v13, %v7176_v4  ;;  %v7181_v44 = vor.u32 %v7371_v57, %v7180_v8  ;;  %v3336_v19 = vld [vmem:[#allocation2 + $0x4c] sm:$0x1]  ;;  %v8852_v10 = vrot.slane %v3681_v51, 3  ;;  %v3438_v13 = vshrl.u32 %v8811_v37, 16  ;;  %v2295_v8 = vpop.f32.mrf.mxu2 }
 0x290   : > { %v2459_v47 = vadd.f32 %v8486_v35, %v2435_v38  ;;  %v3669_v35 = vor.u32 %v3668_v39, %v3665_v41  ;;  %v4842_v18 = vor.u32 %v4841_v17, %v4838_v54  ;;  %v3488_v31 = vunpack.c.l.b16 %v3336_v19  ;;  %v8859_v49 = vld [vmem:[%s9428_s4] ss:$0 sm:$0xff]  ;;  %v6793_v27 = vld [vmem:[#allocation3 + $0x18] sm:$0xff]  ;;  %4430 = vmatpush.bf16.msrb.mxu2 %v6801_v26  ;;  %v7372_v19 = vld [vmem:[#allocation2 + $0x50] sm:$0xf0]  }
 0x291   : > { %v3655_v34 = vshrl.u32 %v7177_v61, 16  ;;  %v3658_v60 = vshll.u32 %v7177_v61, 16  ;;  %v4828_v9 = vshrl.u32 %v7181_v44, 16  ;;  %v4831_v43 = vshll.u32 %v7181_v44, 16  ;;  %4381 = vmatpush.bf16.msrb.mxu1 %v6793_v27 }
 0x292   : > { %v2479_v58 = vmax.f32 %v2459_v47, 0.0  ;;  %v3496_v38 = vpack.c.b16 %v3488_v31, %v3488_v31  ;;  %v3686_v59 = vrot.slane %v3684_v5, 4  ;;  %v3441_v41 = vshll.u32 %v8811_v37, 16 }
 0x293   : > { %v2405_v50 = vpop.f32.mrf.mxu0  ;;  %v3657_v57 = vrot.slane %v3655_v34, 3  ;;  %v3660_v23 = vrot.slane %v3658_v60, 4  ;;  %v4833_v55 = vrot.slane %v4831_v43, 4  ;;  %v2495_v39 = vadd.s32 7, %v8476_v7  ;;  %v2659_v34 = vld [vmem:[#allocation2 + $0x5c] sm:$0x1] }
 0x294   : > { %v2560_v1 = vsel %vm8842_vm0, %v2479_v58, 0.0  ;;  %v2406_v63 = vadd.f32 %v2405_v50, %v8819_v20  ;;  %v4830_v20 = vrot.slane %v4828_v9, 3  ;;  %v3511_v2 = vrot.slane %v3496_v38, 5  ;;  %v2354_v58 = vpop.f32.mrf.mxu3 }
 0x295   : > { %v2580_v40 = vpack.c.bf16 %v2560_v1, %v2560_v1  ;;  %v3687_v47 = vor.u32 %v3686_v59, %v8852_v10  ;;  %v3661_v28 = vor.u32 %v3660_v23, %v3657_v57  ;;  %v8866_v51 = vadd.f32 %v2354_v58, %v2295_v8 }
 0x296   : > { %v2436_v30 = vadd.f32 %v2406_v63, %v8615_v36  ;;  %v3440_v36 = vrot.slane %v3438_v13, 4  ;;  %v4834_v4 = vor.u32 %v4833_v55, %v4830_v20  ;;  %v3512_v17 = vsel %vm2866_vm1, %v3510_v22, %v3511_v2  ;;  %v8872_v63 = vld [vmem:[#allocation2 + $0x54] sm:$0xff]  }
 0x297   : > { %2600 = vst [vmem:[#allocation2 + $0x64] sm:$0xf] %v2580_v40  ;;  %v2627_v5 = vsel %vm8489_vm6, 0, %v2626_v46  ;;  %v3670_v1 = vsel %vm2891_vm4, %v3661_v28, %v3669_v35  ;;  %v3689_v37 = vshrl.u32 %v3512_v17, 16  ;;  %v3692_v44 = vshll.u32 %v3512_v17, 16  ;;  %v8877_v10 = vld [vmem:[#allocation2 + $0x54] sm:$0xff]   ;;  %v2297_v17 = vpop.f32.mrf.mxu2 }
 0x298   : > { %v2460_v53 = vadd.f32 %v8859_v49, %v2436_v30  ;;  %v4843_v61 = vsel %vm2891_vm4, %v4834_v4, %v4842_v18  ;;  %2628 = vst [vmem:[#allocation2 + $0x50] sm:$0x8] %v2627_v5  ;;  %4109 = vmatmul.bf16.gmra.mxu1 %v3670_v1  ;;  %v3443_v40 = vrot.slane %v3441_v41, 5  ;;  %vm2505_vm2 = vcmp.ge.s32.totalorder %v2495_v39, 0  ;;  %v7373_v35 = vld [vmem:[#allocation2 + $0x50] sm:$0xf0]  }
 0x299   : > { %5320 = vmatmul.bf16.gmra.mxu0 %v4843_v61  ;;  %v3691_v60 = vrot.slane %v3689_v37, 3  ;;  %v3694_v9 = vrot.slane %v3692_v44, 4  ;;  %vm2515_vm3 = vcmp.lt.s32.totalorder %v2495_v39, 16  ;;  %v3379_v38 = vunpack.c.h.b16 %v8872_v63 }
 0x29a   : > { %v2480_v54 = vmax.f32 %v2460_v53, 0.0  ;;  %v3444_v43 = vor.u32 %v3443_v40, %v3440_v36  ;;  %v4592_v59 = vunpack.c.h.b16 %v8877_v10  ;;  %vm8887_vm5 = vmand %vm2505_vm2, %vm2515_vm3 }
 0x29b   : > { %v2408_v50 = vpop.f32.mrf.mxu0  ;;  %v3695_v24 = vor.u32 %v3694_v9, %v3691_v60  ;;  %v3398_v20 = vpack.c.b16 %v3379_v38, %v3379_v38 }
 0x29c   : > { %v2561_v22 = vsel %vm8842_vm0, %v2480_v54, 0.0  ;;  %v2409_v31 = vadd.f32 %v2408_v50, %v8825_v29  ;;  %v2660_v29 = vsel %vm8495_vm9, 0, %v2659_v34  ;;  %v3672_v13 = vshrl.u32 %v3444_v43, 16  ;;  %v2356_v50 = vpop.f32.mrf.mxu3 }
 0x29d   : > { %v2581_v18 = vpack.c.bf16 %v2561_v22, %v2561_v22  ;;  %v3675_v57 = vshll.u32 %v3444_v43, 16  ;;  %2661 = vst [vmem:[#allocation2 + $0x5c] sm:$0x1] %v2660_v29  ;;  %v3696_v55 = vsel %vm2891_vm4, %v3687_v47, %v3695_v24  ;;  %v4612_v46 = vpack.c.b16 %v4592_v59, %v4592_v59 }
 0x29e   : > { %v2437_v30 = vadd.f32 %v2409_v31, %v8619_v12  ;;  %4207 = vmatmul.bf16.gmra.mxu3 %v3696_v55  ;;  %v3674_v53 = vrot.slane %v3672_v13, 3  ;;  %v3706_v27 = vshrl.u32 %v3398_v20, 16  ;;  %v3709_v4 = vshll.u32 %v3398_v20, 16 }
 0x29f   : > { %2601 = vst [vmem:[#allocation2 + $0x68] sm:$0xf] %v2581_v18  ;;  %v3677_v2 = vrot.slane %v3675_v57, 4  ;;  %v7184_v26 = vld [vmem:[#allocation2 + $0x50] sm:$0x8]  ;;  %v4879_v8 = vshrl.u32 %v4612_v46, 16  ;;  %v8895_v43 = vadd.f32 %v2356_v50, %v2297_v17 }
 0x2a0   : > { %v2461_v23 = vadd.f32 %v8859_v49, %v2437_v30  ;;  %v7188_v41 = vld [vmem:[#allocation2 + $0x50] sm:$0x8]  ;;  %v4882_v58 = vshll.u32 %v4612_v46, 16  ;;  %v3708_v39 = vrot.slane %v3706_v27, 3  ;;  %v7185_v1 = vor.u32 %v7372_v19, %v7184_v26 }
 0x2a1   : > { %v3678_v54 = vor.u32 %v3677_v2, %v3674_v53  ;;  %v3711_v61 = vrot.slane %v3709_v4, 4  ;;  %v4881_v37 = vrot.slane %v4879_v8, 3  ;;  %v7189_v44 = vor.u32 %v7373_v35, %v7188_v41 }
 0x2a2   : > { %v2481_v36 = vmax.f32 %v2461_v23, 0.0  ;;  %v4884_v22 = vrot.slane %v4882_v58, 4  ;;  %v3513_v31 = vrot.slane %v8872_v63, 5  ;;  %v3698_v34 = vshrl.u32 %v7185_v1, 16 }
 0x2a3   : > { %v2410_v28 = vpop.f32.mrf.mxu0  ;;  %4158 = vmatmul.bf16.gmra.mxu2 %v3678_v54  ;;  %v3701_v18 = vshll.u32 %v7185_v1, 16  ;;  %v3712_v60 = vor.u32 %v3711_v61, %v3708_v39  ;;  %v4871_v30 = vshrl.u32 %v7189_v44, 16  ;;  %v4874_v38 = vshll.u32 %v7189_v44, 16  ;;  %v2629_v54 = vld [vmem:[#allocation2 + $0x60] sm:$0x8] }
 0x2a4   : > { %v2562_v47 = vsel %vm8887_vm5, %v2481_v36, 0.0  ;;  %v2411_v40 = vadd.f32 %v2410_v28, %v8846_v32  ;;  %v3337_v9 = vld [vmem:[#allocation2 + $0x5c] sm:$0x1]  ;;  %v4885_v24 = vor.u32 %v4884_v22, %v4881_v37  ;;  %v3700_v59 = vrot.slane %v3698_v34, 3  ;;  %v8908_v1 = vld [vmem:[#allocation2 + $0x60] sm:$0xf0]  }
 0x2a5   : > { %v2582_v5 = vpack.c.bf16 %v2562_v47, %v2562_v47  ;;  %v3703_v29 = vrot.slane %v3701_v18, 4  ;;  %v3489_v35 = vunpack.c.l.b16 %v3337_v9  ;;  %v3724_v13 = vshrl.u32 %v3513_v31, 16  ;;  %v7375_v18 = vld [vmem:[#allocation2 + $0x60] sm:$0xf0]   ;;  %v2300_v9 = vpop.f32.mrf.mxu2 }
 0x2a6   : > { %v2438_v19 = vadd.f32 %v2411_v40, %v8631_v48  ;;  %v4873_v57 = vrot.slane %v4871_v30, 3  ;;  %v4876_v32 = vrot.slane %v4874_v38, 4  ;;  %v3727_v20 = vshll.u32 %v3513_v31, 16  ;;  %v8915_v34 = vld [vmem:[#allocation2 + $0x64] sm:$0xff]   ;;  %v2359_v30 = vpop.f32.mrf.mxu3  ;;  %v6792_v38 = vld [vmem:[#allocation3 + $0x10] sm:$0xff] }
 0x2a7   : > { %2602 = vst [vmem:[#allocation2 + $0x74] sm:$0xf] %v2582_v5  ;;  %v3704_v46 = vor.u32 %v3703_v29, %v3700_v59  ;;  %v3497_v53 = vpack.c.b16 %v3489_v35, %v3489_v35  ;;  %v3726_v2 = vrot.slane %v3724_v13, 3  ;;  %v3446_v36 = vshrl.u32 %v8872_v63, 16  ;;  %v8906_v5 = vld [vmem:[#allocation2 + $0x64] sm:$0xff]   ;;  %4382 = vmatpush.bf16.msrb.mxu1 %v6792_v38 }
 0x2a8   : > { %v2462_v23 = vadd.f32 %v8859_v49, %v2438_v19  ;;  %v4877_v26 = vor.u32 %v4876_v32, %v4873_v57  ;;  %v3729_v28 = vrot.slane %v3727_v20, 4  ;;  %v3449_v48 = vshll.u32 %v8872_v63, 16 }
 0x2a9   : > { %v3713_v4 = vsel %vm2891_vm4, %v3704_v46, %v3712_v60  ;;  %v3514_v41 = vrot.slane %v3497_v53, 5  ;;  %v3448_v8 = vrot.slane %v3446_v36, 4  ;;  %v2630_v12 = vsel %vm8489_vm6, 0, %v2629_v54  ;;  %v6800_v60 = vld [vmem:[#allocation3 + $0x50] sm:$0xff] }
 0x2aa   : > { %v2482_v27 = vmax.f32 %v2462_v23, 0.0  ;;  %4114 = vmatmul.bf16.gmra.mxu1 %v3713_v4  ;;  %v4886_v47 = vsel %vm2891_vm4, %v4877_v26, %v4885_v24  ;;  %v3730_v17 = vor.u32 %v3729_v28, %v3726_v2  ;;  %v3451_v50 = vrot.slane %v3449_v48, 5  ;;  %2631 = vst [vmem:[#allocation2 + $0x60] sm:$0x8] %v2630_v12  ;;  %4431 = vmatpush.bf16.msrb.mxu2 %v6800_v60  ;;  %v2662_v26 = vld [vmem:[#allocation2 + $0x6c] sm:$0x1] }
 0x2ab   : > { %v2413_v55 = vpop.f32.mrf.mxu0  ;;  %5325 = vmatmul.bf16.gmra.mxu0 %v4886_v47  ;;  %v3515_v61 = vsel %vm2866_vm1, %v3513_v31, %v3514_v41  ;;  %v3382_v57 = vunpack.c.h.b16 %v8906_v5  ;;  %v4595_v32 = vunpack.c.h.b16 %v8915_v34  ;;  %v8932_v47 = vrot.slane %v8906_v5, 5 }
 0x2ac   : > { %v2414_v58 = vadd.f32 %v2413_v55, %v8866_v51  ;;  %v2563_v39 = vsel %vm8887_vm5, %v2482_v27, 0.0  ;;  %v2496_v51 = vadd.s32 8, %v8476_v7  ;;  %v3732_v44 = vshrl.u32 %v3515_v61, 16 }
 0x2ad   : > { %v2583_v63 = vpack.c.bf16 %v2563_v39, %v2563_v39  ;;  %v3735_v22 = vshll.u32 %v3515_v61, 16  ;;  %v3452_v40 = vor.u32 %v3451_v50, %v3448_v8  ;;  %v3400_v2 = vpack.c.b16 %v3382_v57, %v3382_v57 }
 0x2ae   : > { %v2439_v37 = vadd.f32 %v2414_v58, %v8640_v25  ;;  %vm2506_vm7 = vcmp.ge.s32.totalorder %v2496_v51, 0  ;;  %vm2516_vm8 = vcmp.lt.s32.totalorder %v2496_v51, 16  ;;  %v3734_v25 = vrot.slane %v3732_v44, 3  ;;  %v2361_v50 = vpop.f32.mrf.mxu3 }
 0x2af   : > { %2603 = vst [vmem:[#allocation2 + $0x78] sm:$0xf] %v2583_v63  ;;  %v3737_v24 = vrot.slane %v3735_v22, 4  ;;  %v3715_v19 = vshrl.u32 %v3452_v40, 16  ;;  %v3718_v59 = vshll.u32 %v3452_v40, 16  ;;  %vm8918_vm10 = vmand %vm2506_vm7, %vm2516_vm8  ;;  %v4614_v36 = vpack.c.b16 %v4595_v32, %v4595_v32 }
 0x2b0   : > { %v2463_v31 = vadd.f32 %v8859_v49, %v2439_v37  ;;  %v3749_v4 = vshrl.u32 %v3400_v2, 16  ;;  %v3752_v41 = vshll.u32 %v3400_v2, 16  ;;  %v3454_v39 = vshrl.u32 %v8906_v5, 16  ;;  %v2632_v2 = vld [vmem:[#allocation2 + $0x70] sm:$0x8] }
 0x2b1   : > { %v3738_v23 = vor.u32 %v3737_v24, %v3734_v25  ;;  %v3717_v20 = vrot.slane %v3715_v19, 3  ;;  %v3720_v55 = vrot.slane %v3718_v59, 4  ;;  %v4922_v8 = vshrl.u32 %v4614_v36, 16  ;;  %v7192_v63 = vld [vmem:[#allocation2 + $0x60] sm:$0x8] }
 0x2b2   : > { %v2483_v13 = vmax.f32 %v2463_v31, 0.0  ;;  %v4925_v58 = vshll.u32 %v4614_v36, 16  ;;  %v3751_v61 = vrot.slane %v3749_v4, 3  ;;  %v3754_v37 = vrot.slane %v3752_v41, 4  ;;  %v7196_v51 = vld [vmem:[#allocation2 + $0x60] sm:$0x8] }
 0x2b3   : > { %v2415_v35 = vpop.f32.mrf.mxu0  ;;  %v3739_v27 = vsel %vm2891_vm4, %v3730_v17, %v3738_v23  ;;  %v3721_v28 = vor.u32 %v3720_v55, %v3717_v20  ;;  %v2302_v17 = vpop.f32.mrf.mxu2  ;;  %v2360_v44 = vadd.f32 %v2359_v30, %v2300_v9  ;;  %v4924_v40 = vrot.slane %v4922_v8, 3  ;;  %v6813_v36 = vld [vmem:[#allocation3 + $0xb8] sm:$0xff]  ;;  %v6799_v4 = vld [vmem:[#allocation3 + $0x48] sm:$0xff] }
 0x2b4   : > { %v2416_v46 = vadd.f32 %v2415_v35, %v8895_v43  ;;  %v2564_v53 = vsel %vm8918_vm10, %v2483_v13, 0.0  ;;  %4212 = vmatmul.bf16.gmra.mxu3 %v3739_v27  ;;  %v2663_v43 = vsel %vm8495_vm9, 0, %v2662_v26  ;;  %v8935_v22 = vadd.f32 %v2361_v50, %v2302_v17  ;;  %4432 = vmatpush.bf16.msrb.mxu2 %v6799_v4 }
 0x2b5   : > { %v2584_v48 = vpack.c.bf16 %v2564_v53, %v2564_v53  ;;  %4163 = vmatmul.bf16.gmra.mxu2 %v3721_v28  ;;  %v4927_v12 = vrot.slane %v4925_v58, 4  ;;  %2664 = vst [vmem:[#allocation2 + $0x6c] sm:$0x1] %v2663_v43  ;;  %v3755_v60 = vor.u32 %v3754_v37, %v3751_v61  ;;  %v3767_v31 = vshrl.u32 %v8932_v47, 16  ;;  %4475 = vmatpush.bf16.msra.mxu3 %v6813_v36  ;;  %v7376_v61 = vld [vmem:[#allocation2 + $0x70] sm:$0xf0]  }
 0x2b6   : > { %v2440_v54 = vadd.f32 %v2416_v46, %v8643_v56  ;;  %v3770_v25 = vshll.u32 %v8932_v47, 16  ;;  %v7193_v24 = vor.u32 %v8908_v1, %v7192_v63  ;;  %v7197_v19 = vor.u32 %v7375_v18, %v7196_v51  ;;  %v8954_v63 = vld [vmem:[#allocation2 + $0x74] sm:$0xff]  }
 0x2b7   : > { %2604 = vst [vmem:[#allocation2 + $0x84] sm:$0xf] %v2584_v48  ;;  %v4928_v59 = vor.u32 %v4927_v12, %v4924_v40  ;;  %v3456_v35 = vrot.slane %v3454_v39, 4  ;;  %v8941_v9 = vrot.slane %v3767_v31, 3  ;;  %v3457_v57 = vshll.u32 %v8906_v5, 16  ;;  %v6812_v37 = vld [vmem:[#allocation3 + $0xb0] sm:$0xff] }
 0x2b8   : > { %v2464_v38 = vadd.f32 %v8859_v49, %v2440_v54  ;;  %v8943_v30 = vrot.slane %v3770_v25, 4  ;;  %v3741_v32 = vshrl.u32 %v7193_v24, 16  ;;  %v3744_v23 = vshll.u32 %v7193_v24, 16  ;;  %v6791_v54 = vld [vmem:[#allocation3 + $0x8] sm:$0xff]  ;;  %v7377_v40 = vld [vmem:[#allocation2 + $0x70] sm:$0xf0]  }
 0x2b9   : > { %v4914_v20 = vshrl.u32 %v7197_v19, 16  ;;  %v4917_v55 = vshll.u32 %v7197_v19, 16  ;;  %v3459_v18 = vrot.slane %v3457_v57, 5  ;;  %v2497_v29 = vadd.s32 9, %v8476_v7  ;;  %v8957_v7 = vld [vmem:[#allocation2 + $0x74] sm:$0xff]   ;;  %4383 = vmatpush.bf16.msrb.mxu1 %v6791_v54  ;;  %4476 = vmatpush.bf16.msra.mxu3 %v6812_v37 }
 0x2ba   : > { %v2484_v13 = vmax.f32 %v2464_v38, 0.0  ;;  %v3773_v1 = vor.u32 %v8943_v30, %v8941_v9  ;;  %v3743_v26 = vrot.slane %v3741_v32, 3  ;;  %v3746_v27 = vrot.slane %v3744_v23, 4  ;;  %v2665_v25 = vld [vmem:[#allocation2 + $0x7c] sm:$0x1]  ;;  %v6811_v32 = vld [vmem:[#allocation3 + $0xa8] sm:$0xff] }
 0x2bb   : > { %v2418_v56 = vpop.f32.mrf.mxu0  ;;  %v4916_v28 = vrot.slane %v4914_v20, 3  ;;  %v4919_v48 = vrot.slane %v4917_v55, 4  ;;  %v3460_v8 = vor.u32 %v3459_v18, %v3456_v35  ;;  %v2633_v50 = vsel %vm8489_vm6, 0, %v2632_v2  ;;  %v2635_v9 = vld [vmem:[#allocation2 + $0x80] sm:$0x8] }
 0x2bc   : > { %v2565_v46 = vsel %vm8918_vm10, %v2484_v13, 0.0  ;;  %v2419_v53 = vadd.f32 %v2418_v56, %v2360_v44  ;;  %v3338_v41 = vld [vmem:[#allocation2 + $0x6c] sm:$0x1]  ;;  %v3747_v43 = vor.u32 %v3746_v27, %v3743_v26  ;;  %vm2507_vm11 = vcmp.ge.s32.totalorder %v2497_v29, 0  ;;  %2634 = vst [vmem:[#allocation2 + $0x70] sm:$0x8] %v2633_v50 }
 0x2bd   : > { %v2585_v5 = vpack.c.bf16 %v2565_v46, %v2565_v46  ;;  %v4920_v39 = vor.u32 %v4919_v48, %v4916_v28  ;;  %v3490_v17 = vunpack.c.l.b16 %v3338_v41  ;;  %v3758_v51 = vshrl.u32 %v3460_v8, 16  ;;  %v6810_v28 = vld [vmem:[#allocation3 + $0xa0] sm:$0xff]  ;;  %4477 = vmatpush.bf16.msra.mxu3 %v6811_v32 }
 0x2be   : > { %v2441_v58 = vadd.f32 %v2419_v53, %v8646_v11  ;;  %v3761_v44 = vshll.u32 %v3460_v8, 16  ;;  %v3756_v12 = vsel %vm2891_vm4, %v3747_v43, %v3755_v60  ;;  %vm2517_vm12 = vcmp.lt.s32.totalorder %v2497_v29, 16  ;;  %v6798_v30 = vld [vmem:[#allocation3 + $0x40] sm:$0xff] }
 0x2bf   : > { %2605 = vst [vmem:[#allocation2 + $0x88] sm:$0xf] %v2585_v5  ;;  %v4929_v56 = vsel %vm2891_vm4, %v4920_v39, %v4928_v59  ;;  %v3498_v38 = vpack.c.b16 %v3490_v17, %v3490_v17  ;;  %4119 = vmatmul.bf16.gmra.mxu1 %v3756_v12  ;;  %v3760_v24 = vrot.slane %v3758_v51, 3  ;;  %vm8962_vm13 = vmand %vm2507_vm11, %vm2517_vm12  ;;  %v3385_v60 = vunpack.c.h.b16 %v8954_v63  ;;  %4433 = vmatpush.bf16.msrb.mxu2 %v6798_v30 }
 0x2c0   : > { %v2465_v11 = vadd.f32 %v8859_v49, %v2441_v58  ;;  %5330 = vmatmul.bf16.gmra.mxu0 %v4929_v56  ;;  %v3763_v19 = vrot.slane %v3761_v44, 4  ;;  %v4598_v59 = vunpack.c.h.b16 %v8957_v7  ;;  %v2666_v46 = vsel %vm8495_vm9, 0, %v2665_v25 }
 0x2c1   : > { %v3517_v57 = vrot.slane %v3498_v38, 5  ;;  %v3402_v2 = vpack.c.b16 %v3385_v60, %v3385_v60  ;;  %2667 = vst [vmem:[#allocation2 + $0x7c] sm:$0x1] %v2666_v46  ;;  %4478 = vmatpush.bf16.msra.mxu3 %v6810_v28 }
 0x2c2   : > { %v2485_v35 = vmax.f32 %v2465_v11, 0.0  ;;  %v3764_v23 = vor.u32 %v3763_v19, %v3760_v24  ;;  %v4616_v27 = vpack.c.b16 %v4598_v59, %v4598_v59 }
 0x2c3   : > { %v2420_v31 = vpop.f32.mrf.mxu0  ;;  %v3518_v18 = vsel %vm2866_vm1, %v8932_v47, %v3517_v57  ;;  %v3792_v48 = vshrl.u32 %v3402_v2, 16  ;;  %v3795_v4 = vshll.u32 %v3402_v2, 16  ;;  %v8981_v47 = vld [vmem:[#allocation2 + $0x80] sm:$0xf0]   ;;  %v7200_v29 = vld [vmem:[#allocation2 + $0x70] sm:$0x8] }
 0x2c4   : > { %v2566_v20 = vsel %vm8962_vm13, %v2485_v35, 0.0  ;;  %v2421_v55 = vadd.f32 %v2420_v31, %v8935_v22  ;;  %v3775_v36 = vshrl.u32 %v3518_v18, 16  ;;  %v3778_v26 = vshll.u32 %v3518_v18, 16  ;;  %v7204_v54 = vld [vmem:[#allocation2 + $0x70] sm:$0x8] }
 0x2c5   : > { %v2586_v53 = vpack.c.bf16 %v2566_v20, %v2566_v20  ;;  %4168 = vmatmul.bf16.gmra.mxu2 %v3764_v23  ;;  %v8977_v22 = vrot.slane %v8954_v63, 5  ;;  %v3794_v39 = vrot.slane %v3792_v48, 3  ;;  %v3797_v17 = vrot.slane %v3795_v4, 4 }
 0x2c6   : > { %v2442_v5 = vadd.f32 %v2421_v55, %v8648_v52  ;;  %v8979_v41 = vld [vmem:[#allocation2 + $0x84] sm:$0xff]   ;;  %v3777_v8 = vrot.slane %v3775_v36, 3  ;;  %v3780_v58 = vrot.slane %v3778_v26, 4  ;;  %v4965_v37 = vshrl.u32 %v4616_v27, 16 }
 0x2c7   : > { %2606 = vst [vmem:[#allocation2 + $0x94] sm:$0xf] %v2586_v53  ;;  %v3388_v43 = vunpack.c.h.b16 %v8979_v41  ;;  %v4968_v51 = vshll.u32 %v4616_v27, 16  ;;  %v7201_v44 = vor.u32 %v7376_v61, %v7200_v29  ;;  %v3798_v11 = vor.u32 %v3797_v17, %v3794_v39  ;;  %v6809_v61 = vld [vmem:[#allocation3 + $0x98] sm:$0xff]  ;;  %v6808_v53 = vld [vmem:[#allocation3 + $0x90] sm:$0xff] }
 0x2c8   : > { %v3781_v50 = vor.u32 %v3780_v58, %v3777_v8  ;;  %v2466_v52 = vadd.f32 %v8859_v49, %v2442_v5  ;;  %v7205_v12 = vor.u32 %v7377_v40, %v7204_v54  ;;  %v3810_v56 = vshrl.u32 %v8977_v22, 16  ;;  %v3339_v19 = vld [vmem:[#allocation2 + $0x7c] sm:$0x1]  ;;  %4479 = vmatpush.bf16.msra.mxu3 %v6809_v61  ;;  %v8999_v54 = vld [vmem:[#allocation2 + $0x84] sm:$0xff]  }
 0x2c9   : > { %v4967_v31 = vrot.slane %v4965_v37, 3  ;;  %v4970_v25 = vrot.slane %v4968_v51, 4  ;;  %v3784_v35 = vshrl.u32 %v7201_v44, 16  ;;  %v3787_v57 = vshll.u32 %v7201_v44, 16  ;;  %v7379_v39 = vld [vmem:[#allocation2 + $0x80] sm:$0xf0]  }
 0x2ca   : > { %v3782_v38 = vsel %vm2891_vm4, %v3773_v1, %v3781_v50  ;;  %v2486_v24 = vmax.f32 %v2466_v52, 0.0  ;;  %v4957_v60 = vshrl.u32 %v7205_v12, 16  ;;  %v4960_v49 = vshll.u32 %v7205_v12, 16  ;;  %v6790_v1 = vld [vmem:[#allocation3] sm:$0xff]  ;;  %v2668_v51 = vld [vmem:[#allocation2 + $0x8c] sm:$0x1] }
 0x2cb   : > { %4217 = vmatmul.bf16.gmra.mxu3 %v3782_v38  ;;  %v4971_v59 = vor.u32 %v4970_v25, %v4967_v31  ;;  %v3491_v32 = vunpack.c.l.b16 %v3339_v19  ;;  %v8992_v23 = vrot.slane %v3810_v56, 3  ;;  %v3786_v20 = vrot.slane %v3784_v35, 3  ;;  %4384 = vmatpush.bf16.msrb.mxu1 %v6790_v1 }
 0x2cc   : > { %v2567_v40 = vsel %vm8962_vm13, %v2486_v24, 0.0  ;;  %v3789_v55 = vrot.slane %v3787_v57, 4  ;;  %v4959_v46 = vrot.slane %v4957_v60, 3  ;;  %v4962_v18 = vrot.slane %v4960_v49, 4  ;;  %4480 = vmatpush.bf16.msra.mxu3 %v6808_v53 }
 0x2cd   : > { %v2587_v2 = vpack.c.bf16 %v2567_v40, %v2567_v40  ;;  %v3499_v36 = vpack.c.b16 %v3491_v32, %v3491_v32  ;;  %v3813_v26 = vshll.u32 %v8977_v22, 16  ;;  %v3462_v27 = vshrl.u32 %v8954_v63, 16 }
 0x2ce   : > { %v3790_v13 = vor.u32 %v3789_v55, %v3786_v20  ;;  %v4963_v28 = vor.u32 %v4962_v18, %v4959_v46  ;;  %v3465_v48 = vshll.u32 %v8954_v63, 16  ;;  %v2636_v4 = vsel %vm8489_vm6, 0, %v2635_v9  ;;  %v6807_v63 = vld [vmem:[#allocation3 + $0x88] sm:$0xff]  ;;  %v9023_v30 = vld [vmem:[#allocation2 + $0x90] sm:$0xf0]  }
 0x2cf   : > { %2607 = vst [vmem:[#allocation2 + $0x98] sm:$0xf] %v2587_v2  ;;  %v3520_v5 = vrot.slane %v3499_v36, 5  ;;  %v3815_v8 = vrot.slane %v3813_v26, 4  ;;  %v3464_v58 = vrot.slane %v3462_v27, 4  ;;  %v3404_v29 = vpack.c.b16 %v3388_v43, %v3388_v43 }
 0x2d0   : > { %v3799_v17 = vsel %vm2891_vm4, %v3790_v13, %v3798_v11  ;;  %v4972_v50 = vsel %vm2891_vm4, %v4963_v28, %v4971_v59  ;;  %v3467_v37 = vrot.slane %v3465_v48, 5  ;;  %2637 = vst [vmem:[#allocation2 + $0x80] sm:$0x8] %v2636_v4  ;;  %v9005_v52 = vor.u32 %v8658_v21, %v8650_v16  ;;  %v6806_v21 = vld [vmem:[#allocation3 + $0x80] sm:$0xff]  ;;  %4481 = vmatpush.bf16.msra.mxu3 %v6807_v63  ;;  %v2638_v36 = vld [vmem:[#allocation2 + $0x90] sm:$0x8] }
 0x2d1   : > { %4124 = vmatmul.bf16.gmra.mxu1 %v3799_v17  ;;  %5335 = vmatmul.bf16.gmra.mxu0 %v4972_v50  ;;  %v3521_v43 = vsel %vm2866_vm1, %v8977_v22, %v3520_v5  ;;  %v3835_v44 = vshrl.u32 %v3404_v29, 16  ;;  %v3838_v12 = vshll.u32 %v3404_v29, 16  ;;  %v3816_v31 = vor.u32 %v3815_v8, %v8992_v23 }
 0x2d2   : > { %v3818_v56 = vshrl.u32 %v3521_v43, 16  ;;  %v3821_v11 = vshll.u32 %v3521_v43, 16  ;;  %v3468_v38 = vor.u32 %v3467_v37, %v3464_v58  ;;  %v4601_v24 = vunpack.c.h.b16 %v8999_v54  ;;  %v6861_v37 = vld [vmem:[#allocation3 + $0x238] sm:$0xff] }
 0x2d3   : > { %v9010_v25 = vrot.slane %v3835_v44, 3  ;;  %v2669_v16 = vsel %vm8495_vm9, 0, %v2668_v51  ;;  %v9015_v22 = vrot.slane %v3838_v12, 4  ;;  %v9018_v61 = vrot.slane %v8979_v41, 5  ;;  %5400 = vmatpush.bf16.msra.mxu2 %v6861_v37 }
 0x2d4   : > { %v3820_v19 = vrot.slane %v3818_v56, 3  ;;  %v3823_v35 = vrot.slane %v3821_v11, 4  ;;  %v3801_v57 = vshrl.u32 %v3468_v38, 16  ;;  %v3804_v60 = vshll.u32 %v3468_v38, 16  ;;  %2670 = vst [vmem:[#allocation2 + $0x8c] sm:$0x1] %v2669_v16  ;;  %4482 = vmatpush.bf16.msra.mxu3 %v6806_v21 }
 0x2d5   : > { %v4618_v49 = vpack.c.b16 %v4601_v24, %v4601_v24  ;;  %v3470_v23 = vshrl.u32 %v8979_v41, 16  ;;  %v9028_v18 = vpack.c.b16 %v2732_v33, %v2732_v33  ;;  %v3841_v26 = vor.u32 %v9015_v22, %v9010_v25  ;;  %v6853_v56 = vld [vmem:[#allocation3 + $0x1f8] sm:$0xff] }
 0x2d6   : > { %v3824_v59 = vor.u32 %v3823_v35, %v3820_v19  ;;  %v3803_v40 = vrot.slane %v3801_v57, 3  ;;  %v3806_v32 = vrot.slane %v3804_v60, 4  ;;  %v9021_v9 = vld [vmem:[#allocation2 + $0x94] sm:$0xff]   ;;  %v2893_v48 = vshrl.u32 %v9005_v52, 16  ;;  %5351 = vmatpush.bf16.msra.mxu1 %v6853_v56 }
 0x2d7   : > { %v7208_v1 = vld [vmem:[#allocation2 + $0x80] sm:$0x8]  ;;  %v5008_v55 = vshrl.u32 %v4618_v49, 16  ;;  %v5011_v46 = vshll.u32 %v4618_v49, 16  ;;  %v3473_v5 = vshll.u32 %v8979_v41, 16  ;;  %v3853_v58 = vshrl.u32 %v9018_v61, 16 }
 0x2d8   : > { %v7212_v20 = vld [vmem:[#allocation2 + $0x80] sm:$0x8]  ;;  %v3825_v53 = vsel %vm2891_vm4, %v3816_v31, %v3824_v59  ;;  %v3807_v2 = vor.u32 %v3806_v32, %v3803_v40  ;;  %v7209_v4 = vor.u32 %v8981_v47, %v7208_v1  ;;  %v3472_v29 = vrot.slane %v3470_v23, 4  ;;  %v2678_v56 = vld [vmem:[#allocation2 + $0x14] sm:$0xff]  }
 0x2d9   : > { %v5010_v27 = vrot.slane %v5008_v55, 3  ;;  %v5013_v13 = vrot.slane %v5011_v46, 4  ;;  %v7213_v33 = vor.u32 %v7379_v39, %v7212_v20  ;;  %v2639_v17 = vsel %vm8489_vm6, 0, %v2638_v36 }
 0x2da   : > { %4173 = vmatmul.bf16.gmra.mxu2 %v3807_v2  ;;  %v4604_v50 = vunpack.c.h.b16 %v9021_v9  ;;  %v3827_v51 = vshrl.u32 %v7209_v4, 16  ;;  %v3830_v63 = vshll.u32 %v7209_v4, 16  ;;  %2640 = vst [vmem:[#allocation2 + $0x90] sm:$0x8] %v2639_v17  ;;  %v3856_v39 = vshll.u32 %v9018_v61, 16  ;;  %5352 = vmatpush.bf16.msra.mxu1 %v6852_v0 }
 0x2db   : > { %4222 = vmatmul.bf16.gmra.mxu3 %v3825_v53  ;;  %v3340_v8 = vld [vmem:[#allocation2 + $0x8c] sm:$0x1]  ;;  %v5000_v43 = vshrl.u32 %v7213_v33, 16  ;;  %v5003_v44 = vshll.u32 %v7213_v33, 16  ;;  %v5014_v12 = vor.u32 %v5013_v13, %v5010_v27  ;;  %v3475_v41 = vrot.slane %v3473_v5, 5 }
 0x2dc   : > { %v3492_v47 = vunpack.c.l.b16 %v3340_v8  ;;  %v3829_v11 = vrot.slane %v3827_v51, 3  ;;  %v3832_v38 = vrot.slane %v3830_v63, 4  ;;  %v4620_v16 = vpack.c.b16 %v4604_v50, %v4604_v50 }
 0x2dd   : > { %v5002_v31 = vrot.slane %v5000_v43, 3  ;;  %v5005_v42 = vrot.slane %v5003_v44, 4  ;;  %v3476_v24 = vor.u32 %v3475_v41, %v3472_v29  ;;  %v3855_v35 = vrot.slane %v3853_v58, 3 }
 0x2de   : > { %v3500_v25 = vpack.c.b16 %v3492_v47, %v3492_v47  ;;  %v3833_v21 = vor.u32 %v3832_v38, %v3829_v11  ;;  %v2896_v57 = vshll.u32 %v9005_v52, 16  ;;  %v3858_v22 = vrot.slane %v3856_v39, 4  ;;  %v7385_v11 = vld [vmem:[#allocation2 + $0x10] sm:$0xf0]  }
 0x2df   : > { %v9033_v28 = vpop.f32.mrf.mxu1  ;;  %v5006_v19 = vor.u32 %v5005_v42, %v5002_v31  ;;  %v3844_v49 = vshrl.u32 %v3476_v24, 16  ;;  %v3847_v59 = vshll.u32 %v3476_v24, 16  ;;  %v2779_v1 = vshrl.u32 %v8656_v15, 16  ;;  %v7220_v42 = vld [vmem:[#allocation2 + $0x10] sm:$0x8] }
 0x2e0   : > { %v3523_v60 = vrot.slane %v3500_v25, 5  ;;  %v3842_v40 = vsel %vm2891_vm4, %v3833_v21, %v3841_v26  ;;  %v2782_v20 = vshll.u32 %v8656_v15, 16  ;;  %v5051_v2 = vshrl.u32 %v4620_v16, 16  ;;  %v6860_v21 = vld [vmem:[#allocation3 + $0x230] sm:$0xff] }
 0x2e1   : > { %v5015_v32 = vsel %vm2891_vm4, %v5006_v19, %v5014_v12  ;;  %4129 = vmatmul.bf16.gmra.mxu1 %v3842_v40  ;;  %v3846_v52 = vrot.slane %v3844_v49, 3  ;;  %v3849_v46 = vrot.slane %v3847_v59, 4  ;;  %v7216_v53 = vld [vmem:[#allocation2 + $0x90] sm:$0x8]  ;;  %v5054_v26 = vshll.u32 %v4620_v16, 16  ;;  %5401 = vmatpush.bf16.msra.mxu2 %v6860_v21 }
 0x2e2   : > { %5340 = vmatmul.bf16.gmra.mxu0 %v5015_v32  ;;  %v3524_v55 = vsel %vm2866_vm1, %v9018_v61, %v3523_v60  ;;  %v3859_v13 = vor.u32 %v3858_v22, %v3855_v35  ;;  %v2901_v4 = vshrl.u32 %v9028_v18, 16  ;;  %v2904_v33 = vshll.u32 %v9028_v18, 16  ;;  %v2699_v16 = vld [vmem:[#allocation2 + $0x1c] sm:$0x1] }
 0x2e3   : > { %v3861_v36 = vshrl.u32 %v3524_v55, 16  ;;  %v3864_v27 = vshll.u32 %v3524_v55, 16  ;;  %v2867_v5 = vrot.slane %v8656_v15, 5  ;;  %v3850_v29 = vor.u32 %v3849_v46, %v3846_v52 }
 0x2e4   : > { %v7217_v17 = vor.u32 %v9023_v30, %v7216_v53  ;;  %v2895_v61 = vrot.slane %v2893_v48, 3  ;;  %v5053_v50 = vrot.slane %v5051_v2, 3  ;;  %v2781_v37 = vrot.slane %v2779_v1, 4 }
 0x2e5   : > { %v3863_v8 = vrot.slane %v3861_v36, 3  ;;  %v3866_v58 = vrot.slane %v3864_v27, 4  ;;  %v2784_v51 = vrot.slane %v2782_v20, 5  ;;  %v5056_v12 = vrot.slane %v5054_v26, 4 }
 0x2e6   : > { %v5043_v43 = vshrl.u32 %v7217_v17, 16  ;;  %v5046_v44 = vshll.u32 %v7217_v17, 16  ;;  %v2898_v47 = vrot.slane %v2896_v57, 4  ;;  %v2903_v39 = vrot.slane %v2901_v4, 3 }
 0x2e7   : > { %v9046_v23 = vpop.f32.mrf.mxu1  ;;  %v3867_v63 = vor.u32 %v3866_v58, %v3863_v8  ;;  %v2906_v41 = vrot.slane %v2904_v33, 4  ;;  %v2869_v15 = vsel %vm2866_vm1, %v2867_v5, %v2868_v6  ;;  %v2919_v25 = vshrl.u32 %v2867_v5, 16 }
 0x2e8   : > { %v5045_v48 = vrot.slane %v5043_v43, 3  ;;  %v5048_v38 = vrot.slane %v5046_v44, 4  ;;  %v2785_v24 = vor.u32 %v2784_v51, %v2781_v37  ;;  %v5057_v6 = vor.u32 %v5056_v12, %v5053_v50 }
 0x2e9   : > { %v3868_v30 = vsel %vm2891_vm4, %v3859_v13, %v3867_v63  ;;  %v2735_v57 = vunpack.c.h.b16 %v2678_v56  ;;  %v2922_v60 = vshll.u32 %v2867_v5, 16  ;;  %v2927_v22 = vshrl.u32 %v2869_v15, 16 }
 0x2ea   : > { %4178 = vmatmul.bf16.gmra.mxu2 %v3850_v29  ;;  %v5049_v19 = vor.u32 %v5048_v38, %v5045_v48  ;;  %v2930_v49 = vshll.u32 %v2869_v15, 16  ;;  %v2899_v59 = vor.u32 %v2898_v47, %v2895_v61  ;;  %v2851_v40 = vunpack.c.l.b16 %v2699_v16  ;;  %v2681_v15 = vld [vmem:[#allocation2 + $0x24] sm:$0xff]  }
 0x2eb   : > { %4227 = vmatmul.bf16.gmra.mxu3 %v3868_v30  ;;  %v2921_v32 = vrot.slane %v2919_v25, 3  ;;  %v2910_v20 = vshrl.u32 %v2785_v24, 16  ;;  %v2913_v55 = vshll.u32 %v2785_v24, 16  ;;  %v2924_v52 = vrot.slane %v2922_v60, 4  ;;  %v6859_v25 = vld [vmem:[#allocation3 + $0x228] sm:$0xff] }
 0x2ec   : > { %v4144_v18 = vpop.f32.mrf.mxu2  ;;  %v5058_v1 = vsel %vm2891_vm4, %v5049_v19, %v5057_v6  ;;  %v2929_v46 = vrot.slane %v2927_v22, 3  ;;  %v2932_v53 = vrot.slane %v2930_v49, 4  ;;  %v7221_v2 = vor.u32 %v7385_v11, %v7220_v42  ;;  %v7224_v42 = vld [vmem:[#allocation2 + $0x20] sm:$0x8]  ;;  %v6851_v24 = vld [vmem:[#allocation3 + $0x1e8] sm:$0xff]  ;;  %5402 = vmatpush.bf16.msra.mxu2 %v6859_v25 }
 0x2ed   : > { %v9061_v31 = vadd.f32 %v4144_v18, %v9033_v28  ;;  %v2907_v28 = vor.u32 %v2906_v41, %v2903_v39  ;;  %v2757_v27 = vpack.c.b16 %v2735_v57, %v2735_v57  ;;  %v2859_v26 = vpack.c.b16 %v2851_v40, %v2851_v40  ;;  %v7386_v18 = vld [vmem:[#allocation2 + $0x20] sm:$0xf0]   ;;  %5353 = vmatpush.bf16.msra.mxu1 %v6851_v24 }
 0x2ee   : > { %v2912_v13 = vrot.slane %v2910_v20, 3  ;;  %v2915_v4 = vrot.slane %v2913_v55, 4  ;;  %v2787_v5 = vshrl.u32 %v2678_v56, 16  ;;  %v2790_v8 = vshll.u32 %v2678_v56, 16  ;;  %v6858_v25 = vld [vmem:[#allocation3 + $0x220] sm:$0xff] }
 0x2ef   : > { %v9063_v35 = vpop.f32.mrf.mxu1  ;;  %v2908_v36 = vsel %vm2891_vm4, %v2899_v59, %v2907_v28  ;;  %v2925_v58 = vor.u32 %v2924_v52, %v2921_v32  ;;  %v2933_v29 = vor.u32 %v2932_v53, %v2929_v46  ;;  %v2936_v17 = vshrl.u32 %v7221_v2, 16  ;;  %v6850_v24 = vld [vmem:[#allocation3 + $0x1e0] sm:$0xff] }
 0x2f0   : > { %v2939_v61 = vshll.u32 %v7221_v2, 16  ;;  %v2944_v50 = vshrl.u32 %v2757_v27, 16  ;;  %v2947_v37 = vshll.u32 %v2757_v27, 16  ;;  %v2870_v51 = vrot.slane %v2678_v56, 5  ;;  %v2700_v56 = vld [vmem:[#allocation2 + $0x2c] sm:$0x1]  ;;  %5403 = vmatpush.bf16.msra.mxu2 %v6858_v25 }
 0x2f1   : > { %4385 = vmatmul.bf16.vlgmr.msrb.gmra.mxu1 %v2908_v36  ;;  %v2871_v63 = vrot.slane %v2859_v26, 5  ;;  %v2916_v44 = vor.u32 %v2915_v4, %v2912_v13  ;;  %v2789_v12 = vrot.slane %v2787_v5, 4  ;;  %v2792_v47 = vrot.slane %v2790_v8, 5  ;;  %v7232_v25 = vld [vmem:[#allocation2 + $0x40] sm:$0x8] }
 0x2f2   : > { %5345 = vmatmul.bf16.gmra.mxu0 %v5058_v1  ;;  %v2934_v39 = vsel %vm2891_vm4, %v2925_v58, %v2933_v29  ;;  %v2938_v41 = vrot.slane %v2936_v17, 3  ;;  %v2941_v11 = vrot.slane %v2939_v61, 4  ;;  %v2946_v30 = vrot.slane %v2944_v50, 3  ;;  %5354 = vmatpush.bf16.msra.mxu1 %v6850_v24 }
 0x2f3   : > { %v2949_v48 = vrot.slane %v2947_v37, 4  ;;  %v2872_v38 = vsel %vm2866_vm1, %v2870_v51, %v2871_v63  ;;  %v2962_v16 = vshrl.u32 %v2870_v51, 16  ;;  %v2793_v21 = vor.u32 %v2792_v47, %v2789_v12  ;;  %v2684_v47 = vld [vmem:[#allocation2 + $0x34] sm:$0xff]  }
 0x2f4   : > { %v9067_v33 = vpop.f32.mrf.mxu2  ;;  %v2738_v0 = vunpack.c.h.b16 %v2681_v15  ;;  %v2965_v19 = vshll.u32 %v2870_v51, 16  ;;  %v2970_v6 = vshrl.u32 %v2872_v38, 16  ;;  %v2973_v57 = vshll.u32 %v2872_v38, 16 }
 0x2f5   : > { %v2942_v60 = vor.u32 %v2941_v11, %v2938_v41  ;;  %v2950_v22 = vor.u32 %v2949_v48, %v2946_v30  ;;  %v2852_v59 = vunpack.c.l.b16 %v2700_v56  ;;  %v2964_v40 = vrot.slane %v2962_v16, 3  ;;  %v7228_v56 = vld [vmem:[#allocation2 + $0x30] sm:$0x8] }
 0x2f6   : > { %v2953_v32 = vshrl.u32 %v2793_v21, 16  ;;  %v2956_v1 = vshll.u32 %v2793_v21, 16  ;;  %v2967_v55 = vrot.slane %v2965_v19, 4  ;;  %v2972_v52 = vrot.slane %v2970_v6, 3  ;;  %v2701_v21 = vld [vmem:[#allocation2 + $0x3c] sm:$0x1] }
 0x2f7   : > { %v9069_v43 = vpop.f32.mrf.mxu1  ;;  %v2975_v46 = vrot.slane %v2973_v57, 4  ;;  %v7225_v53 = vor.u32 %v7386_v18, %v7224_v42  ;;  %v2951_v2 = vsel %vm2891_vm4, %v2942_v60, %v2950_v22  ;;  %v2759_v36 = vpack.c.b16 %v2738_v0, %v2738_v0 }
 0x2f8   : > { %v2860_v27 = vpack.c.b16 %v2852_v59, %v2852_v59  ;;  %v2955_v26 = vrot.slane %v2953_v32, 3  ;;  %v2958_v13 = vrot.slane %v2956_v1, 4  ;;  %v2795_v4 = vshrl.u32 %v2681_v15, 16 }
 0x2f9   : > { %v2798_v5 = vshll.u32 %v2681_v15, 16  ;;  %v2968_v8 = vor.u32 %v2967_v55, %v2964_v40  ;;  %v2979_v58 = vshrl.u32 %v7225_v53, 16  ;;  %v2982_v29 = vshll.u32 %v7225_v53, 16 }
 0x2fa   : > { %4434 = vmatmul.bf16.vlgmr.msrb.gmra.mxu2 %v2916_v44  ;;  %v2987_v61 = vshrl.u32 %v2759_v36, 16  ;;  %v2990_v50 = vshll.u32 %v2759_v36, 16  ;;  %v2873_v37 = vrot.slane %v2681_v15, 5  ;;  %v2874_v51 = vrot.slane %v2860_v27, 5 }
 0x2fb   : > { %4483 = vmatmul.bf16.vlgmr.msra.gmra.mxu3 %v2934_v39  ;;  %v2959_v63 = vor.u32 %v2958_v13, %v2955_v26  ;;  %v2797_v44 = vrot.slane %v2795_v4, 4  ;;  %v2800_v12 = vrot.slane %v2798_v5, 5  ;;  %v7387_v39 = vld [vmem:[#allocation2 + $0x30] sm:$0xf0]   ;;  %v2981_v18 = vrot.slane %v2979_v58, 3 }
 0x2fc   : > { %v2984_v11 = vrot.slane %v2982_v29, 4  ;;  %v2989_v30 = vrot.slane %v2987_v61, 3  ;;  %v2992_v48 = vrot.slane %v2990_v50, 4  ;;  %v2875_v38 = vsel %vm2866_vm1, %v2873_v37, %v2874_v51 }
 0x2fd   : > { %v2741_v15 = vunpack.c.h.b16 %v2684_v47  ;;  %v2801_v16 = vor.u32 %v2800_v12, %v2797_v44  ;;  %v3005_v0 = vshrl.u32 %v2873_v37, 16  ;;  %v3008_v19 = vshll.u32 %v2873_v37, 16 }
 0x2fe   : > { %v3013_v6 = vshrl.u32 %v2875_v38, 16  ;;  %v3016_v57 = vshll.u32 %v2875_v38, 16  ;;  %v2985_v60 = vor.u32 %v2984_v11, %v2981_v18  ;;  %v2993_v22 = vor.u32 %v2992_v48, %v2989_v30  ;;  %v2687_v11 = vld [vmem:[#allocation2 + $0x44] sm:$0xff]  }
 0x2ff   : > { %v4105_v20 = vpop.f32.mrf.mxu1  ;;  %v2853_v59 = vunpack.c.l.b16 %v2701_v21  ;;  %v2996_v40 = vshrl.u32 %v2801_v16, 16  ;;  %v2999_v32 = vshll.u32 %v2801_v16, 16  ;;  %v3007_v55 = vrot.slane %v3005_v0, 3  ;;  %v7388_v30 = vld [vmem:[#allocation2 + $0x40] sm:$0xf0]   ;;  %v6857_v16 = vld [vmem:[#allocation3 + $0x218] sm:$0xff] }
 0x300   : > { %v4149_v49 = vpop.f32.mrf.mxu2  ;;  %v3018_v53 = vrot.slane %v3016_v57, 4  ;;  %v7229_v36 = vor.u32 %v7387_v39, %v7228_v56  ;;  %v2761_v27 = vpack.c.b16 %v2741_v15, %v2741_v15  ;;  %v2803_v13 = vshrl.u32 %v2684_v47, 16  ;;  %v6849_v21 = vld [vmem:[#allocation3 + $0x1d8] sm:$0xff]  ;;  %5404 = vmatpush.bf16.msra.mxu2 %v6857_v16 }
 0x301   : > { %v9074_v28 = vadd.f32 %v4149_v49, %v9063_v35  ;;  %4390 = vmatmul.bf16.gmra.mxu1 %v2951_v2  ;;  %v2976_v35 = vor.u32 %v2975_v46, %v2972_v52  ;;  %v3010_v52 = vrot.slane %v3008_v19, 4  ;;  %v3015_v46 = vrot.slane %v3013_v6, 3  ;;  %v2702_v19 = vld [vmem:[#allocation2 + $0x4c] sm:$0x1] }
 0x302   : > { %v2994_v2 = vsel %vm2891_vm4, %v2985_v60, %v2993_v22  ;;  %v2861_v26 = vpack.c.b16 %v2853_v59, %v2853_v59  ;;  %v2806_v4 = vshll.u32 %v2684_v47, 16  ;;  %v2998_v5 = vrot.slane %v2996_v40, 3  ;;  %5355 = vmatpush.bf16.msra.mxu1 %v6849_v21 }
 0x303   : > { %v2977_v41 = vsel %vm2891_vm4, %v2968_v8, %v2976_v35  ;;  %v3001_v8 = vrot.slane %v2999_v32, 4  ;;  %v3011_v58 = vor.u32 %v3010_v52, %v3007_v55  ;;  %v3019_v29 = vor.u32 %v3018_v53, %v3015_v46 }
 0x304   : > { %v3022_v61 = vshrl.u32 %v7229_v36, 16  ;;  %v3030_v50 = vshrl.u32 %v2761_v27, 16  ;;  %v3033_v37 = vshll.u32 %v2761_v27, 16  ;;  %v2876_v51 = vrot.slane %v2684_v47, 5 }
 0x305   : > { %v2805_v44 = vrot.slane %v2803_v13, 4  ;;  %v2808_v12 = vrot.slane %v2806_v4, 5  ;;  %v3020_v39 = vsel %vm2891_vm4, %v3011_v58, %v3019_v29  ;;  %v2744_v0 = vunpack.c.h.b16 %v2687_v11 }
 0x306   : > { %v3024_v48 = vrot.slane %v3022_v61, 3  ;;  %v3032_v56 = vrot.slane %v3030_v50, 3  ;;  %v3035_v15 = vrot.slane %v3033_v37, 4  ;;  %v3048_v6 = vshrl.u32 %v2876_v51, 16  ;;  %v9093_v50 = vpop.f32.mrf.mxu3 }
 0x307   : > { %v9081_v42 = vpop.f32.mrf.mxu1  ;;  %v2809_v47 = vor.u32 %v2808_v12, %v2805_v44  ;;  %v3051_v57 = vshll.u32 %v2876_v51, 16  ;;  %v2854_v55 = vunpack.c.l.b16 %v2702_v19  ;;  %v2763_v13 = vpack.c.b16 %v2744_v0, %v2744_v0  ;;  %v7236_v19 = vld [vmem:[#allocation2 + $0x50] sm:$0x8] }
 0x308   : > { %v9077_v17 = vpop.f32.mrf.mxu2  ;;  %v3036_v22 = vor.u32 %v3035_v15, %v3032_v56  ;;  %v3050_v46 = vrot.slane %v3048_v6, 3  ;;  %v2811_v61 = vshrl.u32 %v2687_v11, 16  ;;  %vm5489_vm6 = vsmask.f32 3328 }
 0x309   : > { %v3039_v32 = vshrl.u32 %v2809_v47, 16  ;;  %v3042_v52 = vshll.u32 %v2809_v47, 16  ;;  %v3053_v53 = vrot.slane %v3051_v57, 4  ;;  %v3073_v12 = vshrl.u32 %v2763_v13, 16 }
 0x30a   : > { %4439 = vmatmul.bf16.gmra.mxu2 %v2959_v63  ;;  %v2877_v63 = vrot.slane %v2861_v26, 5  ;;  %v2813_v56 = vrot.slane %v2811_v61, 4 }
 0x30b   : > { %4488 = vmatmul.bf16.gmra.mxu3 %v2977_v41  ;;  %v3002_v41 = vor.u32 %v3001_v8, %v2998_v5  ;;  %v3041_v4 = vrot.slane %v3039_v32, 3  ;;  %v2862_v8 = vpack.c.b16 %v2854_v55, %v2854_v55  ;;  %v3044_v58 = vrot.slane %v3042_v52, 4  ;;  %v6848_v52 = vld [vmem:[#allocation3 + $0x1d0] sm:$0xff] }
 0x30c   : > { %v2878_v24 = vsel %vm2866_vm1, %v2876_v51, %v2877_v63  ;;  %v3054_v37 = vor.u32 %v3053_v53, %v3050_v46  ;;  %v3075_v21 = vrot.slane %v3073_v12, 3  ;;  %5356 = vmatpush.bf16.msra.mxu1 %v6848_v52 }
 0x30d   : > { %v3059_v59 = vshll.u32 %v2878_v24, 16 }
 0x30f   : > { %v3061_v26 = vrot.slane %v3059_v59, 4  ;;  %v2703_v59 = vld [vmem:[#allocation2 + $0x5c] sm:$0x1] }
 0x311   : > { %4395 = vmatmul.bf16.gmra.mxu1 %v2994_v2  ;;  %v7233_v2 = vor.u32 %v7388_v30, %v7232_v25  ;;  %v2880_v30 = vrot.slane %v2862_v8, 5 }
 0x312   : > { %v4154_v49 = vpop.f32.mrf.mxu2 }
 0x313   : > { %v9083_v1 = vadd.f32 %v4154_v49, %v4105_v20  ;;  %v3025_v20 = vshll.u32 %v7229_v36, 16  ;;  %v3056_v49 = vshrl.u32 %v2878_v24, 16  ;;  %v3065_v51 = vshrl.u32 %v7233_v2, 16  ;;  %v2690_v24 = vld [vmem:[#allocation2 + $0x54] sm:$0xff]  }
 0x314   : > { %v3068_v44 = vshll.u32 %v7233_v2, 16 }
 0x315   : > { %v4110_v35 = vpop.f32.mrf.mxu1  ;;  %v3027_v38 = vrot.slane %v3025_v20, 4  ;;  %v3058_v27 = vrot.slane %v3056_v49, 3  ;;  %v2814_v20 = vshll.u32 %v2687_v11, 16  ;;  %v3067_v25 = vrot.slane %v3065_v51, 3 }
 0x316   : > { %v3070_v16 = vrot.slane %v3068_v44, 4  ;;  %v2747_v49 = vunpack.c.h.b16 %v2690_v24 }
 0x317   : > { %v3028_v60 = vor.u32 %v3027_v38, %v3024_v48  ;;  %v3062_v63 = vor.u32 %v3061_v26, %v3058_v27  ;;  %v3045_v48 = vor.u32 %v3044_v58, %v3041_v4  ;;  %v2816_v15 = vrot.slane %v2814_v20, 5  ;;  %v9099_v27 = vpop.f32.mrf.mxu3 }
 0x318   : > { %v3071_v46 = vor.u32 %v3070_v16, %v3067_v25  ;;  %v2855_v26 = vunpack.c.l.b16 %v2703_v59  ;;  %v2765_v51 = vpack.c.b16 %v2747_v49, %v2747_v49  ;;  %v2693_v59 = vld [vmem:[#allocation2 + $0x64] sm:$0xff]  }
 0x319   : > { %v3037_v36 = vsel %vm2891_vm4, %v3028_v60, %v3036_v22  ;;  %v3063_v47 = vsel %vm2891_vm4, %v3054_v37, %v3062_v63  ;;  %v2817_v22 = vor.u32 %v2816_v15, %v2813_v56 }
 0x31a   : > { %v9087_v18 = vpop.f32.mrf.mxu2  ;;  %4444 = vmatmul.bf16.gmra.mxu2 %v3002_v41  ;;  %v3076_v41 = vshll.u32 %v2763_v13, 16  ;;  %v2863_v63 = vpack.c.b16 %v2855_v26, %v2855_v26  ;;  %v3119_v16 = vshll.u32 %v2765_v51, 16  ;;  %v2750_v26 = vunpack.c.h.b16 %v2693_v59 }
 0x31b   : > { %4493 = vmatmul.bf16.gmra.mxu3 %v3020_v39  ;;  %v2879_v39 = vrot.slane %v2687_v11, 5  ;;  %v6856_v11 = vld [vmem:[#allocation3 + $0x210] sm:$0xff]  ;;  %v3082_v13 = vshrl.u32 %v2817_v22, 16  ;;  %v3085_v4 = vshll.u32 %v2817_v22, 16 }
 0x31c   : > { %v3078_v0 = vrot.slane %v3076_v41, 4  ;;  %5405 = vmatpush.bf16.msra.mxu2 %v6856_v11  ;;  %v2819_v41 = vshrl.u32 %v2690_v24, 16 }
 0x31d   : > { %v4112_v40 = vpop.f32.mrf.mxu1  ;;  %v2881_v57 = vsel %vm2866_vm1, %v2879_v39, %v2880_v30  ;;  %v3091_v32 = vshrl.u32 %v2879_v39, 16  ;;  %v3094_v55 = vshll.u32 %v2879_v39, 16  ;;  %v3084_v44 = vrot.slane %v3082_v13, 3  ;;  %v2704_v13 = vld [vmem:[#allocation2 + $0x6c] sm:$0x1] }
 0x31e   : > { %v3079_v53 = vor.u32 %v3078_v0, %v3075_v21  ;;  %v3099_v2 = vshrl.u32 %v2881_v57, 16  ;;  %v3087_v12 = vrot.slane %v3085_v4, 4  ;;  %v2822_v39 = vshll.u32 %v2690_v24, 16 }
 0x31f   : > { %v2882_v21 = vrot.slane %v2690_v24, 5  ;;  %v2883_v0 = vrot.slane %v2863_v63, 5  ;;  %v9104_v11 = vpop.f32.mrf.mxu3  ;;  %v6855_v24 = vld [vmem:[#allocation3 + $0x208] sm:$0xff] }
 0x320   : > { %v3080_v58 = vsel %vm2891_vm4, %v3071_v46, %v3079_v53  ;;  %v3101_v61 = vrot.slane %v3099_v2, 3  ;;  %v3121_v46 = vrot.slane %v3119_v16, 4  ;;  %5406 = vmatpush.bf16.msra.mxu2 %v6855_v24  ;;  %v6847_v63 = vld [vmem:[#allocation3 + $0x1c8] sm:$0xff]  ;;  %v2885_v24 = vrot.slane %v2693_v59, 5 }
 0x321   : > { %4400 = vmatmul.bf16.gmra.mxu1 %v3037_v36  ;;  %v3102_v36 = vshll.u32 %v2881_v57, 16  ;;  %v2824_v57 = vrot.slane %v2822_v39, 5  ;;  %v2884_v53 = vsel %vm2866_vm1, %v2882_v21, %v2883_v0  ;;  %v4199_v3 = vadd.f32 %v9104_v11, %v9074_v28 }
 0x322   : > { %5357 = vmatpush.bf16.msra.mxu1 %v6847_v63  ;;  %v4723_v28 = vrot.slane %v8823_v62, 5 }
 0x323   : > { %v3104_v20 = vrot.slane %v3102_v36, 4 }
 0x325   : > { %v3105_v25 = vor.u32 %v3104_v20, %v3101_v61  ;;  %v3142_v20 = vshrl.u32 %v2884_v53, 16 }
 0x326   : > { %v4159_v5 = vpop.f32.mrf.mxu2 }
 0x327   : > { %v9091_v29 = vadd.f32 %v4159_v5, %v4110_v35  ;;  %v4115_v38 = vpop.f32.mrf.mxu1  ;;  %v7389_v35 = vld [vmem:[#allocation2 + $0x50] sm:$0xf0]   ;;  %v3093_v5 = vrot.slane %v3091_v32, 3  ;;  %v7390_v32 = vld [vmem:[#allocation2 + $0x60] sm:$0xf0]   ;;  %v9111_v16 = vpop.f32.mrf.mxu3 }
 0x328   : > { %v7237_v8 = vor.u32 %v7389_v35, %v7236_v19  ;;  %v3116_v35 = vshrl.u32 %v2765_v51, 16  ;;  %v3088_v19 = vor.u32 %v3087_v12, %v3084_v44  ;;  %v3145_v51 = vshll.u32 %v2884_v53, 16 }
 0x329   : > { %v2856_v44 = vunpack.c.l.b16 %v2704_v13 }
 0x32a   : > { %4449 = vmatmul.bf16.gmra.mxu2 %v3045_v48  ;;  %v3108_v56 = vshrl.u32 %v7237_v8, 16  ;;  %v3111_v15 = vshll.u32 %v7237_v8, 16  ;;  %v3118_v52 = vrot.slane %v3116_v35, 3  ;;  %v3137_v8 = vshll.u32 %v2882_v21, 16 }
 0x32b   : > { %4498 = vmatmul.bf16.gmra.mxu3 %v3063_v47  ;;  %v2767_v35 = vpack.c.b16 %v2750_v26, %v2750_v26 }
 0x32c   : > { %v3110_v22 = vrot.slane %v3108_v56, 3  ;;  %v3113_v49 = vrot.slane %v3111_v15, 4  ;;  %v3122_v61 = vor.u32 %v3121_v46, %v3118_v52  ;;  %v3144_v15 = vrot.slane %v3142_v20, 3 }
 0x32e   : > { %v4161_v6 = vpop.f32.mrf.mxu2 }
 0x32f   : > { %v9097_v60 = vadd.f32 %v4161_v6, %v4112_v40  ;;  %v3096_v40 = vrot.slane %v3094_v55, 4  ;;  %v4117_v37 = vpop.f32.mrf.mxu1  ;;  %v2821_v6 = vrot.slane %v2819_v41, 4 }
 0x331   : > { %4405 = vmatmul.bf16.gmra.mxu1 %v3080_v58  ;;  %v3097_v30 = vor.u32 %v3096_v40, %v3093_v5  ;;  %v2825_v36 = vor.u32 %v2824_v57, %v2821_v6  ;;  %v3114_v5 = vor.u32 %v3113_v49, %v3110_v22  ;;  %v3134_v40 = vshrl.u32 %v2882_v21, 16 }
 0x332   : > { %v2827_v6 = vshrl.u32 %v2693_v59, 16  ;;  %v2830_v57 = vshll.u32 %v2693_v59, 16 }
 0x333   : > { %v3106_v55 = vsel %vm2891_vm4, %v3097_v30, %v3105_v25  ;;  %v3125_v12 = vshrl.u32 %v2825_v36, 16  ;;  %v3128_v41 = vshll.u32 %v2825_v36, 16  ;;  %v3136_v39 = vrot.slane %v3134_v40, 3  ;;  %v2696_v40 = vld [vmem:[#allocation2 + $0x74] sm:$0xff]  }
 0x334   : > { %v3139_v30 = vrot.slane %v3137_v8, 4  ;;  %v3123_v56 = vsel %vm2891_vm4, %v3114_v5, %v3122_v61  ;;  %v3147_v25 = vrot.slane %v3145_v51, 4  ;;  %v2829_v13 = vrot.slane %v2827_v6, 4  ;;  %v7391_v8 = vld [vmem:[#allocation2 + $0x70] sm:$0xf0]  }
 0x335   : > { %v3127_v0 = vrot.slane %v3125_v12, 3  ;;  %v2753_v59 = vunpack.c.h.b16 %v2696_v40 }
 0x336   : > { %v3140_v22 = vor.u32 %v3139_v30, %v3136_v39  ;;  %v2705_v39 = vld [vmem:[#allocation2 + $0x7c] sm:$0x1]  ;;  %v9117_v30 = vpop.f32.mrf.mxu3 }
 0x338   : > { %v4164_v48 = vpop.f32.mrf.mxu2 }
 0x339   : > { %v9102_v47 = vadd.f32 %v4164_v48, %v4115_v38  ;;  %v7240_v38 = vld [vmem:[#allocation2 + $0x60] sm:$0x8] }
 0x33a   : > { %4454 = vmatmul.bf16.gmra.mxu2 %v3088_v19  ;;  %v7241_v48 = vor.u32 %v7390_v32, %v7240_v38  ;;  %v3130_v19 = vrot.slane %v3128_v41, 4  ;;  %v3159_v32 = vshrl.u32 %v2767_v35, 16  ;;  %v3162_v38 = vshll.u32 %v2767_v35, 16 }
 0x33b   : > { %4503 = vmatmul.bf16.gmra.mxu3 %v3106_v55  ;;  %v3148_v55 = vor.u32 %v3147_v25, %v3144_v15 }
 0x33c   : > { %v4120_v2 = vpop.f32.mrf.mxu1  ;;  %v3151_v49 = vshrl.u32 %v7241_v48, 16  ;;  %v3154_v46 = vshll.u32 %v7241_v48, 16  ;;  %v3131_v26 = vor.u32 %v3130_v19, %v3127_v0  ;;  %v3161_v51 = vrot.slane %v3159_v32, 3  ;;  %v6846_v19 = vld [vmem:[#allocation3 + $0x1c0] sm:$0xff] }
 0x33d   : > { %v3149_v61 = vsel %vm2891_vm4, %v3140_v22, %v3148_v55  ;;  %v3164_v63 = vrot.slane %v3162_v38, 4  ;;  %v3177_v48 = vshrl.u32 %v2885_v24, 16  ;;  %5358 = vmatpush.bf16.msra.mxu1 %v6846_v19 }
 0x33e   : > { %v3153_v5 = vrot.slane %v3151_v49, 3  ;;  %v3156_v20 = vrot.slane %v3154_v46, 4 }
 0x33f   : > { %v3165_v35 = vor.u32 %v3164_v63, %v3161_v51 }
 0x340   : > { %v4166_v4 = vpop.f32.mrf.mxu2  ;;  %v3157_v25 = vor.u32 %v3156_v20, %v3153_v5  ;;  %v2838_v20 = vshll.u32 %v2696_v40, 16 }
 0x341   : > { %v9108_v58 = vadd.f32 %v4166_v4, %v4117_v37  ;;  %4410 = vmatmul.bf16.gmra.mxu1 %v3123_v56  ;;  %v2864_v37 = vpack.c.b16 %v2856_v44, %v2856_v44  ;;  %v2832_v4 = vrot.slane %v2830_v57, 5  ;;  %v7244_v44 = vld [vmem:[#allocation2 + $0x70] sm:$0x8]  ;;  %v3180_v56 = vshll.u32 %v2885_v24, 16 }
 0x342   : > { %v2857_v57 = vunpack.c.l.b16 %v2705_v39  ;;  %v7245_v32 = vor.u32 %v7391_v8, %v7244_v44  ;;  %v3166_v38 = vsel %vm2891_vm4, %v3157_v25, %v3165_v35  ;;  %v2888_v8 = vrot.slane %v2696_v40, 5 }
 0x343   : > { %v2886_v36 = vrot.slane %v2864_v37, 5  ;;  %v2833_v41 = vor.u32 %v2832_v4, %v2829_v13  ;;  %v3182_v46 = vrot.slane %v3180_v56, 4 }
 0x344   : > { %v4122_v21 = vpop.f32.mrf.mxu1  ;;  %v2865_v13 = vpack.c.b16 %v2857_v57, %v2857_v57  ;;  %v3194_v51 = vshrl.u32 %v7245_v32, 16  ;;  %v4549_v57 = vld [vmem:[#allocation2 + $0x2c] sm:$0x1] }
 0x345   : > { %v2887_v12 = vsel %vm2866_vm1, %v2885_v24, %v2886_v36  ;;  %v3168_v49 = vshrl.u32 %v2833_v41, 16  ;;  %v3171_v55 = vshll.u32 %v2833_v41, 16 }
 0x346   : > { %v3185_v37 = vshrl.u32 %v2887_v12, 16  ;;  %v3188_v0 = vshll.u32 %v2887_v12, 16  ;;  %v2889_v44 = vrot.slane %v2865_v13, 5  ;;  %v3196_v35 = vrot.slane %v3194_v51, 3 }
 0x347   : > { %v3170_v4 = vrot.slane %v3168_v49, 3  ;;  %v3173_v5 = vrot.slane %v3171_v55, 4 }
 0x348   : > { %v4169_v52 = vpop.f32.mrf.mxu2  ;;  %v3187_v24 = vrot.slane %v3185_v37, 3  ;;  %v3190_v36 = vrot.slane %v3188_v0, 4  ;;  %v2890_v49 = vsel %vm2866_vm1, %v2888_v8, %v2889_v44 }
 0x349   : > { %v9113_v53 = vadd.f32 %v4169_v52, %v4120_v2  ;;  %v6854_v2 = vld [vmem:[#allocation3 + $0x200] sm:$0xff]  ;;  %v3179_v52 = vrot.slane %v3177_v48, 3  ;;  %v9122_v48 = vpop.f32.mrf.mxu3  ;;  %v3174_v56 = vor.u32 %v3173_v5, %v3170_v4  ;;  %v3228_v4 = vshrl.u32 %v2890_v49, 16 }
 0x34a   : > { %4459 = vmatmul.bf16.gmra.mxu2 %v3131_v26  ;;  %v2769_v26 = vpack.c.b16 %v2753_v59, %v2753_v59  ;;  %v3191_v12 = vor.u32 %v3190_v36, %v3187_v24  ;;  %v2840_v59 = vrot.slane %v2838_v20, 5  ;;  %v3223_v24 = vshll.u32 %v2888_v8, 16 }
 0x34b   : > { %4508 = vmatmul.bf16.gmra.mxu3 %v3149_v61  ;;  %5407 = vmatpush.bf16.msra.mxu2 %v6854_v2  ;;  %v2835_v61 = vshrl.u32 %v2696_v40, 16  ;;  %v3183_v63 = vor.u32 %v3182_v46, %v3179_v52  ;;  %v4630_v52 = vshrl.u32 %v8735_v45, 16  ;;  %v4633_v40 = vshll.u32 %v8735_v45, 16 }
 0x34c   : > { %v3202_v41 = vshrl.u32 %v2769_v26, 16  ;;  %v3205_v39 = vshll.u32 %v2769_v26, 16  ;;  %v4701_v36 = vunpack.c.l.b16 %v4549_v57  ;;  %v3231_v5 = vshll.u32 %v2890_v49, 16 }
 0x34d   : > { %v2837_v25 = vrot.slane %v2835_v61, 4  ;;  %v3192_v0 = vsel %vm2891_vm4, %v3183_v63, %v3191_v12  ;;  %v4635_v63 = vrot.slane %v4633_v40, 5  ;;  %v4717_v57 = vrot.slane %v8735_v45, 5 }
 0x34e   : > { %v4125_v15 = vpop.f32.mrf.mxu1  ;;  %v3204_v19 = vrot.slane %v3202_v41, 3  ;;  %v4638_v45 = vshrl.u32 %v8775_v14, 16 }
 0x34f   : > { %v2841_v55 = vor.u32 %v2840_v59, %v2837_v25  ;;  %v3233_v25 = vrot.slane %v3231_v5, 4  ;;  %v4771_v5 = vshll.u32 %v4717_v57, 16 }
 0x350   : > { %v4171_v6 = vpop.f32.mrf.mxu2 }
 0x351   : > { %v9119_v22 = vadd.f32 %v4171_v6, %v4122_v21  ;;  %4415 = vmatmul.bf16.gmra.mxu1 %v3166_v38  ;;  %v3197_v21 = vshll.u32 %v7245_v32, 16  ;;  %v3207_v6 = vrot.slane %v3205_v39, 4  ;;  %v3220_v38 = vshrl.u32 %v2888_v8, 16  ;;  %v9130_v12 = vpop.f32.mrf.mxu3 }
 0x352   : > { %v3211_v20 = vshrl.u32 %v2841_v55, 16  ;;  %v3214_v51 = vshll.u32 %v2841_v55, 16  ;;  %v3225_v39 = vrot.slane %v3223_v24, 4  ;;  %v4709_v8 = vpack.c.b16 %v4701_v36, %v4701_v36 }
 0x353   : > { %v3199_v37 = vrot.slane %v3197_v21, 4  ;;  %v3208_v13 = vor.u32 %v3207_v6, %v3204_v19  ;;  %v4632_v21 = vrot.slane %v4630_v52, 4  ;;  %v3222_v41 = vrot.slane %v3220_v38, 3 }
 0x354   : > { %v3216_v59 = vrot.slane %v3214_v51, 4  ;;  %v4718_v49 = vrot.slane %v4709_v8, 5  ;;  %v4768_v36 = vshrl.u32 %v4717_v57, 16 }
 0x355   : > { %v3200_v32 = vor.u32 %v3199_v37, %v3196_v35  ;;  %v4636_v35 = vor.u32 %v4635_v63, %v4632_v21  ;;  %v4641_v63 = vshll.u32 %v8775_v14, 16 }
 0x356   : > { %v4127_v2 = vpop.f32.mrf.mxu1  ;;  %v4719_v38 = vsel %vm2866_vm1, %v4717_v57, %v4718_v49  ;;  %v4770_v8 = vrot.slane %v4768_v36, 3 }
 0x357   : > { %v3209_v44 = vsel %vm2891_vm4, %v3200_v32, %v3208_v13  ;;  %v4759_v40 = vshrl.u32 %v4636_v35, 16  ;;  %v4550_v13 = vld [vmem:[#allocation2 + $0x3c] sm:$0x1]  ;;  %v4776_v51 = vshrl.u32 %v4719_v38, 16  ;;  %v4779_v21 = vshll.u32 %v4719_v38, 16 }
 0x359   : > { %v9138_v24 = vpop.f32.mrf.mxu3 }
 0x35a   : > { %4464 = vmatmul.bf16.gmra.mxu2 %v3174_v56  ;;  %v3230_v56 = vrot.slane %v3228_v4, 3 }
 0x35b   : > { %4513 = vmatmul.bf16.gmra.mxu3 %v3192_v0  ;;  %v3226_v0 = vor.u32 %v3225_v39, %v3222_v41  ;;  %v4702_v39 = vunpack.c.l.b16 %v4550_v13 }
 0x35c   : > { %v3234_v6 = vor.u32 %v3233_v25, %v3230_v56 }
 0x35d   : > { %v4174_v46 = vpop.f32.mrf.mxu2  ;;  %v4710_v57 = vpack.c.b16 %v4702_v39, %v4702_v39 }
 0x35e   : > { %v9128_v26 = vadd.f32 %v4174_v46, %v4125_v15  ;;  %v4130_v61 = vpop.f32.mrf.mxu1  ;;  %v3213_v15 = vrot.slane %v3211_v20, 3  ;;  %v4762_v46 = vshll.u32 %v4636_v35, 16  ;;  %v3235_v32 = vsel %vm2891_vm4, %v3226_v0, %v3234_v6 }
 0x35f   : > { %v4781_v0 = vrot.slane %v4779_v21, 4  ;;  %v4643_v6 = vrot.slane %v4641_v63, 5 }
 0x360   : > { %v3217_v52 = vor.u32 %v3216_v59, %v3213_v15  ;;  %v4764_v4 = vrot.slane %v4762_v46, 4  ;;  %v4773_v15 = vrot.slane %v4771_v5, 4  ;;  %v4640_v59 = vrot.slane %v4638_v45, 4  ;;  %v4551_v5 = vld [vmem:[#allocation2 + $0x4c] sm:$0x1] }
 0x361   : > { %4420 = vmatmul.bf16.gmra.mxu1 %v3209_v44  ;;  %v4194_v44 = vadd.f32 %v9093_v50, %v9061_v31  ;;  %v4721_v31 = vrot.slane %v4710_v57, 5 }
 0x365   : > { %v4176_v37 = vpop.f32.mrf.mxu2 }
 0x366   : > { %v9133_v19 = vadd.f32 %v4176_v37, %v4127_v2  ;;  %v4132_v55 = vpop.f32.mrf.mxu1  ;;  %v4761_v2 = vrot.slane %v4759_v40, 3  ;;  %v4778_v37 = vrot.slane %v4776_v51, 3 }
 0x368   : > { %v4765_v25 = vor.u32 %v4764_v4, %v4761_v2  ;;  %v4782_v40 = vor.u32 %v4781_v0, %v4778_v37  ;;  %v2671_v2 = vld [vmem:[#allocation2 + $0x9c] sm:$0x1] }
 0x369   : > { %v2672_v45 = vsel %vm8495_vm9, 0, %v2671_v2  ;;  %vm5490_vm9 = vsmask.f32 7440 }
 0x36a   : > { %4469 = vmatmul.bf16.gmra.mxu2 %v3217_v52  ;;  %v4774_v52 = vor.u32 %v4773_v15, %v4770_v8  ;;  %2673 = vst [vmem:[#allocation2 + $0x9c] sm:$0x1] %v2672_v45  ;;  %v4703_v15 = vunpack.c.l.b16 %v4551_v5 }
 0x36b   : > { %4518 = vmatmul.bf16.gmra.mxu3 %v3235_v32  ;;  %v4720_v32 = vrot.slane %v8775_v14, 5  ;;  %v4649_v14 = vshll.u32 %v8823_v62, 16 }
 0x36c   : > { %v4783_v38 = vsel %vm2891_vm4, %v4774_v52, %v4782_v40 }
 0x36d   : > { %v4179_v20 = vpop.f32.mrf.mxu2  ;;  %v4722_v4 = vsel %vm2866_vm1, %v4720_v32, %v4721_v31  ;;  %v4814_v51 = vshll.u32 %v4720_v32, 16  ;;  %v4651_v57 = vrot.slane %v4649_v14, 5  ;;  %v4711_v31 = vpack.c.b16 %v4703_v15, %v4703_v15 }
 0x36e   : > { %v9142_v41 = vadd.f32 %v4179_v20, %v4130_v61  ;;  %v4386_v56 = vpop.f32.mrf.mxu1  ;;  %v4644_v61 = vor.u32 %v4643_v6, %v4640_v59  ;;  %v4811_v20 = vshrl.u32 %v4720_v32, 16 }
 0x36f   : > { %v4387_v35 = vadd.f32 %v4386_v56, %v4194_v44  ;;  %v4819_v44 = vshrl.u32 %v4722_v4, 16  ;;  %v4822_v56 = vshll.u32 %v4722_v4, 16  ;;  %v4816_v0 = vrot.slane %v4814_v51, 4 }
 0x370   : > { %v4802_v36 = vshrl.u32 %v4644_v61, 16  ;;  %v4805_v13 = vshll.u32 %v4644_v61, 16  ;;  %v4813_v37 = vrot.slane %v4811_v20, 3  ;;  %v4724_v11 = vrot.slane %v4711_v31, 5  ;;  %v4552_v20 = vld [vmem:[#allocation2 + $0x5c] sm:$0x1] }
 0x371   : > { %5359 = vmatmul.bf16.vlgmr.msra.gmra.mxu1 %v4765_v25  ;;  %v4147_v25 = vadd.f32 %v9067_v33, %v9046_v23  ;;  %v4821_v40 = vrot.slane %v4819_v44, 3  ;;  %v4824_v61 = vrot.slane %v4822_v56, 4  ;;  %v4854_v51 = vshrl.u32 %v4723_v28, 16 }
 0x372   : > { %v4804_v63 = vrot.slane %v4802_v36, 3  ;;  %v4807_v39 = vrot.slane %v4805_v13, 4  ;;  %v4704_v56 = vunpack.c.l.b16 %v4552_v20 }
 0x373   : > { %v4196_v32 = vadd.f32 %v9099_v27, %v4147_v25  ;;  %v4825_v36 = vor.u32 %v4824_v61, %v4821_v40  ;;  %v4725_v27 = vsel %vm2866_vm1, %v4723_v28, %v4724_v11  ;;  %v4152_v25 = vadd.f32 %v9077_v17, %v9069_v43 }
 0x374   : > { %v4808_v52 = vor.u32 %v4807_v39, %v4804_v63  ;;  %v4657_v63 = vshll.u32 %v8877_v10, 16  ;;  %v4865_v44 = vshll.u32 %v4725_v27, 16  ;;  %v4157_v43 = vadd.f32 %v9087_v18, %v9081_v42 }
 0x375   : > { %v4181_v49 = vpop.f32.mrf.mxu2 }
 0x376   : > { %v9146_v46 = vadd.f32 %v4181_v49, %v4132_v55  ;;  %v4388_v50 = vpop.f32.mrf.mxu1  ;;  %v4646_v55 = vshrl.u32 %v8823_v62, 16  ;;  %v4862_v62 = vshrl.u32 %v4725_v27, 16  ;;  %v4659_v40 = vrot.slane %v4657_v63, 5 }
 0x377   : > { %v4389_v23 = vadd.f32 %v4388_v50, %v4196_v32  ;;  %v4857_v50 = vshll.u32 %v4723_v28, 16  ;;  %v4867_v31 = vrot.slane %v4865_v44, 4  ;;  %v4206_v11 = vadd.f32 %v9122_v48, %v4157_v43 }
 0x378   : > { %v4648_v6 = vrot.slane %v4646_v55, 4  ;;  %v4864_v32 = vrot.slane %v4862_v62, 3  ;;  %v4662_v48 = vshrl.u32 %v8915_v34, 16  ;;  %v4665_v63 = vshll.u32 %v8915_v34, 16 }
 0x379   : > { %v4209_v44 = vadd.f32 %v9130_v12, %v9091_v29 }
 0x37a   : > { %5408 = vmatmul.bf16.vlgmr.msra.gmra.mxu2 %v4783_v38  ;;  %v4652_v33 = vor.u32 %v4651_v57, %v4648_v6  ;;  %v4817_v38 = vor.u32 %v4816_v0, %v4813_v37  ;;  %v4856_v37 = vrot.slane %v4854_v51, 3  ;;  %v4859_v57 = vrot.slane %v4857_v50, 4 }
 0x37c   : > { %v4845_v4 = vshrl.u32 %v4652_v33, 16  ;;  %v4848_v5 = vshll.u32 %v4652_v33, 16  ;;  %v4826_v45 = vsel %vm2891_vm4, %v4817_v38, %v4825_v36  ;;  %v4201_v33 = vadd.f32 %v9111_v16, %v4152_v25 }
 0x37d   : > { %v4435_v21 = vpop.f32.mrf.mxu2  ;;  %v4726_v38 = vrot.slane %v8877_v10, 5 }
 0x37e   : > { %v9157_v8 = vadd.f32 %v4435_v21, %v4387_v35  ;;  %v4391_v59 = vpop.f32.mrf.mxu1  ;;  %v4847_v55 = vrot.slane %v4845_v4, 3  ;;  %v4850_v14 = vrot.slane %v4848_v5, 4  ;;  %v4654_v21 = vshrl.u32 %v8877_v10, 16 }
 0x37f   : > { %v4392_v49 = vadd.f32 %v4391_v59, %v4199_v3  ;;  %v9173_v3 = vpop.f32.mrf.mxu3  ;;  %v4204_v59 = vadd.f32 %v9117_v30, %v9083_v1  ;;  %v4860_v1 = vor.u32 %v4859_v57, %v4856_v37  ;;  %v4868_v30 = vor.u32 %v4867_v31, %v4864_v32 }
 0x380   : > { %v4851_v6 = vor.u32 %v4850_v14, %v4847_v55  ;;  %v4897_v20 = vshrl.u32 %v4726_v38, 16  ;;  %v4900_v51 = vshll.u32 %v4726_v38, 16 }
 0x381   : > { %5364 = vmatmul.bf16.gmra.mxu1 %v4808_v52  ;;  %v4656_v52 = vrot.slane %v4654_v21, 4  ;;  %v4869_v42 = vsel %vm2891_vm4, %v4860_v1, %v4868_v30 }
 0x382   : > { %v4902_v37 = vrot.slane %v4900_v51, 4 }
 0x385   : > { %v4437_v35 = vpop.f32.mrf.mxu2 }
 0x386   : > { %v9162_v13 = vadd.f32 %v4437_v35, %v4389_v23  ;;  %v4393_v2 = vpop.f32.mrf.mxu1  ;;  %v4712_v23 = vpack.c.b16 %v4704_v56, %v4704_v56  ;;  %v4899_v56 = vrot.slane %v4897_v20, 3 }
 0x387   : > { %v4394_v17 = vadd.f32 %v4393_v2, %v4201_v33  ;;  %v9184_v16 = vpop.f32.mrf.mxu3  ;;  %v4553_v2 = vld [vmem:[#allocation2 + $0x6c] sm:$0x1] }
 0x388   : > { %v4727_v36 = vrot.slane %v4712_v23, 5  ;;  %v4903_v23 = vor.u32 %v4902_v37, %v4899_v56 }
 0x38a   : > { %5413 = vmatmul.bf16.gmra.mxu2 %v4826_v45  ;;  %v4728_v18 = vsel %vm2866_vm1, %v4726_v38, %v4727_v36 }
 0x38b   : > { %v4905_v55 = vshrl.u32 %v4728_v18, 16  ;;  %v4908_v14 = vshll.u32 %v4728_v18, 16 }
 0x38d   : > { %v4440_v39 = vpop.f32.mrf.mxu2 }
 0x38e   : > { %v9171_v15 = vadd.f32 %v4440_v39, %v4392_v49  ;;  %v4396_v0 = vpop.f32.mrf.mxu1  ;;  %v4660_v49 = vor.u32 %v4659_v40, %v4656_v52  ;;  %v4705_v39 = vunpack.c.l.b16 %v4553_v2  ;;  %v4664_v52 = vrot.slane %v4662_v48, 4 }
 0x38f   : > { %v4397_v61 = vadd.f32 %v4396_v0, %v4204_v59  ;;  %v4907_v0 = vrot.slane %v4905_v55, 3  ;;  %v4667_v40 = vrot.slane %v4665_v63, 5  ;;  %v9194_v31 = vpop.f32.mrf.mxu3 }
 0x390   : > { %v4888_v5 = vshrl.u32 %v4660_v49, 16  ;;  %v4891_v45 = vshll.u32 %v4660_v49, 16  ;;  %v4713_v32 = vpack.c.b16 %v4705_v39, %v4705_v39  ;;  %v4211_v49 = vadd.f32 %v9138_v24, %v9097_v60 }
 0x391   : > { %5369 = vmatmul.bf16.gmra.mxu1 %v4851_v6  ;;  %v4910_v6 = vrot.slane %v4908_v14, 4  ;;  %v4668_v43 = vor.u32 %v4667_v40, %v4664_v52 }
 0x392   : > { %v4890_v10 = vrot.slane %v4888_v5, 3  ;;  %v4893_v50 = vrot.slane %v4891_v45, 4  ;;  %v4730_v29 = vrot.slane %v4713_v32, 5 }
 0x393   : > { %v4911_v33 = vor.u32 %v4910_v6, %v4907_v0  ;;  %v4931_v38 = vshrl.u32 %v4668_v43, 16  ;;  %v4934_v36 = vshll.u32 %v4668_v43, 16 }
 0x394   : > { %v4894_v59 = vor.u32 %v4893_v50, %v4890_v10  ;;  %v4214_v50 = vadd.f32 %v9173_v3, %v9102_v47  ;;  %v4216_v3 = vadd.f32 %v9184_v16, %v9108_v58  ;;  %v4681_v58 = vshll.u32 %v8999_v54, 16 }
 0x395   : > { %v4442_v35 = vpop.f32.mrf.mxu2  ;;  %v4912_v1 = vsel %vm2891_vm4, %v4903_v23, %v4911_v33  ;;  %v4933_v24 = vrot.slane %v4931_v38, 3  ;;  %v4936_v2 = vrot.slane %v4934_v36, 4 }
 0x396   : > { %v9181_v28 = vadd.f32 %v4442_v35, %v4394_v17  ;;  %v4398_v4 = vpop.f32.mrf.mxu1  ;;  %v4729_v17 = vrot.slane %v8915_v34, 5  ;;  %v4670_v34 = vshrl.u32 %v8957_v7, 16 }
 0x397   : > { %v4399_v27 = vadd.f32 %v4398_v4, %v4206_v11  ;;  %v4554_v4 = vld [vmem:[#allocation2 + $0x7c] sm:$0x1]  ;;  %v9205_v18 = vpop.f32.mrf.mxu3  ;;  %v4937_v56 = vor.u32 %v4936_v2, %v4933_v24 }
 0x398   : > { %v4731_v11 = vsel %vm2866_vm1, %v4729_v17, %v4730_v29  ;;  %v4940_v5 = vshrl.u32 %v4729_v17, 16  ;;  %v4943_v45 = vshll.u32 %v4729_v17, 16  ;;  %v4706_v51 = vunpack.c.l.b16 %v4554_v4 }
 0x399   : > { %v4951_v20 = vshll.u32 %v4731_v11, 16  ;;  %v4672_v63 = vrot.slane %v4670_v34, 4  ;;  %v4678_v4 = vshrl.u32 %v8999_v54, 16 }
 0x39a   : > { %5418 = vmatmul.bf16.gmra.mxu2 %v4869_v42  ;;  %v4948_v42 = vshrl.u32 %v4731_v11, 16  ;;  %v4942_v55 = vrot.slane %v4940_v5, 3 }
 0x39c   : > { %v4950_v48 = vrot.slane %v4948_v42, 3 }
 0x39d   : > { %v4445_v21 = vpop.f32.mrf.mxu2 }
 0x39e   : > { %v9190_v62 = vadd.f32 %v4445_v21, %v4397_v61  ;;  %v4401_v25 = vpop.f32.mrf.mxu1  ;;  %v4945_v21 = vrot.slane %v4943_v45, 4  ;;  %v4219_v45 = vadd.f32 %v9194_v31, %v9113_v53  ;;  %v4221_v31 = vadd.f32 %v9205_v18, %v9119_v22 }
 0x39f   : > { %v4402_v57 = vadd.f32 %v4401_v25, %v4209_v44  ;;  %v4953_v25 = vrot.slane %v4951_v20, 4  ;;  %v4223_v47 = vpop.f32.mrf.mxu3  ;;  %v4686_v22 = vshrl.u32 %v9021_v9, 16  ;;  %v4689_v18 = vshll.u32 %v9021_v9, 16 }
 0x3a0   : > { %v4946_v6 = vor.u32 %v4945_v21, %v4942_v55  ;;  %v4683_v55 = vrot.slane %v4681_v58, 5 }
 0x3a1   : > { %5374 = vmatmul.bf16.gmra.mxu1 %v4894_v59  ;;  %v4714_v59 = vpack.c.b16 %v4706_v51, %v4706_v51  ;;  %v4954_v52 = vor.u32 %v4953_v25, %v4950_v48  ;;  %v4688_v58 = vrot.slane %v4686_v22, 4 }
 0x3a3   : > { %v4733_v40 = vrot.slane %v4714_v59, 5  ;;  %v4955_v17 = vsel %vm2891_vm4, %v4946_v6, %v4954_v52 }
 0x3a5   : > { %v4447_v61 = vpop.f32.mrf.mxu2 }
 0x3a6   : > { %v9197_v12 = vadd.f32 %v4447_v61, %v4399_v27  ;;  %v4403_v35 = vpop.f32.mrf.mxu1  ;;  %v4673_v27 = vshll.u32 %v8957_v7, 16 }
 0x3a7   : > { %v4404_v30 = vadd.f32 %v4403_v35, %v4211_v49  ;;  %v4555_v49 = vld [vmem:[#allocation2 + $0x8c] sm:$0x1]  ;;  %v4225_v20 = vpop.f32.mrf.mxu3 }
 0x3a8   : > { %v4675_v39 = vrot.slane %v4673_v27, 5  ;;  %v4707_v16 = vunpack.c.l.b16 %v4555_v49 }
 0x3aa   : > { %5423 = vmatmul.bf16.gmra.mxu2 %v4912_v1  ;;  %v4676_v37 = vor.u32 %v4675_v39, %v4672_v63 }
 0x3ac   : > { %v4974_v33 = vshrl.u32 %v4676_v37, 16  ;;  %v4977_v61 = vshll.u32 %v4676_v37, 16 }
 0x3ad   : > { %v4450_v60 = vpop.f32.mrf.mxu2 }
 0x3ae   : > { %v9207_v10 = vadd.f32 %v4450_v60, %v4402_v57  ;;  %v4406_v14 = vpop.f32.mrf.mxu1  ;;  %v4732_v57 = vrot.slane %v8957_v7, 5  ;;  %v4976_v7 = vrot.slane %v4974_v33, 3  ;;  %v4979_v38 = vrot.slane %v4977_v61, 4 }
 0x3af   : > { %v4407_v44 = vadd.f32 %v4406_v14, %v4214_v50  ;;  %v4680_v50 = vrot.slane %v4678_v4, 4  ;;  %v4715_v14 = vpack.c.b16 %v4707_v16, %v4707_v16  ;;  %v4691_v16 = vrot.slane %v4689_v18, 5 }
 0x3b0   : > { %v4734_v29 = vsel %vm2866_vm1, %v4732_v57, %v4733_v40  ;;  %v4983_v35 = vshrl.u32 %v4732_v57, 16  ;;  %v4986_v1 = vshll.u32 %v4732_v57, 16  ;;  %v4980_v27 = vor.u32 %v4979_v38, %v4976_v7  ;;  %v4228_v57 = vpop.f32.mrf.mxu3  ;;  %v4556_v40 = vld [vmem:[#allocation2 + $0x9c] sm:$0x1] }
 0x3b1   : > { %5379 = vmatmul.bf16.gmra.mxu1 %v4937_v56  ;;  %v4994_v36 = vshll.u32 %v4734_v29, 16  ;;  %v4684_v39 = vor.u32 %v4683_v55, %v4680_v50  ;;  %v4736_v56 = vrot.slane %v4715_v14, 5  ;;  %v4708_v49 = vunpack.c.l.b16 %v4556_v40 }
 0x3b2   : > { %v4985_v42 = vrot.slane %v4983_v35, 3  ;;  %v4988_v60 = vrot.slane %v4986_v1, 4  ;;  %v4224_v35 = vadd.f32 %v4223_v47, %v9128_v26  ;;  %v4738_v26 = vrot.slane %v9021_v9, 5 }
 0x3b3   : > { %v4996_v2 = vrot.slane %v4994_v36, 4  ;;  %v5020_v6 = vshll.u32 %v4684_v39, 16 }
 0x3b4   : > { %v4989_v21 = vor.u32 %v4988_v60, %v4985_v42 }
 0x3b5   : > { %v4452_v0 = vpop.f32.mrf.mxu2 }
 0x3b6   : > { %v9212_v32 = vadd.f32 %v4452_v0, %v4404_v30  ;;  %v4408_v23 = vpop.f32.mrf.mxu1  ;;  %v4991_v30 = vshrl.u32 %v4734_v29, 16  ;;  %v5017_v0 = vshrl.u32 %v4684_v39, 16  ;;  %v5069_v39 = vshrl.u32 %v4738_v26, 16 }
 0x3b7   : > { %v4409_v43 = vadd.f32 %v4408_v23, %v4216_v3 }
 0x3b8   : > { %v4993_v24 = vrot.slane %v4991_v30, 3  ;;  %v4230_v42 = vpop.f32.mrf.mxu3 }
 0x3ba   : > { %5428 = vmatmul.bf16.gmra.mxu2 %v4955_v17  ;;  %v4997_v48 = vor.u32 %v4996_v2, %v4993_v24  ;;  %v5022_v17 = vrot.slane %v5020_v6, 4  ;;  %v4692_v24 = vor.u32 %v4691_v16, %v4688_v58 }
 0x3bc   : > { %v4998_v59 = vsel %vm2891_vm4, %v4989_v21, %v4997_v48  ;;  %v5060_v21 = vshrl.u32 %v4692_v24, 16  ;;  %v5063_v48 = vshll.u32 %v4692_v24, 16 }
 0x3bd   : > { %v4455_v11 = vpop.f32.mrf.mxu2 }
 0x3be   : > { %v9220_v5 = vadd.f32 %v4455_v11, %v4407_v44  ;;  %v4411_v34 = vpop.f32.mrf.mxu1  ;;  %v4735_v44 = vrot.slane %v8999_v54, 5 }
 0x3bf   : > { %v4412_v51 = vadd.f32 %v4411_v34, %v4219_v45  ;;  %v4716_v45 = vpack.c.b16 %v4708_v49, %v4708_v49  ;;  %v4231_v49 = vadd.f32 %v4230_v42, %v9146_v46 }
 0x3c0   : > { %v4737_v52 = vsel %vm2866_vm1, %v4735_v44, %v4736_v56  ;;  %v5026_v3 = vshrl.u32 %v4735_v44, 16  ;;  %v5029_v23 = vshll.u32 %v4735_v44, 16  ;;  %v5072_v44 = vshll.u32 %v4738_v26, 16  ;;  %v5311_v56 = vpop.f32.mrf.mxu0 }
 0x3c1   : > { %5384 = vmatmul.bf16.gmra.mxu1 %v4980_v27  ;;  %v5034_v54 = vshrl.u32 %v4737_v52, 16  ;;  %v5037_v33 = vshll.u32 %v4737_v52, 16  ;;  %v4739_v47 = vrot.slane %v4716_v45, 5  ;;  %v5071_v52 = vrot.slane %v5069_v39, 3  ;;  %v6687_v45 = vld [vmem:[%s7585_s16 + $0x1c] sm:$0xf] }
 0x3c2   : > { %v5028_v7 = vrot.slane %v5026_v3, 3  ;;  %v5031_v38 = vrot.slane %v5029_v23, 4  ;;  %v5074_v40 = vrot.slane %v5072_v44, 4  ;;  %v5506_v46 = vshrl.u32 %v6687_v45, 16 }
 0x3c3   : > { %v5036_v30 = vrot.slane %v5034_v54, 3  ;;  %v5039_v36 = vrot.slane %v5037_v33, 4  ;;  %v5502_v24 = vshll.u32 %v6687_v45, 16 }
 0x3c4   : > { %v5032_v27 = vor.u32 %v5031_v38, %v5028_v7 }
 0x3c5   : > { %v4457_v63 = vpop.f32.mrf.mxu2  ;;  %v5040_v60 = vor.u32 %v5039_v36, %v5036_v30  ;;  %v6686_v36 = vld [vmem:[%s7585_s16 + $0x18] sm:$0xf] }
 0x3c6   : > { %v9225_v53 = vadd.f32 %v4457_v63, %v4409_v43  ;;  %v4413_v25 = vpop.f32.mrf.mxu1  ;;  %v5019_v43 = vrot.slane %v5017_v0, 3  ;;  %v4740_v63 = vsel %vm2866_vm1, %v4738_v26, %v4739_v47  ;;  %v5493_v58 = vshrl.u32 %v6686_v36, 16  ;;  %vm9263_vm1 = vmor %vm5489_vm6, %vm5490_vm9 }
 0x3c7   : > { %v4414_v37 = vadd.f32 %v4413_v25, %v4221_v31  ;;  %v5041_v14 = vsel %vm2891_vm4, %v5032_v27, %v5040_v60  ;;  %v5062_v25 = vrot.slane %v5060_v21, 3  ;;  %v5080_v9 = vshll.u32 %v4740_v63, 16 }
 0x3c8   : > { %v5023_v4 = vor.u32 %v5022_v17, %v5019_v43  ;;  %v5075_v43 = vor.u32 %v5074_v40, %v5071_v52  ;;  %v5313_v18 = vpop.f32.mrf.mxu0  ;;  %v5496_v16 = vshll.u32 %v6686_v36, 16  ;;  %v5495_v27 = vrot.slane %v5493_v58, 4  ;;  %v9271_v40 = vld [vmem:[%s9429_s5] ss:$0 sm:$0xff] }
 0x3c9   : > { %v5082_v33 = vrot.slane %v5080_v9, 4  ;;  %v5508_v47 = vrot.slane %v5506_v46, 4 }
 0x3ca   : > { %5433 = vmatmul.bf16.gmra.mxu2 %v4998_v59  ;;  %v5065_v59 = vrot.slane %v5063_v48, 4  ;;  %v5498_v60 = vrot.slane %v5496_v16, 5 }
 0x3cc   : > { %v5066_v23 = vor.u32 %v5065_v59, %v5062_v25 }
 0x3cd   : > { %v4460_v61 = vpop.f32.mrf.mxu2 }
 0x3ce   : > { %v9233_v29 = vadd.f32 %v4460_v61, %v4412_v51  ;;  %v4416_v1 = vpop.f32.mrf.mxu1  ;;  %v4226_v51 = vadd.f32 %v4225_v20, %v9133_v19  ;;  %v4484_v19 = vpop.f32.mrf.mxu3  ;;  %v4229_v20 = vadd.f32 %v4228_v57, %v9142_v41 }
 0x3cf   : > { %v4417_v11 = vadd.f32 %v4416_v1, %v4224_v35  ;;  %v4485_v59 = vadd.f32 %v4484_v19, %v9157_v8  ;;  %v6690_v19 = vld [vmem:[%s7585_s16 + $0x28] sm:$0xf] }
 0x3d0   : > { %v5526_v36 = vshll.u32 %v6690_v19, 16 }
 0x3d1   : > { %5389 = vmatmul.bf16.gmra.mxu1 %v5023_v4 }
 0x3d5   : > { %v4462_v34 = vpop.f32.mrf.mxu2 }
 0x3d6   : > { %v9236_v2 = vadd.f32 %v4462_v34, %v4414_v37  ;;  %v4418_v50 = vpop.f32.mrf.mxu1  ;;  %v5077_v37 = vshrl.u32 %v4740_v63, 16  ;;  %v4486_v41 = vpop.f32.mrf.mxu3 }
 0x3d7   : > { %v4419_v55 = vadd.f32 %v4418_v50, %v4226_v51  ;;  %v6688_v51 = vld [vmem:[%s7585_s16 + $0x20] sm:$0x1] }
 0x3d8   : > { %v5079_v54 = vrot.slane %v5077_v37, 3  ;;  %v5512_v44 = vshll.u32 %v6688_v51, 16 }
 0x3da   : > { %5438 = vmatmul.bf16.gmra.mxu2 %v5041_v14  ;;  %v5083_v17 = vor.u32 %v5082_v33, %v5079_v54  ;;  %v5504_v14 = vrot.slane %v5502_v24, 5 }
 0x3dc   : > { %v5084_v1 = vsel %vm2891_vm4, %v5075_v43, %v5083_v17  ;;  %v5509_v39 = vor.u32 %v5508_v47, %v5504_v14  ;;  %v5530_v17 = vshrl.u32 %v6690_v19, 16 }
 0x3dd   : > { %v4465_v31 = vpop.f32.mrf.mxu2 }
 0x3de   : > { %v9242_v0 = vadd.f32 %v4465_v31, %v4417_v11  ;;  %v4421_v6 = vpop.f32.mrf.mxu1  ;;  %v5316_v11 = vpop.f32.mrf.mxu0 }
 0x3df   : > { %v4422_v3 = vadd.f32 %v4421_v6, %v4229_v20  ;;  %v9252_v4 = vpop.f32.mrf.mxu3  ;;  %v6689_v20 = vld [vmem:[%s7585_s16 + $0x24] sm:$0xf]  ;;  %v5510_v6 = vrot.slane %v5509_v39, 4 }
 0x3e0   : > { %v5520_v54 = vshll.u32 %v6689_v20, 16 }
 0x3e1   : > { %5394 = vmatmul.bf16.gmra.mxu1 %v5066_v23  ;;  %v5517_v23 = vshrl.u32 %v6689_v20, 16  ;;  %v6692_v20 = vld [vmem:[%s7585_s16 + $0x30] sm:$0xf] }
 0x3e5   : > { %v4467_v61 = vpop.f32.mrf.mxu2 }
 0x3e6   : > { %v9245_v22 = vadd.f32 %v4467_v61, %v4419_v55  ;;  %v4423_v35 = vpop.f32.mrf.mxu1  ;;  %v9258_v50 = vpop.f32.mrf.mxu0  ;;  %v5499_v55 = vor.u32 %v5498_v60, %v5495_v27  ;;  %v6691_v60 = vld [vmem:[%s7585_s16 + $0x2c] sm:$0x1] }
 0x3e7   : > { %v4424_v57 = vadd.f32 %v4423_v35, %v4231_v49  ;;  %v9260_v48 = vpop.f32.mrf.mxu3  ;;  %v4487_v49 = vadd.f32 %v4486_v41, %v9162_v13  ;;  %v5528_v41 = vrot.slane %v5526_v36, 5 }
 0x3e8   : > { %v5500_v25 = vrot.slane %v5499_v55, 4  ;;  %v5536_v55 = vshll.u32 %v6691_v60, 16 }
 0x3ea   : > { %5443 = vmatmul.bf16.gmra.mxu2 %v5084_v1 }
 0x3ed   : > { %v4470_v7 = vpop.f32.mrf.mxu2 }
 0x3ee   : > { %v9249_v38 = vadd.f32 %v4470_v7, %v4422_v3  ;;  %v5360_v30 = vpop.f32.mrf.mxu1  ;;  %v5505_v3 = vsel %vm9263_vm1, %v5500_v25, %v5504_v14  ;;  %v9276_v33 = vpop.f32.mrf.mxu0 }
 0x3ef   : > { %v5361_v21 = vadd.f32 %v5360_v30, %v5311_v56  ;;  %v5514_v56 = vrot.slane %v5512_v44, 5  ;;  %v5700_v35 = vunpack.c.l.bf16 %v5505_v3  ;;  %v9282_v7 = vpop.f32.mrf.mxu3  ;;  %v5522_v30 = vrot.slane %v5520_v54, 5 }
 0x3f0   : > { %v5541_v3 = vshrl.u32 %v6692_v20, 16 }
 0x3f1   : > { %v5515_v43 = vsel %vm9263_vm1, %v5510_v6, %v5514_v56 }
 0x3f2   : > { %v5701_v16 = vunpack.c.l.bf16 %v5515_v43 }
 0x3f5   : > { %v4472_v34 = vpop.f32.mrf.mxu2 }
 0x3f6   : > { %v9255_v42 = vadd.f32 %v4472_v34, %v4424_v57  ;;  %v5362_v26 = vpop.f32.mrf.mxu1  ;;  %v5532_v34 = vrot.slane %v5530_v17, 4  ;;  %v5323_v39 = vpop.f32.mrf.mxu0 }
 0x3f7   : > { %v5363_v8 = vadd.f32 %v5362_v26, %v5313_v18  ;;  %v5519_v18 = vrot.slane %v5517_v23, 4  ;;  %v4496_v6 = vpop.f32.mrf.mxu3  ;;  %v5544_v23 = vshll.u32 %v6692_v20, 16 }
 0x3f8   : > { %v5533_v51 = vor.u32 %v5532_v34, %v5528_v41  ;;  %v6694_v34 = vld [vmem:[%s7585_s16 + $0x38] sm:$0x1] }
 0x3f9   : > { %v5523_v13 = vor.u32 %v5522_v30, %v5519_v18 }
 0x3fb   : > { %v5524_v44 = vrot.slane %v5523_v13, 4 }
 0x3fd   : > { %v5409_v63 = vpop.f32.mrf.mxu2 }
 0x3fe   : > { %v5410_v31 = vadd.f32 %v5409_v63, %v5361_v21  ;;  %v5365_v9 = vpop.f32.mrf.mxu1  ;;  %v5326_v36 = vpop.f32.mrf.mxu0 }
 0x3ff   : > { %v5366_v24 = vadd.f32 %v5365_v9, %v5316_v11  ;;  %v5534_v11 = vrot.slane %v5533_v51, 4  ;;  %v5538_v9 = vrot.slane %v5536_v55, 5 }
 0x400   : > { %v5449_v52 = vadd.f32 %v5410_v31, %v4485_v59  ;;  %v4490_v31 = vadd.f32 %v9252_v4, %v9171_v15 }
 0x401   : > { %v5539_v4 = vsel %vm9263_vm1, %v5534_v11, %v5538_v9 }
 0x402   : > { %v5720_v57 = vadd.f32 %v9271_v40, %v5449_v52  ;;  %v5529_v52 = vsel %vm9263_vm1, %v5524_v44, %v5528_v41  ;;  %v5703_v30 = vunpack.c.l.bf16 %v5539_v4  ;;  %v6695_v44 = vld [vmem:[%s7585_s16 + $0x3c] sm:$0xf] }
 0x403   : > { %v5702_v43 = vunpack.c.l.bf16 %v5529_v52  ;;  %v5565_v11 = vshrl.u32 %v6695_v44, 16  ;;  %v5568_v9 = vshll.u32 %v6695_v44, 16  ;;  %v6696_v52 = vld [vmem:[%s7585_s16 + $0x40] sm:$0xf] }
 0x404   : > { %v5736_v46 = vadd.f32 %v5720_v57, %v5700_v35  ;;  %v5543_v35 = vrot.slane %v5541_v3, 4  ;;  %v5546_v57 = vrot.slane %v5544_v23, 5 }
 0x405   : > { %v5411_v61 = vpop.f32.mrf.mxu2 }
 0x406   : > { %v5412_v1 = vadd.f32 %v5411_v61, %v5363_v8  ;;  %v5367_v45 = vpop.f32.mrf.mxu1  ;;  %v5752_v14 = vmax.f32 %v5736_v46, 0.0  ;;  %v6693_v8 = vld [vmem:[%s7585_s16 + $0x34] sm:$0xf]  ;;  %v4492_v61 = vadd.f32 %v9260_v48, %v9181_v28  ;;  %v4499_v46 = vpop.f32.mrf.mxu3 }
 0x407   : > { %v5368_v54 = vadd.f32 %v5367_v45, %v9258_v50  ;;  %v5554_v19 = vshrl.u32 %v6693_v8, 16 }
 0x408   : > { %v5450_v58 = vadd.f32 %v5412_v1, %v4487_v49  ;;  %v5550_v1 = vshll.u32 %v6693_v8, 16 }
 0x40a   : > { %v5721_v27 = vadd.f32 %v9271_v40, %v5450_v58  ;;  %v5556_v58 = vrot.slane %v5554_v19, 4  ;;  %v5552_v28 = vrot.slane %v5550_v1, 5  ;;  %v5567_v19 = vrot.slane %v5565_v11, 4 }
 0x40c   : > { %v5737_v26 = vadd.f32 %v5721_v27, %v5701_v16  ;;  %v5547_v27 = vor.u32 %v5546_v57, %v5543_v35  ;;  %v5557_v41 = vor.u32 %v5556_v58, %v5552_v28 }
 0x40d   : > { %v5414_v47 = vpop.f32.mrf.mxu2 }
 0x40e   : > { %v5753_v21 = vmax.f32 %v5737_v26, 0.0  ;;  %v5415_v63 = vadd.f32 %v5414_v47, %v5366_v24  ;;  %v5370_v59 = vpop.f32.mrf.mxu1  ;;  %v5560_v24 = vshll.u32 %v6694_v34, 16  ;;  %v5548_v55 = vrot.slane %v5547_v27, 4  ;;  %v4501_v3 = vpop.f32.mrf.mxu3 }
 0x40f   : > { %v5371_v48 = vadd.f32 %v5370_v59, %v9276_v33  ;;  %v5328_v33 = vpop.f32.mrf.mxu0 }
 0x410   : > { %v6926_v25 = vpack.c.bf16 %v5753_v21, %v5752_v14  ;;  %v5451_v56 = vadd.f32 %v5415_v63, %v4490_v31  ;;  %v4495_v14 = vadd.f32 %v9282_v7, %v9190_v62  ;;  %v5558_v31 = vrot.slane %v5557_v41, 4 }
 0x411   : > { %v5553_v59 = vsel %vm9263_vm1, %v5548_v55, %v5552_v28  ;;  %v5578_v7 = vshrl.u32 %v6696_v52, 16  ;;  %v4500_v41 = vadd.f32 %v4499_v46, %v9207_v10  ;;  %v4502_v10 = vadd.f32 %v4501_v3, %v9212_v32 }
 0x412   : > { %6927 = vst [vmem:[%s9292_s20] sm:$0xff] %v6926_v25   ;;  %v5722_v17 = vadd.f32 %v9271_v40, %v5451_v56  ;;  %v5562_v25 = vrot.slane %v5560_v24, 5  ;;  %v5704_v8 = vunpack.c.l.bf16 %v5553_v59 }
 0x413   : > { %v5580_v35 = vrot.slane %v5578_v7, 4 }
 0x414   : > { %v5738_v16 = vadd.f32 %v5722_v17, %v5702_v43  ;;  %v5563_v62 = vsel %vm9263_vm1, %v5558_v31, %v5562_v25  ;;  %v5574_v43 = vshll.u32 %v6696_v52, 16  ;;  %v6699_v31 = vld [vmem:[%s7585_s16 + $0x4c] sm:$0xf] }
 0x415   : > { %v5416_v15 = vpop.f32.mrf.mxu2  ;;  %v5602_v59 = vshrl.u32 %v6699_v31, 16 }
 0x416   : > { %v5417_v49 = vadd.f32 %v5416_v15, %v5368_v54  ;;  %v5372_v50 = vpop.f32.mrf.mxu1  ;;  %v5754_v26 = vmax.f32 %v5738_v16, 0.0  ;;  %v4497_v54 = vadd.f32 %v4496_v6, %v9197_v12 }
 0x417   : > { %v5373_v56 = vadd.f32 %v5372_v50, %v5323_v39  ;;  %v5576_v50 = vrot.slane %v5574_v43, 5  ;;  %v5331_v6 = vpop.f32.mrf.mxu0 }
 0x418   : > { %v5452_v18 = vadd.f32 %v5417_v49, %v4492_v61  ;;  %v5570_v61 = vrot.slane %v5568_v9, 5  ;;  %v5705_v49 = vunpack.c.l.bf16 %v5563_v62  ;;  %v5598_v62 = vshll.u32 %v6699_v31, 16 }
 0x41a   : > { %v5723_v45 = vadd.f32 %v9271_v40, %v5452_v18  ;;  %v6697_v18 = vld [vmem:[%s7585_s16 + $0x44] sm:$0x1]  ;;  %v5600_v32 = vrot.slane %v5598_v62, 5 }
 0x41b   : > { %v5584_v34 = vshll.u32 %v6697_v18, 16 }
 0x41c   : > { %v5739_v60 = vadd.f32 %v5723_v45, %v5703_v30  ;;  %v5571_v30 = vor.u32 %v5570_v61, %v5567_v19  ;;  %v5581_v45 = vor.u32 %v5580_v35, %v5576_v50  ;;  %v6700_v61 = vld [vmem:[%s7585_s16 + $0x50] sm:$0x1] }
 0x41d   : > { %v5419_v13 = vpop.f32.mrf.mxu2  ;;  %v5586_v55 = vrot.slane %v5584_v34, 5  ;;  %v5608_v35 = vshll.u32 %v6700_v61, 16 }
 0x41e   : > { %v5755_v47 = vmax.f32 %v5739_v60, 0.0  ;;  %v5420_v51 = vadd.f32 %v5419_v13, %v5371_v48  ;;  %v5375_v63 = vpop.f32.mrf.mxu1  ;;  %v4504_v60 = vpop.f32.mrf.mxu3  ;;  %v5572_v13 = vrot.slane %v5571_v30, 4 }
 0x41f   : > { %v5376_v58 = vadd.f32 %v5375_v63, %v5326_v36 }
 0x420   : > { %v6931_v21 = vpack.c.bf16 %v5755_v47, %v5754_v26  ;;  %v5453_v20 = vadd.f32 %v5420_v51, %v4495_v14  ;;  %v6698_v47 = vld [vmem:[%s7585_s16 + $0x48] sm:$0xf]  ;;  %v5582_v51 = vrot.slane %v5581_v45, 4  ;;  %v5577_v14 = vsel %vm9263_vm1, %v5572_v13, %v5576_v50 }
 0x421   : > { %v5592_v63 = vshll.u32 %v6698_v47, 16  ;;  %v5706_v46 = vunpack.c.l.bf16 %v5577_v14  ;;  %v4505_v50 = vadd.f32 %v4504_v60, %v9220_v5 }
 0x422   : > { %7022 = vst [vmem:[%s9292_s20 + $0x8] sm:$0xff] %v6931_v21   ;;  %v5724_v15 = vadd.f32 %v9271_v40, %v5453_v20  ;;  %v5589_v21 = vshrl.u32 %v6698_v47, 16  ;;  %v5587_v20 = vsel %vm9263_vm1, %v5582_v51, %v5586_v55 }
 0x424   : > { %v5740_v57 = vadd.f32 %v5724_v15, %v5704_v8  ;;  %v5591_v52 = vrot.slane %v5589_v21, 4  ;;  %v5604_v15 = vrot.slane %v5602_v59, 4 }
 0x425   : > { %v5421_v23 = vpop.f32.mrf.mxu2 }
 0x426   : > { %v5422_v4 = vadd.f32 %v5421_v23, %v5373_v56  ;;  %v5377_v39 = vpop.f32.mrf.mxu1  ;;  %v5756_v27 = vmax.f32 %v5740_v57, 0.0  ;;  %v5333_v56 = vpop.f32.mrf.mxu0  ;;  %v5594_v23 = vrot.slane %v5592_v63, 5 }
 0x427   : > { %v5378_v44 = vadd.f32 %v5377_v39, %v5328_v33  ;;  %v4506_v8 = vpop.f32.mrf.mxu3  ;;  %v5605_v39 = vor.u32 %v5604_v15, %v5600_v32 }
 0x428   : > { %v5454_v17 = vadd.f32 %v5422_v4, %v4497_v54  ;;  %v5707_v54 = vunpack.c.l.bf16 %v5587_v20  ;;  %v5595_v43 = vor.u32 %v5594_v23, %v5591_v52  ;;  %v4507_v51 = vadd.f32 %v4506_v8, %v9225_v53 }
 0x429   : > { %v5606_v34 = vrot.slane %v5605_v39, 4 }
 0x42a   : > { %v5725_v1 = vadd.f32 %v9271_v40, %v5454_v17  ;;  %v5596_v30 = vrot.slane %v5595_v43, 4 }
 0x42c   : > { %v5741_v12 = vadd.f32 %v5725_v1, %v5705_v49 }
 0x42d   : > { %v5424_v16 = vpop.f32.mrf.mxu2 }
 0x42e   : > { %v5757_v28 = vmax.f32 %v5741_v12, 0.0  ;;  %v5425_v48 = vadd.f32 %v5424_v16, %v5376_v58  ;;  %v5380_v26 = vpop.f32.mrf.mxu1  ;;  %v6701_v16 = vld [vmem:[%s7585_s16 + $0x54] sm:$0xf]  ;;  %v5336_v45 = vpop.f32.mrf.mxu0 }
 0x42f   : > { %v5381_v3 = vadd.f32 %v5380_v26, %v5331_v6  ;;  %v5613_v13 = vshrl.u32 %v6701_v16, 16  ;;  %v6702_v26 = vld [vmem:[%s7585_s16 + $0x58] sm:$0xf] }
 0x430   : > { %v6936_v24 = vpack.c.bf16 %v5757_v28, %v5756_v27  ;;  %v5455_v36 = vadd.f32 %v5425_v48, %v4500_v41  ;;  %v5610_v27 = vrot.slane %v5608_v35, 5  ;;  %v4509_v28 = vpop.f32.mrf.mxu3  ;;  %v5601_v48 = vsel %vm9263_vm1, %v5596_v30, %v5600_v32  ;;  %v6704_v32 = vld [vmem:[%s7585_s16 + $0x60] sm:$0xf]  ;;  %v6705_v30 = vld [vmem:[%s7585_s16 + $0x64] sm:$0xf] }
 0x431   : > { %v5616_v41 = vshll.u32 %v6701_v16, 16  ;;  %v5626_v60 = vshrl.u32 %v6702_v26, 16  ;;  %v5708_v55 = vunpack.c.l.bf16 %v5601_v48  ;;  %v5615_v21 = vrot.slane %v5613_v13, 4 }
 0x432   : > { %7023 = vst [vmem:[%s9292_s20 + $0x10] sm:$0xff] %v6936_v24   ;;  %v5726_v11 = vadd.f32 %v9271_v40, %v5455_v36  ;;  %v5611_v5 = vsel %vm9263_vm1, %v5606_v34, %v5610_v27  ;;  %v4510_v61 = vadd.f32 %v4509_v28, %v9233_v29  ;;  %v5646_v13 = vshll.u32 %v6705_v30, 16 }
 0x433   : > { %v5618_v63 = vrot.slane %v5616_v41, 5  ;;  %v5628_v59 = vrot.slane %v5626_v60, 4  ;;  %v6706_v60 = vld [vmem:[%s7585_s16 + $0x68] sm:$0x1] }
 0x434   : > { %v5742_v4 = vadd.f32 %v5726_v11, %v5706_v46  ;;  %v6703_v11 = vld [vmem:[%s7585_s16 + $0x5c] sm:$0x1] }
 0x435   : > { %v5426_v25 = vpop.f32.mrf.mxu2 }
 0x436   : > { %v5427_v9 = vadd.f32 %v5426_v25, %v5378_v44  ;;  %v5382_v33 = vpop.f32.mrf.mxu1  ;;  %v5758_v57 = vmax.f32 %v5742_v4, 0.0  ;;  %v5622_v44 = vshll.u32 %v6702_v26, 16  ;;  %v5709_v25 = vunpack.c.l.bf16 %v5611_v5 }
 0x437   : > { %v5383_v24 = vadd.f32 %v5382_v33, %v5333_v56  ;;  %v5619_v56 = vor.u32 %v5618_v63, %v5615_v21  ;;  %v5632_v33 = vshll.u32 %v6703_v11, 16 }
 0x438   : > { %v5456_v7 = vadd.f32 %v5427_v9, %v4502_v10  ;;  %v5338_v9 = vpop.f32.mrf.mxu0  ;;  %v5624_v52 = vrot.slane %v5622_v44, 5  ;;  %v4511_v62 = vpop.f32.mrf.mxu3  ;;  %v5656_v44 = vshll.u32 %v6706_v60, 16 }
 0x439   : > { %v4512_v16 = vadd.f32 %v4511_v62, %v9236_v2 }
 0x43a   : > { %v5727_v19 = vadd.f32 %v9271_v40, %v5456_v7 }
 0x43c   : > { %v5743_v17 = vadd.f32 %v5727_v19, %v5707_v54  ;;  %v5629_v54 = vor.u32 %v5628_v59, %v5624_v52  ;;  %v5620_v19 = vrot.slane %v5619_v56, 4 }
 0x43d   : > { %v5429_v49 = vpop.f32.mrf.mxu2 }
 0x43e   : > { %v5759_v1 = vmax.f32 %v5743_v17, 0.0  ;;  %v5430_v18 = vadd.f32 %v5429_v49, %v5381_v3  ;;  %v5385_v12 = vpop.f32.mrf.mxu1  ;;  %v5630_v3 = vrot.slane %v5629_v54, 4  ;;  %v5634_v17 = vrot.slane %v5632_v33, 5 }
 0x43f   : > { %v5386_v53 = vadd.f32 %v5385_v12, %v5336_v45  ;;  %v5625_v39 = vsel %vm9263_vm1, %v5620_v19, %v5624_v52  ;;  %v5650_v12 = vshrl.u32 %v6705_v30, 16 }
 0x440   : > { %v6941_v58 = vpack.c.bf16 %v5759_v1, %v5758_v57  ;;  %v5457_v6 = vadd.f32 %v5430_v18, %v4505_v50  ;;  %v5637_v57 = vshrl.u32 %v6704_v32, 16  ;;  %v5640_v1 = vshll.u32 %v6704_v32, 16  ;;  %v5341_v50 = vpop.f32.mrf.mxu0 }
 0x441   : > { %v5635_v29 = vsel %vm9263_vm1, %v5630_v3, %v5634_v17  ;;  %v5710_v45 = vunpack.c.l.bf16 %v5625_v39  ;;  %v5652_v26 = vrot.slane %v5650_v12, 4 }
 0x442   : > { %7024 = vst [vmem:[%s9292_s20 + $0x18] sm:$0xff] %v6941_v58   ;;  %v5728_v36 = vadd.f32 %v9271_v40, %v5457_v6  ;;  %v4514_v6 = vpop.f32.mrf.mxu3  ;;  %v5639_v28 = vrot.slane %v5637_v57, 4  ;;  %v5642_v48 = vrot.slane %v5640_v1, 5 }
 0x444   : > { %v5744_v10 = vadd.f32 %v5728_v36, %v5708_v55  ;;  %v5648_v55 = vrot.slane %v5646_v13, 5 }
 0x445   : > { %v5431_v47 = vpop.f32.mrf.mxu2 }
 0x446   : > { %v5432_v14 = vadd.f32 %v5431_v47, %v5383_v24  ;;  %v5387_v20 = vpop.f32.mrf.mxu1  ;;  %v5760_v8 = vmax.f32 %v5744_v10, 0.0  ;;  %v5711_v24 = vunpack.c.l.bf16 %v5635_v29  ;;  %v5653_v63 = vor.u32 %v5652_v26, %v5648_v55 }
 0x447   : > { %v5388_v18 = vadd.f32 %v5387_v20, %v5338_v9  ;;  %v6707_v9 = vld [vmem:[%s7585_s16 + $0x6c] sm:$0xf] }
 0x448   : > { %v5458_v31 = vadd.f32 %v5432_v14, %v4507_v51  ;;  %v5643_v51 = vor.u32 %v5642_v48, %v5639_v28  ;;  %v5343_v59 = vpop.f32.mrf.mxu0  ;;  %v5654_v52 = vrot.slane %v5653_v63, 4  ;;  %v5664_v54 = vshll.u32 %v6707_v9, 16 }
 0x44a   : > { %v5729_v46 = vadd.f32 %v9271_v40, %v5458_v31  ;;  %v5644_v10 = vrot.slane %v5643_v51, 4  ;;  %v4516_v56 = vpop.f32.mrf.mxu3 }
 0x44b   : > { %v4517_v19 = vadd.f32 %v4516_v56, %v9245_v22 }
 0x44c   : > { %v5745_v23 = vadd.f32 %v5729_v46, %v5709_v25  ;;  %v4515_v46 = vadd.f32 %v4514_v6, %v9242_v0  ;;  %v5649_v62 = vsel %vm9263_vm1, %v5644_v10, %v5648_v55 }
 0x44d   : > { %v5434_v7 = vpop.f32.mrf.mxu2 }
 0x44e   : > { %v5761_v15 = vmax.f32 %v5745_v23, 0.0  ;;  %v5435_v4 = vadd.f32 %v5434_v7, %v5386_v53  ;;  %v5390_v35 = vpop.f32.mrf.mxu1  ;;  %v5658_v53 = vrot.slane %v5656_v44, 5  ;;  %v5661_v7 = vshrl.u32 %v6707_v9, 16 }
 0x44f   : > { %v5391_v36 = vadd.f32 %v5390_v35, %v5341_v50 }
 0x450   : > { %v6946_v43 = vpack.c.bf16 %v5761_v15, %v5760_v8  ;;  %v5459_v49 = vadd.f32 %v5435_v4, %v4510_v61  ;;  %v6708_v8 = vld [vmem:[%s7585_s16 + $0x70] sm:$0xf]  ;;  %v5659_v4 = vsel %vm9263_vm1, %v5654_v52, %v5658_v53  ;;  %v5712_v61 = vunpack.c.l.bf16 %v5649_v62  ;;  %v5346_v1 = vpop.f32.mrf.mxu0 }
 0x451   : > { %v5674_v0 = vshrl.u32 %v6708_v8, 16  ;;  %v5663_v17 = vrot.slane %v5661_v7, 4  ;;  %v5670_v39 = vshll.u32 %v6708_v8, 16  ;;  %v5713_v57 = vunpack.c.l.bf16 %v5659_v4 }
 0x452   : > { %7025 = vst [vmem:[%s9292_s20 + $0x20] sm:$0xff] %v6946_v43   ;;  %v5730_v34 = vadd.f32 %v9271_v40, %v5459_v49  ;;  %v5666_v49 = vrot.slane %v5664_v54, 5  ;;  %v4519_v29 = vpop.f32.mrf.mxu3 }
 0x453   : > { %v5672_v22 = vrot.slane %v5670_v39, 5 }
 0x454   : > { %v5746_v47 = vadd.f32 %v5730_v34, %v5710_v45  ;;  %v5667_v12 = vor.u32 %v5666_v49, %v5663_v17 }
 0x455   : > { %v5436_v58 = vpop.f32.mrf.mxu2 }
 0x456   : > { %v5437_v27 = vadd.f32 %v5436_v58, %v5388_v18  ;;  %v5392_v14 = vpop.f32.mrf.mxu1  ;;  %v5762_v31 = vmax.f32 %v5746_v47, 0.0  ;;  %v5676_v18 = vrot.slane %v5674_v0, 4  ;;  %v6709_v58 = vld [vmem:[%s7585_s16 + $0x74] sm:$0x1]  ;;  %s6862_s16 = sshll.u32 %s7412_s26, 4 }
 0x457   : > { %v5393_v33 = vadd.f32 %v5392_v14, %v5343_v59  ;;  %v5680_v6 = vshll.u32 %v6709_v58, 16  ;;  %s5813_s23 = sadd.s32 %s6862_s16, %s6713_s21  ;;  %s7296_s21 = scalar_lea.hbm %s9431_s7, 256 }
 0x458   : > { %v5460_v41 = vadd.f32 %v5437_v27, %v4512_v16  ;;  %v5677_v27 = vor.u32 %v5676_v18, %v5672_v22  ;;  %v5348_v55 = vpop.f32.mrf.mxu0  ;;  %s6714_s26 = sshll.u32 %s5813_s23, 2 }
 0x459   : > { %v5682_v60 = vrot.slane %v5680_v6, 5  ;;  %s5815_s17 = scalar_lea.hbm %s9431_s7, %s6714_s26 }
 0x45a   : > { %v5731_v5 = vadd.f32 %v9271_v40, %v5460_v41  ;;  %v5668_v41 = vrot.slane %v5667_v12, 4  ;;  %v4521_v14 = vpop.f32.mrf.mxu3  ;;  %s5818_s18 = sshll.u32 %s5815_s17, 4  ;;  %s5819_s18 = int_to_ptr.hbm [resolvable:$true] %s5818_s18 }
 0x45b   : > { %v4522_v63 = vadd.f32 %v4521_v14, %v9255_v42  ;;  %s7290_s30 = sshra.s32 %s5819_s18, 4  ;;  %s7291_s30 = int_to_ptr.hbm [resolvable:$true] %s7290_s30 }
 0x45c   : > { %v5747_v2 = vadd.f32 %v5731_v5, %v5711_v24  ;;  %v4520_v24 = vadd.f32 %v4519_v29, %v9249_v38  ;;  %v5678_v5 = vrot.slane %v5677_v27, 4  ;;  %s7292_s11 = scalar_lea.hbm %s7291_s30, 64  ;;  %p7297_p6 = scmp.lt.s32.totalorder %s7291_s30, %s9431_s7 }
 0x45d   : > { %v5439_v21 = vpop.f32.mrf.mxu2  ;;  %p7293_p2 = scmp.ne.s32.totalorder %s7291_s30, %s7292_s11  ;;  %p7298_p7 = scmp.lt.s32.totalorder %s7296_s21, %s7292_s11 }
 0x45e   : > { %v5763_v25 = vmax.f32 %v5747_v2, 0.0  ;;  %v5440_v20 = vadd.f32 %v5439_v21, %v5391_v36  ;;  %v5395_v3 = vpop.f32.mrf.mxu1  ;;  %v5673_v36 = vsel %vm9263_vm1, %v5668_v41, %v5672_v22  ;;  %v5683_v38 = vsel %vm9263_vm1, %v5678_v5, %v5682_v60 }
 0x45f   : > { %v5396_v16 = vadd.f32 %v5395_v3, %v5346_v1  ;;  %v5714_v44 = vunpack.c.l.bf16 %v5673_v36  ;;  %v5715_v59 = vunpack.c.l.bf16 %v5683_v38  ;;  %p7294_p4 = pnand %p7293_p2, %p7527_p3  ;;  %p7299_p9 = por %p7298_p7, %p7297_p6 }
 0x460   : > { %v6951_v11 = vpack.c.bf16 %v5763_v25, %v5762_v31  ;;  %v5461_v23 = vadd.f32 %v5440_v20, %v4515_v46 }
 0x461   : > { %p7295_p5 = pneg %p7294_p4 }
 0x462   : > { %7026 = vst [vmem:[%s9292_s20 + $0x28] sm:$0xff] %v6951_v11   ;;  %v5732_v43 = vadd.f32 %v9271_v40, %v5461_v23 }
 0x463   : > { %p7300_p10 = pnand %p7299_p9, %p7295_p5 }
 0x464   : > { %v5748_v30 = vadd.f32 %v5732_v43, %v5712_v61 }
 0x465   : > { %v5441_v15 = vpop.f32.mrf.mxu2 }
 0x466   : > { %v5442_v32 = vadd.f32 %v5441_v15, %v5393_v33  ;;  %v5764_v28 = vmax.f32 %v5748_v30, 0.0  ;;  %v5397_v47 = vpop.f32.mrf.mxu1 }
 0x467   : > { %v5398_v2 = vadd.f32 %v5397_v47, %v5348_v55 }
 0x468   : > { %v5462_v35 = vadd.f32 %v5442_v32, %v4517_v19 }
 0x46a   : > { %v5733_v50 = vadd.f32 %v9271_v40, %v5462_v35 }
 0x46c   : > { %v5749_v45 = vadd.f32 %v5733_v50, %v5713_v57 }
 0x46d   : > { %v5444_v34 = vpop.f32.mrf.mxu2 }
 0x46e   : > { %v5765_v48 = vmax.f32 %v5749_v45, 0.0  ;;  %v5445_v13 = vadd.f32 %v5444_v34, %v5396_v16 }
 0x470   : > { %v6956_v26 = vpack.c.bf16 %v5765_v48, %v5764_v28  ;;  %v5463_v51 = vadd.f32 %v5445_v13, %v4520_v24 }
 0x472   : > { %7027 = vst [vmem:[%s9292_s20 + $0x30] sm:$0xff] %v6956_v26   ;;  %v5734_v31 = vadd.f32 %v9271_v40, %v5463_v51 }
 0x474   : > { %v5750_v10 = vadd.f32 %v5734_v31, %v5714_v44 }
 0x475   : > { %v5446_v21 = vpop.f32.mrf.mxu2 }
 0x476   : > { %v5447_v25 = vadd.f32 %v5446_v21, %v5398_v2  ;;  %v5766_v42 = vmax.f32 %v5750_v10, 0.0 }
 0x478   : > { %v5464_v20 = vadd.f32 %v5447_v25, %v4522_v63 }
 0x47a   : > { %v5735_v46 = vadd.f32 %v9271_v40, %v5464_v20 }
 0x47c   : > { %v5751_v37 = vadd.f32 %v5735_v46, %v5715_v59 }
 0x47e   : > { %v5767_v11 = vmax.f32 %v5751_v37, 0.0 }
 0x480   : > { %v6961_v9 = vpack.c.bf16 %v5767_v11, %v5766_v42 }
 0x482   : > { %7028 = vst [vmem:[%s9292_s20 + $0x38] sm:$0xff] %v6961_v9  }
 0x483   : > { %7303 = shalt.err (!%p7300_p10)
}
 0x484   : > { %s7433_s15 = smov 64   ;;  %s7434_s20 = smov 4  }
 0x485   : > { %7050 = dma.vmem_to_hbm [thread:$0]  (%p7527_p3), %s5817_s8, 1024, %s5819_s18, %s5801_s12, %s7433_s15, %s7433_s15, %s7434_s20  }
 0x486 PF: > { %p7062_p11 = scmp.ge.s32.totalorder %s7428_s6, 2  ;;  %s5833_s27 = sand.u32 1, %s7400_s24  }
 0x487   : > { %s5834_s2 = scalar_lea.sflag [#allocation5], %s5833_s27 }
 0x488   : > { %p7057_p12 = pnand %p7062_p11, %p7536_p8 }
 0x48a   : > { %p7058_p13 = pneg %p7057_p12 }
 0x48c   : > { %7341 = dma.done.wait (%p7058_p13), %s5834_s2, 1024  }
 0x48d   : > { %7343 = vsyncadd (%p7058_p13), %s5834_s2, 4294966272  ;;  %s21_s6 = sadd.s32 1, %s7428_s6   ;;  %s9488_s24 = smov %s7404_s25 }
 0x48e   : > { %p18_p0 = scmp.ge.s32.totalorder %s21_s6, 6   ;;  %s9489_s25 = smov %s7408_s3 }
 0x48f   : > { %s9490_s3 = smov %s7557_s22  ;;  %s9491_s26 = smov %s7420_s28 }
 0x490   : > { %s9492_s27 = smov %s7424_s29  ;;  %s9493_s28 = smov %s9496_s9 }
 0x491   : > { %s9494_s29 = smov %s9500_s10  ;;  %20 = sbr.rel (!%p18_p0) target bundleno = 8 (0x8), region = 97 }
 0x496   :  { %5840 = vsyncpa [#allocation4], 1 }
 0x497   :  { %5842 = vsyncpa [#allocation4 + $0x1], 1 }
 0x498   :  { %5843 = vsyncpa [#allocation5], 1 }
 0x499   :  { %5845 = vsyncpa [#allocation5 + $0x1], 1 }

</bundles_post_ra>
